<compile_context>
chip_gen: v6e
topology: v6e:2x2x1
jax: 0.10.0
libtpu: 0.0.40
codegen_flags: <defaults>
</compile_context>

<pallas_src>
import jax
import jax.numpy as jnp
import numpy as np
from jax.experimental import pallas as pl
from jax.experimental.pallas import tpu as pltpu

LANES = 128

# Spatial stages: (H, W, C).  Note W * C == 128 for every stage.
STAGES = ((16, 16, 8), (8, 8, 16), (4, 4, 32), (2, 2, 64))

# One entry per conv_unit, forward order: (src_stage, Cin, Cout, stride).
LAYERS = (
    (0, 3, 8, 1), (0, 8, 8, 1), (0, 8, 8, 1), (0, 8, 8, 2),          # block 1
    (1, 8, 16, 1), (1, 16, 16, 1), (1, 16, 16, 1), (1, 16, 16, 2),   # block 2
    (2, 16, 32, 1), (2, 32, 32, 1), (2, 32, 32, 1), (2, 32, 32, 2),  # block 3
    (3, 32, 64, 1), (3, 64, 64, 1), (3, 64, 64, 1),                  # block 4
)
N_UNITS = len(LAYERS)


def _layer_geom(src, stride):
    """(dst_stage, H, W, cb_in, Ho, Wo, cb_out) for one conv unit."""
    H, W, cb_in = STAGES[src]
    dst = src + (1 if stride == 2 else 0)
    Ho, Wo, cb_out = STAGES[dst]
    return dst, H, W, cb_in, Ho, Wo, cb_out


# ----------------------------------------------------------------------------
# Fused Pallas kernel
# ----------------------------------------------------------------------------
def _conv_bn_lrelu(src_ref, dst_ref, w, bias, gamma, beta, fold,
                   H, Ho, Wo, stride, N, eps=1e-5, slope=0.1):
    """One conv_unit on lane-dense row slabs.

    src_ref : (N, H+2, 128) f32; rows 0 / H+1 are the zero vertical border.
    dst_ref : (N, Ho+2, 128) f32 destination slab (None for the last unit).
    w       : (384, 128) bf16 folded conv matrix (3 row taps x 128 in-slots).
    bias/gamma/beta : (1, 128) f32 per-channel values tiled over the W slots
              (zero in padded-channel slots).
    fold    : (128, 128) f32 0/1 matrix: sums the Wo column slots of each
              channel and broadcasts the total back to every slot (idle MXU).
    """
    # (N*Ho, 3*128) LHS: the three vertically shifted row slabs, lane-concat.
    if stride == 1:
        parts = [src_ref[:, dy:dy + H, :] for dy in range(3)]
    else:
        even = src_ref[:, pl.ds(0, Ho + 1, 2), :]        # rows 0, 2, ..., H
        odd = src_ref[:, pl.ds(1, Ho, 2), :]             # rows 1, 3, ..., H-1
        parts = [even[:, :Ho, :], odd, even[:, 1:, :]]   # dy = 0, 1, 2
    lhs = jnp.concatenate(parts, axis=-1).reshape(N * Ho, 3 * LANES)

    # Whole 3x3 conv (+ "same" pad + stride + channel pad) as one bf16 matmul.
    z = jnp.dot(lhs.astype(jnp.bfloat16), w,
                preferred_element_type=jnp.float32) + bias        # (N*Ho, 128)

    # Training-mode BatchNorm (per-batch stats, biased variance), all in f32.
    inv_m = 1.0 / (N * Ho * Wo)
    s1 = jnp.dot(jnp.sum(z, axis=0, keepdims=True), fold,
                 preferred_element_type=jnp.float32)              # (1, 128)
    s2 = jnp.dot(jnp.sum(z * z, axis=0, keepdims=True), fold,
                 preferred_element_type=jnp.float32)
    mean = s1 * inv_m
    var = jnp.maximum(s2 * inv_m - mean * mean, 0.0)
    scale = gamma * jax.lax.rsqrt(var + eps)
    shift = beta - mean * scale
    y = z * scale + shift
    y = jnp.where(y >= 0.0, y, slope * y)                         # leaky_relu

    if dst_ref is not None:   # single dense write, straight into the next slab
        dst_ref[:, 1:Ho + 1, :] = y.reshape(N, Ho, LANES)
    return y


def cnn_kernel(x_ref, wbig_ref, bias_ref, gamma_ref, beta_ref, fold_ref,
               lw_ref, lb_ref, o_ref, slab0, slab1, slab2, slab3):
    slabs = (slab0, slab1, slab2, slab3)
    N = x_ref.shape[0]

    # Only the two vertical zero-border rows of each slab need initializing;
    # the interiors (all 128 lanes) are fully overwritten by their producer.
    zrow = jnp.zeros((N, 1, LANES), jnp.float32)
    for slab in slabs:
        slab[:, 0:1, :] = zrow
        slab[:, slab.shape[1] - 1:, :] = zrow

    y = None
    for li, (src, _cin, _cout, stride) in enumerate(LAYERS):
        dst, H, _W, _cbi, Ho, Wo, _cbo = _layer_geom(src, stride)
        src_ref = x_ref if li == 0 else slabs[src]
        dst_ref = None if li == N_UNITS - 1 else slabs[dst]
        y = _conv_bn_lrelu(src_ref, dst_ref,
                           wbig_ref[li], bias_ref[li], gamma_ref[li],
                           beta_ref[li], fold_ref[dst],
                           H, Ho, Wo, stride, N)

    # Global 2x2 max pool (2 rows x 2 lane groups of 64) + Linear(64 -> 2).
    m = jnp.maximum(y[:, :64], y[:, 64:])             # (N*2, 64): max over x
    pooled = jnp.max(m.reshape(N, 2, 64), axis=1)     # (N, 64):   max over y
    o_ref[...] = (jnp.dot(pooled, lw_ref[...],
                          preferred_element_type=jnp.float32) + lb_ref[...])


# ----------------------------------------------------------------------------
# Host-side parameter folding / packing
# ----------------------------------------------------------------------------
def _flatten_units(params):
    units = []
    for blk, n in (("c1", 4), ("c2", 4), ("c3", 4), ("c4", 3)):
        for ui in range(n):
            units.append(params[blk][f"c{ui + 1}"])
    return units


def _fold_conv_weight(w, cin, cout, cb_in, cb_out, W, Wo, stride):
    """(3,3,cin,cout) HWIO kernel -> (3*W*cb_in, Wo*cb_out) = (384, 128)
    matrix acting on lane-dense padded row slabs (folds horizontal taps,
    horizontal 'same' padding, the column stride and the channel padding)."""
    w_pad = jnp.zeros((3, 3, cb_in, cb_out), jnp.float32)
    w_pad = w_pad.at[:, :, :cin, :cout].set(w.astype(jnp.float32))
    sel = np.zeros((3, W, Wo), np.float32)           # sel[dx, x_in, x_out]
    for dx in range(3):
        for xo in range(Wo):
            xin = stride * xo + dx - 1
            if 0 <= xin < W:
                sel[dx, xin, xo] = 1.0
    big = jnp.einsum("axw,daio->dxiwo", jnp.asarray(sel), w_pad)
    big = big.reshape(3 * W * cb_in, Wo * cb_out)
    assert big.shape == (3 * LANES, LANES)
    return big.astype(jnp.bfloat16)


def _tile_slots(v, cout, cb, wo):
    """Per-channel (cout,) vector -> (1, wo*cb) in slot layout x*cb + c,
    with zeros in the padded-channel slots."""
    vp = jnp.zeros((cb,), jnp.float32).at[:cout].set(v.astype(jnp.float32))
    return jnp.tile(vp, wo).reshape(1, wo * cb)


def _fold_matrix(W, C):
    idx = np.arange(W * C)
    return jnp.asarray((idx[:, None] % C == idx[None, :] % C).astype(np.float32))


def _prepare_inputs(x_nhwc, params):
    N, H0, W0, cin0 = x_nhwc.shape
    cb0 = STAGES[0][2]
    # Input as a lane-dense, zero-bordered slab: (N, 18, 16*8) = (N, 18, 128).
    x_slab = jnp.pad(x_nhwc.astype(jnp.float32),
                     ((0, 0), (0, 0), (0, 0), (0, cb0 - cin0)))
    x_slab = x_slab.reshape(N, H0, W0 * cb0)
    x_slab = jnp.pad(x_slab, ((0, 0), (1, 1), (0, 0)))

    wbig, bias, gamma, beta = [], [], [], []
    for (src, cin, cout, stride), u in zip(LAYERS, _flatten_units(params)):
        _dst, _H, W, cb_in, _Ho, Wo, cb_out = _layer_geom(src, stride)
        wbig.append(_fold_conv_weight(u["w"], cin, cout, cb_in, cb_out,
                                      W, Wo, stride))
        bias.append(_tile_slots(u["b"], cout, cb_out, Wo))
        gamma.append(_tile_slots(u["gamma"], cout, cb_out, Wo))
        beta.append(_tile_slots(u["beta"], cout, cb_out, Wo))

    folds = jnp.stack([_fold_matrix(w, c) for (_h, w, c) in STAGES])
    return (x_slab, jnp.stack(wbig), jnp.stack(bias), jnp.stack(gamma),
            jnp.stack(beta), folds,
            params["l1_wT"].astype(jnp.float32),
            params["l1_b"].reshape(1, 2).astype(jnp.float32))


def cnn_forward(x_nhwc, params):
    flat = _prepare_inputs(x_nhwc, params)
    N = x_nhwc.shape[0]
    vmem = pl.BlockSpec(memory_space=pltpu.MemorySpace.VMEM)
    scratch = [pltpu.VMEM((N, h + 2, LANES), jnp.float32)
               for (h, _w, _c) in STAGES]
    return pl.pallas_call(
        cnn_kernel,
        out_shape=jax.ShapeDtypeStruct((N, 2), jnp.float32),
        in_specs=[vmem] * len(flat),
        out_specs=vmem,
        scratch_shapes=scratch,
    )(*flat)


# ----------------------------------------------------------------------------
# Deterministic parameter initialization (PyTorch-shaped, synthetic values)
# ----------------------------------------------------------------------------
def init_conv_unit(key, in_ch, out_ch):
    k1, k2 = jax.random.split(key)
    bound = 1.0 / np.sqrt(in_ch * 9)
    return {
        "w": jax.random.uniform(k1, (3, 3, in_ch, out_ch), jnp.float32, -bound, bound),
        "b": jax.random.uniform(k2, (out_ch,), jnp.float32, -bound, bound),
        "gamma": jnp.ones((out_ch,), jnp.float32),
        "beta": jnp.zeros((out_ch,), jnp.float32),
    }


def init_conv_block(key, in_ch, out_ch, make_last=True):
    ks = jax.random.split(key, 4)
    p = {
        "c1": init_conv_unit(ks[0], in_ch, out_ch),
        "c2": init_conv_unit(ks[1], out_ch, out_ch),
        "c3": init_conv_unit(ks[2], out_ch, out_ch),
    }
    if make_last:
        p["c4"] = init_conv_unit(ks[3], out_ch, out_ch)
    return p


def init_params(key):
    ks = jax.random.split(key, 6)
    bound = 1.0 / np.sqrt(64)
    return {
        "c1": init_conv_block(ks[0], 3, 8, True),
        "c2": init_conv_block(ks[1], 8, 16, True),
        "c3": init_conv_block(ks[2], 16, 32, True),
        "c4": init_conv_block(ks[3], 32, 64, False),
        "l1_wT": jax.random.uniform(ks[4], (64, 2), jnp.float32, -bound, bound),
        "l1_b": jax.random.uniform(ks[5], (2,), jnp.float32, -bound, bound),
    }


# ----------------------------------------------------------------------------
# Pure-JAX reference (correctness check)
# ----------------------------------------------------------------------------
def _ref_conv_unit(x, p, stride):
    z = jax.lax.conv_general_dilated(
        x, p["w"], window_strides=(stride, stride),
        padding=((1, 1), (1, 1)),
        dimension_numbers=("NHWC", "HWIO", "NHWC"),
    ) + p["b"].reshape(1, 1, 1, -1)
    mean = jnp.mean(z, axis=(0, 1, 2), keepdims=True)
    var = jnp.mean(jnp.square(z - mean), axis=(0, 1, 2), keepdims=True)
    y = (z - mean) * jax.lax.rsqrt(var + 1e-5)
    y = y * p["gamma"].reshape(1, 1, 1, -1) + p["beta"].reshape(1, 1, 1, -1)
    return jnp.where(y >= 0, y, 0.1 * y)


def _ref_block(x, p, make_last=True):
    y = _ref_conv_unit(x, p["c1"], 1)
    y = _ref_conv_unit(y, p["c2"], 1)
    y = _ref_conv_unit(y, p["c3"], 1)
    if make_last:
        y = _ref_conv_unit(y, p["c4"], 2)
    return y


def ref_forward(x, params):
    y = _ref_block(x, params["c1"], True)
    y = _ref_block(y, params["c2"], True)
    y = _ref_block(y, params["c3"], True)
    y = _ref_block(y, params["c4"], False)
    pooled = jnp.max(y, axis=(1, 2))
    return pooled @ params["l1_wT"] + params["l1_b"]


# ----------------------------------------------------------------------------
if __name__ == "__main__":
    key = jax.random.PRNGKey(0)
    kp, kx = jax.random.split(key)
    params = init_params(kp)

    # PyTorch-style NCHW input, transposed once to NHWC for the fused kernel.
    x_nchw = jax.random.normal(kx, (2, 3, 16, 16), jnp.float32)
    x = jnp.transpose(x_nchw, (0, 2, 3, 1))

    fwd = jax.jit(cnn_forward)
    out = jax.block_until_ready(fwd(x, params))
    assert out.shape == (2, 2) and out.dtype == jnp.float32

    ref = jax.block_until_ready(ref_forward(x, params))
    # Conv matmuls use bf16 operands (with f32 accumulation and f32 BN
    # statistics); across 15 conv+BN layers that costs a few 1e-3 of relative
    # accuracy vs. the all-f32 reference, so verify at a 5e-2 tolerance.
    np.testing.assert_allclose(np.asarray(out), np.asarray(ref),
                               rtol=5e-2, atol=5e-2)
    print("KERNEL_OK")
</pallas_src>

<mosaic_0001>
module attributes {stable_mosaic.version = 11 : i64} {
  func.func @cnn_kernel(%arg0: memref<2x18x128xf32, #tpu.memory_space<vmem>>, %arg1: memref<15x384x128xbf16, #tpu.memory_space<vmem>>, %arg2: memref<15x1x128xf32, #tpu.memory_space<vmem>>, %arg3: memref<15x1x128xf32, #tpu.memory_space<vmem>>, %arg4: memref<15x1x128xf32, #tpu.memory_space<vmem>>, %arg5: memref<4x128x128xf32, #tpu.memory_space<vmem>>, %arg6: memref<64x2xf32, #tpu.memory_space<vmem>>, %arg7: memref<1x2xf32, #tpu.memory_space<vmem>>, %arg8: memref<2x2xf32, #tpu.memory_space<vmem>>, %arg9: memref<2x18x128xf32, #tpu.memory_space<vmem>>, %arg10: memref<2x10x128xf32, #tpu.memory_space<vmem>>, %arg11: memref<2x6x128xf32, #tpu.memory_space<vmem>>, %arg12: memref<2x4x128xf32, #tpu.memory_space<vmem>>) attributes {dimension_semantics = [], scalar_prefetch = 0 : i64, scratch_operands = 4 : i64, tpu.core_type = #tpu.core_type<tc>} {
    %cst = arith.constant 0.000000e+00 : f32
    %0 = vector.broadcast %cst : f32 to vector<2x1x128xf32>
    %c0 = arith.constant 0 : index
    %c0_0 = arith.constant 0 : index
    %c0_1 = arith.constant 0 : index
    %1 = vector.load %arg9[%c0, %c0_0, %c0_1] : memref<2x18x128xf32, #tpu.memory_space<vmem>>, vector<2x1x128xf32>
    tpu.vector_store %arg9[%c0, %c0_0, %c0_1], %0 {strides = array<i32>} : memref<2x18x128xf32, #tpu.memory_space<vmem>>, vector<2x1x128xf32>,
    %c0_2 = arith.constant 0 : index
    %c17 = arith.constant 17 : index
    %c0_3 = arith.constant 0 : index
    %2 = vector.load %arg9[%c0_2, %c17, %c0_3] : memref<2x18x128xf32, #tpu.memory_space<vmem>>, vector<2x1x128xf32>
    tpu.vector_store %arg9[%c0_2, %c17, %c0_3], %0 {strides = array<i32>} : memref<2x18x128xf32, #tpu.memory_space<vmem>>, vector<2x1x128xf32>,
    %c0_4 = arith.constant 0 : index
    %c0_5 = arith.constant 0 : index
    %c0_6 = arith.constant 0 : index
    %3 = vector.load %arg10[%c0_4, %c0_5, %c0_6] : memref<2x10x128xf32, #tpu.memory_space<vmem>>, vector<2x1x128xf32>
    tpu.vector_store %arg10[%c0_4, %c0_5, %c0_6], %0 {strides = array<i32>} : memref<2x10x128xf32, #tpu.memory_space<vmem>>, vector<2x1x128xf32>,
    %c0_7 = arith.constant 0 : index
    %c9 = arith.constant 9 : index
    %c0_8 = arith.constant 0 : index
    %4 = vector.load %arg10[%c0_7, %c9, %c0_8] : memref<2x10x128xf32, #tpu.memory_space<vmem>>, vector<2x1x128xf32>
    tpu.vector_store %arg10[%c0_7, %c9, %c0_8], %0 {strides = array<i32>} : memref<2x10x128xf32, #tpu.memory_space<vmem>>, vector<2x1x128xf32>,
    %c0_9 = arith.constant 0 : index
    %c0_10 = arith.constant 0 : index
    %c0_11 = arith.constant 0 : index
    %5 = vector.load %arg11[%c0_9, %c0_10, %c0_11] : memref<2x6x128xf32, #tpu.memory_space<vmem>>, vector<2x1x128xf32>
    tpu.vector_store %arg11[%c0_9, %c0_10, %c0_11], %0 {strides = array<i32>} : memref<2x6x128xf32, #tpu.memory_space<vmem>>, vector<2x1x128xf32>,
    %c0_12 = arith.constant 0 : index
    %c5 = arith.constant 5 : index
    %c0_13 = arith.constant 0 : index
    %6 = vector.load %arg11[%c0_12, %c5, %c0_13] : memref<2x6x128xf32, #tpu.memory_space<vmem>>, vector<2x1x128xf32>
    tpu.vector_store %arg11[%c0_12, %c5, %c0_13], %0 {strides = array<i32>} : memref<2x6x128xf32, #tpu.memory_space<vmem>>, vector<2x1x128xf32>,
    %c0_14 = arith.constant 0 : index
    %c0_15 = arith.constant 0 : index
    %c0_16 = arith.constant 0 : index
    %7 = vector.load %arg12[%c0_14, %c0_15, %c0_16] : memref<2x4x128xf32, #tpu.memory_space<vmem>>, vector<2x1x128xf32>
    tpu.vector_store %arg12[%c0_14, %c0_15, %c0_16], %0 {strides = array<i32>} : memref<2x4x128xf32, #tpu.memory_space<vmem>>, vector<2x1x128xf32>,
    %c0_17 = arith.constant 0 : index
    %c3 = arith.constant 3 : index
    %c0_18 = arith.constant 0 : index
    %8 = vector.load %arg12[%c0_17, %c3, %c0_18] : memref<2x4x128xf32, #tpu.memory_space<vmem>>, vector<2x1x128xf32>
    tpu.vector_store %arg12[%c0_17, %c3, %c0_18], %0 {strides = array<i32>} : memref<2x4x128xf32, #tpu.memory_space<vmem>>, vector<2x1x128xf32>,
    %c0_19 = arith.constant 0 : index
    %c0_20 = arith.constant 0 : index
    %c0_21 = arith.constant 0 : index
    %9 = vector.load %arg1[%c0_19, %c0_20, %c0_21] : memref<15x384x128xbf16, #tpu.memory_space<vmem>>, vector<1x384x128xbf16>
    %10 = vector.shape_cast %9 : vector<1x384x128xbf16> to vector<384x128xbf16>
    %c0_22 = arith.constant 0 : index
    %c0_23 = arith.constant 0 : index
    %c0_24 = arith.constant 0 : index
    %11 = vector.load %arg2[%c0_22, %c0_23, %c0_24] : memref<15x1x128xf32, #tpu.memory_space<vmem>>, vector<1x1x128xf32>
    %12 = vector.shape_cast %11 : vector<1x1x128xf32> to vector<1x128xf32>
    %c0_25 = arith.constant 0 : index
    %c0_26 = arith.constant 0 : index
    %c0_27 = arith.constant 0 : index
    %13 = vector.load %arg3[%c0_25, %c0_26, %c0_27] : memref<15x1x128xf32, #tpu.memory_space<vmem>>, vector<1x1x128xf32>
    %14 = vector.shape_cast %13 : vector<1x1x128xf32> to vector<1x128xf32>
    %c0_28 = arith.constant 0 : index
    %c0_29 = arith.constant 0 : index
    %c0_30 = arith.constant 0 : index
    %15 = vector.load %arg4[%c0_28, %c0_29, %c0_30] : memref<15x1x128xf32, #tpu.memory_space<vmem>>, vector<1x1x128xf32>
    %16 = vector.shape_cast %15 : vector<1x1x128xf32> to vector<1x128xf32>
    %c0_31 = arith.constant 0 : index
    %c0_32 = arith.constant 0 : index
    %c0_33 = arith.constant 0 : index
    %17 = vector.load %arg5[%c0_31, %c0_32, %c0_33] : memref<4x128x128xf32, #tpu.memory_space<vmem>>, vector<1x128x128xf32>
    %18 = vector.shape_cast %17 : vector<1x128x128xf32> to vector<128x128xf32>
    %c0_34 = arith.constant 0 : index
    %c0_35 = arith.constant 0 : index
    %c0_36 = arith.constant 0 : index
    %19 = vector.load %arg0[%c0_34, %c0_35, %c0_36] : memref<2x18x128xf32, #tpu.memory_space<vmem>>, vector<2x16x128xf32>
    %c0_37 = arith.constant 0 : index
    %c1 = arith.constant 1 : index
    %c0_38 = arith.constant 0 : index
    %20 = vector.load %arg0[%c0_37, %c1, %c0_38] : memref<2x18x128xf32, #tpu.memory_space<vmem>>, vector<2x16x128xf32>
    %c0_39 = arith.constant 0 : index
    %c2 = arith.constant 2 : index
    %c0_40 = arith.constant 0 : index
    %21 = vector.load %arg0[%c0_39, %c2, %c0_40] : memref<2x18x128xf32, #tpu.memory_space<vmem>>, vector<2x16x128xf32>
    %22 = tpu.concatenate %19, %20, %21 in 2 : vector<2x16x128xf32>, vector<2x16x128xf32>, vector<2x16x128xf32> -> vector<2x16x384xf32>
    %23 = vector.shape_cast %22 : vector<2x16x384xf32> to vector<32x384xf32>
    %24 = arith.truncf %23 : vector<32x384xf32> to vector<32x384xbf16>
    %cst_41 = arith.constant dense<0.000000e+00> : vector<32x128xf32>
    %25 = tpu.matmul %24, %10, %cst_41 {dimension_numbers = #tpu.dot_dimension_numbers<[1], [0], [0], [1], [0, 0, 1, 1], [], []>} : vector<32x384xbf16>, vector<384x128xbf16>, vector<32x128xf32> -> vector<32x128xf32>
    %26 = vector.broadcast %12 : vector<1x128xf32> to vector<32x128xf32>
    %27 = arith.addf %25, %26 : vector<32x128xf32>
    %cst_42 = arith.constant dense<0.000000e+00> : vector<128xf32>
    %28 = vector.multi_reduction <add>, %27, %cst_42 [0] : vector<32x128xf32> to vector<128xf32>
    %29 = vector.shape_cast %28 : vector<128xf32> to vector<1x128xf32>
    %cst_43 = arith.constant dense<0.000000e+00> : vector<1x128xf32>
    %30 = tpu.matmul %29, %18, %cst_43 {dimension_numbers = #tpu.dot_dimension_numbers<[1], [0], [0], [1], [0, 0, 1, 1], [], []>} : vector<1x128xf32>, vector<128x128xf32>, vector<1x128xf32> -> vector<1x128xf32>
    %31 = arith.mulf %27, %27 : vector<32x128xf32>
    %cst_44 = arith.constant dense<0.000000e+00> : vector<128xf32>
    %32 = vector.multi_reduction <add>, %31, %cst_44 [0] : vector<32x128xf32> to vector<128xf32>
    %33 = vector.shape_cast %32 : vector<128xf32> to vector<1x128xf32>
    %cst_45 = arith.constant dense<0.000000e+00> : vector<1x128xf32>
    %34 = tpu.matmul %33, %18, %cst_45 {dimension_numbers = #tpu.dot_dimension_numbers<[1], [0], [0], [1], [0, 0, 1, 1], [], []>} : vector<1x128xf32>, vector<128x128xf32>, vector<1x128xf32> -> vector<1x128xf32>
    %cst_46 = arith.constant 0.001953125 : f32
    %35 = vector.broadcast %cst_46 : f32 to vector<1x128xf32>
    %36 = arith.mulf %30, %35 : vector<1x128xf32>
    %cst_47 = arith.constant 0.001953125 : f32
    %37 = vector.broadcast %cst_47 : f32 to vector<1x128xf32>
    %38 = arith.mulf %34, %37 : vector<1x128xf32>
    %39 = arith.mulf %36, %36 : vector<1x128xf32>
    %40 = arith.subf %38, %39 : vector<1x128xf32>
    %cst_48 = arith.constant 0.000000e+00 : f32
    %41 = vector.broadcast %cst_48 : f32 to vector<1x128xf32>
    %42 = arith.maximumf %40, %41 : vector<1x128xf32>
    %cst_49 = arith.constant 9.99999974E-6 : f32
    %43 = vector.broadcast %cst_49 : f32 to vector<1x128xf32>
    %44 = arith.addf %42, %43 : vector<1x128xf32>
    %45 = math.rsqrt %44 : vector<1x128xf32>
    %46 = arith.mulf %14, %45 : vector<1x128xf32>
    %47 = arith.mulf %36, %46 : vector<1x128xf32>
    %48 = arith.subf %16, %47 : vector<1x128xf32>
    %49 = vector.broadcast %46 : vector<1x128xf32> to vector<32x128xf32>
    %50 = arith.mulf %27, %49 : vector<32x128xf32>
    %51 = vector.broadcast %48 : vector<1x128xf32> to vector<32x128xf32>
    %52 = arith.addf %50, %51 : vector<32x128xf32>
    %cst_50 = arith.constant 0.000000e+00 : f32
    %53 = vector.broadcast %cst_50 : f32 to vector<32x128xf32>
    %54 = arith.cmpf oge, %52, %53 : vector<32x128xf32>
    %cst_51 = arith.constant 1.000000e-01 : f32
    %55 = vector.broadcast %cst_51 : f32 to vector<32x128xf32>
    %56 = arith.mulf %55, %52 : vector<32x128xf32>
    %57 = arith.select %54, %52, %56 : vector<32x128xi1>, vector<32x128xf32>
    %58 = vector.shape_cast %57 : vector<32x128xf32> to vector<2x16x128xf32>
    %c0_52 = arith.constant 0 : index
    %c1_53 = arith.constant 1 : index
    %c0_54 = arith.constant 0 : index
    %59 = vector.load %arg9[%c0_52, %c1_53, %c0_54] : memref<2x18x128xf32, #tpu.memory_space<vmem>>, vector<2x16x128xf32>
    tpu.vector_store %arg9[%c0_52, %c1_53, %c0_54], %58 {strides = array<i32>} : memref<2x18x128xf32, #tpu.memory_space<vmem>>, vector<2x16x128xf32>,
    %c1_55 = arith.constant 1 : index
    %c0_56 = arith.constant 0 : index
    %c0_57 = arith.constant 0 : index
    %60 = vector.load %arg1[%c1_55, %c0_56, %c0_57] : memref<15x384x128xbf16, #tpu.memory_space<vmem>>, vector<1x384x128xbf16>
    %61 = vector.shape_cast %60 : vector<1x384x128xbf16> to vector<384x128xbf16>
    %c1_58 = arith.constant 1 : index
    %c0_59 = arith.constant 0 : index
    %c0_60 = arith.constant 0 : index
    %62 = vector.load %arg2[%c1_58, %c0_59, %c0_60] : memref<15x1x128xf32, #tpu.memory_space<vmem>>, vector<1x1x128xf32>
    %63 = vector.shape_cast %62 : vector<1x1x128xf32> to vector<1x128xf32>
    %c1_61 = arith.constant 1 : index
    %c0_62 = arith.constant 0 : index
    %c0_63 = arith.constant 0 : index
    %64 = vector.load %arg3[%c1_61, %c0_62, %c0_63] : memref<15x1x128xf32, #tpu.memory_space<vmem>>, vector<1x1x128xf32>
    %65 = vector.shape_cast %64 : vector<1x1x128xf32> to vector<1x128xf32>
    %c1_64 = arith.constant 1 : index
    %c0_65 = arith.constant 0 : index
    %c0_66 = arith.constant 0 : index
    %66 = vector.load %arg4[%c1_64, %c0_65, %c0_66] : memref<15x1x128xf32, #tpu.memory_space<vmem>>, vector<1x1x128xf32>
    %67 = vector.shape_cast %66 : vector<1x1x128xf32> to vector<1x128xf32>
    %c0_67 = arith.constant 0 : index
    %c0_68 = arith.constant 0 : index
    %c0_69 = arith.constant 0 : index
    %68 = vector.load %arg5[%c0_67, %c0_68, %c0_69] : memref<4x128x128xf32, #tpu.memory_space<vmem>>, vector<1x128x128xf32>
    %69 = vector.shape_cast %68 : vector<1x128x128xf32> to vector<128x128xf32>
    %c0_70 = arith.constant 0 : index
    %c0_71 = arith.constant 0 : index
    %c0_72 = arith.constant 0 : index
    %70 = vector.load %arg9[%c0_70, %c0_71, %c0_72] : memref<2x18x128xf32, #tpu.memory_space<vmem>>, vector<2x16x128xf32>
    %c0_73 = arith.constant 0 : index
    %c1_74 = arith.constant 1 : index
    %c0_75 = arith.constant 0 : index
    %71 = vector.load %arg9[%c0_73, %c1_74, %c0_75] : memref<2x18x128xf32, #tpu.memory_space<vmem>>, vector<2x16x128xf32>
    %c0_76 = arith.constant 0 : index
    %c2_77 = arith.constant 2 : index
    %c0_78 = arith.constant 0 : index
    %72 = vector.load %arg9[%c0_76, %c2_77, %c0_78] : memref<2x18x128xf32, #tpu.memory_space<vmem>>, vector<2x16x128xf32>
    %73 = tpu.concatenate %70, %71, %72 in 2 : vector<2x16x128xf32>, vector<2x16x128xf32>, vector<2x16x128xf32> -> vector<2x16x384xf32>
    %74 = vector.shape_cast %73 : vector<2x16x384xf32> to vector<32x384xf32>
    %75 = arith.truncf %74 : vector<32x384xf32> to vector<32x384xbf16>
    %cst_79 = arith.constant dense<0.000000e+00> : vector<32x128xf32>
    %76 = tpu.matmul %75, %61, %cst_79 {dimension_numbers = #tpu.dot_dimension_numbers<[1], [0], [0], [1], [0, 0, 1, 1], [], []>} : vector<32x384xbf16>, vector<384x128xbf16>, vector<32x128xf32> -> vector<32x128xf32>
    %77 = vector.broadcast %63 : vector<1x128xf32> to vector<32x128xf32>
    %78 = arith.addf %76, %77 : vector<32x128xf32>
    %cst_80 = arith.constant dense<0.000000e+00> : vector<128xf32>
    %79 = vector.multi_reduction <add>, %78, %cst_80 [0] : vector<32x128xf32> to vector<128xf32>
    %80 = vector.shape_cast %79 : vector<128xf32> to vector<1x128xf32>
    %cst_81 = arith.constant dense<0.000000e+00> : vector<1x128xf32>
    %81 = tpu.matmul %80, %69, %cst_81 {dimension_numbers = #tpu.dot_dimension_numbers<[1], [0], [0], [1], [0, 0, 1, 1], [], []>} : vector<1x128xf32>, vector<128x128xf32>, vector<1x128xf32> -> vector<1x128xf32>
    %82 = arith.mulf %78, %78 : vector<32x128xf32>
    %cst_82 = arith.constant dense<0.000000e+00> : vector<128xf32>
    %83 = vector.multi_reduction <add>, %82, %cst_82 [0] : vector<32x128xf32> to vector<128xf32>
    %84 = vector.shape_cast %83 : vector<128xf32> to vector<1x128xf32>
    %cst_83 = arith.constant dense<0.000000e+00> : vector<1x128xf32>
    %85 = tpu.matmul %84, %69, %cst_83 {dimension_numbers = #tpu.dot_dimension_numbers<[1], [0], [0], [1], [0, 0, 1, 1], [], []>} : vector<1x128xf32>, vector<128x128xf32>, vector<1x128xf32> -> vector<1x128xf32>
    %cst_84 = arith.constant 0.001953125 : f32
    %86 = vector.broadcast %cst_84 : f32 to vector<1x128xf32>
    %87 = arith.mulf %81, %86 : vector<1x128xf32>
    %cst_85 = arith.constant 0.001953125 : f32
    %88 = vector.broadcast %cst_85 : f32 to vector<1x128xf32>
    %89 = arith.mulf %85, %88 : vector<1x128xf32>
    %90 = arith.mulf %87, %87 : vector<1x128xf32>
    %91 = arith.subf %89, %90 : vector<1x128xf32>
    %cst_86 = arith.constant 0.000000e+00 : f32
    %92 = vector.broadcast %cst_86 : f32 to vector<1x128xf32>
    %93 = arith.maximumf %91, %92 : vector<1x128xf32>
    %cst_87 = arith.constant 9.99999974E-6 : f32
    %94 = vector.broadcast %cst_87 : f32 to vector<1x128xf32>
    %95 = arith.addf %93, %94 : vector<1x128xf32>
    %96 = math.rsqrt %95 : vector<1x128xf32>
    %97 = arith.mulf %65, %96 : vector<1x128xf32>
    %98 = arith.mulf %87, %97 : vector<1x128xf32>
    %99 = arith.subf %67, %98 : vector<1x128xf32>
    %100 = vector.broadcast %97 : vector<1x128xf32> to vector<32x128xf32>
    %101 = arith.mulf %78, %100 : vector<32x128xf32>
    %102 = vector.broadcast %99 : vector<1x128xf32> to vector<32x128xf32>
    %103 = arith.addf %101, %102 : vector<32x128xf32>
    %cst_88 = arith.constant 0.000000e+00 : f32
    %104 = vector.broadcast %cst_88 : f32 to vector<32x128xf32>
    %105 = arith.cmpf oge, %103, %104 : vector<32x128xf32>
    %cst_89 = arith.constant 1.000000e-01 : f32
    %106 = vector.broadcast %cst_89 : f32 to vector<32x128xf32>
    %107 = arith.mulf %106, %103 : vector<32x128xf32>
    %108 = arith.select %105, %103, %107 : vector<32x128xi1>, vector<32x128xf32>
    %109 = vector.shape_cast %108 : vector<32x128xf32> to vector<2x16x128xf32>
    %c0_90 = arith.constant 0 : index
    %c1_91 = arith.constant 1 : index
    %c0_92 = arith.constant 0 : index
    %110 = vector.load %arg9[%c0_90, %c1_91, %c0_92] : memref<2x18x128xf32, #tpu.memory_space<vmem>>, vector<2x16x128xf32>
    tpu.vector_store %arg9[%c0_90, %c1_91, %c0_92], %109 {strides = array<i32>} : memref<2x18x128xf32, #tpu.memory_space<vmem>>, vector<2x16x128xf32>,
    %c2_93 = arith.constant 2 : index
    %c0_94 = arith.constant 0 : index
    %c0_95 = arith.constant 0 : index
    %111 = vector.load %arg1[%c2_93, %c0_94, %c0_95] : memref<15x384x128xbf16, #tpu.memory_space<vmem>>, vector<1x384x128xbf16>
    %112 = vector.shape_cast %111 : vector<1x384x128xbf16> to vector<384x128xbf16>
    %c2_96 = arith.constant 2 : index
    %c0_97 = arith.constant 0 : index
    %c0_98 = arith.constant 0 : index
    %113 = vector.load %arg2[%c2_96, %c0_97, %c0_98] : memref<15x1x128xf32, #tpu.memory_space<vmem>>, vector<1x1x128xf32>
    %114 = vector.shape_cast %113 : vector<1x1x128xf32> to vector<1x128xf32>
    %c2_99 = arith.constant 2 : index
    %c0_100 = arith.constant 0 : index
    %c0_101 = arith.constant 0 : index
    %115 = vector.load %arg3[%c2_99, %c0_100, %c0_101] : memref<15x1x128xf32, #tpu.memory_space<vmem>>, vector<1x1x128xf32>
    %116 = vector.shape_cast %115 : vector<1x1x128xf32> to vector<1x128xf32>
    %c2_102 = arith.constant 2 : index
    %c0_103 = arith.constant 0 : index
    %c0_104 = arith.constant 0 : index
    %117 = vector.load %arg4[%c2_102, %c0_103, %c0_104] : memref<15x1x128xf32, #tpu.memory_space<vmem>>, vector<1x1x128xf32>
    %118 = vector.shape_cast %117 : vector<1x1x128xf32> to vector<1x128xf32>
    %c0_105 = arith.constant 0 : index
    %c0_106 = arith.constant 0 : index
    %c0_107 = arith.constant 0 : index
    %119 = vector.load %arg5[%c0_105, %c0_106, %c0_107] : memref<4x128x128xf32, #tpu.memory_space<vmem>>, vector<1x128x128xf32>
    %120 = vector.shape_cast %119 : vector<1x128x128xf32> to vector<128x128xf32>
    %c0_108 = arith.constant 0 : index
    %c0_109 = arith.constant 0 : index
    %c0_110 = arith.constant 0 : index
    %121 = vector.load %arg9[%c0_108, %c0_109, %c0_110] : memref<2x18x128xf32, #tpu.memory_space<vmem>>, vector<2x16x128xf32>
    %c0_111 = arith.constant 0 : index
    %c1_112 = arith.constant 1 : index
    %c0_113 = arith.constant 0 : index
    %122 = vector.load %arg9[%c0_111, %c1_112, %c0_113] : memref<2x18x128xf32, #tpu.memory_space<vmem>>, vector<2x16x128xf32>
    %c0_114 = arith.constant 0 : index
    %c2_115 = arith.constant 2 : index
    %c0_116 = arith.constant 0 : index
    %123 = vector.load %arg9[%c0_114, %c2_115, %c0_116] : memref<2x18x128xf32, #tpu.memory_space<vmem>>, vector<2x16x128xf32>
    %124 = tpu.concatenate %121, %122, %123 in 2 : vector<2x16x128xf32>, vector<2x16x128xf32>, vector<2x16x128xf32> -> vector<2x16x384xf32>
    %125 = vector.shape_cast %124 : vector<2x16x384xf32> to vector<32x384xf32>
    %126 = arith.truncf %125 : vector<32x384xf32> to vector<32x384xbf16>
    %cst_117 = arith.constant dense<0.000000e+00> : vector<32x128xf32>
    %127 = tpu.matmul %126, %112, %cst_117 {dimension_numbers = #tpu.dot_dimension_numbers<[1], [0], [0], [1], [0, 0, 1, 1], [], []>} : vector<32x384xbf16>, vector<384x128xbf16>, vector<32x128xf32> -> vector<32x128xf32>
    %128 = vector.broadcast %114 : vector<1x128xf32> to vector<32x128xf32>
    %129 = arith.addf %127, %128 : vector<32x128xf32>
    %cst_118 = arith.constant dense<0.000000e+00> : vector<128xf32>
    %130 = vector.multi_reduction <add>, %129, %cst_118 [0] : vector<32x128xf32> to vector<128xf32>
    %131 = vector.shape_cast %130 : vector<128xf32> to vector<1x128xf32>
    %cst_119 = arith.constant dense<0.000000e+00> : vector<1x128xf32>
    %132 = tpu.matmul %131, %120, %cst_119 {dimension_numbers = #tpu.dot_dimension_numbers<[1], [0], [0], [1], [0, 0, 1, 1], [], []>} : vector<1x128xf32>, vector<128x128xf32>, vector<1x128xf32> -> vector<1x128xf32>
    %133 = arith.mulf %129, %129 : vector<32x128xf32>
    %cst_120 = arith.constant dense<0.000000e+00> : vector<128xf32>
    %134 = vector.multi_reduction <add>, %133, %cst_120 [0] : vector<32x128xf32> to vector<128xf32>
    %135 = vector.shape_cast %134 : vector<128xf32> to vector<1x128xf32>
    %cst_121 = arith.constant dense<0.000000e+00> : vector<1x128xf32>
    %136 = tpu.matmul %135, %120, %cst_121 {dimension_numbers = #tpu.dot_dimension_numbers<[1], [0], [0], [1], [0, 0, 1, 1], [], []>} : vector<1x128xf32>, vector<128x128xf32>, vector<1x128xf32> -> vector<1x128xf32>
    %cst_122 = arith.constant 0.001953125 : f32
    %137 = vector.broadcast %cst_122 : f32 to vector<1x128xf32>
    %138 = arith.mulf %132, %137 : vector<1x128xf32>
    %cst_123 = arith.constant 0.001953125 : f32
    %139 = vector.broadcast %cst_123 : f32 to vector<1x128xf32>
    %140 = arith.mulf %136, %139 : vector<1x128xf32>
    %141 = arith.mulf %138, %138 : vector<1x128xf32>
    %142 = arith.subf %140, %141 : vector<1x128xf32>
    %cst_124 = arith.constant 0.000000e+00 : f32
    %143 = vector.broadcast %cst_124 : f32 to vector<1x128xf32>
    %144 = arith.maximumf %142, %143 : vector<1x128xf32>
    %cst_125 = arith.constant 9.99999974E-6 : f32
    %145 = vector.broadcast %cst_125 : f32 to vector<1x128xf32>
    %146 = arith.addf %144, %145 : vector<1x128xf32>
    %147 = math.rsqrt %146 : vector<1x128xf32>
    %148 = arith.mulf %116, %147 : vector<1x128xf32>
    %149 = arith.mulf %138, %148 : vector<1x128xf32>
    %150 = arith.subf %118, %149 : vector<1x128xf32>
    %151 = vector.broadcast %148 : vector<1x128xf32> to vector<32x128xf32>
    %152 = arith.mulf %129, %151 : vector<32x128xf32>
    %153 = vector.broadcast %150 : vector<1x128xf32> to vector<32x128xf32>
    %154 = arith.addf %152, %153 : vector<32x128xf32>
    %cst_126 = arith.constant 0.000000e+00 : f32
    %155 = vector.broadcast %cst_126 : f32 to vector<32x128xf32>
    %156 = arith.cmpf oge, %154, %155 : vector<32x128xf32>
    %cst_127 = arith.constant 1.000000e-01 : f32
    %157 = vector.broadcast %cst_127 : f32 to vector<32x128xf32>
    %158 = arith.mulf %157, %154 : vector<32x128xf32>
    %159 = arith.select %156, %154, %158 : vector<32x128xi1>, vector<32x128xf32>
    %160 = vector.shape_cast %159 : vector<32x128xf32> to vector<2x16x128xf32>
    %c0_128 = arith.constant 0 : index
    %c1_129 = arith.constant 1 : index
    %c0_130 = arith.constant 0 : index
    %161 = vector.load %arg9[%c0_128, %c1_129, %c0_130] : memref<2x18x128xf32, #tpu.memory_space<vmem>>, vector<2x16x128xf32>
    tpu.vector_store %arg9[%c0_128, %c1_129, %c0_130], %160 {strides = array<i32>} : memref<2x18x128xf32, #tpu.memory_space<vmem>>, vector<2x16x128xf32>,
    %c3_131 = arith.constant 3 : index
    %c0_132 = arith.constant 0 : index
    %c0_133 = arith.constant 0 : index
    %162 = vector.load %arg1[%c3_131, %c0_132, %c0_133] : memref<15x384x128xbf16, #tpu.memory_space<vmem>>, vector<1x384x128xbf16>
    %163 = vector.shape_cast %162 : vector<1x384x128xbf16> to vector<384x128xbf16>
    %c3_134 = arith.constant 3 : index
    %c0_135 = arith.constant 0 : index
    %c0_136 = arith.constant 0 : index
    %164 = vector.load %arg2[%c3_134, %c0_135, %c0_136] : memref<15x1x128xf32, #tpu.memory_space<vmem>>, vector<1x1x128xf32>
    %165 = vector.shape_cast %164 : vector<1x1x128xf32> to vector<1x128xf32>
    %c3_137 = arith.constant 3 : index
    %c0_138 = arith.constant 0 : index
    %c0_139 = arith.constant 0 : index
    %166 = vector.load %arg3[%c3_137, %c0_138, %c0_139] : memref<15x1x128xf32, #tpu.memory_space<vmem>>, vector<1x1x128xf32>
    %167 = vector.shape_cast %166 : vector<1x1x128xf32> to vector<1x128xf32>
    %c3_140 = arith.constant 3 : index
    %c0_141 = arith.constant 0 : index
    %c0_142 = arith.constant 0 : index
    %168 = vector.load %arg4[%c3_140, %c0_141, %c0_142] : memref<15x1x128xf32, #tpu.memory_space<vmem>>, vector<1x1x128xf32>
    %169 = vector.shape_cast %168 : vector<1x1x128xf32> to vector<1x128xf32>
    %c1_143 = arith.constant 1 : index
    %c0_144 = arith.constant 0 : index
    %c0_145 = arith.constant 0 : index
    %170 = vector.load %arg5[%c1_143, %c0_144, %c0_145] : memref<4x128x128xf32, #tpu.memory_space<vmem>>, vector<1x128x128xf32>
    %171 = vector.shape_cast %170 : vector<1x128x128xf32> to vector<128x128xf32>
    %c0_146 = arith.constant 0 : index
    %c0_147 = arith.constant 0 : index
    %c0_148 = arith.constant 0 : index
    %172 = tpu.strided_load %arg9[%c0_146, %c0_147, %c0_148] {strides = array<i32: 1, 2, 1>} : memref<2x18x128xf32, #tpu.memory_space<vmem>>, vector<2x9x128xf32>
    %c0_149 = arith.constant 0 : index
    %c1_150 = arith.constant 1 : index
    %c0_151 = arith.constant 0 : index
    %173 = tpu.strided_load %arg9[%c0_149, %c1_150, %c0_151] {strides = array<i32: 1, 2, 1>} : memref<2x18x128xf32, #tpu.memory_space<vmem>>, vector<2x8x128xf32>
    %174 = vector.extract_strided_slice %172 {offsets = [0, 0, 0], sizes = [2, 8, 128], strides = [1, 1, 1]} : vector<2x9x128xf32> to vector<2x8x128xf32>
    %175 = vector.extract_strided_slice %172 {offsets = [0, 1, 0], sizes = [2, 8, 128], strides = [1, 1, 1]} : vector<2x9x128xf32> to vector<2x8x128xf32>
    %176 = tpu.concatenate %174, %173, %175 in 2 : vector<2x8x128xf32>, vector<2x8x128xf32>, vector<2x8x128xf32> -> vector<2x8x384xf32>
    %177 = vector.shape_cast %176 : vector<2x8x384xf32> to vector<16x384xf32>
    %178 = arith.truncf %177 : vector<16x384xf32> to vector<16x384xbf16>
    %cst_152 = arith.constant dense<0.000000e+00> : vector<16x128xf32>
    %179 = tpu.matmul %178, %163, %cst_152 {dimension_numbers = #tpu.dot_dimension_numbers<[1], [0], [0], [1], [0, 0, 1, 1], [], []>} : vector<16x384xbf16>, vector<384x128xbf16>, vector<16x128xf32> -> vector<16x128xf32>
    %180 = vector.broadcast %165 : vector<1x128xf32> to vector<16x128xf32>
    %181 = arith.addf %179, %180 : vector<16x128xf32>
    %cst_153 = arith.constant dense<0.000000e+00> : vector<128xf32>
    %182 = vector.multi_reduction <add>, %181, %cst_153 [0] : vector<16x128xf32> to vector<128xf32>
    %183 = vector.shape_cast %182 : vector<128xf32> to vector<1x128xf32>
    %cst_154 = arith.constant dense<0.000000e+00> : vector<1x128xf32>
    %184 = tpu.matmul %183, %171, %cst_154 {dimension_numbers = #tpu.dot_dimension_numbers<[1], [0], [0], [1], [0, 0, 1, 1], [], []>} : vector<1x128xf32>, vector<128x128xf32>, vector<1x128xf32> -> vector<1x128xf32>
    %185 = arith.mulf %181, %181 : vector<16x128xf32>
    %cst_155 = arith.constant dense<0.000000e+00> : vector<128xf32>
    %186 = vector.multi_reduction <add>, %185, %cst_155 [0] : vector<16x128xf32> to vector<128xf32>
    %187 = vector.shape_cast %186 : vector<128xf32> to vector<1x128xf32>
    %cst_156 = arith.constant dense<0.000000e+00> : vector<1x128xf32>
    %188 = tpu.matmul %187, %171, %cst_156 {dimension_numbers = #tpu.dot_dimension_numbers<[1], [0], [0], [1], [0, 0, 1, 1], [], []>} : vector<1x128xf32>, vector<128x128xf32>, vector<1x128xf32> -> vector<1x128xf32>
    %cst_157 = arith.constant 7.812500e-03 : f32
    %189 = vector.broadcast %cst_157 : f32 to vector<1x128xf32>
    %190 = arith.mulf %184, %189 : vector<1x128xf32>
    %cst_158 = arith.constant 7.812500e-03 : f32
    %191 = vector.broadcast %cst_158 : f32 to vector<1x128xf32>
    %192 = arith.mulf %188, %191 : vector<1x128xf32>
    %193 = arith.mulf %190, %190 : vector<1x128xf32>
    %194 = arith.subf %192, %193 : vector<1x128xf32>
    %cst_159 = arith.constant 0.000000e+00 : f32
    %195 = vector.broadcast %cst_159 : f32 to vector<1x128xf32>
    %196 = arith.maximumf %194, %195 : vector<1x128xf32>
    %cst_160 = arith.constant 9.99999974E-6 : f32
    %197 = vector.broadcast %cst_160 : f32 to vector<1x128xf32>
    %198 = arith.addf %196, %197 : vector<1x128xf32>
    %199 = math.rsqrt %198 : vector<1x128xf32>
    %200 = arith.mulf %167, %199 : vector<1x128xf32>
    %201 = arith.mulf %190, %200 : vector<1x128xf32>
    %202 = arith.subf %169, %201 : vector<1x128xf32>
    %203 = vector.broadcast %200 : vector<1x128xf32> to vector<16x128xf32>
    %204 = arith.mulf %181, %203 : vector<16x128xf32>
    %205 = vector.broadcast %202 : vector<1x128xf32> to vector<16x128xf32>
    %206 = arith.addf %204, %205 : vector<16x128xf32>
    %cst_161 = arith.constant 0.000000e+00 : f32
    %207 = vector.broadcast %cst_161 : f32 to vector<16x128xf32>
    %208 = arith.cmpf oge, %206, %207 : vector<16x128xf32>
    %cst_162 = arith.constant 1.000000e-01 : f32
    %209 = vector.broadcast %cst_162 : f32 to vector<16x128xf32>
    %210 = arith.mulf %209, %206 : vector<16x128xf32>
    %211 = arith.select %208, %206, %210 : vector<16x128xi1>, vector<16x128xf32>
    %212 = vector.shape_cast %211 : vector<16x128xf32> to vector<2x8x128xf32>
    %c0_163 = arith.constant 0 : index
    %c1_164 = arith.constant 1 : index
    %c0_165 = arith.constant 0 : index
    %213 = vector.load %arg10[%c0_163, %c1_164, %c0_165] : memref<2x10x128xf32, #tpu.memory_space<vmem>>, vector<2x8x128xf32>
    tpu.vector_store %arg10[%c0_163, %c1_164, %c0_165], %212 {strides = array<i32>} : memref<2x10x128xf32, #tpu.memory_space<vmem>>, vector<2x8x128xf32>,
    %c4 = arith.constant 4 : index
    %c0_166 = arith.constant 0 : index
    %c0_167 = arith.constant 0 : index
    %214 = vector.load %arg1[%c4, %c0_166, %c0_167] : memref<15x384x128xbf16, #tpu.memory_space<vmem>>, vector<1x384x128xbf16>
    %215 = vector.shape_cast %214 : vector<1x384x128xbf16> to vector<384x128xbf16>
    %c4_168 = arith.constant 4 : index
    %c0_169 = arith.constant 0 : index
    %c0_170 = arith.constant 0 : index
    %216 = vector.load %arg2[%c4_168, %c0_169, %c0_170] : memref<15x1x128xf32, #tpu.memory_space<vmem>>, vector<1x1x128xf32>
    %217 = vector.shape_cast %216 : vector<1x1x128xf32> to vector<1x128xf32>
    %c4_171 = arith.constant 4 : index
    %c0_172 = arith.constant 0 : index
    %c0_173 = arith.constant 0 : index
    %218 = vector.load %arg3[%c4_171, %c0_172, %c0_173] : memref<15x1x128xf32, #tpu.memory_space<vmem>>, vector<1x1x128xf32>
    %219 = vector.shape_cast %218 : vector<1x1x128xf32> to vector<1x128xf32>
    %c4_174 = arith.constant 4 : index
    %c0_175 = arith.constant 0 : index
    %c0_176 = arith.constant 0 : index
    %220 = vector.load %arg4[%c4_174, %c0_175, %c0_176] : memref<15x1x128xf32, #tpu.memory_space<vmem>>, vector<1x1x128xf32>
    %221 = vector.shape_cast %220 : vector<1x1x128xf32> to vector<1x128xf32>
    %c1_177 = arith.constant 1 : index
    %c0_178 = arith.constant 0 : index
    %c0_179 = arith.constant 0 : index
    %222 = vector.load %arg5[%c1_177, %c0_178, %c0_179] : memref<4x128x128xf32, #tpu.memory_space<vmem>>, vector<1x128x128xf32>
    %223 = vector.shape_cast %222 : vector<1x128x128xf32> to vector<128x128xf32>
    %c0_180 = arith.constant 0 : index
    %c0_181 = arith.constant 0 : index
    %c0_182 = arith.constant 0 : index
    %224 = vector.load %arg10[%c0_180, %c0_181, %c0_182] : memref<2x10x128xf32, #tpu.memory_space<vmem>>, vector<2x8x128xf32>
    %c0_183 = arith.constant 0 : index
    %c1_184 = arith.constant 1 : index
    %c0_185 = arith.constant 0 : index
    %225 = vector.load %arg10[%c0_183, %c1_184, %c0_185] : memref<2x10x128xf32, #tpu.memory_space<vmem>>, vector<2x8x128xf32>
    %c0_186 = arith.constant 0 : index
    %c2_187 = arith.constant 2 : index
    %c0_188 = arith.constant 0 : index
    %226 = vector.load %arg10[%c0_186, %c2_187, %c0_188] : memref<2x10x128xf32, #tpu.memory_space<vmem>>, vector<2x8x128xf32>
    %227 = tpu.concatenate %224, %225, %226 in 2 : vector<2x8x128xf32>, vector<2x8x128xf32>, vector<2x8x128xf32> -> vector<2x8x384xf32>
    %228 = vector.shape_cast %227 : vector<2x8x384xf32> to vector<16x384xf32>
    %229 = arith.truncf %228 : vector<16x384xf32> to vector<16x384xbf16>
    %cst_189 = arith.constant dense<0.000000e+00> : vector<16x128xf32>
    %230 = tpu.matmul %229, %215, %cst_189 {dimension_numbers = #tpu.dot_dimension_numbers<[1], [0], [0], [1], [0, 0, 1, 1], [], []>} : vector<16x384xbf16>, vector<384x128xbf16>, vector<16x128xf32> -> vector<16x128xf32>
    %231 = vector.broadcast %217 : vector<1x128xf32> to vector<16x128xf32>
    %232 = arith.addf %230, %231 : vector<16x128xf32>
    %cst_190 = arith.constant dense<0.000000e+00> : vector<128xf32>
    %233 = vector.multi_reduction <add>, %232, %cst_190 [0] : vector<16x128xf32> to vector<128xf32>
    %234 = vector.shape_cast %233 : vector<128xf32> to vector<1x128xf32>
    %cst_191 = arith.constant dense<0.000000e+00> : vector<1x128xf32>
    %235 = tpu.matmul %234, %223, %cst_191 {dimension_numbers = #tpu.dot_dimension_numbers<[1], [0], [0], [1], [0, 0, 1, 1], [], []>} : vector<1x128xf32>, vector<128x128xf32>, vector<1x128xf32> -> vector<1x128xf32>
    %236 = arith.mulf %232, %232 : vector<16x128xf32>
    %cst_192 = arith.constant dense<0.000000e+00> : vector<128xf32>
    %237 = vector.multi_reduction <add>, %236, %cst_192 [0] : vector<16x128xf32> to vector<128xf32>
    %238 = vector.shape_cast %237 : vector<128xf32> to vector<1x128xf32>
    %cst_193 = arith.constant dense<0.000000e+00> : vector<1x128xf32>
    %239 = tpu.matmul %238, %223, %cst_193 {dimension_numbers = #tpu.dot_dimension_numbers<[1], [0], [0], [1], [0, 0, 1, 1], [], []>} : vector<1x128xf32>, vector<128x128xf32>, vector<1x128xf32> -> vector<1x128xf32>
    %cst_194 = arith.constant 7.812500e-03 : f32
    %240 = vector.broadcast %cst_194 : f32 to vector<1x128xf32>
    %241 = arith.mulf %235, %240 : vector<1x128xf32>
    %cst_195 = arith.constant 7.812500e-03 : f32
    %242 = vector.broadcast %cst_195 : f32 to vector<1x128xf32>
    %243 = arith.mulf %239, %242 : vector<1x128xf32>
    %244 = arith.mulf %241, %241 : vector<1x128xf32>
    %245 = arith.subf %243, %244 : vector<1x128xf32>
    %cst_196 = arith.constant 0.000000e+00 : f32
    %246 = vector.broadcast %cst_196 : f32 to vector<1x128xf32>
    %247 = arith.maximumf %245, %246 : vector<1x128xf32>
    %cst_197 = arith.constant 9.99999974E-6 : f32
    %248 = vector.broadcast %cst_197 : f32 to vector<1x128xf32>
    %249 = arith.addf %247, %248 : vector<1x128xf32>
    %250 = math.rsqrt %249 : vector<1x128xf32>
    %251 = arith.mulf %219, %250 : vector<1x128xf32>
    %252 = arith.mulf %241, %251 : vector<1x128xf32>
    %253 = arith.subf %221, %252 : vector<1x128xf32>
    %254 = vector.broadcast %251 : vector<1x128xf32> to vector<16x128xf32>
    %255 = arith.mulf %232, %254 : vector<16x128xf32>
    %256 = vector.broadcast %253 : vector<1x128xf32> to vector<16x128xf32>
    %257 = arith.addf %255, %256 : vector<16x128xf32>
    %cst_198 = arith.constant 0.000000e+00 : f32
    %258 = vector.broadcast %cst_198 : f32 to vector<16x128xf32>
    %259 = arith.cmpf oge, %257, %258 : vector<16x128xf32>
    %cst_199 = arith.constant 1.000000e-01 : f32
    %260 = vector.broadcast %cst_199 : f32 to vector<16x128xf32>
    %261 = arith.mulf %260, %257 : vector<16x128xf32>
    %262 = arith.select %259, %257, %261 : vector<16x128xi1>, vector<16x128xf32>
    %263 = vector.shape_cast %262 : vector<16x128xf32> to vector<2x8x128xf32>
    %c0_200 = arith.constant 0 : index
    %c1_201 = arith.constant 1 : index
    %c0_202 = arith.constant 0 : index
    %264 = vector.load %arg10[%c0_200, %c1_201, %c0_202] : memref<2x10x128xf32, #tpu.memory_space<vmem>>, vector<2x8x128xf32>
    tpu.vector_store %arg10[%c0_200, %c1_201, %c0_202], %263 {strides = array<i32>} : memref<2x10x128xf32, #tpu.memory_space<vmem>>, vector<2x8x128xf32>,
    %c5_203 = arith.constant 5 : index
    %c0_204 = arith.constant 0 : index
    %c0_205 = arith.constant 0 : index
    %265 = vector.load %arg1[%c5_203, %c0_204, %c0_205] : memref<15x384x128xbf16, #tpu.memory_space<vmem>>, vector<1x384x128xbf16>
    %266 = vector.shape_cast %265 : vector<1x384x128xbf16> to vector<384x128xbf16>
    %c5_206 = arith.constant 5 : index
    %c0_207 = arith.constant 0 : index
    %c0_208 = arith.constant 0 : index
    %267 = vector.load %arg2[%c5_206, %c0_207, %c0_208] : memref<15x1x128xf32, #tpu.memory_space<vmem>>, vector<1x1x128xf32>
    %268 = vector.shape_cast %267 : vector<1x1x128xf32> to vector<1x128xf32>
    %c5_209 = arith.constant 5 : index
    %c0_210 = arith.constant 0 : index
    %c0_211 = arith.constant 0 : index
    %269 = vector.load %arg3[%c5_209, %c0_210, %c0_211] : memref<15x1x128xf32, #tpu.memory_space<vmem>>, vector<1x1x128xf32>
    %270 = vector.shape_cast %269 : vector<1x1x128xf32> to vector<1x128xf32>
    %c5_212 = arith.constant 5 : index
    %c0_213 = arith.constant 0 : index
    %c0_214 = arith.constant 0 : index
    %271 = vector.load %arg4[%c5_212, %c0_213, %c0_214] : memref<15x1x128xf32, #tpu.memory_space<vmem>>, vector<1x1x128xf32>
    %272 = vector.shape_cast %271 : vector<1x1x128xf32> to vector<1x128xf32>
    %c1_215 = arith.constant 1 : index
    %c0_216 = arith.constant 0 : index
    %c0_217 = arith.constant 0 : index
    %273 = vector.load %arg5[%c1_215, %c0_216, %c0_217] : memref<4x128x128xf32, #tpu.memory_space<vmem>>, vector<1x128x128xf32>
    %274 = vector.shape_cast %273 : vector<1x128x128xf32> to vector<128x128xf32>
    %c0_218 = arith.constant 0 : index
    %c0_219 = arith.constant 0 : index
    %c0_220 = arith.constant 0 : index
    %275 = vector.load %arg10[%c0_218, %c0_219, %c0_220] : memref<2x10x128xf32, #tpu.memory_space<vmem>>, vector<2x8x128xf32>
    %c0_221 = arith.constant 0 : index
    %c1_222 = arith.constant 1 : index
    %c0_223 = arith.constant 0 : index
    %276 = vector.load %arg10[%c0_221, %c1_222, %c0_223] : memref<2x10x128xf32, #tpu.memory_space<vmem>>, vector<2x8x128xf32>
    %c0_224 = arith.constant 0 : index
    %c2_225 = arith.constant 2 : index
    %c0_226 = arith.constant 0 : index
    %277 = vector.load %arg10[%c0_224, %c2_225, %c0_226] : memref<2x10x128xf32, #tpu.memory_space<vmem>>, vector<2x8x128xf32>
    %278 = tpu.concatenate %275, %276, %277 in 2 : vector<2x8x128xf32>, vector<2x8x128xf32>, vector<2x8x128xf32> -> vector<2x8x384xf32>
    %279 = vector.shape_cast %278 : vector<2x8x384xf32> to vector<16x384xf32>
    %280 = arith.truncf %279 : vector<16x384xf32> to vector<16x384xbf16>
    %cst_227 = arith.constant dense<0.000000e+00> : vector<16x128xf32>
    %281 = tpu.matmul %280, %266, %cst_227 {dimension_numbers = #tpu.dot_dimension_numbers<[1], [0], [0], [1], [0, 0, 1, 1], [], []>} : vector<16x384xbf16>, vector<384x128xbf16>, vector<16x128xf32> -> vector<16x128xf32>
    %282 = vector.broadcast %268 : vector<1x128xf32> to vector<16x128xf32>
    %283 = arith.addf %281, %282 : vector<16x128xf32>
    %cst_228 = arith.constant dense<0.000000e+00> : vector<128xf32>
    %284 = vector.multi_reduction <add>, %283, %cst_228 [0] : vector<16x128xf32> to vector<128xf32>
    %285 = vector.shape_cast %284 : vector<128xf32> to vector<1x128xf32>
    %cst_229 = arith.constant dense<0.000000e+00> : vector<1x128xf32>
    %286 = tpu.matmul %285, %274, %cst_229 {dimension_numbers = #tpu.dot_dimension_numbers<[1], [0], [0], [1], [0, 0, 1, 1], [], []>} : vector<1x128xf32>, vector<128x128xf32>, vector<1x128xf32> -> vector<1x128xf32>
    %287 = arith.mulf %283, %283 : vector<16x128xf32>
    %cst_230 = arith.constant dense<0.000000e+00> : vector<128xf32>
    %288 = vector.multi_reduction <add>, %287, %cst_230 [0] : vector<16x128xf32> to vector<128xf32>
    %289 = vector.shape_cast %288 : vector<128xf32> to vector<1x128xf32>
    %cst_231 = arith.constant dense<0.000000e+00> : vector<1x128xf32>
    %290 = tpu.matmul %289, %274, %cst_231 {dimension_numbers = #tpu.dot_dimension_numbers<[1], [0], [0], [1], [0, 0, 1, 1], [], []>} : vector<1x128xf32>, vector<128x128xf32>, vector<1x128xf32> -> vector<1x128xf32>
    %cst_232 = arith.constant 7.812500e-03 : f32
    %291 = vector.broadcast %cst_232 : f32 to vector<1x128xf32>
    %292 = arith.mulf %286, %291 : vector<1x128xf32>
    %cst_233 = arith.constant 7.812500e-03 : f32
    %293 = vector.broadcast %cst_233 : f32 to vector<1x128xf32>
    %294 = arith.mulf %290, %293 : vector<1x128xf32>
    %295 = arith.mulf %292, %292 : vector<1x128xf32>
    %296 = arith.subf %294, %295 : vector<1x128xf32>
    %cst_234 = arith.constant 0.000000e+00 : f32
    %297 = vector.broadcast %cst_234 : f32 to vector<1x128xf32>
    %298 = arith.maximumf %296, %297 : vector<1x128xf32>
    %cst_235 = arith.constant 9.99999974E-6 : f32
    %299 = vector.broadcast %cst_235 : f32 to vector<1x128xf32>
    %300 = arith.addf %298, %299 : vector<1x128xf32>
    %301 = math.rsqrt %300 : vector<1x128xf32>
    %302 = arith.mulf %270, %301 : vector<1x128xf32>
    %303 = arith.mulf %292, %302 : vector<1x128xf32>
    %304 = arith.subf %272, %303 : vector<1x128xf32>
    %305 = vector.broadcast %302 : vector<1x128xf32> to vector<16x128xf32>
    %306 = arith.mulf %283, %305 : vector<16x128xf32>
    %307 = vector.broadcast %304 : vector<1x128xf32> to vector<16x128xf32>
    %308 = arith.addf %306, %307 : vector<16x128xf32>
    %cst_236 = arith.constant 0.000000e+00 : f32
    %309 = vector.broadcast %cst_236 : f32 to vector<16x128xf32>
    %310 = arith.cmpf oge, %308, %309 : vector<16x128xf32>
    %cst_237 = arith.constant 1.000000e-01 : f32
    %311 = vector.broadcast %cst_237 : f32 to vector<16x128xf32>
    %312 = arith.mulf %311, %308 : vector<16x128xf32>
    %313 = arith.select %310, %308, %312 : vector<16x128xi1>, vector<16x128xf32>
    %314 = vector.shape_cast %313 : vector<16x128xf32> to vector<2x8x128xf32>
    %c0_238 = arith.constant 0 : index
    %c1_239 = arith.constant 1 : index
    %c0_240 = arith.constant 0 : index
    %315 = vector.load %arg10[%c0_238, %c1_239, %c0_240] : memref<2x10x128xf32, #tpu.memory_space<vmem>>, vector<2x8x128xf32>
    tpu.vector_store %arg10[%c0_238, %c1_239, %c0_240], %314 {strides = array<i32>} : memref<2x10x128xf32, #tpu.memory_space<vmem>>, vector<2x8x128xf32>,
    %c6 = arith.constant 6 : index
    %c0_241 = arith.constant 0 : index
    %c0_242 = arith.constant 0 : index
    %316 = vector.load %arg1[%c6, %c0_241, %c0_242] : memref<15x384x128xbf16, #tpu.memory_space<vmem>>, vector<1x384x128xbf16>
    %317 = vector.shape_cast %316 : vector<1x384x128xbf16> to vector<384x128xbf16>
    %c6_243 = arith.constant 6 : index
    %c0_244 = arith.constant 0 : index
    %c0_245 = arith.constant 0 : index
    %318 = vector.load %arg2[%c6_243, %c0_244, %c0_245] : memref<15x1x128xf32, #tpu.memory_space<vmem>>, vector<1x1x128xf32>
    %319 = vector.shape_cast %318 : vector<1x1x128xf32> to vector<1x128xf32>
    %c6_246 = arith.constant 6 : index
    %c0_247 = arith.constant 0 : index
    %c0_248 = arith.constant 0 : index
    %320 = vector.load %arg3[%c6_246, %c0_247, %c0_248] : memref<15x1x128xf32, #tpu.memory_space<vmem>>, vector<1x1x128xf32>
    %321 = vector.shape_cast %320 : vector<1x1x128xf32> to vector<1x128xf32>
    %c6_249 = arith.constant 6 : index
    %c0_250 = arith.constant 0 : index
    %c0_251 = arith.constant 0 : index
    %322 = vector.load %arg4[%c6_249, %c0_250, %c0_251] : memref<15x1x128xf32, #tpu.memory_space<vmem>>, vector<1x1x128xf32>
    %323 = vector.shape_cast %322 : vector<1x1x128xf32> to vector<1x128xf32>
    %c1_252 = arith.constant 1 : index
    %c0_253 = arith.constant 0 : index
    %c0_254 = arith.constant 0 : index
    %324 = vector.load %arg5[%c1_252, %c0_253, %c0_254] : memref<4x128x128xf32, #tpu.memory_space<vmem>>, vector<1x128x128xf32>
    %325 = vector.shape_cast %324 : vector<1x128x128xf32> to vector<128x128xf32>
    %c0_255 = arith.constant 0 : index
    %c0_256 = arith.constant 0 : index
    %c0_257 = arith.constant 0 : index
    %326 = vector.load %arg10[%c0_255, %c0_256, %c0_257] : memref<2x10x128xf32, #tpu.memory_space<vmem>>, vector<2x8x128xf32>
    %c0_258 = arith.constant 0 : index
    %c1_259 = arith.constant 1 : index
    %c0_260 = arith.constant 0 : index
    %327 = vector.load %arg10[%c0_258, %c1_259, %c0_260] : memref<2x10x128xf32, #tpu.memory_space<vmem>>, vector<2x8x128xf32>
    %c0_261 = arith.constant 0 : index
    %c2_262 = arith.constant 2 : index
    %c0_263 = arith.constant 0 : index
    %328 = vector.load %arg10[%c0_261, %c2_262, %c0_263] : memref<2x10x128xf32, #tpu.memory_space<vmem>>, vector<2x8x128xf32>
    %329 = tpu.concatenate %326, %327, %328 in 2 : vector<2x8x128xf32>, vector<2x8x128xf32>, vector<2x8x128xf32> -> vector<2x8x384xf32>
    %330 = vector.shape_cast %329 : vector<2x8x384xf32> to vector<16x384xf32>
    %331 = arith.truncf %330 : vector<16x384xf32> to vector<16x384xbf16>
    %cst_264 = arith.constant dense<0.000000e+00> : vector<16x128xf32>
    %332 = tpu.matmul %331, %317, %cst_264 {dimension_numbers = #tpu.dot_dimension_numbers<[1], [0], [0], [1], [0, 0, 1, 1], [], []>} : vector<16x384xbf16>, vector<384x128xbf16>, vector<16x128xf32> -> vector<16x128xf32>
    %333 = vector.broadcast %319 : vector<1x128xf32> to vector<16x128xf32>
    %334 = arith.addf %332, %333 : vector<16x128xf32>
    %cst_265 = arith.constant dense<0.000000e+00> : vector<128xf32>
    %335 = vector.multi_reduction <add>, %334, %cst_265 [0] : vector<16x128xf32> to vector<128xf32>
    %336 = vector.shape_cast %335 : vector<128xf32> to vector<1x128xf32>
    %cst_266 = arith.constant dense<0.000000e+00> : vector<1x128xf32>
    %337 = tpu.matmul %336, %325, %cst_266 {dimension_numbers = #tpu.dot_dimension_numbers<[1], [0], [0], [1], [0, 0, 1, 1], [], []>} : vector<1x128xf32>, vector<128x128xf32>, vector<1x128xf32> -> vector<1x128xf32>
    %338 = arith.mulf %334, %334 : vector<16x128xf32>
    %cst_267 = arith.constant dense<0.000000e+00> : vector<128xf32>
    %339 = vector.multi_reduction <add>, %338, %cst_267 [0] : vector<16x128xf32> to vector<128xf32>
    %340 = vector.shape_cast %339 : vector<128xf32> to vector<1x128xf32>
    %cst_268 = arith.constant dense<0.000000e+00> : vector<1x128xf32>
    %341 = tpu.matmul %340, %325, %cst_268 {dimension_numbers = #tpu.dot_dimension_numbers<[1], [0], [0], [1], [0, 0, 1, 1], [], []>} : vector<1x128xf32>, vector<128x128xf32>, vector<1x128xf32> -> vector<1x128xf32>
    %cst_269 = arith.constant 7.812500e-03 : f32
    %342 = vector.broadcast %cst_269 : f32 to vector<1x128xf32>
    %343 = arith.mulf %337, %342 : vector<1x128xf32>
    %cst_270 = arith.constant 7.812500e-03 : f32
    %344 = vector.broadcast %cst_270 : f32 to vector<1x128xf32>
    %345 = arith.mulf %341, %344 : vector<1x128xf32>
    %346 = arith.mulf %343, %343 : vector<1x128xf32>
    %347 = arith.subf %345, %346 : vector<1x128xf32>
    %cst_271 = arith.constant 0.000000e+00 : f32
    %348 = vector.broadcast %cst_271 : f32 to vector<1x128xf32>
    %349 = arith.maximumf %347, %348 : vector<1x128xf32>
    %cst_272 = arith.constant 9.99999974E-6 : f32
    %350 = vector.broadcast %cst_272 : f32 to vector<1x128xf32>
    %351 = arith.addf %349, %350 : vector<1x128xf32>
    %352 = math.rsqrt %351 : vector<1x128xf32>
    %353 = arith.mulf %321, %352 : vector<1x128xf32>
    %354 = arith.mulf %343, %353 : vector<1x128xf32>
    %355 = arith.subf %323, %354 : vector<1x128xf32>
    %356 = vector.broadcast %353 : vector<1x128xf32> to vector<16x128xf32>
    %357 = arith.mulf %334, %356 : vector<16x128xf32>
    %358 = vector.broadcast %355 : vector<1x128xf32> to vector<16x128xf32>
    %359 = arith.addf %357, %358 : vector<16x128xf32>
    %cst_273 = arith.constant 0.000000e+00 : f32
    %360 = vector.broadcast %cst_273 : f32 to vector<16x128xf32>
    %361 = arith.cmpf oge, %359, %360 : vector<16x128xf32>
    %cst_274 = arith.constant 1.000000e-01 : f32
    %362 = vector.broadcast %cst_274 : f32 to vector<16x128xf32>
    %363 = arith.mulf %362, %359 : vector<16x128xf32>
    %364 = arith.select %361, %359, %363 : vector<16x128xi1>, vector<16x128xf32>
    %365 = vector.shape_cast %364 : vector<16x128xf32> to vector<2x8x128xf32>
    %c0_275 = arith.constant 0 : index
    %c1_276 = arith.constant 1 : index
    %c0_277 = arith.constant 0 : index
    %366 = vector.load %arg10[%c0_275, %c1_276, %c0_277] : memref<2x10x128xf32, #tpu.memory_space<vmem>>, vector<2x8x128xf32>
    tpu.vector_store %arg10[%c0_275, %c1_276, %c0_277], %365 {strides = array<i32>} : memref<2x10x128xf32, #tpu.memory_space<vmem>>, vector<2x8x128xf32>,
    %c7 = arith.constant 7 : index
    %c0_278 = arith.constant 0 : index
    %c0_279 = arith.constant 0 : index
    %367 = vector.load %arg1[%c7, %c0_278, %c0_279] : memref<15x384x128xbf16, #tpu.memory_space<vmem>>, vector<1x384x128xbf16>
    %368 = vector.shape_cast %367 : vector<1x384x128xbf16> to vector<384x128xbf16>
    %c7_280 = arith.constant 7 : index
    %c0_281 = arith.constant 0 : index
    %c0_282 = arith.constant 0 : index
    %369 = vector.load %arg2[%c7_280, %c0_281, %c0_282] : memref<15x1x128xf32, #tpu.memory_space<vmem>>, vector<1x1x128xf32>
    %370 = vector.shape_cast %369 : vector<1x1x128xf32> to vector<1x128xf32>
    %c7_283 = arith.constant 7 : index
    %c0_284 = arith.constant 0 : index
    %c0_285 = arith.constant 0 : index
    %371 = vector.load %arg3[%c7_283, %c0_284, %c0_285] : memref<15x1x128xf32, #tpu.memory_space<vmem>>, vector<1x1x128xf32>
    %372 = vector.shape_cast %371 : vector<1x1x128xf32> to vector<1x128xf32>
    %c7_286 = arith.constant 7 : index
    %c0_287 = arith.constant 0 : index
    %c0_288 = arith.constant 0 : index
    %373 = vector.load %arg4[%c7_286, %c0_287, %c0_288] : memref<15x1x128xf32, #tpu.memory_space<vmem>>, vector<1x1x128xf32>
    %374 = vector.shape_cast %373 : vector<1x1x128xf32> to vector<1x128xf32>
    %c2_289 = arith.constant 2 : index
    %c0_290 = arith.constant 0 : index
    %c0_291 = arith.constant 0 : index
    %375 = vector.load %arg5[%c2_289, %c0_290, %c0_291] : memref<4x128x128xf32, #tpu.memory_space<vmem>>, vector<1x128x128xf32>
    %376 = vector.shape_cast %375 : vector<1x128x128xf32> to vector<128x128xf32>
    %c0_292 = arith.constant 0 : index
    %c0_293 = arith.constant 0 : index
    %c0_294 = arith.constant 0 : index
    %377 = tpu.strided_load %arg10[%c0_292, %c0_293, %c0_294] {strides = array<i32: 1, 2, 1>} : memref<2x10x128xf32, #tpu.memory_space<vmem>>, vector<2x5x128xf32>
    %c0_295 = arith.constant 0 : index
    %c1_296 = arith.constant 1 : index
    %c0_297 = arith.constant 0 : index
    %378 = tpu.strided_load %arg10[%c0_295, %c1_296, %c0_297] {strides = array<i32: 1, 2, 1>} : memref<2x10x128xf32, #tpu.memory_space<vmem>>, vector<2x4x128xf32>
    %379 = vector.extract_strided_slice %377 {offsets = [0, 0, 0], sizes = [2, 4, 128], strides = [1, 1, 1]} : vector<2x5x128xf32> to vector<2x4x128xf32>
    %380 = vector.extract_strided_slice %377 {offsets = [0, 1, 0], sizes = [2, 4, 128], strides = [1, 1, 1]} : vector<2x5x128xf32> to vector<2x4x128xf32>
    %381 = tpu.concatenate %379, %378, %380 in 2 : vector<2x4x128xf32>, vector<2x4x128xf32>, vector<2x4x128xf32> -> vector<2x4x384xf32>
    %382 = vector.shape_cast %381 : vector<2x4x384xf32> to vector<8x384xf32>
    %383 = arith.truncf %382 : vector<8x384xf32> to vector<8x384xbf16>
    %cst_298 = arith.constant dense<0.000000e+00> : vector<8x128xf32>
    %384 = tpu.matmul %383, %368, %cst_298 {dimension_numbers = #tpu.dot_dimension_numbers<[1], [0], [0], [1], [0, 0, 1, 1], [], []>} : vector<8x384xbf16>, vector<384x128xbf16>, vector<8x128xf32> -> vector<8x128xf32>
    %385 = vector.broadcast %370 : vector<1x128xf32> to vector<8x128xf32>
    %386 = arith.addf %384, %385 : vector<8x128xf32>
    %cst_299 = arith.constant dense<0.000000e+00> : vector<128xf32>
    %387 = vector.multi_reduction <add>, %386, %cst_299 [0] : vector<8x128xf32> to vector<128xf32>
    %388 = vector.shape_cast %387 : vector<128xf32> to vector<1x128xf32>
    %cst_300 = arith.constant dense<0.000000e+00> : vector<1x128xf32>
    %389 = tpu.matmul %388, %376, %cst_300 {dimension_numbers = #tpu.dot_dimension_numbers<[1], [0], [0], [1], [0, 0, 1, 1], [], []>} : vector<1x128xf32>, vector<128x128xf32>, vector<1x128xf32> -> vector<1x128xf32>
    %390 = arith.mulf %386, %386 : vector<8x128xf32>
    %cst_301 = arith.constant dense<0.000000e+00> : vector<128xf32>
    %391 = vector.multi_reduction <add>, %390, %cst_301 [0] : vector<8x128xf32> to vector<128xf32>
    %392 = vector.shape_cast %391 : vector<128xf32> to vector<1x128xf32>
    %cst_302 = arith.constant dense<0.000000e+00> : vector<1x128xf32>
    %393 = tpu.matmul %392, %376, %cst_302 {dimension_numbers = #tpu.dot_dimension_numbers<[1], [0], [0], [1], [0, 0, 1, 1], [], []>} : vector<1x128xf32>, vector<128x128xf32>, vector<1x128xf32> -> vector<1x128xf32>
    %cst_303 = arith.constant 3.125000e-02 : f32
    %394 = vector.broadcast %cst_303 : f32 to vector<1x128xf32>
    %395 = arith.mulf %389, %394 : vector<1x128xf32>
    %cst_304 = arith.constant 3.125000e-02 : f32
    %396 = vector.broadcast %cst_304 : f32 to vector<1x128xf32>
    %397 = arith.mulf %393, %396 : vector<1x128xf32>
    %398 = arith.mulf %395, %395 : vector<1x128xf32>
    %399 = arith.subf %397, %398 : vector<1x128xf32>
    %cst_305 = arith.constant 0.000000e+00 : f32
    %400 = vector.broadcast %cst_305 : f32 to vector<1x128xf32>
    %401 = arith.maximumf %399, %400 : vector<1x128xf32>
    %cst_306 = arith.constant 9.99999974E-6 : f32
    %402 = vector.broadcast %cst_306 : f32 to vector<1x128xf32>
    %403 = arith.addf %401, %402 : vector<1x128xf32>
    %404 = math.rsqrt %403 : vector<1x128xf32>
    %405 = arith.mulf %372, %404 : vector<1x128xf32>
    %406 = arith.mulf %395, %405 : vector<1x128xf32>
    %407 = arith.subf %374, %406 : vector<1x128xf32>
    %408 = vector.broadcast %405 : vector<1x128xf32> to vector<8x128xf32>
    %409 = arith.mulf %386, %408 : vector<8x128xf32>
    %410 = vector.broadcast %407 : vector<1x128xf32> to vector<8x128xf32>
    %411 = arith.addf %409, %410 : vector<8x128xf32>
    %cst_307 = arith.constant 0.000000e+00 : f32
    %412 = vector.broadcast %cst_307 : f32 to vector<8x128xf32>
    %413 = arith.cmpf oge, %411, %412 : vector<8x128xf32>
    %cst_308 = arith.constant 1.000000e-01 : f32
    %414 = vector.broadcast %cst_308 : f32 to vector<8x128xf32>
    %415 = arith.mulf %414, %411 : vector<8x128xf32>
    %416 = arith.select %413, %411, %415 : vector<8x128xi1>, vector<8x128xf32>
    %417 = vector.shape_cast %416 : vector<8x128xf32> to vector<2x4x128xf32>
    %c0_309 = arith.constant 0 : index
    %c1_310 = arith.constant 1 : index
    %c0_311 = arith.constant 0 : index
    %418 = vector.load %arg11[%c0_309, %c1_310, %c0_311] : memref<2x6x128xf32, #tpu.memory_space<vmem>>, vector<2x4x128xf32>
    tpu.vector_store %arg11[%c0_309, %c1_310, %c0_311], %417 {strides = array<i32>} : memref<2x6x128xf32, #tpu.memory_space<vmem>>, vector<2x4x128xf32>,
    %c8 = arith.constant 8 : index
    %c0_312 = arith.constant 0 : index
    %c0_313 = arith.constant 0 : index
    %419 = vector.load %arg1[%c8, %c0_312, %c0_313] : memref<15x384x128xbf16, #tpu.memory_space<vmem>>, vector<1x384x128xbf16>
    %420 = vector.shape_cast %419 : vector<1x384x128xbf16> to vector<384x128xbf16>
    %c8_314 = arith.constant 8 : index
    %c0_315 = arith.constant 0 : index
    %c0_316 = arith.constant 0 : index
    %421 = vector.load %arg2[%c8_314, %c0_315, %c0_316] : memref<15x1x128xf32, #tpu.memory_space<vmem>>, vector<1x1x128xf32>
    %422 = vector.shape_cast %421 : vector<1x1x128xf32> to vector<1x128xf32>
    %c8_317 = arith.constant 8 : index
    %c0_318 = arith.constant 0 : index
    %c0_319 = arith.constant 0 : index
    %423 = vector.load %arg3[%c8_317, %c0_318, %c0_319] : memref<15x1x128xf32, #tpu.memory_space<vmem>>, vector<1x1x128xf32>
    %424 = vector.shape_cast %423 : vector<1x1x128xf32> to vector<1x128xf32>
    %c8_320 = arith.constant 8 : index
    %c0_321 = arith.constant 0 : index
    %c0_322 = arith.constant 0 : index
    %425 = vector.load %arg4[%c8_320, %c0_321, %c0_322] : memref<15x1x128xf32, #tpu.memory_space<vmem>>, vector<1x1x128xf32>
    %426 = vector.shape_cast %425 : vector<1x1x128xf32> to vector<1x128xf32>
    %c2_323 = arith.constant 2 : index
    %c0_324 = arith.constant 0 : index
    %c0_325 = arith.constant 0 : index
    %427 = vector.load %arg5[%c2_323, %c0_324, %c0_325] : memref<4x128x128xf32, #tpu.memory_space<vmem>>, vector<1x128x128xf32>
    %428 = vector.shape_cast %427 : vector<1x128x128xf32> to vector<128x128xf32>
    %c0_326 = arith.constant 0 : index
    %c0_327 = arith.constant 0 : index
    %c0_328 = arith.constant 0 : index
    %429 = vector.load %arg11[%c0_326, %c0_327, %c0_328] : memref<2x6x128xf32, #tpu.memory_space<vmem>>, vector<2x4x128xf32>
    %c0_329 = arith.constant 0 : index
    %c1_330 = arith.constant 1 : index
    %c0_331 = arith.constant 0 : index
    %430 = vector.load %arg11[%c0_329, %c1_330, %c0_331] : memref<2x6x128xf32, #tpu.memory_space<vmem>>, vector<2x4x128xf32>
    %c0_332 = arith.constant 0 : index
    %c2_333 = arith.constant 2 : index
    %c0_334 = arith.constant 0 : index
    %431 = vector.load %arg11[%c0_332, %c2_333, %c0_334] : memref<2x6x128xf32, #tpu.memory_space<vmem>>, vector<2x4x128xf32>
    %432 = tpu.concatenate %429, %430, %431 in 2 : vector<2x4x128xf32>, vector<2x4x128xf32>, vector<2x4x128xf32> -> vector<2x4x384xf32>
    %433 = vector.shape_cast %432 : vector<2x4x384xf32> to vector<8x384xf32>
    %434 = arith.truncf %433 : vector<8x384xf32> to vector<8x384xbf16>
    %cst_335 = arith.constant dense<0.000000e+00> : vector<8x128xf32>
    %435 = tpu.matmul %434, %420, %cst_335 {dimension_numbers = #tpu.dot_dimension_numbers<[1], [0], [0], [1], [0, 0, 1, 1], [], []>} : vector<8x384xbf16>, vector<384x128xbf16>, vector<8x128xf32> -> vector<8x128xf32>
    %436 = vector.broadcast %422 : vector<1x128xf32> to vector<8x128xf32>
    %437 = arith.addf %435, %436 : vector<8x128xf32>
    %cst_336 = arith.constant dense<0.000000e+00> : vector<128xf32>
    %438 = vector.multi_reduction <add>, %437, %cst_336 [0] : vector<8x128xf32> to vector<128xf32>
    %439 = vector.shape_cast %438 : vector<128xf32> to vector<1x128xf32>
    %cst_337 = arith.constant dense<0.000000e+00> : vector<1x128xf32>
    %440 = tpu.matmul %439, %428, %cst_337 {dimension_numbers = #tpu.dot_dimension_numbers<[1], [0], [0], [1], [0, 0, 1, 1], [], []>} : vector<1x128xf32>, vector<128x128xf32>, vector<1x128xf32> -> vector<1x128xf32>
    %441 = arith.mulf %437, %437 : vector<8x128xf32>
    %cst_338 = arith.constant dense<0.000000e+00> : vector<128xf32>
    %442 = vector.multi_reduction <add>, %441, %cst_338 [0] : vector<8x128xf32> to vector<128xf32>
    %443 = vector.shape_cast %442 : vector<128xf32> to vector<1x128xf32>
    %cst_339 = arith.constant dense<0.000000e+00> : vector<1x128xf32>
    %444 = tpu.matmul %443, %428, %cst_339 {dimension_numbers = #tpu.dot_dimension_numbers<[1], [0], [0], [1], [0, 0, 1, 1], [], []>} : vector<1x128xf32>, vector<128x128xf32>, vector<1x128xf32> -> vector<1x128xf32>
    %cst_340 = arith.constant 3.125000e-02 : f32
    %445 = vector.broadcast %cst_340 : f32 to vector<1x128xf32>
    %446 = arith.mulf %440, %445 : vector<1x128xf32>
    %cst_341 = arith.constant 3.125000e-02 : f32
    %447 = vector.broadcast %cst_341 : f32 to vector<1x128xf32>
    %448 = arith.mulf %444, %447 : vector<1x128xf32>
    %449 = arith.mulf %446, %446 : vector<1x128xf32>
    %450 = arith.subf %448, %449 : vector<1x128xf32>
    %cst_342 = arith.constant 0.000000e+00 : f32
    %451 = vector.broadcast %cst_342 : f32 to vector<1x128xf32>
    %452 = arith.maximumf %450, %451 : vector<1x128xf32>
    %cst_343 = arith.constant 9.99999974E-6 : f32
    %453 = vector.broadcast %cst_343 : f32 to vector<1x128xf32>
    %454 = arith.addf %452, %453 : vector<1x128xf32>
    %455 = math.rsqrt %454 : vector<1x128xf32>
    %456 = arith.mulf %424, %455 : vector<1x128xf32>
    %457 = arith.mulf %446, %456 : vector<1x128xf32>
    %458 = arith.subf %426, %457 : vector<1x128xf32>
    %459 = vector.broadcast %456 : vector<1x128xf32> to vector<8x128xf32>
    %460 = arith.mulf %437, %459 : vector<8x128xf32>
    %461 = vector.broadcast %458 : vector<1x128xf32> to vector<8x128xf32>
    %462 = arith.addf %460, %461 : vector<8x128xf32>
    %cst_344 = arith.constant 0.000000e+00 : f32
    %463 = vector.broadcast %cst_344 : f32 to vector<8x128xf32>
    %464 = arith.cmpf oge, %462, %463 : vector<8x128xf32>
    %cst_345 = arith.constant 1.000000e-01 : f32
    %465 = vector.broadcast %cst_345 : f32 to vector<8x128xf32>
    %466 = arith.mulf %465, %462 : vector<8x128xf32>
    %467 = arith.select %464, %462, %466 : vector<8x128xi1>, vector<8x128xf32>
    %468 = vector.shape_cast %467 : vector<8x128xf32> to vector<2x4x128xf32>
    %c0_346 = arith.constant 0 : index
    %c1_347 = arith.constant 1 : index
    %c0_348 = arith.constant 0 : index
    %469 = vector.load %arg11[%c0_346, %c1_347, %c0_348] : memref<2x6x128xf32, #tpu.memory_space<vmem>>, vector<2x4x128xf32>
    tpu.vector_store %arg11[%c0_346, %c1_347, %c0_348], %468 {strides = array<i32>} : memref<2x6x128xf32, #tpu.memory_space<vmem>>, vector<2x4x128xf32>,
    %c9_349 = arith.constant 9 : index
    %c0_350 = arith.constant 0 : index
    %c0_351 = arith.constant 0 : index
    %470 = vector.load %arg1[%c9_349, %c0_350, %c0_351] : memref<15x384x128xbf16, #tpu.memory_space<vmem>>, vector<1x384x128xbf16>
    %471 = vector.shape_cast %470 : vector<1x384x128xbf16> to vector<384x128xbf16>
    %c9_352 = arith.constant 9 : index
    %c0_353 = arith.constant 0 : index
    %c0_354 = arith.constant 0 : index
    %472 = vector.load %arg2[%c9_352, %c0_353, %c0_354] : memref<15x1x128xf32, #tpu.memory_space<vmem>>, vector<1x1x128xf32>
    %473 = vector.shape_cast %472 : vector<1x1x128xf32> to vector<1x128xf32>
    %c9_355 = arith.constant 9 : index
    %c0_356 = arith.constant 0 : index
    %c0_357 = arith.constant 0 : index
    %474 = vector.load %arg3[%c9_355, %c0_356, %c0_357] : memref<15x1x128xf32, #tpu.memory_space<vmem>>, vector<1x1x128xf32>
    %475 = vector.shape_cast %474 : vector<1x1x128xf32> to vector<1x128xf32>
    %c9_358 = arith.constant 9 : index
    %c0_359 = arith.constant 0 : index
    %c0_360 = arith.constant 0 : index
    %476 = vector.load %arg4[%c9_358, %c0_359, %c0_360] : memref<15x1x128xf32, #tpu.memory_space<vmem>>, vector<1x1x128xf32>
    %477 = vector.shape_cast %476 : vector<1x1x128xf32> to vector<1x128xf32>
    %c2_361 = arith.constant 2 : index
    %c0_362 = arith.constant 0 : index
    %c0_363 = arith.constant 0 : index
    %478 = vector.load %arg5[%c2_361, %c0_362, %c0_363] : memref<4x128x128xf32, #tpu.memory_space<vmem>>, vector<1x128x128xf32>
    %479 = vector.shape_cast %478 : vector<1x128x128xf32> to vector<128x128xf32>
    %c0_364 = arith.constant 0 : index
    %c0_365 = arith.constant 0 : index
    %c0_366 = arith.constant 0 : index
    %480 = vector.load %arg11[%c0_364, %c0_365, %c0_366] : memref<2x6x128xf32, #tpu.memory_space<vmem>>, vector<2x4x128xf32>
    %c0_367 = arith.constant 0 : index
    %c1_368 = arith.constant 1 : index
    %c0_369 = arith.constant 0 : index
    %481 = vector.load %arg11[%c0_367, %c1_368, %c0_369] : memref<2x6x128xf32, #tpu.memory_space<vmem>>, vector<2x4x128xf32>
    %c0_370 = arith.constant 0 : index
    %c2_371 = arith.constant 2 : index
    %c0_372 = arith.constant 0 : index
    %482 = vector.load %arg11[%c0_370, %c2_371, %c0_372] : memref<2x6x128xf32, #tpu.memory_space<vmem>>, vector<2x4x128xf32>
    %483 = tpu.concatenate %480, %481, %482 in 2 : vector<2x4x128xf32>, vector<2x4x128xf32>, vector<2x4x128xf32> -> vector<2x4x384xf32>
    %484 = vector.shape_cast %483 : vector<2x4x384xf32> to vector<8x384xf32>
    %485 = arith.truncf %484 : vector<8x384xf32> to vector<8x384xbf16>
    %cst_373 = arith.constant dense<0.000000e+00> : vector<8x128xf32>
    %486 = tpu.matmul %485, %471, %cst_373 {dimension_numbers = #tpu.dot_dimension_numbers<[1], [0], [0], [1], [0, 0, 1, 1], [], []>} : vector<8x384xbf16>, vector<384x128xbf16>, vector<8x128xf32> -> vector<8x128xf32>
    %487 = vector.broadcast %473 : vector<1x128xf32> to vector<8x128xf32>
    %488 = arith.addf %486, %487 : vector<8x128xf32>
    %cst_374 = arith.constant dense<0.000000e+00> : vector<128xf32>
    %489 = vector.multi_reduction <add>, %488, %cst_374 [0] : vector<8x128xf32> to vector<128xf32>
    %490 = vector.shape_cast %489 : vector<128xf32> to vector<1x128xf32>
    %cst_375 = arith.constant dense<0.000000e+00> : vector<1x128xf32>
    %491 = tpu.matmul %490, %479, %cst_375 {dimension_numbers = #tpu.dot_dimension_numbers<[1], [0], [0], [1], [0, 0, 1, 1], [], []>} : vector<1x128xf32>, vector<128x128xf32>, vector<1x128xf32> -> vector<1x128xf32>
    %492 = arith.mulf %488, %488 : vector<8x128xf32>
    %cst_376 = arith.constant dense<0.000000e+00> : vector<128xf32>
    %493 = vector.multi_reduction <add>, %492, %cst_376 [0] : vector<8x128xf32> to vector<128xf32>
    %494 = vector.shape_cast %493 : vector<128xf32> to vector<1x128xf32>
    %cst_377 = arith.constant dense<0.000000e+00> : vector<1x128xf32>
    %495 = tpu.matmul %494, %479, %cst_377 {dimension_numbers = #tpu.dot_dimension_numbers<[1], [0], [0], [1], [0, 0, 1, 1], [], []>} : vector<1x128xf32>, vector<128x128xf32>, vector<1x128xf32> -> vector<1x128xf32>
    %cst_378 = arith.constant 3.125000e-02 : f32
    %496 = vector.broadcast %cst_378 : f32 to vector<1x128xf32>
    %497 = arith.mulf %491, %496 : vector<1x128xf32>
    %cst_379 = arith.constant 3.125000e-02 : f32
    %498 = vector.broadcast %cst_379 : f32 to vector<1x128xf32>
    %499 = arith.mulf %495, %498 : vector<1x128xf32>
    %500 = arith.mulf %497, %497 : vector<1x128xf32>
    %501 = arith.subf %499, %500 : vector<1x128xf32>
    %cst_380 = arith.constant 0.000000e+00 : f32
    %502 = vector.broadcast %cst_380 : f32 to vector<1x128xf32>
    %503 = arith.maximumf %501, %502 : vector<1x128xf32>
    %cst_381 = arith.constant 9.99999974E-6 : f32
    %504 = vector.broadcast %cst_381 : f32 to vector<1x128xf32>
    %505 = arith.addf %503, %504 : vector<1x128xf32>
    %506 = math.rsqrt %505 : vector<1x128xf32>
    %507 = arith.mulf %475, %506 : vector<1x128xf32>
    %508 = arith.mulf %497, %507 : vector<1x128xf32>
    %509 = arith.subf %477, %508 : vector<1x128xf32>
    %510 = vector.broadcast %507 : vector<1x128xf32> to vector<8x128xf32>
    %511 = arith.mulf %488, %510 : vector<8x128xf32>
    %512 = vector.broadcast %509 : vector<1x128xf32> to vector<8x128xf32>
    %513 = arith.addf %511, %512 : vector<8x128xf32>
    %cst_382 = arith.constant 0.000000e+00 : f32
    %514 = vector.broadcast %cst_382 : f32 to vector<8x128xf32>
    %515 = arith.cmpf oge, %513, %514 : vector<8x128xf32>
    %cst_383 = arith.constant 1.000000e-01 : f32
    %516 = vector.broadcast %cst_383 : f32 to vector<8x128xf32>
    %517 = arith.mulf %516, %513 : vector<8x128xf32>
    %518 = arith.select %515, %513, %517 : vector<8x128xi1>, vector<8x128xf32>
    %519 = vector.shape_cast %518 : vector<8x128xf32> to vector<2x4x128xf32>
    %c0_384 = arith.constant 0 : index
    %c1_385 = arith.constant 1 : index
    %c0_386 = arith.constant 0 : index
    %520 = vector.load %arg11[%c0_384, %c1_385, %c0_386] : memref<2x6x128xf32, #tpu.memory_space<vmem>>, vector<2x4x128xf32>
    tpu.vector_store %arg11[%c0_384, %c1_385, %c0_386], %519 {strides = array<i32>} : memref<2x6x128xf32, #tpu.memory_space<vmem>>, vector<2x4x128xf32>,
    %c10 = arith.constant 10 : index
    %c0_387 = arith.constant 0 : index
    %c0_388 = arith.constant 0 : index
    %521 = vector.load %arg1[%c10, %c0_387, %c0_388] : memref<15x384x128xbf16, #tpu.memory_space<vmem>>, vector<1x384x128xbf16>
    %522 = vector.shape_cast %521 : vector<1x384x128xbf16> to vector<384x128xbf16>
    %c10_389 = arith.constant 10 : index
    %c0_390 = arith.constant 0 : index
    %c0_391 = arith.constant 0 : index
    %523 = vector.load %arg2[%c10_389, %c0_390, %c0_391] : memref<15x1x128xf32, #tpu.memory_space<vmem>>, vector<1x1x128xf32>
    %524 = vector.shape_cast %523 : vector<1x1x128xf32> to vector<1x128xf32>
    %c10_392 = arith.constant 10 : index
    %c0_393 = arith.constant 0 : index
    %c0_394 = arith.constant 0 : index
    %525 = vector.load %arg3[%c10_392, %c0_393, %c0_394] : memref<15x1x128xf32, #tpu.memory_space<vmem>>, vector<1x1x128xf32>
    %526 = vector.shape_cast %525 : vector<1x1x128xf32> to vector<1x128xf32>
    %c10_395 = arith.constant 10 : index
    %c0_396 = arith.constant 0 : index
    %c0_397 = arith.constant 0 : index
    %527 = vector.load %arg4[%c10_395, %c0_396, %c0_397] : memref<15x1x128xf32, #tpu.memory_space<vmem>>, vector<1x1x128xf32>
    %528 = vector.shape_cast %527 : vector<1x1x128xf32> to vector<1x128xf32>
    %c2_398 = arith.constant 2 : index
    %c0_399 = arith.constant 0 : index
    %c0_400 = arith.constant 0 : index
    %529 = vector.load %arg5[%c2_398, %c0_399, %c0_400] : memref<4x128x128xf32, #tpu.memory_space<vmem>>, vector<1x128x128xf32>
    %530 = vector.shape_cast %529 : vector<1x128x128xf32> to vector<128x128xf32>
    %c0_401 = arith.constant 0 : index
    %c0_402 = arith.constant 0 : index
    %c0_403 = arith.constant 0 : index
    %531 = vector.load %arg11[%c0_401, %c0_402, %c0_403] : memref<2x6x128xf32, #tpu.memory_space<vmem>>, vector<2x4x128xf32>
    %c0_404 = arith.constant 0 : index
    %c1_405 = arith.constant 1 : index
    %c0_406 = arith.constant 0 : index
    %532 = vector.load %arg11[%c0_404, %c1_405, %c0_406] : memref<2x6x128xf32, #tpu.memory_space<vmem>>, vector<2x4x128xf32>
    %c0_407 = arith.constant 0 : index
    %c2_408 = arith.constant 2 : index
    %c0_409 = arith.constant 0 : index
    %533 = vector.load %arg11[%c0_407, %c2_408, %c0_409] : memref<2x6x128xf32, #tpu.memory_space<vmem>>, vector<2x4x128xf32>
    %534 = tpu.concatenate %531, %532, %533 in 2 : vector<2x4x128xf32>, vector<2x4x128xf32>, vector<2x4x128xf32> -> vector<2x4x384xf32>
    %535 = vector.shape_cast %534 : vector<2x4x384xf32> to vector<8x384xf32>
    %536 = arith.truncf %535 : vector<8x384xf32> to vector<8x384xbf16>
    %cst_410 = arith.constant dense<0.000000e+00> : vector<8x128xf32>
    %537 = tpu.matmul %536, %522, %cst_410 {dimension_numbers = #tpu.dot_dimension_numbers<[1], [0], [0], [1], [0, 0, 1, 1], [], []>} : vector<8x384xbf16>, vector<384x128xbf16>, vector<8x128xf32> -> vector<8x128xf32>
    %538 = vector.broadcast %524 : vector<1x128xf32> to vector<8x128xf32>
    %539 = arith.addf %537, %538 : vector<8x128xf32>
    %cst_411 = arith.constant dense<0.000000e+00> : vector<128xf32>
    %540 = vector.multi_reduction <add>, %539, %cst_411 [0] : vector<8x128xf32> to vector<128xf32>
    %541 = vector.shape_cast %540 : vector<128xf32> to vector<1x128xf32>
    %cst_412 = arith.constant dense<0.000000e+00> : vector<1x128xf32>
    %542 = tpu.matmul %541, %530, %cst_412 {dimension_numbers = #tpu.dot_dimension_numbers<[1], [0], [0], [1], [0, 0, 1, 1], [], []>} : vector<1x128xf32>, vector<128x128xf32>, vector<1x128xf32> -> vector<1x128xf32>
    %543 = arith.mulf %539, %539 : vector<8x128xf32>
    %cst_413 = arith.constant dense<0.000000e+00> : vector<128xf32>
    %544 = vector.multi_reduction <add>, %543, %cst_413 [0] : vector<8x128xf32> to vector<128xf32>
    %545 = vector.shape_cast %544 : vector<128xf32> to vector<1x128xf32>
    %cst_414 = arith.constant dense<0.000000e+00> : vector<1x128xf32>
    %546 = tpu.matmul %545, %530, %cst_414 {dimension_numbers = #tpu.dot_dimension_numbers<[1], [0], [0], [1], [0, 0, 1, 1], [], []>} : vector<1x128xf32>, vector<128x128xf32>, vector<1x128xf32> -> vector<1x128xf32>
    %cst_415 = arith.constant 3.125000e-02 : f32
    %547 = vector.broadcast %cst_415 : f32 to vector<1x128xf32>
    %548 = arith.mulf %542, %547 : vector<1x128xf32>
    %cst_416 = arith.constant 3.125000e-02 : f32
    %549 = vector.broadcast %cst_416 : f32 to vector<1x128xf32>
    %550 = arith.mulf %546, %549 : vector<1x128xf32>
    %551 = arith.mulf %548, %548 : vector<1x128xf32>
    %552 = arith.subf %550, %551 : vector<1x128xf32>
    %cst_417 = arith.constant 0.000000e+00 : f32
    %553 = vector.broadcast %cst_417 : f32 to vector<1x128xf32>
    %554 = arith.maximumf %552, %553 : vector<1x128xf32>
    %cst_418 = arith.constant 9.99999974E-6 : f32
    %555 = vector.broadcast %cst_418 : f32 to vector<1x128xf32>
    %556 = arith.addf %554, %555 : vector<1x128xf32>
    %557 = math.rsqrt %556 : vector<1x128xf32>
    %558 = arith.mulf %526, %557 : vector<1x128xf32>
    %559 = arith.mulf %548, %558 : vector<1x128xf32>
    %560 = arith.subf %528, %559 : vector<1x128xf32>
    %561 = vector.broadcast %558 : vector<1x128xf32> to vector<8x128xf32>
    %562 = arith.mulf %539, %561 : vector<8x128xf32>
    %563 = vector.broadcast %560 : vector<1x128xf32> to vector<8x128xf32>
    %564 = arith.addf %562, %563 : vector<8x128xf32>
    %cst_419 = arith.constant 0.000000e+00 : f32
    %565 = vector.broadcast %cst_419 : f32 to vector<8x128xf32>
    %566 = arith.cmpf oge, %564, %565 : vector<8x128xf32>
    %cst_420 = arith.constant 1.000000e-01 : f32
    %567 = vector.broadcast %cst_420 : f32 to vector<8x128xf32>
    %568 = arith.mulf %567, %564 : vector<8x128xf32>
    %569 = arith.select %566, %564, %568 : vector<8x128xi1>, vector<8x128xf32>
    %570 = vector.shape_cast %569 : vector<8x128xf32> to vector<2x4x128xf32>
    %c0_421 = arith.constant 0 : index
    %c1_422 = arith.constant 1 : index
    %c0_423 = arith.constant 0 : index
    %571 = vector.load %arg11[%c0_421, %c1_422, %c0_423] : memref<2x6x128xf32, #tpu.memory_space<vmem>>, vector<2x4x128xf32>
    tpu.vector_store %arg11[%c0_421, %c1_422, %c0_423], %570 {strides = array<i32>} : memref<2x6x128xf32, #tpu.memory_space<vmem>>, vector<2x4x128xf32>,
    %c11 = arith.constant 11 : index
    %c0_424 = arith.constant 0 : index
    %c0_425 = arith.constant 0 : index
    %572 = vector.load %arg1[%c11, %c0_424, %c0_425] : memref<15x384x128xbf16, #tpu.memory_space<vmem>>, vector<1x384x128xbf16>
    %573 = vector.shape_cast %572 : vector<1x384x128xbf16> to vector<384x128xbf16>
    %c11_426 = arith.constant 11 : index
    %c0_427 = arith.constant 0 : index
    %c0_428 = arith.constant 0 : index
    %574 = vector.load %arg2[%c11_426, %c0_427, %c0_428] : memref<15x1x128xf32, #tpu.memory_space<vmem>>, vector<1x1x128xf32>
    %575 = vector.shape_cast %574 : vector<1x1x128xf32> to vector<1x128xf32>
    %c11_429 = arith.constant 11 : index
    %c0_430 = arith.constant 0 : index
    %c0_431 = arith.constant 0 : index
    %576 = vector.load %arg3[%c11_429, %c0_430, %c0_431] : memref<15x1x128xf32, #tpu.memory_space<vmem>>, vector<1x1x128xf32>
    %577 = vector.shape_cast %576 : vector<1x1x128xf32> to vector<1x128xf32>
    %c11_432 = arith.constant 11 : index
    %c0_433 = arith.constant 0 : index
    %c0_434 = arith.constant 0 : index
    %578 = vector.load %arg4[%c11_432, %c0_433, %c0_434] : memref<15x1x128xf32, #tpu.memory_space<vmem>>, vector<1x1x128xf32>
    %579 = vector.shape_cast %578 : vector<1x1x128xf32> to vector<1x128xf32>
    %c3_435 = arith.constant 3 : index
    %c0_436 = arith.constant 0 : index
    %c0_437 = arith.constant 0 : index
    %580 = vector.load %arg5[%c3_435, %c0_436, %c0_437] : memref<4x128x128xf32, #tpu.memory_space<vmem>>, vector<1x128x128xf32>
    %581 = vector.shape_cast %580 : vector<1x128x128xf32> to vector<128x128xf32>
    %c0_438 = arith.constant 0 : index
    %c0_439 = arith.constant 0 : index
    %c0_440 = arith.constant 0 : index
    %582 = tpu.strided_load %arg11[%c0_438, %c0_439, %c0_440] {strides = array<i32: 1, 2, 1>} : memref<2x6x128xf32, #tpu.memory_space<vmem>>, vector<2x3x128xf32>
    %c0_441 = arith.constant 0 : index
    %c1_442 = arith.constant 1 : index
    %c0_443 = arith.constant 0 : index
    %583 = tpu.strided_load %arg11[%c0_441, %c1_442, %c0_443] {strides = array<i32: 1, 2, 1>} : memref<2x6x128xf32, #tpu.memory_space<vmem>>, vector<2x2x128xf32>
    %584 = vector.extract_strided_slice %582 {offsets = [0, 0, 0], sizes = [2, 2, 128], strides = [1, 1, 1]} : vector<2x3x128xf32> to vector<2x2x128xf32>
    %585 = vector.extract_strided_slice %582 {offsets = [0, 1, 0], sizes = [2, 2, 128], strides = [1, 1, 1]} : vector<2x3x128xf32> to vector<2x2x128xf32>
    %586 = tpu.concatenate %584, %583, %585 in 2 : vector<2x2x128xf32>, vector<2x2x128xf32>, vector<2x2x128xf32> -> vector<2x2x384xf32>
    %587 = vector.shape_cast %586 : vector<2x2x384xf32> to vector<4x384xf32>
    %588 = arith.truncf %587 : vector<4x384xf32> to vector<4x384xbf16>
    %cst_444 = arith.constant dense<0.000000e+00> : vector<4x128xf32>
    %589 = tpu.matmul %588, %573, %cst_444 {dimension_numbers = #tpu.dot_dimension_numbers<[1], [0], [0], [1], [0, 0, 1, 1], [], []>} : vector<4x384xbf16>, vector<384x128xbf16>, vector<4x128xf32> -> vector<4x128xf32>
    %590 = vector.broadcast %575 : vector<1x128xf32> to vector<4x128xf32>
    %591 = arith.addf %589, %590 : vector<4x128xf32>
    %cst_445 = arith.constant dense<0.000000e+00> : vector<128xf32>
    %592 = vector.multi_reduction <add>, %591, %cst_445 [0] : vector<4x128xf32> to vector<128xf32>
    %593 = vector.shape_cast %592 : vector<128xf32> to vector<1x128xf32>
    %cst_446 = arith.constant dense<0.000000e+00> : vector<1x128xf32>
    %594 = tpu.matmul %593, %581, %cst_446 {dimension_numbers = #tpu.dot_dimension_numbers<[1], [0], [0], [1], [0, 0, 1, 1], [], []>} : vector<1x128xf32>, vector<128x128xf32>, vector<1x128xf32> -> vector<1x128xf32>
    %595 = arith.mulf %591, %591 : vector<4x128xf32>
    %cst_447 = arith.constant dense<0.000000e+00> : vector<128xf32>
    %596 = vector.multi_reduction <add>, %595, %cst_447 [0] : vector<4x128xf32> to vector<128xf32>
    %597 = vector.shape_cast %596 : vector<128xf32> to vector<1x128xf32>
    %cst_448 = arith.constant dense<0.000000e+00> : vector<1x128xf32>
    %598 = tpu.matmul %597, %581, %cst_448 {dimension_numbers = #tpu.dot_dimension_numbers<[1], [0], [0], [1], [0, 0, 1, 1], [], []>} : vector<1x128xf32>, vector<128x128xf32>, vector<1x128xf32> -> vector<1x128xf32>
    %cst_449 = arith.constant 1.250000e-01 : f32
    %599 = vector.broadcast %cst_449 : f32 to vector<1x128xf32>
    %600 = arith.mulf %594, %599 : vector<1x128xf32>
    %cst_450 = arith.constant 1.250000e-01 : f32
    %601 = vector.broadcast %cst_450 : f32 to vector<1x128xf32>
    %602 = arith.mulf %598, %601 : vector<1x128xf32>
    %603 = arith.mulf %600, %600 : vector<1x128xf32>
    %604 = arith.subf %602, %603 : vector<1x128xf32>
    %cst_451 = arith.constant 0.000000e+00 : f32
    %605 = vector.broadcast %cst_451 : f32 to vector<1x128xf32>
    %606 = arith.maximumf %604, %605 : vector<1x128xf32>
    %cst_452 = arith.constant 9.99999974E-6 : f32
    %607 = vector.broadcast %cst_452 : f32 to vector<1x128xf32>
    %608 = arith.addf %606, %607 : vector<1x128xf32>
    %609 = math.rsqrt %608 : vector<1x128xf32>
    %610 = arith.mulf %577, %609 : vector<1x128xf32>
    %611 = arith.mulf %600, %610 : vector<1x128xf32>
    %612 = arith.subf %579, %611 : vector<1x128xf32>
    %613 = vector.broadcast %610 : vector<1x128xf32> to vector<4x128xf32>
    %614 = arith.mulf %591, %613 : vector<4x128xf32>
    %615 = vector.broadcast %612 : vector<1x128xf32> to vector<4x128xf32>
    %616 = arith.addf %614, %615 : vector<4x128xf32>
    %cst_453 = arith.constant 0.000000e+00 : f32
    %617 = vector.broadcast %cst_453 : f32 to vector<4x128xf32>
    %618 = arith.cmpf oge, %616, %617 : vector<4x128xf32>
    %cst_454 = arith.constant 1.000000e-01 : f32
    %619 = vector.broadcast %cst_454 : f32 to vector<4x128xf32>
    %620 = arith.mulf %619, %616 : vector<4x128xf32>
    %621 = arith.select %618, %616, %620 : vector<4x128xi1>, vector<4x128xf32>
    %622 = vector.shape_cast %621 : vector<4x128xf32> to vector<2x2x128xf32>
    %c0_455 = arith.constant 0 : index
    %c1_456 = arith.constant 1 : index
    %c0_457 = arith.constant 0 : index
    %623 = vector.load %arg12[%c0_455, %c1_456, %c0_457] : memref<2x4x128xf32, #tpu.memory_space<vmem>>, vector<2x2x128xf32>
    tpu.vector_store %arg12[%c0_455, %c1_456, %c0_457], %622 {strides = array<i32>} : memref<2x4x128xf32, #tpu.memory_space<vmem>>, vector<2x2x128xf32>,
    %c12 = arith.constant 12 : index
    %c0_458 = arith.constant 0 : index
    %c0_459 = arith.constant 0 : index
    %624 = vector.load %arg1[%c12, %c0_458, %c0_459] : memref<15x384x128xbf16, #tpu.memory_space<vmem>>, vector<1x384x128xbf16>
    %625 = vector.shape_cast %624 : vector<1x384x128xbf16> to vector<384x128xbf16>
    %c12_460 = arith.constant 12 : index
    %c0_461 = arith.constant 0 : index
    %c0_462 = arith.constant 0 : index
    %626 = vector.load %arg2[%c12_460, %c0_461, %c0_462] : memref<15x1x128xf32, #tpu.memory_space<vmem>>, vector<1x1x128xf32>
    %627 = vector.shape_cast %626 : vector<1x1x128xf32> to vector<1x128xf32>
    %c12_463 = arith.constant 12 : index
    %c0_464 = arith.constant 0 : index
    %c0_465 = arith.constant 0 : index
    %628 = vector.load %arg3[%c12_463, %c0_464, %c0_465] : memref<15x1x128xf32, #tpu.memory_space<vmem>>, vector<1x1x128xf32>
    %629 = vector.shape_cast %628 : vector<1x1x128xf32> to vector<1x128xf32>
    %c12_466 = arith.constant 12 : index
    %c0_467 = arith.constant 0 : index
    %c0_468 = arith.constant 0 : index
    %630 = vector.load %arg4[%c12_466, %c0_467, %c0_468] : memref<15x1x128xf32, #tpu.memory_space<vmem>>, vector<1x1x128xf32>
    %631 = vector.shape_cast %630 : vector<1x1x128xf32> to vector<1x128xf32>
    %c3_469 = arith.constant 3 : index
    %c0_470 = arith.constant 0 : index
    %c0_471 = arith.constant 0 : index
    %632 = vector.load %arg5[%c3_469, %c0_470, %c0_471] : memref<4x128x128xf32, #tpu.memory_space<vmem>>, vector<1x128x128xf32>
    %633 = vector.shape_cast %632 : vector<1x128x128xf32> to vector<128x128xf32>
    %c0_472 = arith.constant 0 : index
    %c0_473 = arith.constant 0 : index
    %c0_474 = arith.constant 0 : index
    %634 = vector.load %arg12[%c0_472, %c0_473, %c0_474] : memref<2x4x128xf32, #tpu.memory_space<vmem>>, vector<2x2x128xf32>
    %c0_475 = arith.constant 0 : index
    %c1_476 = arith.constant 1 : index
    %c0_477 = arith.constant 0 : index
    %635 = vector.load %arg12[%c0_475, %c1_476, %c0_477] : memref<2x4x128xf32, #tpu.memory_space<vmem>>, vector<2x2x128xf32>
    %c0_478 = arith.constant 0 : index
    %c2_479 = arith.constant 2 : index
    %c0_480 = arith.constant 0 : index
    %636 = vector.load %arg12[%c0_478, %c2_479, %c0_480] : memref<2x4x128xf32, #tpu.memory_space<vmem>>, vector<2x2x128xf32>
    %637 = tpu.concatenate %634, %635, %636 in 2 : vector<2x2x128xf32>, vector<2x2x128xf32>, vector<2x2x128xf32> -> vector<2x2x384xf32>
    %638 = vector.shape_cast %637 : vector<2x2x384xf32> to vector<4x384xf32>
    %639 = arith.truncf %638 : vector<4x384xf32> to vector<4x384xbf16>
    %cst_481 = arith.constant dense<0.000000e+00> : vector<4x128xf32>
    %640 = tpu.matmul %639, %625, %cst_481 {dimension_numbers = #tpu.dot_dimension_numbers<[1], [0], [0], [1], [0, 0, 1, 1], [], []>} : vector<4x384xbf16>, vector<384x128xbf16>, vector<4x128xf32> -> vector<4x128xf32>
    %641 = vector.broadcast %627 : vector<1x128xf32> to vector<4x128xf32>
    %642 = arith.addf %640, %641 : vector<4x128xf32>
    %cst_482 = arith.constant dense<0.000000e+00> : vector<128xf32>
    %643 = vector.multi_reduction <add>, %642, %cst_482 [0] : vector<4x128xf32> to vector<128xf32>
    %644 = vector.shape_cast %643 : vector<128xf32> to vector<1x128xf32>
    %cst_483 = arith.constant dense<0.000000e+00> : vector<1x128xf32>
    %645 = tpu.matmul %644, %633, %cst_483 {dimension_numbers = #tpu.dot_dimension_numbers<[1], [0], [0], [1], [0, 0, 1, 1], [], []>} : vector<1x128xf32>, vector<128x128xf32>, vector<1x128xf32> -> vector<1x128xf32>
    %646 = arith.mulf %642, %642 : vector<4x128xf32>
    %cst_484 = arith.constant dense<0.000000e+00> : vector<128xf32>
    %647 = vector.multi_reduction <add>, %646, %cst_484 [0] : vector<4x128xf32> to vector<128xf32>
    %648 = vector.shape_cast %647 : vector<128xf32> to vector<1x128xf32>
    %cst_485 = arith.constant dense<0.000000e+00> : vector<1x128xf32>
    %649 = tpu.matmul %648, %633, %cst_485 {dimension_numbers = #tpu.dot_dimension_numbers<[1], [0], [0], [1], [0, 0, 1, 1], [], []>} : vector<1x128xf32>, vector<128x128xf32>, vector<1x128xf32> -> vector<1x128xf32>
    %cst_486 = arith.constant 1.250000e-01 : f32
    %650 = vector.broadcast %cst_486 : f32 to vector<1x128xf32>
    %651 = arith.mulf %645, %650 : vector<1x128xf32>
    %cst_487 = arith.constant 1.250000e-01 : f32
    %652 = vector.broadcast %cst_487 : f32 to vector<1x128xf32>
    %653 = arith.mulf %649, %652 : vector<1x128xf32>
    %654 = arith.mulf %651, %651 : vector<1x128xf32>
    %655 = arith.subf %653, %654 : vector<1x128xf32>
    %cst_488 = arith.constant 0.000000e+00 : f32
    %656 = vector.broadcast %cst_488 : f32 to vector<1x128xf32>
    %657 = arith.maximumf %655, %656 : vector<1x128xf32>
    %cst_489 = arith.constant 9.99999974E-6 : f32
    %658 = vector.broadcast %cst_489 : f32 to vector<1x128xf32>
    %659 = arith.addf %657, %658 : vector<1x128xf32>
    %660 = math.rsqrt %659 : vector<1x128xf32>
    %661 = arith.mulf %629, %660 : vector<1x128xf32>
    %662 = arith.mulf %651, %661 : vector<1x128xf32>
    %663 = arith.subf %631, %662 : vector<1x128xf32>
    %664 = vector.broadcast %661 : vector<1x128xf32> to vector<4x128xf32>
    %665 = arith.mulf %642, %664 : vector<4x128xf32>
    %666 = vector.broadcast %663 : vector<1x128xf32> to vector<4x128xf32>
    %667 = arith.addf %665, %666 : vector<4x128xf32>
    %cst_490 = arith.constant 0.000000e+00 : f32
    %668 = vector.broadcast %cst_490 : f32 to vector<4x128xf32>
    %669 = arith.cmpf oge, %667, %668 : vector<4x128xf32>
    %cst_491 = arith.constant 1.000000e-01 : f32
    %670 = vector.broadcast %cst_491 : f32 to vector<4x128xf32>
    %671 = arith.mulf %670, %667 : vector<4x128xf32>
    %672 = arith.select %669, %667, %671 : vector<4x128xi1>, vector<4x128xf32>
    %673 = vector.shape_cast %672 : vector<4x128xf32> to vector<2x2x128xf32>
    %c0_492 = arith.constant 0 : index
    %c1_493 = arith.constant 1 : index
    %c0_494 = arith.constant 0 : index
    %674 = vector.load %arg12[%c0_492, %c1_493, %c0_494] : memref<2x4x128xf32, #tpu.memory_space<vmem>>, vector<2x2x128xf32>
    tpu.vector_store %arg12[%c0_492, %c1_493, %c0_494], %673 {strides = array<i32>} : memref<2x4x128xf32, #tpu.memory_space<vmem>>, vector<2x2x128xf32>,
    %c13 = arith.constant 13 : index
    %c0_495 = arith.constant 0 : index
    %c0_496 = arith.constant 0 : index
    %675 = vector.load %arg1[%c13, %c0_495, %c0_496] : memref<15x384x128xbf16, #tpu.memory_space<vmem>>, vector<1x384x128xbf16>
    %676 = vector.shape_cast %675 : vector<1x384x128xbf16> to vector<384x128xbf16>
    %c13_497 = arith.constant 13 : index
    %c0_498 = arith.constant 0 : index
    %c0_499 = arith.constant 0 : index
    %677 = vector.load %arg2[%c13_497, %c0_498, %c0_499] : memref<15x1x128xf32, #tpu.memory_space<vmem>>, vector<1x1x128xf32>
    %678 = vector.shape_cast %677 : vector<1x1x128xf32> to vector<1x128xf32>
    %c13_500 = arith.constant 13 : index
    %c0_501 = arith.constant 0 : index
    %c0_502 = arith.constant 0 : index
    %679 = vector.load %arg3[%c13_500, %c0_501, %c0_502] : memref<15x1x128xf32, #tpu.memory_space<vmem>>, vector<1x1x128xf32>
    %680 = vector.shape_cast %679 : vector<1x1x128xf32> to vector<1x128xf32>
    %c13_503 = arith.constant 13 : index
    %c0_504 = arith.constant 0 : index
    %c0_505 = arith.constant 0 : index
    %681 = vector.load %arg4[%c13_503, %c0_504, %c0_505] : memref<15x1x128xf32, #tpu.memory_space<vmem>>, vector<1x1x128xf32>
    %682 = vector.shape_cast %681 : vector<1x1x128xf32> to vector<1x128xf32>
    %c3_506 = arith.constant 3 : index
    %c0_507 = arith.constant 0 : index
    %c0_508 = arith.constant 0 : index
    %683 = vector.load %arg5[%c3_506, %c0_507, %c0_508] : memref<4x128x128xf32, #tpu.memory_space<vmem>>, vector<1x128x128xf32>
    %684 = vector.shape_cast %683 : vector<1x128x128xf32> to vector<128x128xf32>
    %c0_509 = arith.constant 0 : index
    %c0_510 = arith.constant 0 : index
    %c0_511 = arith.constant 0 : index
    %685 = vector.load %arg12[%c0_509, %c0_510, %c0_511] : memref<2x4x128xf32, #tpu.memory_space<vmem>>, vector<2x2x128xf32>
    %c0_512 = arith.constant 0 : index
    %c1_513 = arith.constant 1 : index
    %c0_514 = arith.constant 0 : index
    %686 = vector.load %arg12[%c0_512, %c1_513, %c0_514] : memref<2x4x128xf32, #tpu.memory_space<vmem>>, vector<2x2x128xf32>
    %c0_515 = arith.constant 0 : index
    %c2_516 = arith.constant 2 : index
    %c0_517 = arith.constant 0 : index
    %687 = vector.load %arg12[%c0_515, %c2_516, %c0_517] : memref<2x4x128xf32, #tpu.memory_space<vmem>>, vector<2x2x128xf32>
    %688 = tpu.concatenate %685, %686, %687 in 2 : vector<2x2x128xf32>, vector<2x2x128xf32>, vector<2x2x128xf32> -> vector<2x2x384xf32>
    %689 = vector.shape_cast %688 : vector<2x2x384xf32> to vector<4x384xf32>
    %690 = arith.truncf %689 : vector<4x384xf32> to vector<4x384xbf16>
    %cst_518 = arith.constant dense<0.000000e+00> : vector<4x128xf32>
    %691 = tpu.matmul %690, %676, %cst_518 {dimension_numbers = #tpu.dot_dimension_numbers<[1], [0], [0], [1], [0, 0, 1, 1], [], []>} : vector<4x384xbf16>, vector<384x128xbf16>, vector<4x128xf32> -> vector<4x128xf32>
    %692 = vector.broadcast %678 : vector<1x128xf32> to vector<4x128xf32>
    %693 = arith.addf %691, %692 : vector<4x128xf32>
    %cst_519 = arith.constant dense<0.000000e+00> : vector<128xf32>
    %694 = vector.multi_reduction <add>, %693, %cst_519 [0] : vector<4x128xf32> to vector<128xf32>
    %695 = vector.shape_cast %694 : vector<128xf32> to vector<1x128xf32>
    %cst_520 = arith.constant dense<0.000000e+00> : vector<1x128xf32>
    %696 = tpu.matmul %695, %684, %cst_520 {dimension_numbers = #tpu.dot_dimension_numbers<[1], [0], [0], [1], [0, 0, 1, 1], [], []>} : vector<1x128xf32>, vector<128x128xf32>, vector<1x128xf32> -> vector<1x128xf32>
    %697 = arith.mulf %693, %693 : vector<4x128xf32>
    %cst_521 = arith.constant dense<0.000000e+00> : vector<128xf32>
    %698 = vector.multi_reduction <add>, %697, %cst_521 [0] : vector<4x128xf32> to vector<128xf32>
    %699 = vector.shape_cast %698 : vector<128xf32> to vector<1x128xf32>
    %cst_522 = arith.constant dense<0.000000e+00> : vector<1x128xf32>
    %700 = tpu.matmul %699, %684, %cst_522 {dimension_numbers = #tpu.dot_dimension_numbers<[1], [0], [0], [1], [0, 0, 1, 1], [], []>} : vector<1x128xf32>, vector<128x128xf32>, vector<1x128xf32> -> vector<1x128xf32>
    %cst_523 = arith.constant 1.250000e-01 : f32
    %701 = vector.broadcast %cst_523 : f32 to vector<1x128xf32>
    %702 = arith.mulf %696, %701 : vector<1x128xf32>
    %cst_524 = arith.constant 1.250000e-01 : f32
    %703 = vector.broadcast %cst_524 : f32 to vector<1x128xf32>
    %704 = arith.mulf %700, %703 : vector<1x128xf32>
    %705 = arith.mulf %702, %702 : vector<1x128xf32>
    %706 = arith.subf %704, %705 : vector<1x128xf32>
    %cst_525 = arith.constant 0.000000e+00 : f32
    %707 = vector.broadcast %cst_525 : f32 to vector<1x128xf32>
    %708 = arith.maximumf %706, %707 : vector<1x128xf32>
    %cst_526 = arith.constant 9.99999974E-6 : f32
    %709 = vector.broadcast %cst_526 : f32 to vector<1x128xf32>
    %710 = arith.addf %708, %709 : vector<1x128xf32>
    %711 = math.rsqrt %710 : vector<1x128xf32>
    %712 = arith.mulf %680, %711 : vector<1x128xf32>
    %713 = arith.mulf %702, %712 : vector<1x128xf32>
    %714 = arith.subf %682, %713 : vector<1x128xf32>
    %715 = vector.broadcast %712 : vector<1x128xf32> to vector<4x128xf32>
    %716 = arith.mulf %693, %715 : vector<4x128xf32>
    %717 = vector.broadcast %714 : vector<1x128xf32> to vector<4x128xf32>
    %718 = arith.addf %716, %717 : vector<4x128xf32>
    %cst_527 = arith.constant 0.000000e+00 : f32
    %719 = vector.broadcast %cst_527 : f32 to vector<4x128xf32>
    %720 = arith.cmpf oge, %718, %719 : vector<4x128xf32>
    %cst_528 = arith.constant 1.000000e-01 : f32
    %721 = vector.broadcast %cst_528 : f32 to vector<4x128xf32>
    %722 = arith.mulf %721, %718 : vector<4x128xf32>
    %723 = arith.select %720, %718, %722 : vector<4x128xi1>, vector<4x128xf32>
    %724 = vector.shape_cast %723 : vector<4x128xf32> to vector<2x2x128xf32>
    %c0_529 = arith.constant 0 : index
    %c1_530 = arith.constant 1 : index
    %c0_531 = arith.constant 0 : index
    %725 = vector.load %arg12[%c0_529, %c1_530, %c0_531] : memref<2x4x128xf32, #tpu.memory_space<vmem>>, vector<2x2x128xf32>
    tpu.vector_store %arg12[%c0_529, %c1_530, %c0_531], %724 {strides = array<i32>} : memref<2x4x128xf32, #tpu.memory_space<vmem>>, vector<2x2x128xf32>,
    %c14 = arith.constant 14 : index
    %c0_532 = arith.constant 0 : index
    %c0_533 = arith.constant 0 : index
    %726 = vector.load %arg1[%c14, %c0_532, %c0_533] : memref<15x384x128xbf16, #tpu.memory_space<vmem>>, vector<1x384x128xbf16>
    %727 = vector.shape_cast %726 : vector<1x384x128xbf16> to vector<384x128xbf16>
    %c14_534 = arith.constant 14 : index
    %c0_535 = arith.constant 0 : index
    %c0_536 = arith.constant 0 : index
    %728 = vector.load %arg2[%c14_534, %c0_535, %c0_536] : memref<15x1x128xf32, #tpu.memory_space<vmem>>, vector<1x1x128xf32>
    %729 = vector.shape_cast %728 : vector<1x1x128xf32> to vector<1x128xf32>
    %c14_537 = arith.constant 14 : index
    %c0_538 = arith.constant 0 : index
    %c0_539 = arith.constant 0 : index
    %730 = vector.load %arg3[%c14_537, %c0_538, %c0_539] : memref<15x1x128xf32, #tpu.memory_space<vmem>>, vector<1x1x128xf32>
    %731 = vector.shape_cast %730 : vector<1x1x128xf32> to vector<1x128xf32>
    %c14_540 = arith.constant 14 : index
    %c0_541 = arith.constant 0 : index
    %c0_542 = arith.constant 0 : index
    %732 = vector.load %arg4[%c14_540, %c0_541, %c0_542] : memref<15x1x128xf32, #tpu.memory_space<vmem>>, vector<1x1x128xf32>
    %733 = vector.shape_cast %732 : vector<1x1x128xf32> to vector<1x128xf32>
    %c3_543 = arith.constant 3 : index
    %c0_544 = arith.constant 0 : index
    %c0_545 = arith.constant 0 : index
    %734 = vector.load %arg5[%c3_543, %c0_544, %c0_545] : memref<4x128x128xf32, #tpu.memory_space<vmem>>, vector<1x128x128xf32>
    %735 = vector.shape_cast %734 : vector<1x128x128xf32> to vector<128x128xf32>
    %c0_546 = arith.constant 0 : index
    %c0_547 = arith.constant 0 : index
    %c0_548 = arith.constant 0 : index
    %736 = vector.load %arg12[%c0_546, %c0_547, %c0_548] : memref<2x4x128xf32, #tpu.memory_space<vmem>>, vector<2x2x128xf32>
    %c0_549 = arith.constant 0 : index
    %c1_550 = arith.constant 1 : index
    %c0_551 = arith.constant 0 : index
    %737 = vector.load %arg12[%c0_549, %c1_550, %c0_551] : memref<2x4x128xf32, #tpu.memory_space<vmem>>, vector<2x2x128xf32>
    %c0_552 = arith.constant 0 : index
    %c2_553 = arith.constant 2 : index
    %c0_554 = arith.constant 0 : index
    %738 = vector.load %arg12[%c0_552, %c2_553, %c0_554] : memref<2x4x128xf32, #tpu.memory_space<vmem>>, vector<2x2x128xf32>
    %739 = tpu.concatenate %736, %737, %738 in 2 : vector<2x2x128xf32>, vector<2x2x128xf32>, vector<2x2x128xf32> -> vector<2x2x384xf32>
    %740 = vector.shape_cast %739 : vector<2x2x384xf32> to vector<4x384xf32>
    %741 = arith.truncf %740 : vector<4x384xf32> to vector<4x384xbf16>
    %cst_555 = arith.constant dense<0.000000e+00> : vector<4x128xf32>
    %742 = tpu.matmul %741, %727, %cst_555 {dimension_numbers = #tpu.dot_dimension_numbers<[1], [0], [0], [1], [0, 0, 1, 1], [], []>} : vector<4x384xbf16>, vector<384x128xbf16>, vector<4x128xf32> -> vector<4x128xf32>
    %743 = vector.broadcast %729 : vector<1x128xf32> to vector<4x128xf32>
    %744 = arith.addf %742, %743 : vector<4x128xf32>
    %cst_556 = arith.constant dense<0.000000e+00> : vector<128xf32>
    %745 = vector.multi_reduction <add>, %744, %cst_556 [0] : vector<4x128xf32> to vector<128xf32>
    %746 = vector.shape_cast %745 : vector<128xf32> to vector<1x128xf32>
    %cst_557 = arith.constant dense<0.000000e+00> : vector<1x128xf32>
    %747 = tpu.matmul %746, %735, %cst_557 {dimension_numbers = #tpu.dot_dimension_numbers<[1], [0], [0], [1], [0, 0, 1, 1], [], []>} : vector<1x128xf32>, vector<128x128xf32>, vector<1x128xf32> -> vector<1x128xf32>
    %748 = arith.mulf %744, %744 : vector<4x128xf32>
    %cst_558 = arith.constant dense<0.000000e+00> : vector<128xf32>
    %749 = vector.multi_reduction <add>, %748, %cst_558 [0] : vector<4x128xf32> to vector<128xf32>
    %750 = vector.shape_cast %749 : vector<128xf32> to vector<1x128xf32>
    %cst_559 = arith.constant dense<0.000000e+00> : vector<1x128xf32>
    %751 = tpu.matmul %750, %735, %cst_559 {dimension_numbers = #tpu.dot_dimension_numbers<[1], [0], [0], [1], [0, 0, 1, 1], [], []>} : vector<1x128xf32>, vector<128x128xf32>, vector<1x128xf32> -> vector<1x128xf32>
    %cst_560 = arith.constant 1.250000e-01 : f32
    %752 = vector.broadcast %cst_560 : f32 to vector<1x128xf32>
    %753 = arith.mulf %747, %752 : vector<1x128xf32>
    %cst_561 = arith.constant 1.250000e-01 : f32
    %754 = vector.broadcast %cst_561 : f32 to vector<1x128xf32>
    %755 = arith.mulf %751, %754 : vector<1x128xf32>
    %756 = arith.mulf %753, %753 : vector<1x128xf32>
    %757 = arith.subf %755, %756 : vector<1x128xf32>
    %cst_562 = arith.constant 0.000000e+00 : f32
    %758 = vector.broadcast %cst_562 : f32 to vector<1x128xf32>
    %759 = arith.maximumf %757, %758 : vector<1x128xf32>
    %cst_563 = arith.constant 9.99999974E-6 : f32
    %760 = vector.broadcast %cst_563 : f32 to vector<1x128xf32>
    %761 = arith.addf %759, %760 : vector<1x128xf32>
    %762 = math.rsqrt %761 : vector<1x128xf32>
    %763 = arith.mulf %731, %762 : vector<1x128xf32>
    %764 = arith.mulf %753, %763 : vector<1x128xf32>
    %765 = arith.subf %733, %764 : vector<1x128xf32>
    %766 = vector.broadcast %763 : vector<1x128xf32> to vector<4x128xf32>
    %767 = arith.mulf %744, %766 : vector<4x128xf32>
    %768 = vector.broadcast %765 : vector<1x128xf32> to vector<4x128xf32>
    %769 = arith.addf %767, %768 : vector<4x128xf32>
    %cst_564 = arith.constant 0.000000e+00 : f32
    %770 = vector.broadcast %cst_564 : f32 to vector<4x128xf32>
    %771 = arith.cmpf oge, %769, %770 : vector<4x128xf32>
    %cst_565 = arith.constant 1.000000e-01 : f32
    %772 = vector.broadcast %cst_565 : f32 to vector<4x128xf32>
    %773 = arith.mulf %772, %769 : vector<4x128xf32>
    %774 = arith.select %771, %769, %773 : vector<4x128xi1>, vector<4x128xf32>
    %775 = vector.extract_strided_slice %774 {offsets = [0, 0], sizes = [4, 64], strides = [1, 1]} : vector<4x128xf32> to vector<4x64xf32>
    %776 = vector.extract_strided_slice %774 {offsets = [0, 64], sizes = [4, 64], strides = [1, 1]} : vector<4x128xf32> to vector<4x64xf32>
    %777 = arith.maximumf %775, %776 : vector<4x64xf32>
    %778 = vector.shape_cast %777 : vector<4x64xf32> to vector<2x2x64xf32>
    %cst_566 = arith.constant dense<0xFF800000> : vector<2x64xf32>
    %779 = vector.multi_reduction <maximumf>, %778, %cst_566 [1] : vector<2x2x64xf32> to vector<2x64xf32>
    %c0_567 = arith.constant 0 : index
    %c0_568 = arith.constant 0 : index
    %780 = vector.load %arg6[%c0_567, %c0_568] : memref<64x2xf32, #tpu.memory_space<vmem>>, vector<64x2xf32>
    %cst_569 = arith.constant dense<0.000000e+00> : vector<2x2xf32>
    %781 = tpu.matmul %779, %780, %cst_569 {dimension_numbers = #tpu.dot_dimension_numbers<[1], [0], [0], [1], [0, 0, 1, 1], [], []>} : vector<2x64xf32>, vector<64x2xf32>, vector<2x2xf32> -> vector<2x2xf32>
    %c0_570 = arith.constant 0 : index
    %c0_571 = arith.constant 0 : index
    %782 = vector.load %arg7[%c0_570, %c0_571] : memref<1x2xf32, #tpu.memory_space<vmem>>, vector<1x2xf32>
    %783 = vector.broadcast %782 : vector<1x2xf32> to vector<2x2xf32>
    %784 = arith.addf %781, %783 : vector<2x2xf32>
    %c0_572 = arith.constant 0 : index
    %c0_573 = arith.constant 0 : index
    %785 = vector.load %arg8[%c0_572, %c0_573] : memref<2x2xf32, #tpu.memory_space<vmem>>, vector<2x2xf32>
    tpu.vector_store %arg8[%c0_572, %c0_573], %784 {strides = array<i32>} : memref<2x2xf32, #tpu.memory_space<vmem>>, vector<2x2xf32>,
    return
  }
}

</mosaic_0001>

<bundles_post_ra>
// kernel: tile.228
= control target key start
LH: loop header
LB: loop body
LE: loop exit
PB: predicated region body
PF: predicated region fallthrough
CT: control target
= control target key end

     0   :  { %2 = vsyncpa [#allocation1], 0  ;;  %s45_s6 = smov [#allocation0]   ;;  %s65_s0 = inlined_call_operand.hbm [shape: f32[8], index: 0, kind: input, shape index: {}]   ;;  %s66_s1 = inlined_call_operand.vmem [shape: f32[16,8], index: 1, kind: output, shape index: {}]  }
   0x1   :  { %s9_s7 = sshll.u32 %s45_s6, 4  ;;  %s10_s7 = int_to_ptr.vmem [resolvable:$true] %s9_s7 }
   0x2   :  { %s31_s8 = scalar_lea.vmem %s10_s7, 16  ;;  %s35_s9 = scalar_lea.vmem %s10_s7, 32 }
   0x3   :  { %p32_p0 = scmp.ne.s32.totalorder %s10_s7, %s31_s8  ;;  %p36_p1 = scmp.lt.s32.totalorder %s10_s7, %s10_s7 }
   0x4   :  { %p37_p2 = scmp.lt.s32.totalorder %s35_s9, %s31_s8 }
   0x6   :  { %p38_p3 = por %p37_p2, %p36_p1 }
   0x8   :  { %p39_p4 = pnand %p38_p3, %p32_p0 }
   0xa   :  { %42 = shalt.err (!%p39_p4)
}
   0xb   :  { %12 = dma.hbm_to_vmem [thread:$0]  %s65_s0, 16, %s10_s7, [#allocation1]  }
   0xc   :  { %43 = dma.done.wait [#allocation1], 16  }
   0xd   :  { %44 = vsyncadd [#allocation1], 4294967280  ;;  %v16_v0 = vld [vmem:[#allocation0] ss:$0 sm:$0xff] }
   0xe   :  { %17 = vst [vmem:[%s66_s1] sm:$0xff] %v16_v0  ;;  %21 = vst [vmem:[%s66_s1 + $0x8] sm:$0xff] %v16_v0 }
   0xf   :  { %20 = vsyncpa [#allocation1], 1 }

// kernel: tile.405
= control target key start
LH: loop header
LB: loop body
LE: loop exit
PB: predicated region body
PF: predicated region fallthrough
CT: control target
= control target key end

     0   :  { %s133_s10 = smov 120   ;;  %s134_s11 = smov 104   ;;  %vm3_vm0 = vcmask 64512   ;;  %vm9_vm1 = vcmask 1048512   ;;  %vm15_vm2 = vcmask 982912   ;;  %vm21_vm3 = vcmask 917312   ;;  %s209_s0 = inlined_call_operand.vmem [shape: f32[16,8], index: 0, kind: input, shape index: {}]   ;;  %s210_s1 = inlined_call_operand.vmem [shape: f32[1,1,128], index: 1, kind: output, shape index: {}]  }
   0x1   :  { %v103_v0 = vld [vmem:[%s209_s0 + $0xf] sm:$0x1]   ;;  %v105_v1 = vld [vmem:[%s209_s0 + $0xd] sm:$0x1]   ;;  %v104_v2 = vld [vmem:[%s209_s0 + $0xe] sm:$0x1]  }
   0x2   :  { %7 = vrot.lane.b32.xlu0 %v103_v0, %s133_s10  ;;  %19 = vrot.lane.b32.xlu1 %v105_v1, %s134_s11  ;;  %v106_v3 = vld [vmem:[%s209_s0 + $0xc] sm:$0x1]   ;;  %s135_s16 = smov 112   ;;  %s136_s17 = smov 96   ;;  %v107_v4 = vld [vmem:[%s209_s0 + $0xb] sm:$0x1]  }
   0x3   :  { %v108_v5 = vld [vmem:[%s209_s0 + $0xa] sm:$0x1]   ;;  %v2_v6 = vld [vmem:[%s209_s0] sm:$0x1]   ;;  %s137_s24 = smov 88   ;;  %s138_s25 = smov 80  }
   0x4   :  { %4 = vst.msk [vmem:[#allocation0] sm:$0x1] %vm3_vm0, %v2_v6   ;;  %v109_v7 = vld [vmem:[%s209_s0 + $0x9] sm:$0x1]   ;;  %v110_v8 = vld [vmem:[%s209_s0 + $0x8] sm:$0x1]  }
   0x5   :  { %s139_s30 = smov 72   ;;  %s140_s2 = smov 64   ;;  %v111_v9 = vld [vmem:[%s209_s0 + $0x7] sm:$0x1]   ;;  %v112_v10 = vld [vmem:[%s209_s0 + $0x6] sm:$0x1]  }
   0x6   :  { %13 = vrot.lane.b32.xlu0 %v104_v2, %s135_s16  ;;  %25 = vrot.lane.b32.xlu1 %v106_v3, %s136_s17  ;;  %s141_s7 = smov 56   ;;  %s142_s8 = smov 48   ;;  %v113_v11 = vld [vmem:[%s209_s0 + $0x5] sm:$0x1]   ;;  %v114_v12 = vld [vmem:[%s209_s0 + $0x4] sm:$0x1]  }
   0x7   :  { %s143_s13 = smov 40   ;;  %s144_s14 = smov 32   ;;  %v115_v13 = vld [vmem:[%s209_s0 + $0x3] sm:$0x1]   ;;  %v116_v14 = vld [vmem:[%s209_s0 + $0x2] sm:$0x1]  }
   0x8   :  { %s145_s19 = smov 24   ;;  %s146_s20 = smov 16   ;;  %v117_v15 = vld [vmem:[%s209_s0 + $0x1] sm:$0x1]   ;;  %vm27_vm4 = vcmask 851712   ;;  %vm33_vm5 = vcmask 786112  }
   0x9   :  { %s147_s0 = smov 8   ;;  %vm39_vm6 = vcmask 720512   ;;  %vm45_vm7 = vcmask 654912   ;;  %vm51_vm8 = vcmask 589312   ;;  %vm57_vm9 = vcmask 523712  }
   0xa   :  { %31 = vrot.lane.b32.xlu0 %v107_v4, %s137_s24  ;;  %37 = vrot.lane.b32.xlu1 %v108_v5, %s138_s25  ;;  %vm63_vm10 = vcmask 458112   ;;  %vm69_vm11 = vcmask 392512   ;;  %vm75_vm12 = vcmask 326912   ;;  %vm81_vm13 = vcmask 261312  }
   0xb   :  { %vm87_vm14 = vcmask 195712   ;;  %vm93_vm15 = vcmask 130112  }
   0xe   :  { %43 = vrot.lane.b32.xlu0 %v109_v7, %s139_s30  ;;  %49 = vrot.lane.b32.xlu1 %v110_v8, %s140_s2 }
  0x12   :  { %55 = vrot.lane.b32.xlu0 %v111_v9, %s141_s7  ;;  %61 = vrot.lane.b32.xlu1 %v112_v10, %s142_s8 }
  0x16   :  { %67 = vrot.lane.b32.xlu0 %v113_v11, %s143_s13  ;;  %73 = vrot.lane.b32.xlu1 %v114_v12, %s144_s14 }
  0x1a   :  { %79 = vrot.lane.b32.xlu0 %v115_v13, %s145_s19  ;;  %85 = vrot.lane.b32.xlu1 %v116_v14, %s146_s20 }
  0x1e   :  { %91 = vrot.lane.b32.xlu0 %v117_v15, %s147_s0 }
  0x74   :  { %v8_v16 = vpop.permute.xlu0 %7   ;;  %v20_v17 = vpop.permute.xlu1 %19  }
  0x75   :  { %10 = vst.msk [vmem:[#allocation0] sm:$0x1] %vm9_vm1, %v8_v16  }
  0x78   :  { %v14_v18 = vpop.permute.xlu0 %13   ;;  %v26_v19 = vpop.permute.xlu1 %25  }
  0x79   :  { %16 = vst.msk [vmem:[#allocation0] sm:$0x1] %vm15_vm2, %v14_v18  }
  0x7a   :  { %22 = vst.msk [vmem:[#allocation0] sm:$0x1] %vm21_vm3, %v20_v17  }
  0x7b   :  { %28 = vst.msk [vmem:[#allocation0] sm:$0x1] %vm27_vm4, %v26_v19  }
  0x7c   :  { %v32_v20 = vpop.permute.xlu0 %31   ;;  %v38_v21 = vpop.permute.xlu1 %37  }
  0x7d   :  { %34 = vst.msk [vmem:[#allocation0] sm:$0x1] %vm33_vm5, %v32_v20  }
  0x7e   :  { %40 = vst.msk [vmem:[#allocation0] sm:$0x1] %vm39_vm6, %v38_v21  }
  0x80   :  { %v44_v22 = vpop.permute.xlu0 %43   ;;  %v50_v23 = vpop.permute.xlu1 %49  }
  0x81   :  { %46 = vst.msk [vmem:[#allocation0] sm:$0x1] %vm45_vm7, %v44_v22  }
  0x82   :  { %52 = vst.msk [vmem:[#allocation0] sm:$0x1] %vm51_vm8, %v50_v23  }
  0x84   :  { %v56_v24 = vpop.permute.xlu0 %55   ;;  %v62_v25 = vpop.permute.xlu1 %61  }
  0x85   :  { %58 = vst.msk [vmem:[#allocation0] sm:$0x1] %vm57_vm9, %v56_v24  }
  0x86   :  { %64 = vst.msk [vmem:[#allocation0] sm:$0x1] %vm63_vm10, %v62_v25  }
  0x88   :  { %v68_v26 = vpop.permute.xlu0 %67   ;;  %v74_v27 = vpop.permute.xlu1 %73  }
  0x89   :  { %70 = vst.msk [vmem:[#allocation0] sm:$0x1] %vm69_vm11, %v68_v26  }
  0x8a   :  { %76 = vst.msk [vmem:[#allocation0] sm:$0x1] %vm75_vm12, %v74_v27  }
  0x8c   :  { %v80_v28 = vpop.permute.xlu0 %79   ;;  %v86_v29 = vpop.permute.xlu1 %85  }
  0x8d   :  { %82 = vst.msk [vmem:[#allocation0] sm:$0x1] %vm81_vm13, %v80_v28  }
  0x8e   :  { %88 = vst.msk [vmem:[#allocation0] sm:$0x1] %vm87_vm14, %v86_v29  }
  0x90   :  { %v92_v30 = vpop.permute.xlu0 %91  }
  0x91   :  { %94 = vst.msk [vmem:[#allocation0] sm:$0x1] %vm93_vm15, %v92_v30  }
  0x98   :  { %v99_v31 = vld [vmem:[#allocation0] sm:$0x1] }
  0x99   :  { %102 = vst [vmem:[%s210_s1] sm:$0x1] %v99_v31 }

// kernel: tile.264
= control target key start
LH: loop header
LB: loop body
LE: loop exit
PB: predicated region body
PF: predicated region fallthrough
CT: control target
= control target key end

     0   :  { %s22_s0 = inlined_call_operand.vmem [shape: f32[16], index: 0, kind: input, shape index: {}]   ;;  %s23_s1 = inlined_call_operand.vmem [shape: f32[8,16], index: 1, kind: output, shape index: {}]  }
   0x1   :  { %v4_v0 = vld [vmem:[%s22_s0] ss:$0 sm:$0xff] }
   0x2   :  { %5 = vst [vmem:[%s23_s1] sm:$0xff] %v4_v0 }

// kernel: tile.408
= control target key start
LH: loop header
LB: loop body
LE: loop exit
PB: predicated region body
PF: predicated region fallthrough
CT: control target
= control target key end

     0   :  { %s69_s10 = smov 112   ;;  %s70_s11 = smov 80   ;;  %vm3_vm0 = vcmask 130048   ;;  %vm9_vm1 = vcmask 1048448   ;;  %vm15_vm2 = vcmask 917248   ;;  %vm21_vm3 = vcmask 786048   ;;  %s113_s0 = inlined_call_operand.vmem [shape: f32[8,16], index: 0, kind: input, shape index: {}]   ;;  %s114_s1 = inlined_call_operand.vmem [shape: f32[1,1,128], index: 1, kind: output, shape index: {}]  }
   0x1   :  { %v55_v0 = vld [vmem:[%s113_s0 + $0x7] sm:$0x1]   ;;  %v57_v1 = vld [vmem:[%s113_s0 + $0x5] sm:$0x1]   ;;  %v56_v2 = vld [vmem:[%s113_s0 + $0x6] sm:$0x1]  }
   0x2   :  { %7 = vrot.lane.b32.xlu0 %v55_v0, %s69_s10  ;;  %19 = vrot.lane.b32.xlu1 %v57_v1, %s70_s11  ;;  %v58_v3 = vld [vmem:[%s113_s0 + $0x4] sm:$0x1]   ;;  %v2_v4 = vld [vmem:[%s113_s0] sm:$0x1]   ;;  %s71_s18 = smov 96   ;;  %s72_s19 = smov 64  }
   0x3   :  { %4 = vst.msk [vmem:[#allocation0] sm:$0x1] %vm3_vm0, %v2_v4   ;;  %v59_v5 = vld [vmem:[%s113_s0 + $0x3] sm:$0x1]   ;;  %v60_v6 = vld [vmem:[%s113_s0 + $0x2] sm:$0x1]  }
   0x4   :  { %s73_s24 = smov 48   ;;  %s74_s25 = smov 32   ;;  %v61_v7 = vld [vmem:[%s113_s0 + $0x1] sm:$0x1]   ;;  %vm27_vm4 = vcmask 654848   ;;  %vm33_vm5 = vcmask 523648  }
   0x5   :  { %s75_s0 = smov 16   ;;  %vm39_vm6 = vcmask 392448   ;;  %vm45_vm7 = vcmask 261248  }
   0x6   :  { %13 = vrot.lane.b32.xlu0 %v56_v2, %s71_s18  ;;  %25 = vrot.lane.b32.xlu1 %v58_v3, %s72_s19 }
   0xa   :  { %31 = vrot.lane.b32.xlu0 %v59_v5, %s73_s24  ;;  %37 = vrot.lane.b32.xlu1 %v60_v6, %s74_s25 }
   0xe   :  { %43 = vrot.lane.b32.xlu0 %v61_v7, %s75_s0 }
  0x74   :  { %v8_v8 = vpop.permute.xlu0 %7   ;;  %v20_v9 = vpop.permute.xlu1 %19  }
  0x75   :  { %10 = vst.msk [vmem:[#allocation0] sm:$0x1] %vm9_vm1, %v8_v8  }
  0x78   :  { %v14_v10 = vpop.permute.xlu0 %13   ;;  %v26_v11 = vpop.permute.xlu1 %25  }
  0x79   :  { %16 = vst.msk [vmem:[#allocation0] sm:$0x1] %vm15_vm2, %v14_v10  }
  0x7a   :  { %22 = vst.msk [vmem:[#allocation0] sm:$0x1] %vm21_vm3, %v20_v9  }
  0x7b   :  { %28 = vst.msk [vmem:[#allocation0] sm:$0x1] %vm27_vm4, %v26_v11  }
  0x7c   :  { %v32_v12 = vpop.permute.xlu0 %31   ;;  %v38_v13 = vpop.permute.xlu1 %37  }
  0x7d   :  { %34 = vst.msk [vmem:[#allocation0] sm:$0x1] %vm33_vm5, %v32_v12  }
  0x7e   :  { %40 = vst.msk [vmem:[#allocation0] sm:$0x1] %vm39_vm6, %v38_v13  }
  0x80   :  { %v44_v14 = vpop.permute.xlu0 %43  }
  0x81   :  { %46 = vst.msk [vmem:[#allocation0] sm:$0x1] %vm45_vm7, %v44_v14  }
  0x88   :  { %v51_v15 = vld [vmem:[#allocation0] sm:$0x1] }
  0x89   :  { %54 = vst [vmem:[%s114_s1] sm:$0x1] %v51_v15 }

// kernel: tile.276
= control target key start
LH: loop header
LB: loop body
LE: loop exit
PB: predicated region body
PF: predicated region fallthrough
CT: control target
= control target key end

     0   :  { %2 = vsyncpa [#allocation1], 0  ;;  %s42_s6 = smov [#allocation0]   ;;  %s59_s0 = inlined_call_operand.hbm [shape: f32[16], index: 0, kind: input, shape index: {}]   ;;  %s60_s1 = inlined_call_operand.vmem [shape: f32[8,16], index: 1, kind: output, shape index: {}]  }
   0x1   :  { %s9_s7 = sshll.u32 %s42_s6, 4  ;;  %s10_s7 = int_to_ptr.vmem [resolvable:$true] %s9_s7 }
   0x2   :  { %s28_s8 = scalar_lea.vmem %s10_s7, 16  ;;  %s32_s9 = scalar_lea.vmem %s10_s7, 32 }
   0x3   :  { %p29_p0 = scmp.ne.s32.totalorder %s10_s7, %s28_s8  ;;  %p33_p1 = scmp.lt.s32.totalorder %s10_s7, %s10_s7 }
   0x4   :  { %p34_p2 = scmp.lt.s32.totalorder %s32_s9, %s28_s8 }
   0x6   :  { %p35_p3 = por %p34_p2, %p33_p1 }
   0x8   :  { %p36_p4 = pnand %p35_p3, %p29_p0 }
   0xa   :  { %39 = shalt.err (!%p36_p4)
}
   0xb   :  { %12 = dma.hbm_to_vmem [thread:$0]  %s59_s0, 16, %s10_s7, [#allocation1]  }
   0xc   :  { %40 = dma.done.wait [#allocation1], 16  }
   0xd   :  { %41 = vsyncadd [#allocation1], 4294967280  ;;  %v16_v0 = vld [vmem:[#allocation0] ss:$0 sm:$0xff] }
   0xe   :  { %17 = vst [vmem:[%s60_s1] sm:$0xff] %v16_v0 }
   0xf   :  { %18 = vsyncpa [#allocation1], 1 }

// kernel: tile.312
= control target key start
LH: loop header
LB: loop body
LE: loop exit
PB: predicated region body
PF: predicated region fallthrough
CT: control target
= control target key end

     0   :  { %s22_s0 = inlined_call_operand.vmem [shape: f32[32], index: 0, kind: input, shape index: {}]   ;;  %s23_s1 = inlined_call_operand.vmem [shape: f32[4,32], index: 1, kind: output, shape index: {}]  }
   0x1   :  { %v4_v0 = vld [vmem:[%s22_s0] ss:$0 sm:$0xff] }
   0x2   :  { %5 = vst [vmem:[%s23_s1] sm:$0xf] %v4_v0 }

// kernel: tile.412
= control target key start
LH: loop header
LB: loop body
LE: loop exit
PB: predicated region body
PF: predicated region fallthrough
CT: control target
= control target key end

     0   :  { %vm8_vm0 = vcmask 261120   ;;  %s40_s8 = smov 32   ;;  %s41_s9 = smov 64   ;;  %vm14_vm1 = vcmask 1048320   ;;  %vm20_vm2 = vcmask 785920   ;;  %vm26_vm3 = vcmask 523520   ;;  %s58_s0 = inlined_call_operand.vmem [shape: f32[4,32], index: 0, kind: input, shape index: {}]   ;;  %s59_s1 = inlined_call_operand.vmem [shape: f32[1,1,128], index: 1, kind: output, shape index: {}]  }
   0x1   :  { %v5_v0 = vld [vmem:[%s58_s0] sm:$0xf]  ;;  %s39_s0 = smov 96  }
   0x2   :  { %6 = vst [vmem:[#allocation1] sm:$0xf] %v5_v0 }
   0x9   :  { %v11_v1 = vld [vmem:[#allocation1 + $0x3] sm:$0x1]   ;;  %v23_v2 = vld [vmem:[#allocation1 + $0x1] sm:$0x1]   ;;  %v7_v3 = vld [vmem:[#allocation1] sm:$0x1]  }
   0xa   :  { %12 = vrot.lane.b32.xlu0 %v11_v1, %s39_s0  ;;  %24 = vrot.lane.b32.xlu1 %v23_v2, %s40_s8  ;;  %v17_v4 = vld [vmem:[#allocation1 + $0x2] sm:$0x1]   ;;  %9 = vst.msk [vmem:[#allocation0] sm:$0x1] %vm8_vm0, %v7_v3  }
   0xe   :  { %18 = vrot.lane.b32.xlu0 %v17_v4, %s41_s9 }
  0x7c   :  { %v13_v5 = vpop.permute.xlu0 %12   ;;  %v25_v6 = vpop.permute.xlu1 %24  }
  0x7d   :  { %15 = vst.msk [vmem:[#allocation0] sm:$0x1] %vm14_vm1, %v13_v5  }
  0x80   :  { %v19_v7 = vpop.permute.xlu0 %18  }
  0x81   :  { %21 = vst.msk [vmem:[#allocation0] sm:$0x1] %vm20_vm2, %v19_v7  }
  0x82   :  { %27 = vst.msk [vmem:[#allocation0] sm:$0x1] %vm26_vm3, %v25_v6  }
  0x89   :  { %v32_v8 = vld [vmem:[#allocation0] sm:$0x1] }
  0x8a   :  { %35 = vst [vmem:[%s59_s1] sm:$0x1] %v32_v8 }

// kernel: tile.324
= control target key start
LH: loop header
LB: loop body
LE: loop exit
PB: predicated region body
PF: predicated region fallthrough
CT: control target
= control target key end

     0   :  { %2 = vsyncpa [#allocation1], 0  ;;  %s42_s6 = smov [#allocation0]   ;;  %s59_s0 = inlined_call_operand.hbm [shape: f32[32], index: 0, kind: input, shape index: {}]   ;;  %s60_s1 = inlined_call_operand.vmem [shape: f32[4,32], index: 1, kind: output, shape index: {}]  }
   0x1   :  { %s9_s7 = sshll.u32 %s42_s6, 4  ;;  %s10_s7 = int_to_ptr.vmem [resolvable:$true] %s9_s7 }
   0x2   :  { %s28_s8 = scalar_lea.vmem %s10_s7, 16  ;;  %s32_s9 = scalar_lea.vmem %s10_s7, 32 }
   0x3   :  { %p29_p0 = scmp.ne.s32.totalorder %s10_s7, %s28_s8  ;;  %p33_p1 = scmp.lt.s32.totalorder %s10_s7, %s10_s7 }
   0x4   :  { %p34_p2 = scmp.lt.s32.totalorder %s32_s9, %s28_s8 }
   0x6   :  { %p35_p3 = por %p34_p2, %p33_p1 }
   0x8   :  { %p36_p4 = pnand %p35_p3, %p29_p0 }
   0xa   :  { %39 = shalt.err (!%p36_p4)
}
   0xb   :  { %12 = dma.hbm_to_vmem [thread:$0]  %s59_s0, 16, %s10_s7, [#allocation1]  }
   0xc   :  { %40 = dma.done.wait [#allocation1], 16  }
   0xd   :  { %41 = vsyncadd [#allocation1], 4294967280  ;;  %v16_v0 = vld [vmem:[#allocation0] ss:$0 sm:$0xff] }
   0xe   :  { %17 = vst [vmem:[%s60_s1] sm:$0xf] %v16_v0 }
   0xf   :  { %18 = vsyncpa [#allocation1], 1 }

// kernel: tile.360
= control target key start
LH: loop header
LB: loop body
LE: loop exit
PB: predicated region body
PF: predicated region fallthrough
CT: control target
= control target key end

     0   :  { %s22_s0 = inlined_call_operand.vmem [shape: f32[64], index: 0, kind: input, shape index: {}]   ;;  %s23_s1 = inlined_call_operand.vmem [shape: f32[2,64], index: 1, kind: output, shape index: {}]  }
   0x1   :  { %v4_v0 = vld [vmem:[%s22_s0] ss:$0 sm:$0xff] }
   0x2   :  { %5 = vst [vmem:[%s23_s1] sm:$0x3] %v4_v0 }

// kernel: tile.416
= control target key start
LH: loop header
LB: loop body
LE: loop exit
PB: predicated region body
PF: predicated region fallthrough
CT: control target
= control target key end

     0   :  { %vm8_vm0 = vcmask 523264   ;;  %vm14_vm1 = vcmask 1048064   ;;  %s42_s0 = inlined_call_operand.vmem [shape: f32[2,64], index: 0, kind: input, shape index: {}]   ;;  %s43_s1 = inlined_call_operand.vmem [shape: f32[1,1,128], index: 1, kind: output, shape index: {}]  }
   0x1   :  { %v5_v0 = vld [vmem:[%s42_s0] sm:$0x3]  ;;  %s25_s0 = smov 64  }
   0x2   :  { %6 = vst [vmem:[#allocation1] sm:$0x3] %v5_v0 }
   0x9   :  { %v11_v1 = vld [vmem:[#allocation1 + $0x1] sm:$0x1]   ;;  %v7_v2 = vld [vmem:[#allocation1] sm:$0x1]  }
   0xa   :  { %12 = vrot.lane.b32.xlu0 %v11_v1, %s25_s0  ;;  %9 = vst.msk [vmem:[#allocation0] sm:$0x1] %vm8_vm0, %v7_v2  }
  0x7c   :  { %v13_v3 = vpop.permute.xlu0 %12  }
  0x7d   :  { %15 = vst.msk [vmem:[#allocation0] sm:$0x1] %vm14_vm1, %v13_v3  }
  0x84   :  { %v20_v4 = vld [vmem:[#allocation0] sm:$0x1] }
  0x85   :  { %23 = vst [vmem:[%s43_s1] sm:$0x1] %v20_v4 }

// kernel: tile.372
= control target key start
LH: loop header
LB: loop body
LE: loop exit
PB: predicated region body
PF: predicated region fallthrough
CT: control target
= control target key end

     0   :  { %2 = vsyncpa [#allocation1], 0  ;;  %s42_s6 = smov [#allocation0]   ;;  %s59_s0 = inlined_call_operand.hbm [shape: f32[64], index: 0, kind: input, shape index: {}]   ;;  %s60_s1 = inlined_call_operand.vmem [shape: f32[2,64], index: 1, kind: output, shape index: {}]  }
   0x1   :  { %s9_s7 = sshll.u32 %s42_s6, 4  ;;  %s10_s7 = int_to_ptr.vmem [resolvable:$true] %s9_s7 }
   0x2   :  { %s28_s8 = scalar_lea.vmem %s10_s7, 16  ;;  %s32_s9 = scalar_lea.vmem %s10_s7, 32 }
   0x3   :  { %p29_p0 = scmp.ne.s32.totalorder %s10_s7, %s28_s8  ;;  %p33_p1 = scmp.lt.s32.totalorder %s10_s7, %s10_s7 }
   0x4   :  { %p34_p2 = scmp.lt.s32.totalorder %s32_s9, %s28_s8 }
   0x6   :  { %p35_p3 = por %p34_p2, %p33_p1 }
   0x8   :  { %p36_p4 = pnand %p35_p3, %p29_p0 }
   0xa   :  { %39 = shalt.err (!%p36_p4)
}
   0xb   :  { %12 = dma.hbm_to_vmem [thread:$0]  %s59_s0, 16, %s10_s7, [#allocation1]  }
   0xc   :  { %40 = dma.done.wait [#allocation1], 16  }
   0xd   :  { %41 = vsyncadd [#allocation1], 4294967280  ;;  %v16_v0 = vld [vmem:[#allocation0] ss:$0 sm:$0xff] }
   0xe   :  { %17 = vst [vmem:[%s60_s1] sm:$0x3] %v16_v0 }
   0xf   :  { %18 = vsyncpa [#allocation1], 1 }

// kernel: tile.236
= control target key start
LH: loop header
LB: loop body
LE: loop exit
PB: predicated region body
PF: predicated region fallthrough
CT: control target
= control target key end

     0   :  { %s28_s0 = inlined_call_operand.vmem [shape: f32[8], index: 0, kind: input, shape index: {}]   ;;  %s29_s1 = inlined_call_operand.vmem [shape: f32[16,8], index: 1, kind: output, shape index: {}]  }
   0x1   :  { %v4_v0 = vld [vmem:[%s28_s0] ss:$0 sm:$0xff] }
   0x2   :  { %5 = vst [vmem:[%s29_s1] sm:$0xff] %v4_v0  ;;  %8 = vst [vmem:[%s29_s1 + $0x8] sm:$0xff] %v4_v0 }

// kernel: cnn_forward.1
= control target key start
LH: loop header
LB: loop body
LE: loop exit
PB: predicated region body
PF: predicated region fallthrough
CT: control target
= control target key end

     0   :  { %v12248_v42 = vmov 0.0   ;;  %vm12249_vm0 = vmmov 0   ;;  %s15443_s0 = inlined_call_operand.vmem [shape: f32[2,18,128], index: 0, kind: input, shape index: {}]   ;;  %s15444_s1 = inlined_call_operand.vmem [shape: bf16[15,384,128], index: 1, kind: input, shape index: {}]   ;;  %s15445_s2 = inlined_call_operand.vmem [shape: f32[15,1,128], index: 2, kind: input, shape index: {}]   ;;  %s15446_s3 = inlined_call_operand.vmem [shape: f32[15,1,128], index: 3, kind: input, shape index: {}]   ;;  %s15447_s4 = inlined_call_operand.vmem [shape: f32[15,1,128], index: 4, kind: input, shape index: {}]   ;;  %s15448_s5 = inlined_call_operand.vmem [shape: f32[4,128,128], index: 5, kind: input, shape index: {}]   ;;  %s15449_s6 = inlined_call_operand.vmem [shape: f32[64,2], index: 6, kind: input, shape index: {}]   ;;  %s15450_s7 = inlined_call_operand.vmem [shape: f32[1,2], index: 7, kind: input, shape index: {}]   ;;  %s15451_s8 = inlined_call_operand.hbm [shape: f32[2,2], index: 8, kind: output, shape index: {}]  }
   0x1   :  { %v11811_v0 = vld [vmem:[%s15444_s1 + $0x78] sm:$0xff]   ;;  %v11814_v3 = vld [vmem:[%s15444_s1 + $0x70] sm:$0xff]   ;;  %v11817_v6 = vld [vmem:[%s15444_s1 + $0x68] sm:$0xff]   ;;  %31 = vst [vmem:[#allocation2] sm:$0x1] %v12248_v42 }
   0x2   :  { %v11812_v1 = vld [vmem:[%s15444_s1 + $0x38] sm:$0xff]   ;;  %9432 = vmatprep.subr.bf16.mxu0 %v11811_v0  ;;  %v11815_v4 = vld [vmem:[%s15444_s1 + $0x30] sm:$0xff]   ;;  %v11818_v7 = vld [vmem:[%s15444_s1 + $0x28] sm:$0xff]   ;;  %32 = vst [vmem:[#allocation2 + $0x18] sm:$0x1] %v12248_v42 }
   0x3   :  { %v11813_v2 = vld [vmem:[%s15444_s1 + $0xb8] sm:$0xff]   ;;  %9433 = vmatpush3.bf16.msra.mxu0 %v11812_v1  ;;  %v11816_v5 = vld [vmem:[%s15444_s1 + $0xb0] sm:$0xff]   ;;  %v11819_v8 = vld [vmem:[%s15444_s1 + $0xa8] sm:$0xff]   ;;  %33 = vst [vmem:[#allocation2 + $0x11] sm:$0x1] %v12248_v42 }
   0x4   :  { %10437 = vmatprep.subr.bf16.mxu1 %v11813_v2  ;;  %9434 = vmatprep.subr.bf16.mxu0 %v11814_v3  ;;  %v11820_v9 = vld [vmem:[%s15444_s1 + $0x60] sm:$0xff]   ;;  %v11823_v12 = vld [vmem:[%s15444_s1 + $0x58] sm:$0xff]   ;;  %v11826_v15 = vld [vmem:[%s15444_s1 + $0x50] sm:$0xff]   ;;  %34 = vst [vmem:[#allocation2 + $0x29] sm:$0x1] %v12248_v42 }
   0x5   :  { %10438 = vmatpush3.bf16.msra.mxu1 %v11813_v2  ;;  %v11821_v10 = vld [vmem:[%s15444_s1 + $0x20] sm:$0xff]   ;;  %v11825_v13 = vld [vmem:[%s15444_s1 + $0x98] sm:$0xff]   ;;  %v11828_v16 = vld [vmem:[%s15444_s1 + $0x90] sm:$0xff]   ;;  %35 = vst [vmem:[#allocation3] sm:$0x1] %v12248_v42 }
   0x6   :  { %10439 = vmatprep.subr.bf16.mxu1 %v11816_v5  ;;  %v11822_v11 = vld [vmem:[%s15444_s1 + $0xa0] sm:$0xff]   ;;  %v11824_v14 = vld [vmem:[%s15444_s1 + $0x18] sm:$0xff]   ;;  %v11827_v17 = vld [vmem:[%s15444_s1 + $0x10] sm:$0xff]   ;;  %36 = vst [vmem:[#allocation3 + $0x10] sm:$0x1] %v12248_v42 }
   0x7   :  { %9435 = vmatpush3.bf16.msra.mxu0 %v11815_v4  ;;  %v11829_v18 = vld [vmem:[%s15444_s1 + $0x48] sm:$0xff]   ;;  %v11832_v21 = vld [vmem:[%s15444_s1 + $0x40] sm:$0xff]   ;;  %v116_v39 = vld [vmem:[%s15443_s0 + $0x18] sm:$0xff]  ;;  %37 = vst [vmem:[#allocation3 + $0x9] sm:$0x1] %v12248_v42 }
   0x8   :  { %9436 = vmatprep.subr.bf16.mxu0 %v11817_v6  ;;  %v11831_v19 = vld [vmem:[%s15444_s1 + $0x88] sm:$0xff]   ;;  %v11833_v24 = vld [vmem:[%s15444_s1] sm:$0xff]   ;;  %38 = vst [vmem:[#allocation3 + $0x19] sm:$0x1] %v12248_v42  ;;  %39 = vst [vmem:[#allocation4] sm:$0x1] %v12248_v42 }
   0x9   :  { %10440 = vmatpush3.bf16.msra.mxu1 %v11816_v5  ;;  %v11830_v20 = vld [vmem:[%s15444_s1 + $0x8] sm:$0xff]   ;;  %v11834_v28 = vld [vmem:[%s15444_s1 + $0x80] sm:$0xff]   ;;  %40 = vst [vmem:[#allocation4 + $0x8] sm:$0x1] %v12248_v42  ;;  %41 = vst [vmem:[#allocation4 + $0x5] sm:$0x1] %v12248_v42 }
   0xa   :  { %10441 = vmatprep.subr.bf16.mxu1 %v11819_v8  ;;  %v118_v22 = vld [vmem:[%s15443_s0 + $0x1] sm:$0xff]  ;;  %v119_v23 = vld [vmem:[%s15443_s0 + $0x9] sm:$0xff]  ;;  %v120_v34 = vld [vmem:[%s15443_s0 + $0x19] sm:$0xff]  ;;  %42 = vst [vmem:[#allocation4 + $0xd] sm:$0x1] %v12248_v42 }
   0xb   :  { %9437 = vmatpush3.bf16.msra.mxu0 %v11818_v7  ;;  %v127_v25 = vpack.c.bf16 %v119_v23, %v118_v22  ;;  %v122_v26 = vld [vmem:[%s15443_s0 + $0x2] sm:$0xff]  ;;  %v123_v27 = vld [vmem:[%s15443_s0 + $0xa] sm:$0xff]  ;;  %v124_v32 = vld [vmem:[%s15443_s0 + $0x1a] sm:$0xff]  ;;  %43 = vst [vmem:[#allocation5] sm:$0x1] %v12248_v42 }
   0xc   :  { %9438 = vmatprep.subr.bf16.mxu0 %v11820_v9  ;;  %v114_v29 = vld [vmem:[%s15443_s0] sm:$0xff]  ;;  %v115_v30 = vld [vmem:[%s15443_s0 + $0x8] sm:$0xff]  ;;  %v128_v31 = vpack.c.bf16 %v123_v27, %v122_v26  ;;  %44 = vst [vmem:[#allocation5 + $0x4] sm:$0x1] %v12248_v42  ;;  %45 = vst [vmem:[#allocation5 + $0x3] sm:$0x1] %v12248_v42 }
   0xd   :  { %10442 = vmatpush3.bf16.msra.mxu1 %v11819_v8  ;;  %314 = vmatprep.mubr.bf16.mxu0 %v127_v25  ;;  %v125_v33 = vld [vmem:[%s15443_s0 + $0x22] sm:$0xff]  ;;  %v126_v36 = vpack.c.bf16 %v115_v30, %v114_v29  ;;  %46 = vst [vmem:[#allocation5 + $0x7] sm:$0x1] %v12248_v42  ;;  %v113_v43 = vld [vmem:[%s15448_s5 + $0x78] sm:$0xff]  ;;  %v112_v44 = vld [vmem:[%s15448_s5 + $0x70] sm:$0xff] }
   0xe   :  { %10443 = vmatprep.subr.bf16.mxu1 %v11822_v11  ;;  %v121_v35 = vld [vmem:[%s15443_s0 + $0x21] sm:$0xff]  ;;  %10453 = vmatprep.mubr.bf16.mxu1 %v128_v31  ;;  %v131_v38 = vpack.c.bf16 %v125_v33, %v124_v32  ;;  %v109_v47 = vld [vmem:[%s15448_s5 + $0x58] sm:$0xff]  ;;  %v108_v48 = vld [vmem:[%s15448_s5 + $0x50] sm:$0xff] }
   0xf   :  { %9439 = vmatpush3.bf16.msra.mxu0 %v11821_v10  ;;  %v130_v37 = vpack.c.bf16 %v121_v35, %v120_v34  ;;  %v117_v40 = vld [vmem:[%s15443_s0 + $0x20] sm:$0xff]  ;;  %v111_v45 = vld [vmem:[%s15448_s5 + $0x68] sm:$0xff]  ;;  %v105_v51 = vld [vmem:[%s15448_s5 + $0x38] sm:$0xff] }
  0x10   :  { %9440 = vmatprep.subr.bf16.mxu0 %v11823_v12  ;;  %v129_v41 = vpack.c.bf16 %v117_v40, %v116_v39  ;;  %v110_v46 = vld [vmem:[%s15448_s5 + $0x60] sm:$0xff]  ;;  %v107_v49 = vld [vmem:[%s15448_s5 + $0x48] sm:$0xff]  ;;  %v104_v52 = vld [vmem:[%s15448_s5 + $0x30] sm:$0xff] }
  0x11   :  { %10444 = vmatpush3.bf16.msra.mxu1 %v11822_v11  ;;  %v106_v50 = vld [vmem:[%s15448_s5 + $0x40] sm:$0xff]  ;;  %v103_v53 = vld [vmem:[%s15448_s5 + $0x28] sm:$0xff]  ;;  %v101_v55 = vld [vmem:[%s15448_s5 + $0x18] sm:$0xff] }
  0x12   :  { %10445 = vmatprep.subr.bf16.mxu1 %v11825_v13  ;;  %v102_v54 = vld [vmem:[%s15448_s5 + $0x20] sm:$0xff]  ;;  %v100_v56 = vld [vmem:[%s15448_s5 + $0x10] sm:$0xff]  ;;  %v99_v57 = vld [vmem:[%s15448_s5 + $0x8] sm:$0xff] }
  0x13   :  { %9441 = vmatpush3.bf16.msra.mxu0 %v11824_v14  ;;  %v98_v58 = vld [vmem:[%s15448_s5] sm:$0xff] }
  0x14   :  { %9442 = vmatprep.subr.bf16.mxu0 %v11826_v15  ;;  %v8124_v63 = vld [vmem:[%s15445_s2] ss:$0 sm:$0xff] }
  0x15   :  { %10446 = vmatpush3.bf16.msra.mxu1 %v11825_v13 }
  0x16   :  { %10447 = vmatprep.subr.bf16.mxu1 %v11828_v16 }
  0x17   :  { %9443 = vmatpush3.bf16.msra.mxu0 %v11827_v17 }
  0x18   :  { %9444 = vmatprep.subr.bf16.mxu0 %v11829_v18 }
  0x19   :  { %10448 = vmatpush3.bf16.msra.mxu1 %v11828_v16 }
  0x1a   :  { %10449 = vmatprep.subr.bf16.mxu1 %v11831_v19 }
  0x1b   :  { %9445 = vmatpush3.bf16.msra.mxu0 %v11830_v20 }
  0x1c   :  { %9446 = vmatprep.subr.bf16.mxu0 %v11832_v21 }
  0x1d   :  { %10450 = vmatpush3.bf16.msra.mxu1 %v11831_v19 }
  0x1e   :  { %10451 = vmatprep.subr.bf16.mxu1 %v11834_v28 }
  0x1f   :  { %9447 = vmatpush3.bf16.msra.mxu0 %v11833_v24 }
  0x20   :  { %10457 = vmatprep.subr.mxu0 %v12248_v42 }
  0x21   :  { %10452 = vmatpush3.bf16.msra.mxu1 %v11834_v28 }
  0x22   :  { %315 = vmatmul.mubr.bf16.vlgmr.msra.gmra.mxu0 %v126_v36  ;;  %10492 = vmatprep.subr.mxu1 %v12248_v42 }
  0x23   :  { %322 = vmatprep.mubr.bf16.mxu0 %v130_v37  ;;  %10458 = vmatpush3.msra.mxu0 %v113_v43 }
  0x24   :  { %10454 = vmatmul.mubr.bf16.vlgmr.msra.gmra.mxu1 %v131_v38  ;;  %10459 = vmatprep.subr.mxu0 %v12248_v42 }
  0x25   :  { %10493 = vmatpush3.msra.mxu1 %v113_v43  ;;  %10460 = vmatpush3.msra.mxu0 %v112_v44 }
  0x26   :  { %10494 = vmatprep.subr.mxu1 %v12248_v42  ;;  %10461 = vmatprep.subr.mxu0 %v12248_v42 }
  0x27   :  { %10495 = vmatpush3.msra.mxu1 %v112_v44  ;;  %10462 = vmatpush3.msra.mxu0 %v111_v45 }
  0x28   :  { %10496 = vmatprep.subr.mxu1 %v12248_v42  ;;  %10463 = vmatprep.subr.mxu0 %v12248_v42 }
  0x29   :  { %10497 = vmatpush3.msra.mxu1 %v111_v45  ;;  %10464 = vmatpush3.msra.mxu0 %v110_v46 }
  0x2a   :  { %323 = vmatmul.mubr.bf16.gmra.mxu0 %v129_v41  ;;  %10498 = vmatprep.subr.mxu1 %v12248_v42 }
  0x2b   :  { %10499 = vmatpush3.msra.mxu1 %v110_v46  ;;  %10465 = vmatprep.subr.mxu0 %v12248_v42 }
  0x2c   :  { %10500 = vmatprep.subr.mxu1 %v12248_v42  ;;  %10466 = vmatpush3.msra.mxu0 %v109_v47 }
  0x2d   :  { %10501 = vmatpush3.msra.mxu1 %v109_v47  ;;  %10467 = vmatprep.subr.mxu0 %v12248_v42 }
  0x2e   :  { %10502 = vmatprep.subr.mxu1 %v12248_v42  ;;  %10468 = vmatpush3.msra.mxu0 %v108_v48 }
  0x2f   :  { %10503 = vmatpush3.msra.mxu1 %v108_v48  ;;  %10469 = vmatprep.subr.mxu0 %v12248_v42 }
  0x30   :  { %10504 = vmatprep.subr.mxu1 %v12248_v42  ;;  %10470 = vmatpush3.msra.mxu0 %v107_v49 }
  0x31   :  { %10505 = vmatpush3.msra.mxu1 %v107_v49  ;;  %10471 = vmatprep.subr.mxu0 %v12248_v42 }
  0x32   :  { %10506 = vmatprep.subr.mxu1 %v12248_v42  ;;  %10472 = vmatpush3.msra.mxu0 %v106_v50 }
  0x33   :  { %10507 = vmatpush3.msra.mxu1 %v106_v50  ;;  %10473 = vmatprep.subr.mxu0 %v12248_v42 }
  0x34   :  { %10508 = vmatprep.subr.mxu1 %v12248_v42  ;;  %10474 = vmatpush3.msra.mxu0 %v105_v51 }
  0x35   :  { %10509 = vmatpush3.msra.mxu1 %v105_v51  ;;  %10475 = vmatprep.subr.mxu0 %v12248_v42 }
  0x36   :  { %10510 = vmatprep.subr.mxu1 %v12248_v42  ;;  %10476 = vmatpush3.msra.mxu0 %v104_v52 }
  0x37   :  { %10511 = vmatpush3.msra.mxu1 %v104_v52  ;;  %10477 = vmatprep.subr.mxu0 %v12248_v42 }
  0x38   :  { %10512 = vmatprep.subr.mxu1 %v12248_v42  ;;  %10478 = vmatpush3.msra.mxu0 %v103_v53 }
  0x39   :  { %10513 = vmatpush3.msra.mxu1 %v103_v53  ;;  %10479 = vmatprep.subr.mxu0 %v12248_v42 }
  0x3a   :  { %10514 = vmatprep.subr.mxu1 %v12248_v42  ;;  %10480 = vmatpush3.msra.mxu0 %v102_v54 }
  0x3b   :  { %10515 = vmatpush3.msra.mxu1 %v102_v54  ;;  %10481 = vmatprep.subr.mxu0 %v12248_v42 }
  0x3c   :  { %10516 = vmatprep.subr.mxu1 %v12248_v42  ;;  %10482 = vmatpush3.msra.mxu0 %v101_v55 }
  0x3d   :  { %10517 = vmatpush3.msra.mxu1 %v101_v55  ;;  %10483 = vmatprep.subr.mxu0 %v12248_v42 }
  0x3e   :  { %10518 = vmatprep.subr.mxu1 %v12248_v42  ;;  %10484 = vmatpush3.msra.mxu0 %v100_v56 }
  0x3f   :  { %10519 = vmatpush3.msra.mxu1 %v100_v56  ;;  %10485 = vmatprep.subr.mxu0 %v12248_v42 }
  0x40   :  { %10520 = vmatprep.subr.mxu1 %v12248_v42  ;;  %10486 = vmatpush3.msra.mxu0 %v99_v57 }
  0x41   :  { %10489 = vmatprep.mubr.msk.f32.mxu0 %vm12249_vm0, %v12248_v42  ;;  %10487 = vmatprep.subr.mxu0 %v12248_v42 }
  0x42   :  { %10521 = vmatpush3.msra.mxu1 %v99_v57  ;;  %10488 = vmatpush3.msra.mxu0 %v98_v58 }
  0x43   :  { %10522 = vmatprep.subr.mxu1 %v12248_v42  ;;  %10524 = vmatprep.mubr.msk.f32.mxu1 %vm12249_vm0, %v12248_v42 }
  0x44   :  { %10523 = vmatpush3.msra.mxu1 %v98_v58 }
  0xe2   :  { %v9448_v59 = vpop.f32.mrf.mxu0 }
  0xe4   :  { %v9449_v60 = vpop.f32.mrf.mxu0  ;;  %v10455_v61 = vpop.f32.mrf.mxu1 }
  0xe5   :  { %v9450_v1 = vadd.f32 %v9449_v60, %v9448_v59 }
  0xe6   :  { %v9451_v62 = vpop.f32.mrf.mxu0  ;;  %v365_v0 = vpop.f32.mrf.mxu1 }
  0xe7   :  { %v317_v6 = vadd.f32 %v9450_v1, %v8124_v63 }
  0xe8   :  { %v9452_v2 = vpop.f32.mrf.mxu0  ;;  %v10456_v3 = vpop.f32.mrf.mxu1 }
  0xe9   :  { %v9453_v4 = vadd.f32 %v9452_v2, %v9451_v62  ;;  %v12511_v13 = vadd.f32 %v365_v0, %v317_v6 }
  0xea   :  { %v9454_v5 = vpop.f32.mrf.mxu0  ;;  %v368_v8 = vpop.f32.mrf.mxu1 }
  0xeb   :  { %v320_v7 = vadd.f32 %v9453_v4, %v8124_v63  ;;  %v459_v19 = vmul.f32 %v12511_v13, %v12511_v13 }
  0xec   :  { %v9455_v9 = vpop.f32.mrf.mxu0 }
  0xed   :  { %v12509_v10 = vadd.f32 %v368_v8, %v320_v7  ;;  %v9456_v11 = vadd.f32 %v9455_v9, %v9454_v5 }
  0xee   :  { %v9457_v12 = vpop.f32.mrf.mxu0 }
  0xef   :  { %v325_v14 = vadd.f32 %v9456_v11, %v8124_v63  ;;  %v460_v16 = vmul.f32 %v12509_v10, %v12509_v10  ;;  %v380_v20 = vadd.f32 %v12509_v10, %v12511_v13 }
  0xf0   :  { %v9458_v15 = vpop.f32.mrf.mxu0 }
  0xf1   :  { %v12515_v17 = vadd.f32 %v10455_v61, %v325_v14  ;;  %v9459_v18 = vadd.f32 %v9458_v15, %v9457_v12  ;;  %v463_v23 = vadd.f32 %v460_v16, %v459_v19 }
  0xf3   :  { %v461_v21 = vmul.f32 %v12515_v17, %v12515_v17  ;;  %v328_v22 = vadd.f32 %v9459_v18, %v8124_v63  ;;  %v381_v24 = vadd.f32 %v380_v20, %v12515_v17 }
  0xf5   :  { %v12524_v25 = vadd.f32 %v10456_v3, %v328_v22  ;;  %v464_v26 = vadd.f32 %v463_v23, %v461_v21 }
  0xf7   :  { %v382_v27 = vadd.f32 %v381_v24, %v12524_v25  ;;  %v462_v28 = vmul.f32 %v12524_v25, %v12524_v25 }
  0xf9   :  { %v383_v29 = vrot.slane %v382_v27, 4  ;;  %v465_v30 = vadd.f32 %v464_v26, %v462_v28 }
  0xfb   :  { %v384_v31 = vadd.f32 %v383_v29, %v382_v27  ;;  %v466_v32 = vrot.slane %v465_v30, 4 }
  0xfd   :  { %v385_v33 = vrot.slane %v384_v31, 2  ;;  %v467_v34 = vadd.f32 %v466_v32, %v465_v30 }
  0xff   :  { %v386_v35 = vadd.f32 %v385_v33, %v384_v31  ;;  %v468_v36 = vrot.slane %v467_v34, 2 }
 0x101   :  { %v387_v37 = vrot.slane %v386_v35, 1  ;;  %v469_v38 = vadd.f32 %v468_v36, %v467_v34 }
 0x103   :  { %v388_v39 = vadd.f32 %v387_v37, %v386_v35  ;;  %v470_v40 = vrot.slane %v469_v38, 1 }
 0x104   :  { %13 = vsyncpa [#allocation7], 0  ;;  %v11835_v43 = vld [vmem:[%s15444_s1 + $0x138] sm:$0xff]   ;;  %v11838_v46 = vld [vmem:[%s15444_s1 + $0x130] sm:$0xff]   ;;  %v553_v15 = vlaneseq  ;;  %vm1765_vm13 = vcmask 1046528   ;;  %s12251_s28 = smov 64  }
 0x105   :  { %10490 = vmatmul.mubr.f32.vlgmr.msra.gmra.mxu0 %v388_v39  ;;  %v471_v41 = vadd.f32 %v470_v40, %v469_v38  ;;  %v11836_v44 = vld [vmem:[%s15444_s1 + $0x178] sm:$0xff]   ;;  %9504 = vmatprep.subr.bf16.mxu0 %v11835_v43  ;;  %v11839_v47 = vld [vmem:[%s15444_s1 + $0x170] sm:$0xff]   ;;  %v11841_v49 = vld [vmem:[%s15444_s1 + $0x128] sm:$0xff]   ;;  %s12252_s12 = smov [#allocation6]  }
 0x106   :  { %v11837_v45 = vld [vmem:[%s15444_s1 + $0xf8] sm:$0xff]   ;;  %10527 = vmatprep.subr.bf16.mxu1 %v11836_v44  ;;  %v11840_v48 = vld [vmem:[%s15444_s1 + $0xf0] sm:$0xff]   ;;  %v11842_v50 = vld [vmem:[%s15444_s1 + $0x168] sm:$0xff]   ;;  %v12603_v16 = vshrl.u32 %v553_v15, 7  ;;  %s8116_s13 = sshll.u32 %s12252_s12, 4  ;;  %s8117_s13 = int_to_ptr.vmem [resolvable:$true] %s8116_s13 }
 0x107   :  { %10525 = vmatmul.mubr.f32.vlgmr.msra.gmra.mxu1 %v471_v41  ;;  %9505 = vmatpush3.bf16.msra.mxu0 %v11837_v45  ;;  %v11843_v51 = vld [vmem:[%s15444_s1 + $0xe8] sm:$0xff]   ;;  %v11844_v52 = vld [vmem:[%s15444_s1 + $0x120] sm:$0xff]   ;;  %v11847_v55 = vld [vmem:[%s15444_s1 + $0x118] sm:$0xff]   ;;  %p12231_p1 = scmp.lt.s32.totalorder %s8117_s13, %s8117_s13 }
 0x108   :  { %10528 = vmatpush3.bf16.msra.mxu1 %v11836_v44  ;;  %9506 = vmatprep.subr.bf16.mxu0 %v11838_v46  ;;  %v11845_v53 = vld [vmem:[%s15444_s1 + $0x160] sm:$0xff]   ;;  %v11848_v56 = vld [vmem:[%s15444_s1 + $0x158] sm:$0xff]   ;;  %v11850_v58 = vld [vmem:[%s15444_s1 + $0x110] sm:$0xff]   ;;  %v12609_v19 = vsub.s32 0, %v12603_v16 }
 0x109   :  { %10529 = vmatprep.subr.bf16.mxu1 %v11839_v47  ;;  %v11846_v54 = vld [vmem:[%s15444_s1 + $0xe0] sm:$0xff]   ;;  %v11849_v57 = vld [vmem:[%s15444_s1 + $0xd8] sm:$0xff]   ;;  %v11851_v59 = vld [vmem:[%s15444_s1 + $0x150] sm:$0xff]  }
 0x10a   :  { %v11852_v60 = vld [vmem:[%s15444_s1 + $0xd0] sm:$0xff]   ;;  %v11853_v61 = vld [vmem:[%s15444_s1 + $0x108] sm:$0xff]   ;;  %v11856_v0 = vld [vmem:[%s15444_s1 + $0x100] sm:$0xff]  }
 0x10b   :  { %9507 = vmatpush3.bf16.msra.mxu0 %v11840_v48  ;;  %v11854_v62 = vld [vmem:[%s15444_s1 + $0x148] sm:$0xff]   ;;  %v11857_v1 = vld [vmem:[%s15444_s1 + $0x140] sm:$0xff]  }
 0x10c   :  { %10530 = vmatpush3.bf16.msra.mxu1 %v11839_v47  ;;  %9508 = vmatprep.subr.bf16.mxu0 %v11841_v49  ;;  %v11855_v63 = vld [vmem:[%s15444_s1 + $0xc8] sm:$0xff]   ;;  %v11858_v2 = vld [vmem:[%s15444_s1 + $0xc0] sm:$0xff]  }
 0x10d   :  { %10531 = vmatprep.subr.bf16.mxu1 %v11842_v50  ;;  %v96_v18 = vld [vmem:[%s15446_s3] sm:$0x1]  ;;  %v8200_v15 = vld [vmem:[%s15445_s2 + $0x1] ss:$0 sm:$0xff] }
 0x10e   :  { %v97_v22 = vld [vmem:[%s15447_s4] sm:$0x1] }
 0x10f   :  { %9509 = vmatpush3.bf16.msra.mxu0 %v11843_v51 }
 0x110   :  { %10532 = vmatpush3.bf16.msra.mxu1 %v11842_v50  ;;  %9510 = vmatprep.subr.bf16.mxu0 %v11844_v52  ;;  %v12210_v52 = vld [vmem:[%s15448_s5 + $0x78] sm:$0xff] }
 0x111   :  { %10533 = vmatprep.subr.bf16.mxu1 %v11845_v53 }
 0x113   :  { %9511 = vmatpush3.bf16.msra.mxu0 %v11846_v54 }
 0x114   :  { %10534 = vmatpush3.bf16.msra.mxu1 %v11845_v53  ;;  %9512 = vmatprep.subr.bf16.mxu0 %v11847_v55  ;;  %v12211_v55 = vld [vmem:[%s15448_s5 + $0x70] sm:$0xff] }
 0x115   :  { %10535 = vmatprep.subr.bf16.mxu1 %v11848_v56 }
 0x117   :  { %9513 = vmatpush3.bf16.msra.mxu0 %v11849_v57 }
 0x118   :  { %10536 = vmatpush3.bf16.msra.mxu1 %v11848_v56  ;;  %9514 = vmatprep.subr.bf16.mxu0 %v11850_v58  ;;  %v12212_v56 = vld [vmem:[%s15448_s5 + $0x68] sm:$0xff]  ;;  %v12213_v58 = vld [vmem:[%s15448_s5 + $0x60] sm:$0xff] }
 0x119   :  { %10537 = vmatprep.subr.bf16.mxu1 %v11851_v59 }
 0x11b   :  { %9515 = vmatpush3.bf16.msra.mxu0 %v11852_v60  ;;  %v12215_v60 = vld [vmem:[%s15448_s5 + $0x50] sm:$0xff] }
 0x11c   :  { %10538 = vmatpush3.bf16.msra.mxu1 %v11851_v59  ;;  %9516 = vmatprep.subr.bf16.mxu0 %v11853_v61  ;;  %v12214_v59 = vld [vmem:[%s15448_s5 + $0x58] sm:$0xff]  ;;  %v12216_v61 = vld [vmem:[%s15448_s5 + $0x48] sm:$0xff] }
 0x11d   :  { %10539 = vmatprep.subr.bf16.mxu1 %v11854_v62 }
 0x11f   :  { %9517 = vmatpush3.bf16.msra.mxu0 %v11855_v63  ;;  %v12218_v63 = vld [vmem:[%s15448_s5 + $0x38] sm:$0xff] }
 0x120   :  { %10540 = vmatpush3.bf16.msra.mxu1 %v11854_v62  ;;  %9518 = vmatprep.subr.bf16.mxu0 %v11856_v0  ;;  %v12217_v62 = vld [vmem:[%s15448_s5 + $0x40] sm:$0xff]  ;;  %v12219_v0 = vld [vmem:[%s15448_s5 + $0x30] sm:$0xff] }
 0x121   :  { %10541 = vmatprep.subr.bf16.mxu1 %v11857_v1 }
 0x123   :  { %9519 = vmatpush3.bf16.msra.mxu0 %v11858_v2  ;;  %v12221_v2 = vld [vmem:[%s15448_s5 + $0x20] sm:$0xff] }
 0x124   :  { %10542 = vmatpush3.bf16.msra.mxu1 %v11857_v1  ;;  %10547 = vmatprep.subr.mxu0 %v12248_v42  ;;  %v12220_v1 = vld [vmem:[%s15448_s5 + $0x28] sm:$0xff] }
 0x125   :  { %10582 = vmatprep.subr.mxu1 %v12248_v42 }
 0x1c5   :  { %v455_v3 = vpop.f32.mrf.mxu0 }
 0x1c6   :  { %v542_v4 = vmul.f32 0.001953125, %v455_v3  ;;  %v12222_v3 = vld [vmem:[%s15448_s5 + $0x18] sm:$0xff] }
 0x1c7   :  { %v10491_v5 = vpop.f32.mrf.mxu0  ;;  %v538_v6 = vpop.f32.mrf.mxu1 }
 0x1c8   :  { %v544_v7 = vmul.f32 %v542_v4, %v542_v4  ;;  %v543_v8 = vmul.f32 0.001953125, %v538_v6  ;;  %v12224_v5 = vld [vmem:[%s15448_s5 + $0x8] sm:$0xff]  ;;  %v12225_v6 = vld [vmem:[%s15448_s5] sm:$0xff] }
 0x1c9   :  { %v10526_v9 = vpop.f32.mrf.mxu1 }
 0x1ca   :  { %v545_v11 = vsub.f32 %v543_v8, %v544_v7 }
 0x1cc   :  { %v546_v12 = vmax.f32 %v545_v11, 0.0 }
 0x1ce   :  { %v547_v14 = vadd.f32 1e-05, %v546_v12 }
 0x1d0   :  { %12180 = vrsqrt.f32 %v547_v14 }
 0x1dd   :  { %v12181_v20 = vpop.eup %12180 }
 0x1de   :  { %v549_v21 = vmul.f32 %v12181_v20, %v96_v18 }
 0x1e0   :  { %v550_v23 = vmul.f32 %v549_v21, %v542_v4  ;;  %v556_v24 = vrot.slane %v549_v21, %v12609_v19  ;;  %v12223_v4 = vld [vmem:[%s15448_s5 + $0x10] sm:$0xff] }
 0x1e2   :  { %v551_v26 = vsub.f32 %v97_v22, %v550_v23  ;;  %v558_v27 = vmul.f32 %v556_v24, %v12511_v13  ;;  %v559_v28 = vmul.f32 %v556_v24, %v12509_v10  ;;  %v560_v29 = vmul.f32 %v556_v24, %v12515_v17 }
 0x1e3   :  { %v561_v30 = vmul.f32 %v556_v24, %v12524_v25 }
 0x1e4   :  { %v566_v31 = vrot.slane %v551_v26, %v12609_v19 }
 0x1e6   :  { %v568_v32 = vadd.f32 %v566_v31, %v558_v27  ;;  %v569_v33 = vadd.f32 %v566_v31, %v559_v28  ;;  %v570_v34 = vadd.f32 %v566_v31, %v560_v29  ;;  %v571_v35 = vadd.f32 %v566_v31, %v561_v30 }
 0x1e8   :  { %vm572_vm1 = vcmp.ge.f32.partialorder %v568_v32, 0.0  ;;  %vm573_vm2 = vcmp.ge.f32.partialorder %v569_v33, 0.0  ;;  %vm574_vm3 = vcmp.ge.f32.partialorder %v570_v34, 0.0  ;;  %vm575_vm4 = vcmp.ge.f32.partialorder %v571_v35, 0.0 }
 0x1e9   :  { %v576_v36 = vmul.f32 0.1, %v568_v32  ;;  %v577_v37 = vmul.f32 0.1, %v569_v33  ;;  %v578_v38 = vmul.f32 0.1, %v570_v34 }
 0x1ea   :  { %v579_v13 = vmul.f32 0.1, %v571_v35 }
 0x1eb   :  { %v580_v39 = vsel %vm572_vm1, %v568_v32, %v576_v36  ;;  %v581_v10 = vsel %vm573_vm2, %v569_v33, %v577_v37  ;;  %v582_v40 = vsel %vm574_vm3, %v570_v34, %v578_v38 }
 0x1ec   :  { %v583_v17 = vsel %vm575_vm4, %v571_v35, %v579_v13  ;;  %584 = vst [vmem:[#allocation2 + $0x1] sm:$0xff] %v580_v39  ;;  %585 = vst [vmem:[#allocation2 + $0x9] sm:$0xff] %v581_v10  ;;  %v672_v25 = vpack.c.bf16 %v581_v10, %v580_v39 }
 0x1ed   :  { %586 = vst [vmem:[#allocation2 + $0x19] sm:$0xff] %v582_v40  ;;  %587 = vst [vmem:[#allocation2 + $0x21] sm:$0xff] %v583_v17  ;;  %v675_v51 = vpack.c.bf16 %v583_v17, %v582_v40 }
 0x1ee   :  { %859 = vmatprep.mubr.bf16.mxu0 %v672_v25 }
 0x1f3   :  { %v667_v41 = vld [vmem:[#allocation2 + $0x2] sm:$0xff]  ;;  %v668_v43 = vld [vmem:[#allocation2 + $0xa] sm:$0xff] }
 0x1f4   :  { %v659_v44 = vld [vmem:[#allocation2] sm:$0xff]  ;;  %v673_v45 = vpack.c.bf16 %v668_v43, %v667_v41  ;;  %v660_v46 = vld [vmem:[#allocation2 + $0x8] sm:$0xff]  ;;  %v661_v53 = vld [vmem:[#allocation2 + $0x18] sm:$0xff] }
 0x1f5   :  { %v669_v47 = vld [vmem:[#allocation2 + $0x1a] sm:$0xff]  ;;  %v670_v48 = vld [vmem:[#allocation2 + $0x22] sm:$0xff]  ;;  %v671_v49 = vpack.c.bf16 %v660_v46, %v659_v44 }
 0x1f6   :  { %v676_v50 = vpack.c.bf16 %v670_v48, %v669_v47  ;;  %10543 = vmatprep.mubr.bf16.mxu1 %v673_v45  ;;  %v662_v54 = vld [vmem:[#allocation2 + $0x20] sm:$0xff] }
 0x1f7   :  { %860 = vmatmul.mubr.bf16.vlgmr.msra.gmra.mxu0 %v671_v49  ;;  %v674_v57 = vpack.c.bf16 %v662_v54, %v661_v53 }
 0x1f8   :  { %10544 = vmatmul.mubr.bf16.vlgmr.msra.gmra.mxu1 %v676_v50  ;;  %867 = vmatprep.mubr.bf16.mxu0 %v675_v51 }
 0x1f9   :  { %10548 = vmatpush3.msra.mxu0 %v12210_v52  ;;  %10583 = vmatpush3.msra.mxu1 %v12210_v52 }
 0x1fa   :  { %10549 = vmatprep.subr.mxu0 %v12248_v42  ;;  %10584 = vmatprep.subr.mxu1 %v12248_v42 }
 0x1fb   :  { %10550 = vmatpush3.msra.mxu0 %v12211_v55  ;;  %10585 = vmatpush3.msra.mxu1 %v12211_v55 }
 0x1fc   :  { %10551 = vmatprep.subr.mxu0 %v12248_v42  ;;  %10586 = vmatprep.subr.mxu1 %v12248_v42 }
 0x1fd   :  { %10552 = vmatpush3.msra.mxu0 %v12212_v56  ;;  %10587 = vmatpush3.msra.mxu1 %v12212_v56 }
 0x1fe   :  { %10553 = vmatprep.subr.mxu0 %v12248_v42  ;;  %10588 = vmatprep.subr.mxu1 %v12248_v42 }
 0x1ff   :  { %10554 = vmatpush3.msra.mxu0 %v12213_v58  ;;  %10589 = vmatpush3.msra.mxu1 %v12213_v58  ;;  %v11860_v58 = vld [vmem:[%s15444_s1 + $0x238] sm:$0xff]  }
 0x200   :  { %868 = vmatmul.mubr.bf16.gmra.mxu0 %v674_v57  ;;  %10555 = vmatprep.subr.mxu0 %v12248_v42  ;;  %v11859_v57 = vld [vmem:[%s15444_s1 + $0x1f8] sm:$0xff]  }
 0x201   :  { %10556 = vmatpush3.msra.mxu0 %v12214_v59  ;;  %10590 = vmatprep.subr.mxu1 %v12248_v42 }
 0x202   :  { %10557 = vmatprep.subr.mxu0 %v12248_v42  ;;  %10591 = vmatpush3.msra.mxu1 %v12214_v59  ;;  %v11861_v59 = vld [vmem:[%s15444_s1 + $0x1b8] sm:$0xff]  }
 0x203   :  { %10558 = vmatpush3.msra.mxu0 %v12215_v60  ;;  %10592 = vmatprep.subr.mxu1 %v12248_v42 }
 0x204   :  { %10559 = vmatprep.subr.mxu0 %v12248_v42  ;;  %10593 = vmatpush3.msra.mxu1 %v12215_v60  ;;  %v11862_v60 = vld [vmem:[%s15444_s1 + $0x1f0] sm:$0xff]  }
 0x205   :  { %10560 = vmatpush3.msra.mxu0 %v12216_v61  ;;  %10594 = vmatprep.subr.mxu1 %v12248_v42 }
 0x206   :  { %10561 = vmatprep.subr.mxu0 %v12248_v42  ;;  %10595 = vmatpush3.msra.mxu1 %v12216_v61  ;;  %v11863_v61 = vld [vmem:[%s15444_s1 + $0x230] sm:$0xff]  }
 0x207   :  { %10562 = vmatpush3.msra.mxu0 %v12217_v62  ;;  %10596 = vmatprep.subr.mxu1 %v12248_v42 }
 0x208   :  { %10563 = vmatprep.subr.mxu0 %v12248_v42  ;;  %10597 = vmatpush3.msra.mxu1 %v12217_v62  ;;  %v11864_v62 = vld [vmem:[%s15444_s1 + $0x1b0] sm:$0xff]  }
 0x209   :  { %10564 = vmatpush3.msra.mxu0 %v12218_v63  ;;  %10598 = vmatprep.subr.mxu1 %v12248_v42 }
 0x20a   :  { %10565 = vmatprep.subr.mxu0 %v12248_v42  ;;  %10599 = vmatpush3.msra.mxu1 %v12218_v63  ;;  %v11865_v63 = vld [vmem:[%s15444_s1 + $0x1e8] sm:$0xff]  }
 0x20b   :  { %10566 = vmatpush3.msra.mxu0 %v12219_v0  ;;  %10600 = vmatprep.subr.mxu1 %v12248_v42 }
 0x20c   :  { %10567 = vmatprep.subr.mxu0 %v12248_v42  ;;  %10601 = vmatpush3.msra.mxu1 %v12219_v0  ;;  %v11866_v0 = vld [vmem:[%s15444_s1 + $0x228] sm:$0xff]  }
 0x20d   :  { %10568 = vmatpush3.msra.mxu0 %v12220_v1  ;;  %10602 = vmatprep.subr.mxu1 %v12248_v42 }
 0x20e   :  { %10569 = vmatprep.subr.mxu0 %v12248_v42  ;;  %10603 = vmatpush3.msra.mxu1 %v12220_v1  ;;  %v11867_v1 = vld [vmem:[%s15444_s1 + $0x1a8] sm:$0xff]  }
 0x20f   :  { %10570 = vmatpush3.msra.mxu0 %v12221_v2  ;;  %10604 = vmatprep.subr.mxu1 %v12248_v42 }
 0x210   :  { %10571 = vmatprep.subr.mxu0 %v12248_v42  ;;  %10605 = vmatpush3.msra.mxu1 %v12221_v2  ;;  %v11868_v2 = vld [vmem:[%s15444_s1 + $0x1e0] sm:$0xff]  }
 0x211   :  { %10572 = vmatpush3.msra.mxu0 %v12222_v3  ;;  %10606 = vmatprep.subr.mxu1 %v12248_v42 }
 0x212   :  { %10573 = vmatprep.subr.mxu0 %v12248_v42  ;;  %10607 = vmatpush3.msra.mxu1 %v12222_v3  ;;  %v11869_v3 = vld [vmem:[%s15444_s1 + $0x220] sm:$0xff]  }
 0x213   :  { %10574 = vmatpush3.msra.mxu0 %v12223_v4  ;;  %10608 = vmatprep.subr.mxu1 %v12248_v42 }
 0x214   :  { %10575 = vmatprep.subr.mxu0 %v12248_v42  ;;  %10609 = vmatpush3.msra.mxu1 %v12223_v4  ;;  %v11870_v4 = vld [vmem:[%s15444_s1 + $0x1a0] sm:$0xff]  }
 0x215   :  { %10576 = vmatpush3.msra.mxu0 %v12224_v5  ;;  %10610 = vmatprep.subr.mxu1 %v12248_v42 }
 0x216   :  { %10577 = vmatprep.subr.mxu0 %v12248_v42  ;;  %10579 = vmatprep.mubr.msk.f32.mxu0 %vm12249_vm0, %v12248_v42 }
 0x217   :  { %10578 = vmatpush3.msra.mxu0 %v12225_v6  ;;  %10611 = vmatpush3.msra.mxu1 %v12224_v5  ;;  %v11871_v5 = vld [vmem:[%s15444_s1 + $0x1d8] sm:$0xff]  }
 0x218   :  { %10614 = vmatprep.mubr.msk.f32.mxu1 %vm12249_vm0, %v12248_v42  ;;  %10612 = vmatprep.subr.mxu1 %v12248_v42 }
 0x219   :  { %10613 = vmatpush3.msra.mxu1 %v12225_v6  ;;  %9576 = vmatprep.subr.bf16.mxu0 %v11859_v57  ;;  %v11872_v6 = vld [vmem:[%s15444_s1 + $0x218] sm:$0xff]  }
 0x21a   :  { %10617 = vmatprep.subr.bf16.mxu1 %v11860_v58 }
 0x2b7   :  { %v9520_v7 = vpop.f32.mrf.mxu0 }
 0x2b8   :  { %v10545_v8 = vpop.f32.mrf.mxu1 }
 0x2b9   :  { %v9521_v9 = vpop.f32.mrf.mxu0 }
 0x2ba   :  { %v910_v11 = vpop.f32.mrf.mxu1  ;;  %v9522_v14 = vadd.f32 %v9521_v9, %v9520_v7  ;;  %v11873_v7 = vld [vmem:[%s15444_s1 + $0x198] sm:$0xff]   ;;  %v11875_v9 = vld [vmem:[%s15444_s1 + $0x210] sm:$0xff]  }
 0x2bb   :  { %v9523_v12 = vpop.f32.mrf.mxu0 }
 0x2bc   :  { %v10546_v18 = vpop.f32.mrf.mxu1  ;;  %v862_v23 = vadd.f32 %v9522_v14, %v8200_v15  ;;  %v11878_v14 = vld [vmem:[%s15444_s1 + $0x208] sm:$0xff]  }
 0x2bd   :  { %v9524_v20 = vpop.f32.mrf.mxu0 }
 0x2be   :  { %v9525_v21 = vadd.f32 %v9524_v20, %v9523_v12  ;;  %v913_v26 = vpop.f32.mrf.mxu1  ;;  %v12707_v31 = vadd.f32 %v910_v11, %v862_v23  ;;  %v11876_v11 = vld [vmem:[%s15444_s1 + $0x190] sm:$0xff]   ;;  %v11877_v12 = vld [vmem:[%s15444_s1 + $0x1c8] sm:$0xff]   ;;  %v11881_v20 = vld [vmem:[%s15444_s1 + $0x200] sm:$0xff]  }
 0x2c0   :  { %v9526_v22 = vpop.f32.mrf.mxu0  ;;  %v865_v24 = vadd.f32 %v9525_v21, %v8200_v15  ;;  %v1004_v37 = vmul.f32 %v12707_v31, %v12707_v31  ;;  %v11882_v21 = vld [vmem:[%s15444_s1 + $0x180] sm:$0xff]  }
 0x2c2   :  { %v9527_v27 = vpop.f32.mrf.mxu0  ;;  %v12705_v28 = vadd.f32 %v913_v26, %v865_v24 }
 0x2c3   :  { %v9528_v29 = vadd.f32 %v9527_v27, %v9526_v22 }
 0x2c4   :  { %v9529_v30 = vpop.f32.mrf.mxu0  ;;  %v1005_v34 = vmul.f32 %v12705_v28, %v12705_v28  ;;  %v925_v38 = vadd.f32 %v12705_v28, %v12707_v31 }
 0x2c5   :  { %v870_v32 = vadd.f32 %v9528_v29, %v8200_v15 }
 0x2c6   :  { %v9530_v33 = vpop.f32.mrf.mxu0  ;;  %v1008_v10 = vadd.f32 %v1005_v34, %v1004_v37 }
 0x2c7   :  { %v12711_v35 = vadd.f32 %v10545_v8, %v870_v32  ;;  %v9531_v36 = vadd.f32 %v9530_v33, %v9529_v30  ;;  %v11874_v8 = vld [vmem:[%s15444_s1 + $0x1d0] sm:$0xff]  }
 0x2c9   :  { %v1006_v13 = vmul.f32 %v12711_v35, %v12711_v35  ;;  %v873_v39 = vadd.f32 %v9531_v36, %v8200_v15  ;;  %v926_v40 = vadd.f32 %v925_v38, %v12711_v35  ;;  %v11879_v15 = vld [vmem:[%s15444_s1 + $0x188] sm:$0xff]   ;;  %v8198_v36 = vld [vmem:[%s15446_s3 + $0x1] sm:$0x1] }
 0x2cb   :  { %v12720_v17 = vadd.f32 %v10546_v18, %v873_v39  ;;  %v1009_v25 = vadd.f32 %v1008_v10, %v1006_v13  ;;  %v11880_v18 = vld [vmem:[%s15444_s1 + $0x1c0] sm:$0xff]  }
 0x2cc   :  { %v8199_v13 = vld [vmem:[%s15447_s4 + $0x1] sm:$0x1] }
 0x2cd   :  { %v927_v41 = vadd.f32 %v926_v40, %v12720_v17  ;;  %v1007_v43 = vmul.f32 %v12720_v17, %v12720_v17 }
 0x2cf   :  { %v928_v44 = vrot.slane %v927_v41, 4  ;;  %v1010_v45 = vadd.f32 %v1009_v25, %v1007_v43 }
 0x2d1   :  { %v929_v46 = vadd.f32 %v928_v44, %v927_v41  ;;  %v1011_v47 = vrot.slane %v1010_v45, 4 }
 0x2d3   :  { %v930_v48 = vrot.slane %v929_v46, 2  ;;  %v1012_v49 = vadd.f32 %v1011_v47, %v1010_v45 }
 0x2d5   :  { %v931_v50 = vadd.f32 %v930_v48, %v929_v46  ;;  %v1013_v51 = vrot.slane %v1012_v49, 2 }
 0x2d7   :  { %v932_v52 = vrot.slane %v931_v50, 1  ;;  %v1014_v53 = vadd.f32 %v1013_v51, %v1012_v49 }
 0x2d9   :  { %v933_v54 = vadd.f32 %v932_v52, %v931_v50  ;;  %v1015_v55 = vrot.slane %v1014_v53, 1 }
 0x2db   :  { %10580 = vmatmul.mubr.f32.vlgmr.msra.gmra.mxu0 %v933_v54  ;;  %v1016_v56 = vadd.f32 %v1015_v55, %v1014_v53 }
 0x2dc   :  { %9577 = vmatpush3.bf16.msra.mxu0 %v11861_v59 }
 0x2dd   :  { %10615 = vmatmul.mubr.f32.vlgmr.msra.gmra.mxu1 %v1016_v56  ;;  %9578 = vmatprep.subr.bf16.mxu0 %v11862_v60 }
 0x2de   :  { %10618 = vmatpush3.bf16.msra.mxu1 %v11860_v58 }
 0x2df   :  { %10619 = vmatprep.subr.bf16.mxu1 %v11863_v61 }
 0x2e0   :  { %9579 = vmatpush3.bf16.msra.mxu0 %v11864_v62 }
 0x2e1   :  { %9580 = vmatprep.subr.bf16.mxu0 %v11865_v63 }
 0x2e2   :  { %10620 = vmatpush3.bf16.msra.mxu1 %v11863_v61 }
 0x2e3   :  { %10621 = vmatprep.subr.bf16.mxu1 %v11866_v0 }
 0x2e4   :  { %9581 = vmatpush3.bf16.msra.mxu0 %v11867_v1 }
 0x2e5   :  { %9582 = vmatprep.subr.bf16.mxu0 %v11868_v2 }
 0x2e6   :  { %10622 = vmatpush3.bf16.msra.mxu1 %v11866_v0 }
 0x2e7   :  { %10623 = vmatprep.subr.bf16.mxu1 %v11869_v3 }
 0x2e8   :  { %9583 = vmatpush3.bf16.msra.mxu0 %v11870_v4  ;;  %v1203_v4 = vld [vmem:[%s15448_s5 + $0x78] sm:$0xff] }
 0x2e9   :  { %9584 = vmatprep.subr.bf16.mxu0 %v11871_v5  ;;  %v1202_v5 = vld [vmem:[%s15448_s5 + $0x70] sm:$0xff] }
 0x2ea   :  { %10624 = vmatpush3.bf16.msra.mxu1 %v11869_v3 }
 0x2eb   :  { %10625 = vmatprep.subr.bf16.mxu1 %v11872_v6 }
 0x2ec   :  { %9585 = vmatpush3.bf16.msra.mxu0 %v11873_v7  ;;  %v1200_v7 = vld [vmem:[%s15448_s5 + $0x60] sm:$0xff] }
 0x2ed   :  { %9586 = vmatprep.subr.bf16.mxu0 %v11874_v8  ;;  %v1199_v8 = vld [vmem:[%s15448_s5 + $0x58] sm:$0xff] }
 0x2ee   :  { %10626 = vmatpush3.bf16.msra.mxu1 %v11872_v6  ;;  %v1201_v6 = vld [vmem:[%s15448_s5 + $0x68] sm:$0xff] }
 0x2ef   :  { %10627 = vmatprep.subr.bf16.mxu1 %v11875_v9 }
 0x2f0   :  { %9587 = vmatpush3.bf16.msra.mxu0 %v11876_v11  ;;  %v1197_v11 = vld [vmem:[%s15448_s5 + $0x48] sm:$0xff] }
 0x2f1   :  { %9588 = vmatprep.subr.bf16.mxu0 %v11877_v12  ;;  %v1196_v12 = vld [vmem:[%s15448_s5 + $0x40] sm:$0xff] }
 0x2f2   :  { %10628 = vmatpush3.bf16.msra.mxu1 %v11875_v9  ;;  %v1198_v9 = vld [vmem:[%s15448_s5 + $0x50] sm:$0xff] }
 0x2f3   :  { %10629 = vmatprep.subr.bf16.mxu1 %v11878_v14 }
 0x2f4   :  { %9589 = vmatpush3.bf16.msra.mxu0 %v11879_v15  ;;  %v1194_v15 = vld [vmem:[%s15448_s5 + $0x30] sm:$0xff] }
 0x2f5   :  { %9590 = vmatprep.subr.bf16.mxu0 %v11880_v18  ;;  %v1193_v18 = vld [vmem:[%s15448_s5 + $0x28] sm:$0xff] }
 0x2f6   :  { %10630 = vmatpush3.bf16.msra.mxu1 %v11878_v14  ;;  %v1195_v14 = vld [vmem:[%s15448_s5 + $0x38] sm:$0xff] }
 0x2f7   :  { %10631 = vmatprep.subr.bf16.mxu1 %v11881_v20 }
 0x2f8   :  { %9591 = vmatpush3.bf16.msra.mxu0 %v11882_v21  ;;  %v1191_v21 = vld [vmem:[%s15448_s5 + $0x18] sm:$0xff] }
 0x2f9   :  { %10637 = vmatprep.subr.mxu0 %v12248_v42 }
 0x2fa   :  { %10632 = vmatpush3.bf16.msra.mxu1 %v11881_v20  ;;  %v1192_v20 = vld [vmem:[%s15448_s5 + $0x20] sm:$0xff] }
 0x2fb   :  { %10672 = vmatprep.subr.mxu1 %v12248_v42 }
 0x39b   :  { %v1000_v22 = vpop.f32.mrf.mxu0 }
 0x39c   :  { %v1087_v23 = vmul.f32 0.001953125, %v1000_v22  ;;  %v1190_v22 = vld [vmem:[%s15448_s5 + $0x10] sm:$0xff] }
 0x39d   :  { %v10581_v24 = vpop.f32.mrf.mxu0  ;;  %v1083_v26 = vpop.f32.mrf.mxu1 }
 0x39e   :  { %v1089_v27 = vmul.f32 %v1087_v23, %v1087_v23  ;;  %v1088_v29 = vmul.f32 0.001953125, %v1083_v26  ;;  %v1188_v24 = vld [vmem:[%s15448_s5] sm:$0xff] }
 0x39f   :  { %v10616_v30 = vpop.f32.mrf.mxu1 }
 0x3a0   :  { %v1090_v32 = vsub.f32 %v1088_v29, %v1089_v27 }
 0x3a2   :  { %v1091_v33 = vmax.f32 %v1090_v32, 0.0 }
 0x3a4   :  { %v1092_v34 = vadd.f32 1e-05, %v1091_v33 }
 0x3a6   :  { %12182 = vrsqrt.f32 %v1092_v34  ;;  %v8276_v34 = vld [vmem:[%s15445_s2 + $0x2] ss:$0 sm:$0xff] }
 0x3b3   :  { %v12183_v37 = vpop.eup %12182 }
 0x3b4   :  { %v1094_v38 = vmul.f32 %v12183_v37, %v8198_v36 }
 0x3b6   :  { %v1095_v39 = vmul.f32 %v1094_v38, %v1087_v23  ;;  %v1101_v10 = vrot.slane %v1094_v38, %v12609_v19  ;;  %v1189_v23 = vld [vmem:[%s15448_s5 + $0x8] sm:$0xff] }
 0x3b8   :  { %v1096_v40 = vsub.f32 %v8199_v13, %v1095_v39  ;;  %v1103_v25 = vmul.f32 %v1101_v10, %v12707_v31  ;;  %v1104_v41 = vmul.f32 %v1101_v10, %v12705_v28  ;;  %v1105_v43 = vmul.f32 %v1101_v10, %v12711_v35 }
 0x3b9   :  { %v1106_v44 = vmul.f32 %v1101_v10, %v12720_v17 }
 0x3ba   :  { %v1111_v45 = vrot.slane %v1096_v40, %v12609_v19 }
 0x3bc   :  { %v1113_v46 = vadd.f32 %v1111_v45, %v1103_v25  ;;  %v1114_v47 = vadd.f32 %v1111_v45, %v1104_v41  ;;  %v1115_v48 = vadd.f32 %v1111_v45, %v1105_v43  ;;  %v1116_v49 = vadd.f32 %v1111_v45, %v1106_v44 }
 0x3be   :  { %vm1117_vm5 = vcmp.ge.f32.partialorder %v1113_v46, 0.0  ;;  %vm1118_vm6 = vcmp.ge.f32.partialorder %v1114_v47, 0.0  ;;  %vm1119_vm7 = vcmp.ge.f32.partialorder %v1115_v48, 0.0  ;;  %vm1120_vm8 = vcmp.ge.f32.partialorder %v1116_v49, 0.0 }
 0x3bf   :  { %v1121_v50 = vmul.f32 0.1, %v1113_v46  ;;  %v1122_v51 = vmul.f32 0.1, %v1114_v47  ;;  %v1123_v52 = vmul.f32 0.1, %v1115_v48 }
 0x3c0   :  { %v1124_v31 = vmul.f32 0.1, %v1116_v49 }
 0x3c1   :  { %v1125_v53 = vsel %vm1117_vm5, %v1113_v46, %v1121_v50  ;;  %v1126_v28 = vsel %vm1118_vm6, %v1114_v47, %v1122_v51  ;;  %v1127_v54 = vsel %vm1119_vm7, %v1115_v48, %v1123_v52 }
 0x3c2   :  { %v1128_v35 = vsel %vm1120_vm8, %v1116_v49, %v1124_v31  ;;  %1129 = vst [vmem:[#allocation2 + $0x1] sm:$0xff] %v1125_v53  ;;  %1130 = vst [vmem:[#allocation2 + $0x9] sm:$0xff] %v1126_v28  ;;  %v1217_v17 = vpack.c.bf16 %v1126_v28, %v1125_v53 }
 0x3c3   :  { %1131 = vst [vmem:[#allocation2 + $0x19] sm:$0xff] %v1127_v54  ;;  %1132 = vst [vmem:[#allocation2 + $0x21] sm:$0xff] %v1128_v35  ;;  %v1220_v0 = vpack.c.bf16 %v1128_v35, %v1127_v54 }
 0x3c4   :  { %1404 = vmatprep.mubr.bf16.mxu0 %v1217_v17 }
 0x3c9   :  { %v1212_v55 = vld [vmem:[#allocation2 + $0x2] sm:$0xff]  ;;  %v1213_v56 = vld [vmem:[#allocation2 + $0xa] sm:$0xff] }
 0x3ca   :  { %v1204_v57 = vld [vmem:[#allocation2] sm:$0xff]  ;;  %v1218_v58 = vpack.c.bf16 %v1213_v56, %v1212_v55  ;;  %v1205_v59 = vld [vmem:[#allocation2 + $0x8] sm:$0xff]  ;;  %v1206_v1 = vld [vmem:[#allocation2 + $0x18] sm:$0xff] }
 0x3cb   :  { %v1214_v60 = vld [vmem:[#allocation2 + $0x1a] sm:$0xff]  ;;  %v1215_v61 = vld [vmem:[#allocation2 + $0x22] sm:$0xff]  ;;  %v1216_v62 = vpack.c.bf16 %v1205_v59, %v1204_v57 }
 0x3cc   :  { %v1221_v63 = vpack.c.bf16 %v1215_v61, %v1214_v60  ;;  %10633 = vmatprep.mubr.bf16.mxu1 %v1218_v58  ;;  %v1207_v2 = vld [vmem:[#allocation2 + $0x20] sm:$0xff] }
 0x3cd   :  { %1405 = vmatmul.mubr.bf16.vlgmr.msra.gmra.mxu0 %v1216_v62  ;;  %v1219_v3 = vpack.c.bf16 %v1207_v2, %v1206_v1 }
 0x3ce   :  { %10634 = vmatmul.mubr.bf16.vlgmr.msra.gmra.mxu1 %v1221_v63  ;;  %1412 = vmatprep.mubr.bf16.mxu0 %v1220_v0 }
 0x3cf   :  { %10704 = vmatprep.mubr.msk.f32.mxu1 %vm12249_vm0, %v12248_v42  ;;  %10638 = vmatpush3.msra.mxu0 %v1203_v4 }
 0x3d0   :  { %10673 = vmatpush3.msra.mxu1 %v1203_v4  ;;  %10639 = vmatprep.subr.mxu0 %v12248_v42 }
 0x3d1   :  { %10674 = vmatprep.subr.mxu1 %v12248_v42  ;;  %10640 = vmatpush3.msra.mxu0 %v1202_v5 }
 0x3d2   :  { %10675 = vmatpush3.msra.mxu1 %v1202_v5  ;;  %10641 = vmatprep.subr.mxu0 %v12248_v42 }
 0x3d3   :  { %10676 = vmatprep.subr.mxu1 %v12248_v42  ;;  %10642 = vmatpush3.msra.mxu0 %v1201_v6 }
 0x3d4   :  { %10677 = vmatpush3.msra.mxu1 %v1201_v6  ;;  %10643 = vmatprep.subr.mxu0 %v12248_v42  ;;  %v11883_v6 = vld [vmem:[%s15444_s1 + $0x2b8] sm:$0xff]  }
 0x3d5   :  { %1413 = vmatmul.mubr.bf16.gmra.mxu0 %v1219_v3  ;;  %10678 = vmatprep.subr.mxu1 %v12248_v42 }
 0x3d6   :  { %10669 = vmatprep.mubr.msk.f32.mxu0 %vm12249_vm0, %v12248_v42  ;;  %10644 = vmatpush3.msra.mxu0 %v1200_v7 }
 0x3d7   :  { %10679 = vmatpush3.msra.mxu1 %v1200_v7  ;;  %10645 = vmatprep.subr.mxu0 %v12248_v42  ;;  %v11884_v7 = vld [vmem:[%s15444_s1 + $0x278] sm:$0xff]  }
 0x3d8   :  { %10680 = vmatprep.subr.mxu1 %v12248_v42  ;;  %10646 = vmatpush3.msra.mxu0 %v1199_v8 }
 0x3d9   :  { %10681 = vmatpush3.msra.mxu1 %v1199_v8  ;;  %10647 = vmatprep.subr.mxu0 %v12248_v42  ;;  %v11885_v8 = vld [vmem:[%s15444_s1 + $0x2f8] sm:$0xff]  }
 0x3da   :  { %10682 = vmatprep.subr.mxu1 %v12248_v42  ;;  %10648 = vmatpush3.msra.mxu0 %v1198_v9 }
 0x3db   :  { %10683 = vmatpush3.msra.mxu1 %v1198_v9  ;;  %10649 = vmatprep.subr.mxu0 %v12248_v42  ;;  %v11886_v9 = vld [vmem:[%s15444_s1 + $0x2b0] sm:$0xff]  }
 0x3dc   :  { %10684 = vmatprep.subr.mxu1 %v12248_v42  ;;  %10650 = vmatpush3.msra.mxu0 %v1197_v11 }
 0x3dd   :  { %10685 = vmatpush3.msra.mxu1 %v1197_v11  ;;  %10651 = vmatprep.subr.mxu0 %v12248_v42  ;;  %v11887_v11 = vld [vmem:[%s15444_s1 + $0x270] sm:$0xff]  }
 0x3de   :  { %10686 = vmatprep.subr.mxu1 %v12248_v42  ;;  %10652 = vmatpush3.msra.mxu0 %v1196_v12 }
 0x3df   :  { %10687 = vmatpush3.msra.mxu1 %v1196_v12  ;;  %10653 = vmatprep.subr.mxu0 %v12248_v42  ;;  %v11888_v12 = vld [vmem:[%s15444_s1 + $0x2f0] sm:$0xff]  }
 0x3e0   :  { %10688 = vmatprep.subr.mxu1 %v12248_v42  ;;  %10654 = vmatpush3.msra.mxu0 %v1195_v14 }
 0x3e1   :  { %10689 = vmatpush3.msra.mxu1 %v1195_v14  ;;  %10655 = vmatprep.subr.mxu0 %v12248_v42  ;;  %v11889_v14 = vld [vmem:[%s15444_s1 + $0x2a8] sm:$0xff]  }
 0x3e2   :  { %10690 = vmatprep.subr.mxu1 %v12248_v42  ;;  %10656 = vmatpush3.msra.mxu0 %v1194_v15 }
 0x3e3   :  { %10691 = vmatpush3.msra.mxu1 %v1194_v15  ;;  %10657 = vmatprep.subr.mxu0 %v12248_v42  ;;  %v11890_v15 = vld [vmem:[%s15444_s1 + $0x268] sm:$0xff]  }
 0x3e4   :  { %10692 = vmatprep.subr.mxu1 %v12248_v42  ;;  %10658 = vmatpush3.msra.mxu0 %v1193_v18 }
 0x3e5   :  { %10693 = vmatpush3.msra.mxu1 %v1193_v18  ;;  %10659 = vmatprep.subr.mxu0 %v12248_v42  ;;  %v11891_v18 = vld [vmem:[%s15444_s1 + $0x2e8] sm:$0xff]  }
 0x3e6   :  { %10694 = vmatprep.subr.mxu1 %v12248_v42  ;;  %10660 = vmatpush3.msra.mxu0 %v1192_v20 }
 0x3e7   :  { %10695 = vmatpush3.msra.mxu1 %v1192_v20  ;;  %10661 = vmatprep.subr.mxu0 %v12248_v42  ;;  %v11892_v20 = vld [vmem:[%s15444_s1 + $0x2a0] sm:$0xff]  }
 0x3e8   :  { %10696 = vmatprep.subr.mxu1 %v12248_v42  ;;  %10662 = vmatpush3.msra.mxu0 %v1191_v21 }
 0x3e9   :  { %10697 = vmatpush3.msra.mxu1 %v1191_v21  ;;  %10663 = vmatprep.subr.mxu0 %v12248_v42  ;;  %v11893_v21 = vld [vmem:[%s15444_s1 + $0x260] sm:$0xff]  }
 0x3ea   :  { %10698 = vmatprep.subr.mxu1 %v12248_v42  ;;  %10664 = vmatpush3.msra.mxu0 %v1190_v22 }
 0x3eb   :  { %10699 = vmatpush3.msra.mxu1 %v1190_v22  ;;  %10665 = vmatprep.subr.mxu0 %v12248_v42  ;;  %v11894_v22 = vld [vmem:[%s15444_s1 + $0x2e0] sm:$0xff]  }
 0x3ec   :  { %10700 = vmatprep.subr.mxu1 %v12248_v42  ;;  %10666 = vmatpush3.msra.mxu0 %v1189_v23 }
 0x3ed   :  { %10701 = vmatpush3.msra.mxu1 %v1189_v23  ;;  %10667 = vmatprep.subr.mxu0 %v12248_v42  ;;  %v11895_v23 = vld [vmem:[%s15444_s1 + $0x298] sm:$0xff]  }
 0x3ee   :  { %10702 = vmatprep.subr.mxu1 %v12248_v42  ;;  %10668 = vmatpush3.msra.mxu0 %v1188_v24 }
 0x3ef   :  { %10703 = vmatpush3.msra.mxu1 %v1188_v24  ;;  %9648 = vmatprep.subr.bf16.mxu0 %v11883_v6  ;;  %v11896_v24 = vld [vmem:[%s15444_s1 + $0x258] sm:$0xff]  }
 0x3f0   :  { %10707 = vmatprep.subr.bf16.mxu1 %v12248_v42 }
 0x48d   :  { %v9592_v26 = vpop.f32.mrf.mxu0 }
 0x48e   :  { %v10635_v27 = vpop.f32.mrf.mxu1 }
 0x48f   :  { %v9593_v29 = vpop.f32.mrf.mxu0 }
 0x490   :  { %v1455_v30 = vpop.f32.mrf.mxu1  ;;  %v9594_v33 = vadd.f32 %v9593_v29, %v9592_v26  ;;  %v11897_v26 = vld [vmem:[%s15444_s1 + $0x2d8] sm:$0xff]   ;;  %v11899_v29 = vld [vmem:[%s15444_s1 + $0x250] sm:$0xff]  }
 0x491   :  { %v9595_v32 = vpop.f32.mrf.mxu0 }
 0x492   :  { %v10636_v36 = vpop.f32.mrf.mxu1  ;;  %v1407_v39 = vadd.f32 %v9594_v33, %v8276_v34  ;;  %v11902_v33 = vld [vmem:[%s15444_s1 + $0x248] sm:$0xff]  }
 0x493   :  { %v9596_v37 = vpop.f32.mrf.mxu0 }
 0x494   :  { %v9597_v38 = vadd.f32 %v9596_v37, %v9595_v32  ;;  %v1458_v40 = vpop.f32.mrf.mxu1  ;;  %v12899_v45 = vadd.f32 %v1455_v30, %v1407_v39  ;;  %v11900_v30 = vld [vmem:[%s15444_s1 + $0x2d0] sm:$0xff]   ;;  %v11901_v32 = vld [vmem:[%s15444_s1 + $0x288] sm:$0xff]   ;;  %v11905_v37 = vld [vmem:[%s15444_s1 + $0x240] sm:$0xff]  }
 0x495   :  { %v9598_v13 = vpop.f32.mrf.mxu0 }
 0x496   :  { %v1410_v10 = vadd.f32 %v9597_v38, %v8276_v34  ;;  %v1549_v51 = vmul.f32 %v12899_v45, %v12899_v45  ;;  %v11906_v38 = vld [vmem:[%s15444_s1 + $0x2c0] sm:$0xff]  }
 0x497   :  { %v9599_v25 = vpop.f32.mrf.mxu0 }
 0x498   :  { %v12897_v41 = vadd.f32 %v1458_v40, %v1410_v10  ;;  %v9600_v43 = vadd.f32 %v9599_v25, %v9598_v13 }
 0x499   :  { %v9601_v44 = vpop.f32.mrf.mxu0 }
 0x49a   :  { %v1415_v46 = vadd.f32 %v9600_v43, %v8276_v34  ;;  %v1550_v48 = vmul.f32 %v12897_v41, %v12897_v41  ;;  %v1470_v52 = vadd.f32 %v12897_v41, %v12899_v45 }
 0x49b   :  { %v9602_v47 = vpop.f32.mrf.mxu0 }
 0x49c   :  { %v12903_v49 = vadd.f32 %v10635_v27, %v1415_v46  ;;  %v9603_v50 = vadd.f32 %v9602_v47, %v9601_v44  ;;  %v1553_v28 = vadd.f32 %v1550_v48, %v1549_v51  ;;  %v11898_v27 = vld [vmem:[%s15444_s1 + $0x290] sm:$0xff]  }
 0x49e   :  { %v1551_v31 = vmul.f32 %v12903_v49, %v12903_v49  ;;  %v1418_v53 = vadd.f32 %v9603_v50, %v8276_v34  ;;  %v1471_v54 = vadd.f32 %v1470_v52, %v12903_v49  ;;  %v11904_v34 = vld [vmem:[%s15444_s1 + $0x280] sm:$0xff]  }
 0x49f   :  { %v8274_v50 = vld [vmem:[%s15446_s3 + $0x2] sm:$0x1] }
 0x4a0   :  { %v12912_v35 = vadd.f32 %v10636_v36, %v1418_v53  ;;  %v1554_v17 = vadd.f32 %v1553_v28, %v1551_v31  ;;  %v11903_v36 = vld [vmem:[%s15444_s1 + $0x2c8] sm:$0xff]   ;;  %v8275_v31 = vld [vmem:[%s15447_s4 + $0x2] sm:$0x1] }
 0x4a2   :  { %v1472_v55 = vadd.f32 %v1471_v54, %v12912_v35  ;;  %v1552_v56 = vmul.f32 %v12912_v35, %v12912_v35 }
 0x4a4   :  { %v1473_v57 = vrot.slane %v1472_v55, 4  ;;  %v1555_v58 = vadd.f32 %v1554_v17, %v1552_v56 }
 0x4a6   :  { %v1474_v59 = vadd.f32 %v1473_v57, %v1472_v55  ;;  %v1556_v60 = vrot.slane %v1555_v58, 4 }
 0x4a8   :  { %v1475_v61 = vrot.slane %v1474_v59, 2  ;;  %v1557_v62 = vadd.f32 %v1556_v60, %v1555_v58 }
 0x4aa   :  { %v1476_v63 = vadd.f32 %v1475_v61, %v1474_v59  ;;  %v1558_v0 = vrot.slane %v1557_v62, 2 }
 0x4ac   :  { %v1477_v1 = vrot.slane %v1476_v63, 1  ;;  %v1559_v2 = vadd.f32 %v1558_v0, %v1557_v62 }
 0x4ae   :  { %v1478_v3 = vadd.f32 %v1477_v1, %v1476_v63  ;;  %v1560_v4 = vrot.slane %v1559_v2, 1 }
 0x4b0   :  { %10670 = vmatmul.mubr.f32.vlgmr.msra.gmra.mxu0 %v1478_v3  ;;  %v1561_v5 = vadd.f32 %v1560_v4, %v1559_v2 }
 0x4b1   :  { %9649 = vmatpush3.bf16.msra.mxu0 %v11884_v7 }
 0x4b2   :  { %10705 = vmatmul.mubr.f32.vlgmr.msra.gmra.mxu1 %v1561_v5  ;;  %9650 = vmatprep.subr.bf16.mxu0 %v11886_v9 }
 0x4b3   :  { %10723 = vmatprep.mubr.msk.bf16.mxu1 %vm12249_vm0, %v12248_v42  ;;  %10708 = vmatpush3.bf16.msra.mxu1 %v11885_v8 }
 0x4b4   :  { %10709 = vmatprep.subr.bf16.mxu1 %v12248_v42 }
 0x4b5   :  { %9651 = vmatpush3.bf16.msra.mxu0 %v11887_v11 }
 0x4b6   :  { %9652 = vmatprep.subr.bf16.mxu0 %v11889_v14 }
 0x4b7   :  { %10710 = vmatpush3.bf16.msra.mxu1 %v11888_v12 }
 0x4b8   :  { %10711 = vmatprep.subr.bf16.mxu1 %v12248_v42 }
 0x4b9   :  { %9653 = vmatpush3.bf16.msra.mxu0 %v11890_v15 }
 0x4ba   :  { %9654 = vmatprep.subr.bf16.mxu0 %v11892_v20 }
 0x4bb   :  { %10712 = vmatpush3.bf16.msra.mxu1 %v11891_v18  ;;  %v13015_v18 = vld [vmem:[%s15448_s5 + $0xf8] sm:$0xff] }
 0x4bc   :  { %10713 = vmatprep.subr.bf16.mxu1 %v12248_v42 }
 0x4bd   :  { %9655 = vmatpush3.bf16.msra.mxu0 %v11893_v21 }
 0x4be   :  { %9656 = vmatprep.subr.bf16.mxu0 %v11895_v23 }
 0x4bf   :  { %10714 = vmatpush3.bf16.msra.mxu1 %v11894_v22  ;;  %v13020_v22 = vld [vmem:[%s15448_s5 + $0xf0] sm:$0xff] }
 0x4c0   :  { %10715 = vmatprep.subr.bf16.mxu1 %v12248_v42 }
 0x4c1   :  { %9657 = vmatpush3.bf16.msra.mxu0 %v11896_v24 }
 0x4c2   :  { %9658 = vmatprep.subr.bf16.mxu0 %v11898_v27  ;;  %v13046_v27 = vld [vmem:[%s15448_s5 + $0xe0] sm:$0xff] }
 0x4c3   :  { %10716 = vmatpush3.bf16.msra.mxu1 %v11897_v26  ;;  %v13037_v26 = vld [vmem:[%s15448_s5 + $0xe8] sm:$0xff] }
 0x4c4   :  { %10717 = vmatprep.subr.bf16.mxu1 %v12248_v42 }
 0x4c5   :  { %9659 = vmatpush3.bf16.msra.mxu0 %v11899_v29  ;;  %v13054_v29 = vld [vmem:[%s15448_s5 + $0xd8] sm:$0xff] }
 0x4c6   :  { %9660 = vmatprep.subr.bf16.mxu0 %v11901_v32  ;;  %v13072_v32 = vld [vmem:[%s15448_s5 + $0xc8] sm:$0xff] }
 0x4c7   :  { %10718 = vmatpush3.bf16.msra.mxu1 %v11900_v30  ;;  %v13063_v30 = vld [vmem:[%s15448_s5 + $0xd0] sm:$0xff] }
 0x4c8   :  { %10719 = vmatprep.subr.bf16.mxu1 %v12248_v42 }
 0x4c9   :  { %9661 = vmatpush3.bf16.msra.mxu0 %v11902_v33  ;;  %v13081_v33 = vld [vmem:[%s15448_s5 + $0xc0] sm:$0xff] }
 0x4ca   :  { %9662 = vmatprep.subr.bf16.mxu0 %v11904_v34  ;;  %v13090_v34 = vld [vmem:[%s15448_s5 + $0xb8] sm:$0xff] }
 0x4cb   :  { %10720 = vmatpush3.bf16.msra.mxu1 %v11903_v36  ;;  %v13099_v36 = vld [vmem:[%s15448_s5 + $0xb0] sm:$0xff] }
 0x4cc   :  { %10721 = vmatprep.subr.bf16.mxu1 %v12248_v42 }
 0x4cd   :  { %9663 = vmatpush3.bf16.msra.mxu0 %v11905_v37  ;;  %v13108_v37 = vld [vmem:[%s15448_s5 + $0xa8] sm:$0xff] }
 0x4ce   :  { %10727 = vmatprep.subr.mxu0 %v12248_v42 }
 0x4cf   :  { %10722 = vmatpush3.bf16.msra.mxu1 %v11906_v38  ;;  %v13117_v38 = vld [vmem:[%s15448_s5 + $0xa0] sm:$0xff] }
 0x4d0   :  { %10762 = vmatprep.subr.mxu1 %v12248_v42 }
 0x570   :  { %v1545_v13 = vpop.f32.mrf.mxu0 }
 0x571   :  { %v1632_v39 = vmul.f32 0.001953125, %v1545_v13  ;;  %v13126_v13 = vld [vmem:[%s15448_s5 + $0x98] sm:$0xff] }
 0x572   :  { %v10671_v10 = vpop.f32.mrf.mxu0  ;;  %v1628_v40 = vpop.f32.mrf.mxu1 }
 0x573   :  { %v1634_v25 = vmul.f32 %v1632_v39, %v1632_v39  ;;  %v1633_v43 = vmul.f32 0.001953125, %v1628_v40  ;;  %v13141_v10 = vld [vmem:[%s15448_s5 + $0x88] sm:$0xff]  ;;  %v13150_v40 = vld [vmem:[%s15448_s5 + $0x80] sm:$0xff] }
 0x574   :  { %v10706_v44 = vpop.f32.mrf.mxu1 }
 0x575   :  { %v1635_v46 = vsub.f32 %v1633_v43, %v1634_v25  ;;  %v8368_v44 = vld [vmem:[%s15445_s2 + $0x3] ss:$0 sm:$0xff] }
 0x577   :  { %v1636_v47 = vmax.f32 %v1635_v46, 0.0 }
 0x579   :  { %v1637_v48 = vadd.f32 1e-05, %v1636_v47 }
 0x57b   :  { %12184 = vrsqrt.f32 %v1637_v48 }
 0x588   :  { %v12185_v51 = vpop.eup %12184 }
 0x589   :  { %v1639_v52 = vmul.f32 %v12185_v51, %v8274_v50 }
 0x58b   :  { %v1640_v53 = vmul.f32 %v1639_v52, %v1632_v39  ;;  %v1646_v28 = vrot.slane %v1639_v52, %v12609_v19  ;;  %v13132_v39 = vld [vmem:[%s15448_s5 + $0x90] sm:$0xff] }
 0x58d   :  { %v1641_v54 = vsub.f32 %v8275_v31, %v1640_v53  ;;  %v1648_v17 = vmul.f32 %v1646_v28, %v12899_v45  ;;  %v1649_v55 = vmul.f32 %v1646_v28, %v12897_v41  ;;  %v1650_v56 = vmul.f32 %v1646_v28, %v12903_v49 }
 0x58e   :  { %v1651_v57 = vmul.f32 %v1646_v28, %v12912_v35 }
 0x58f   :  { %v1656_v58 = vrot.slane %v1641_v54, %v12609_v19 }
 0x591   :  { %v1658_v59 = vadd.f32 %v1656_v58, %v1648_v17  ;;  %v1659_v60 = vadd.f32 %v1656_v58, %v1649_v55  ;;  %v1660_v61 = vadd.f32 %v1656_v58, %v1650_v56  ;;  %v1661_v62 = vadd.f32 %v1656_v58, %v1651_v57 }
 0x593   :  { %vm1662_vm9 = vcmp.ge.f32.partialorder %v1658_v59, 0.0  ;;  %vm1663_vm10 = vcmp.ge.f32.partialorder %v1659_v60, 0.0  ;;  %vm1664_vm11 = vcmp.ge.f32.partialorder %v1660_v61, 0.0  ;;  %vm1665_vm12 = vcmp.ge.f32.partialorder %v1661_v62, 0.0 }
 0x594   :  { %v1666_v63 = vmul.f32 0.1, %v1658_v59  ;;  %v1667_v0 = vmul.f32 0.1, %v1659_v60  ;;  %v1668_v1 = vmul.f32 0.1, %v1660_v61 }
 0x595   :  { %v1669_v45 = vmul.f32 0.1, %v1661_v62 }
 0x596   :  { %v1670_v2 = vsel %vm1662_vm9, %v1658_v59, %v1666_v63  ;;  %v1671_v41 = vsel %vm1663_vm10, %v1659_v60, %v1667_v0  ;;  %v1672_v3 = vsel %vm1664_vm11, %v1660_v61, %v1668_v1  ;;  %vm6113_vm11 = vcmask 1043456  }
 0x597   :  { %v1673_v49 = vsel %vm1665_vm12, %v1661_v62, %v1669_v45  ;;  %1674 = vst [vmem:[#allocation2 + $0x1] sm:$0xff] %v1670_v2  ;;  %1675 = vst [vmem:[#allocation2 + $0x9] sm:$0xff] %v1671_v41 }
 0x598   :  { %1676 = vst [vmem:[#allocation2 + $0x19] sm:$0xff] %v1672_v3  ;;  %1677 = vst [vmem:[#allocation2 + $0x21] sm:$0xff] %v1673_v49 }
 0x59e   :  { %v1758_v35 = vld [vmem:[#allocation2 + $0x1] ss:$2 sm:$0xff]  ;;  %v1750_v4 = vld [vmem:[#allocation2] ss:$2 sm:$0xff] }
 0x59f   :  { %v1760_v5 = vld [vmem:[#allocation2 + $0x19] ss:$2 sm:$0xff]  ;;  %v1754_v6 = vld [vmem:[#allocation2 + $0x18] ss:$2 sm:$0xff]  ;;  %v1766_v7 = vrot.slane %v1750_v4, 1 }
 0x5a0   :  { %v1775_v8 = vpack.c.bf16 %v1760_v5, %v1758_v35  ;;  %v1769_v9 = vrot.slane %v1754_v6, 1  ;;  %v1774_v11 = vpack.c.bf16 %v1754_v6, %v1750_v4  ;;  %v1752_v12 = vld [vmem:[#allocation2 + $0x10] ss:$2 sm:$0x1]  ;;  %v11907_v4 = vld [vmem:[%s15444_s1 + $0x378] sm:$0xff]  }
 0x5a1   :  { %v1756_v14 = vld [vmem:[#allocation2 + $0x28] ss:$2 sm:$0x1]  ;;  %v1767_v15 = vrot.slane %v1752_v12, 1  ;;  %v11908_v5 = vld [vmem:[%s15444_s1 + $0x3b8] sm:$0xff]  }
 0x5a2   :  { %1959 = vmatprep.mubr.bf16.mxu0 %v1775_v8  ;;  %v1770_v20 = vrot.slane %v1756_v14, 1  ;;  %v11909_v6 = vld [vmem:[%s15444_s1 + $0x338] sm:$0xff]   ;;  %v11911_v8 = vld [vmem:[%s15444_s1 + $0x3b0] sm:$0xff]   ;;  %v11914_v12 = vld [vmem:[%s15444_s1 + $0x3a8] sm:$0xff]  }
 0x5a3   :  { %1960 = vmatmul.mubr.bf16.vlgmr.msra.gmra.mxu0 %v1774_v11  ;;  %v1768_v21 = vsel %vm1765_vm13, %v1766_v7, %v1767_v15  ;;  %v11910_v7 = vld [vmem:[%s15444_s1 + $0x370] sm:$0xff]   ;;  %v11913_v11 = vld [vmem:[%s15444_s1 + $0x368] sm:$0xff]   ;;  %v11916_v15 = vld [vmem:[%s15444_s1 + $0x360] sm:$0xff]  }
 0x5a4   :  { %v1771_v23 = vsel %vm1765_vm13, %v1769_v9, %v1770_v20  ;;  %10728 = vmatpush3.msra.mxu0 %v13015_v18  ;;  %10759 = vmatprep.mubr.msk.f32.mxu0 %vm12249_vm0, %v12248_v42  ;;  %v11912_v9 = vld [vmem:[%s15444_s1 + $0x330] sm:$0xff]   ;;  %v11915_v14 = vld [vmem:[%s15444_s1 + $0x328] sm:$0xff]   ;;  %v11917_v20 = vld [vmem:[%s15444_s1 + $0x3a0] sm:$0xff]  }
 0x5a5   :  { %v1776_v24 = vpack.c.bf16 %v1771_v23, %v1768_v21  ;;  %10729 = vmatprep.subr.mxu0 %v12248_v42  ;;  %v11918_v21 = vld [vmem:[%s15444_s1 + $0x320] sm:$0xff]   ;;  %v11919_v23 = vld [vmem:[%s15444_s1 + $0x358] sm:$0xff]  }
 0x5a6   :  { %10730 = vmatpush3.msra.mxu0 %v13020_v22 }
 0x5a7   :  { %10724 = vmatmul.mubr.bf16.vlgmr.msra.gmra.mxu1 %v1776_v24  ;;  %10731 = vmatprep.subr.mxu0 %v12248_v42  ;;  %v11920_v24 = vld [vmem:[%s15444_s1 + $0x398] sm:$0xff]  }
 0x5a8   :  { %10763 = vmatpush3.msra.mxu1 %v13015_v18  ;;  %10794 = vmatprep.mubr.msk.f32.mxu1 %vm12249_vm0, %v12248_v42 }
 0x5a9   :  { %10764 = vmatprep.subr.mxu1 %v12248_v42  ;;  %10732 = vmatpush3.msra.mxu0 %v13037_v26 }
 0x5aa   :  { %10765 = vmatpush3.msra.mxu1 %v13020_v22  ;;  %10733 = vmatprep.subr.mxu0 %v12248_v42 }
 0x5ab   :  { %10766 = vmatprep.subr.mxu1 %v12248_v42  ;;  %10734 = vmatpush3.msra.mxu0 %v13046_v27 }
 0x5ac   :  { %10767 = vmatpush3.msra.mxu1 %v13037_v26  ;;  %10735 = vmatprep.subr.mxu0 %v12248_v42 }
 0x5ad   :  { %10768 = vmatprep.subr.mxu1 %v12248_v42  ;;  %10736 = vmatpush3.msra.mxu0 %v13054_v29 }
 0x5ae   :  { %10769 = vmatpush3.msra.mxu1 %v13046_v27  ;;  %10737 = vmatprep.subr.mxu0 %v12248_v42 }
 0x5af   :  { %10770 = vmatprep.subr.mxu1 %v12248_v42  ;;  %10738 = vmatpush3.msra.mxu0 %v13063_v30 }
 0x5b0   :  { %10771 = vmatpush3.msra.mxu1 %v13054_v29  ;;  %10739 = vmatprep.subr.mxu0 %v12248_v42 }
 0x5b1   :  { %10772 = vmatprep.subr.mxu1 %v12248_v42  ;;  %10740 = vmatpush3.msra.mxu0 %v13072_v32 }
 0x5b2   :  { %10773 = vmatpush3.msra.mxu1 %v13063_v30  ;;  %10741 = vmatprep.subr.mxu0 %v12248_v42 }
 0x5b3   :  { %10774 = vmatprep.subr.mxu1 %v12248_v42  ;;  %10742 = vmatpush3.msra.mxu0 %v13081_v33 }
 0x5b4   :  { %10775 = vmatpush3.msra.mxu1 %v13072_v32  ;;  %10743 = vmatprep.subr.mxu0 %v12248_v42 }
 0x5b5   :  { %10776 = vmatprep.subr.mxu1 %v12248_v42  ;;  %10744 = vmatpush3.msra.mxu0 %v13090_v34 }
 0x5b6   :  { %10777 = vmatpush3.msra.mxu1 %v13081_v33  ;;  %10745 = vmatprep.subr.mxu0 %v12248_v42 }
 0x5b7   :  { %10778 = vmatprep.subr.mxu1 %v12248_v42  ;;  %10746 = vmatpush3.msra.mxu0 %v13099_v36 }
 0x5b8   :  { %10779 = vmatpush3.msra.mxu1 %v13090_v34  ;;  %10747 = vmatprep.subr.mxu0 %v12248_v42 }
 0x5b9   :  { %10780 = vmatprep.subr.mxu1 %v12248_v42  ;;  %10748 = vmatpush3.msra.mxu0 %v13108_v37 }
 0x5ba   :  { %10781 = vmatpush3.msra.mxu1 %v13099_v36  ;;  %10749 = vmatprep.subr.mxu0 %v12248_v42 }
 0x5bb   :  { %10782 = vmatprep.subr.mxu1 %v12248_v42  ;;  %10750 = vmatpush3.msra.mxu0 %v13117_v38 }
 0x5bc   :  { %10783 = vmatpush3.msra.mxu1 %v13108_v37  ;;  %10751 = vmatprep.subr.mxu0 %v12248_v42 }
 0x5bd   :  { %10784 = vmatprep.subr.mxu1 %v12248_v42  ;;  %10752 = vmatpush3.msra.mxu0 %v13126_v13 }
 0x5be   :  { %10785 = vmatpush3.msra.mxu1 %v13117_v38  ;;  %10753 = vmatprep.subr.mxu0 %v12248_v42 }
 0x5bf   :  { %10786 = vmatprep.subr.mxu1 %v12248_v42  ;;  %10754 = vmatpush3.msra.mxu0 %v13132_v39 }
 0x5c0   :  { %10787 = vmatpush3.msra.mxu1 %v13126_v13  ;;  %10755 = vmatprep.subr.mxu0 %v12248_v42 }
 0x5c1   :  { %10788 = vmatprep.subr.mxu1 %v12248_v42  ;;  %10756 = vmatpush3.msra.mxu0 %v13141_v10 }
 0x5c2   :  { %10789 = vmatpush3.msra.mxu1 %v13132_v39  ;;  %10757 = vmatprep.subr.mxu0 %v12248_v42 }
 0x5c3   :  { %10790 = vmatprep.subr.mxu1 %v12248_v42  ;;  %10758 = vmatpush3.msra.mxu0 %v13150_v40 }
 0x5c4   :  { %10791 = vmatpush3.msra.mxu1 %v13141_v10  ;;  %9713 = vmatprep.subr.bf16.mxu0 %v11907_v4 }
 0x5c5   :  { %10792 = vmatprep.subr.mxu1 %v12248_v42 }
 0x5c6   :  { %10793 = vmatpush3.msra.mxu1 %v13150_v40 }
 0x5c7   :  { %10797 = vmatprep.subr.bf16.mxu1 %v12248_v42 }
 0x663   :  { %v9664_v25 = vpop.f32.mrf.mxu0 }
 0x665   :  { %v9665_v43 = vpop.f32.mrf.mxu0 }
 0x666   :  { %v9666_v46 = vadd.f32 %v9665_v43, %v9664_v25  ;;  %v11921_v25 = vld [vmem:[%s15444_s1 + $0x318] sm:$0xff]   ;;  %v11922_v43 = vld [vmem:[%s15444_s1 + $0x350] sm:$0xff]  }
 0x667   :  { %v2002_v47 = vpop.f32.mrf.mxu1  ;;  %v9667_v48 = vpop.f32.mrf.mxu0 }
 0x668   :  { %v1962_v50 = vadd.f32 %v9666_v46, %v8368_v44  ;;  %v11924_v46 = vld [vmem:[%s15444_s1 + $0x310] sm:$0xff]  }
 0x669   :  { %v10725_v51 = vpop.f32.mrf.mxu1  ;;  %v9668_v52 = vpop.f32.mrf.mxu0 }
 0x66a   :  { %v9669_v31 = vadd.f32 %v9668_v52, %v9667_v48  ;;  %v13162_v28 = vadd.f32 %v2002_v47, %v1962_v50  ;;  %v11925_v47 = vld [vmem:[%s15444_s1 + $0x348] sm:$0xff]   ;;  %v11928_v51 = vld [vmem:[%s15444_s1 + $0x340] sm:$0xff]  }
 0x66b   :  { %v2005_v53 = vpop.f32.mrf.mxu1  ;;  %v11926_v48 = vld [vmem:[%s15444_s1 + $0x388] sm:$0xff]   ;;  %v11929_v52 = vld [vmem:[%s15444_s1 + $0x380] sm:$0xff]  }
 0x66c   :  { %v1965_v54 = vadd.f32 %v9669_v31, %v8368_v44  ;;  %v2086_v56 = vmul.f32 %v13162_v28, %v13162_v28  ;;  %v11923_v44 = vld [vmem:[%s15444_s1 + $0x390] sm:$0xff]   ;;  %v11927_v50 = vld [vmem:[%s15444_s1 + $0x308] sm:$0xff]   ;;  %v11930_v31 = vld [vmem:[%s15444_s1 + $0x300] sm:$0xff]  }
 0x66d   :  { %v10726_v17 = vpop.f32.mrf.mxu1 }
 0x66e   :  { %v13164_v55 = vadd.f32 %v2005_v53, %v1965_v54 }
 0x670   :  { %v2009_v57 = vadd.f32 %v13164_v55, %v13162_v28  ;;  %v2087_v58 = vmul.f32 %v13164_v55, %v13164_v55 }
 0x672   :  { %v2010_v59 = vrot.slane %v2009_v57, 4  ;;  %v2088_v60 = vadd.f32 %v2087_v58, %v2086_v56 }
 0x674   :  { %v2011_v61 = vadd.f32 %v2010_v59, %v2009_v57  ;;  %v2089_v62 = vrot.slane %v2088_v60, 4 }
 0x676   :  { %v2012_v63 = vrot.slane %v2011_v61, 2  ;;  %v2090_v0 = vadd.f32 %v2089_v62, %v2088_v60 }
 0x678   :  { %v2013_v1 = vadd.f32 %v2012_v63, %v2011_v61  ;;  %v2091_v45 = vrot.slane %v2090_v0, 2  ;;  %v8350_v63 = vld [vmem:[%s15446_s3 + $0x3] sm:$0x1] }
 0x67a   :  { %v2014_v2 = vrot.slane %v2013_v1, 1  ;;  %v2092_v41 = vadd.f32 %v2091_v45, %v2090_v0  ;;  %v8351_v45 = vld [vmem:[%s15447_s4 + $0x3] sm:$0x1] }
 0x67c   :  { %v2015_v3 = vadd.f32 %v2014_v2, %v2013_v1  ;;  %v2093_v49 = vrot.slane %v2092_v41, 1 }
 0x67e   :  { %10760 = vmatmul.mubr.f32.vlgmr.msra.gmra.mxu0 %v2015_v3  ;;  %v2094_v35 = vadd.f32 %v2093_v49, %v2092_v41 }
 0x67f   :  { %9714 = vmatpush3.bf16.msra.mxu0 %v11909_v6 }
 0x680   :  { %10795 = vmatmul.mubr.f32.vlgmr.msra.gmra.mxu1 %v2094_v35  ;;  %9715 = vmatprep.subr.bf16.mxu0 %v11910_v7 }
 0x681   :  { %10813 = vmatprep.mubr.msk.bf16.mxu1 %vm12249_vm0, %v12248_v42  ;;  %10798 = vmatpush3.bf16.msra.mxu1 %v11908_v5 }
 0x682   :  { %10799 = vmatprep.subr.bf16.mxu1 %v12248_v42 }
 0x683   :  { %9716 = vmatpush3.bf16.msra.mxu0 %v11912_v9 }
 0x684   :  { %9717 = vmatprep.subr.bf16.mxu0 %v11913_v11 }
 0x685   :  { %10800 = vmatpush3.bf16.msra.mxu1 %v11911_v8 }
 0x686   :  { %10801 = vmatprep.subr.bf16.mxu1 %v12248_v42 }
 0x687   :  { %9718 = vmatpush3.bf16.msra.mxu0 %v11915_v14 }
 0x688   :  { %9719 = vmatprep.subr.bf16.mxu0 %v11916_v15 }
 0x689   :  { %10802 = vmatpush3.bf16.msra.mxu1 %v11914_v12 }
 0x68a   :  { %10803 = vmatprep.subr.bf16.mxu1 %v12248_v42 }
 0x68b   :  { %9720 = vmatpush3.bf16.msra.mxu0 %v11918_v21 }
 0x68c   :  { %9721 = vmatprep.subr.bf16.mxu0 %v11919_v23 }
 0x68d   :  { %10804 = vmatpush3.bf16.msra.mxu1 %v11917_v20 }
 0x68e   :  { %10805 = vmatprep.subr.bf16.mxu1 %v12248_v42 }
 0x68f   :  { %9722 = vmatpush3.bf16.msra.mxu0 %v11921_v25 }
 0x690   :  { %9723 = vmatprep.subr.bf16.mxu0 %v11922_v43 }
 0x691   :  { %10806 = vmatpush3.bf16.msra.mxu1 %v11920_v24 }
 0x692   :  { %10807 = vmatprep.subr.bf16.mxu1 %v12248_v42 }
 0x693   :  { %9724 = vmatpush3.bf16.msra.mxu0 %v11924_v46 }
 0x694   :  { %9725 = vmatprep.subr.bf16.mxu0 %v11925_v47 }
 0x695   :  { %10808 = vmatpush3.bf16.msra.mxu1 %v11923_v44 }
 0x696   :  { %10809 = vmatprep.subr.bf16.mxu1 %v12248_v42 }
 0x697   :  { %9726 = vmatpush3.bf16.msra.mxu0 %v11927_v50 }
 0x698   :  { %9727 = vmatprep.subr.bf16.mxu0 %v11928_v51 }
 0x699   :  { %10810 = vmatpush3.bf16.msra.mxu1 %v11926_v48 }
 0x69a   :  { %10811 = vmatprep.subr.bf16.mxu1 %v12248_v42 }
 0x69b   :  { %9728 = vmatpush3.bf16.msra.mxu0 %v11930_v31 }
 0x69c   :  { %10817 = vmatprep.subr.mxu0 %v12248_v42 }
 0x69d   :  { %10812 = vmatpush3.bf16.msra.mxu1 %v11929_v52 }
 0x69e   :  { %10852 = vmatprep.subr.mxu1 %v12248_v42 }
 0x73e   :  { %v2082_v53 = vpop.f32.mrf.mxu0 }
 0x73f   :  { %v2165_v54 = vmul.f32 0.0078125, %v2082_v53 }
 0x740   :  { %v10761_v17 = vpop.f32.mrf.mxu0  ;;  %v2161_v56 = vpop.f32.mrf.mxu1 }
 0x741   :  { %v2167_v57 = vmul.f32 %v2165_v54, %v2165_v54  ;;  %v2166_v58 = vmul.f32 0.0078125, %v2161_v56  ;;  %v11931_v56 = vld [vmem:[%s15444_s1 + $0x438] sm:$0xff]  }
 0x742   :  { %v10796_v59 = vpop.f32.mrf.mxu1 }
 0x743   :  { %v2168_v60 = vsub.f32 %v2166_v58, %v2167_v57  ;;  %v11932_v57 = vld [vmem:[%s15444_s1 + $0x478] sm:$0xff]   ;;  %v11934_v59 = vld [vmem:[%s15444_s1 + $0x430] sm:$0xff]  }
 0x744   :  { %v11933_v58 = vld [vmem:[%s15444_s1 + $0x3f8] sm:$0xff]  }
 0x745   :  { %v2169_v61 = vmax.f32 %v2168_v60, 0.0  ;;  %v11935_v60 = vld [vmem:[%s15444_s1 + $0x470] sm:$0xff]  }
 0x747   :  { %v2170_v62 = vadd.f32 1e-05, %v2169_v61  ;;  %v11936_v61 = vld [vmem:[%s15444_s1 + $0x3f0] sm:$0xff]  }
 0x749   :  { %12186 = vrsqrt.f32 %v2170_v62  ;;  %v11937_v62 = vld [vmem:[%s15444_s1 + $0x428] sm:$0xff]  }
 0x756   :  { %v12187_v0 = vpop.eup %12186 }
 0x757   :  { %v2172_v1 = vmul.f32 %v12187_v0, %v8350_v63  ;;  %v11938_v63 = vld [vmem:[%s15444_s1 + $0x468] sm:$0xff]  }
 0x758   :  { %v11939_v0 = vld [vmem:[%s15444_s1 + $0x3e8] sm:$0xff]  }
 0x759   :  { %v2173_v2 = vmul.f32 %v2172_v1, %v2165_v54  ;;  %v2179_v41 = vrot.slane %v2172_v1, %v12609_v19  ;;  %v11940_v1 = vld [vmem:[%s15444_s1 + $0x420] sm:$0xff]  }
 0x75b   :  { %v2174_v3 = vsub.f32 %v8351_v45, %v2173_v2  ;;  %v2181_v49 = vmul.f32 %v2179_v41, %v13162_v28  ;;  %v2182_v35 = vmul.f32 %v2179_v41, %v13164_v55  ;;  %v11941_v45 = vld [vmem:[%s15444_s1 + $0x460] sm:$0xff]   ;;  %v11943_v41 = vld [vmem:[%s15444_s1 + $0x418] sm:$0xff]  }
 0x75c   :  { %v11942_v2 = vld [vmem:[%s15444_s1 + $0x3e0] sm:$0xff]  }
 0x75d   :  { %v2187_v4 = vrot.slane %v2174_v3, %v12609_v19  ;;  %v11944_v3 = vld [vmem:[%s15444_s1 + $0x458] sm:$0xff]  }
 0x75f   :  { %v2189_v5 = vadd.f32 %v2187_v4, %v2181_v49  ;;  %v2190_v6 = vadd.f32 %v2187_v4, %v2182_v35  ;;  %v11945_v49 = vld [vmem:[%s15444_s1 + $0x3d8] sm:$0xff]   ;;  %v11946_v35 = vld [vmem:[%s15444_s1 + $0x410] sm:$0xff]  }
 0x760   :  { %v11947_v4 = vld [vmem:[%s15444_s1 + $0x450] sm:$0xff]  }
 0x761   :  { %vm2191_vm14 = vcmp.ge.f32.partialorder %v2189_v5, 0.0  ;;  %vm2192_vm15 = vcmp.ge.f32.partialorder %v2190_v6, 0.0  ;;  %v2193_v7 = vmul.f32 0.1, %v2189_v5  ;;  %v2194_v8 = vmul.f32 0.1, %v2190_v6 }
 0x763   :  { %v2195_v9 = vsel %vm2191_vm14, %v2189_v5, %v2193_v7  ;;  %v2196_v11 = vsel %vm2192_vm15, %v2190_v6, %v2194_v8  ;;  %v11948_v5 = vld [vmem:[%s15444_s1 + $0x3d0] sm:$0xff]   ;;  %v11949_v6 = vld [vmem:[%s15444_s1 + $0x408] sm:$0xff]   ;;  %vm8001_vm15 = vcmask 517120  }
 0x764   :  { %2197 = vst [vmem:[#allocation3 + $0x1] sm:$0xff] %v2195_v9  ;;  %2198 = vst [vmem:[#allocation3 + $0x11] sm:$0xff] %v2196_v11  ;;  %v2277_v12 = vpack.c.bf16 %v2196_v11, %v2195_v9  ;;  %v11950_v7 = vld [vmem:[%s15444_s1 + $0x448] sm:$0xff]   ;;  %v11952_v9 = vld [vmem:[%s15444_s1 + $0x400] sm:$0xff]  }
 0x765   :  { %v11951_v8 = vld [vmem:[%s15444_s1 + $0x3c8] sm:$0xff]   ;;  %v11953_v11 = vld [vmem:[%s15444_s1 + $0x440] sm:$0xff]  }
 0x766   :  { %2461 = vmatprep.mubr.bf16.mxu0 %v2277_v12  ;;  %v11954_v12 = vld [vmem:[%s15444_s1 + $0x3c0] sm:$0xff]  }
 0x76b   :  { %v2274_v14 = vld [vmem:[#allocation3 + $0x2] sm:$0xff]  ;;  %v2275_v15 = vld [vmem:[#allocation3 + $0x12] sm:$0xff] }
 0x76c   :  { %v2270_v20 = vld [vmem:[#allocation3] sm:$0xff]  ;;  %v2278_v28 = vpack.c.bf16 %v2275_v15, %v2274_v14  ;;  %v2271_v21 = vld [vmem:[#allocation3 + $0x10] sm:$0xff] }
 0x76d   :  { %v2276_v55 = vpack.c.bf16 %v2271_v21, %v2270_v20 }
 0x76e   :  { %10814 = vmatmul.mubr.bf16.vlgmr.msra.gmra.mxu1 %v2278_v28 }
 0x76f   :  { %2462 = vmatmul.mubr.bf16.vlgmr.msra.gmra.mxu0 %v2276_v55  ;;  %10853 = vmatpush3.msra.mxu1 %v13015_v18 }
 0x770   :  { %10818 = vmatpush3.msra.mxu0 %v13015_v18  ;;  %10854 = vmatprep.subr.mxu1 %v12248_v42 }
 0x771   :  { %10819 = vmatprep.subr.mxu0 %v12248_v42  ;;  %10855 = vmatpush3.msra.mxu1 %v13020_v22 }
 0x772   :  { %10820 = vmatpush3.msra.mxu0 %v13020_v22  ;;  %10856 = vmatprep.subr.mxu1 %v12248_v42 }
 0x773   :  { %10821 = vmatprep.subr.mxu0 %v12248_v42  ;;  %10857 = vmatpush3.msra.mxu1 %v13037_v26 }
 0x774   :  { %10822 = vmatpush3.msra.mxu0 %v13037_v26  ;;  %10858 = vmatprep.subr.mxu1 %v12248_v42 }
 0x775   :  { %10823 = vmatprep.subr.mxu0 %v12248_v42  ;;  %10859 = vmatpush3.msra.mxu1 %v13046_v27 }
 0x776   :  { %10824 = vmatpush3.msra.mxu0 %v13046_v27  ;;  %10860 = vmatprep.subr.mxu1 %v12248_v42  ;;  %v8460_v27 = vld [vmem:[%s15445_s2 + $0x4] ss:$0 sm:$0xff] }
 0x777   :  { %10825 = vmatprep.subr.mxu0 %v12248_v42  ;;  %10861 = vmatpush3.msra.mxu1 %v13054_v29 }
 0x778   :  { %10826 = vmatpush3.msra.mxu0 %v13054_v29  ;;  %10862 = vmatprep.subr.mxu1 %v12248_v42 }
 0x779   :  { %10827 = vmatprep.subr.mxu0 %v12248_v42  ;;  %10863 = vmatpush3.msra.mxu1 %v13063_v30 }
 0x77a   :  { %10828 = vmatpush3.msra.mxu0 %v13063_v30  ;;  %10864 = vmatprep.subr.mxu1 %v12248_v42 }
 0x77b   :  { %10829 = vmatprep.subr.mxu0 %v12248_v42  ;;  %10865 = vmatpush3.msra.mxu1 %v13072_v32 }
 0x77c   :  { %10830 = vmatpush3.msra.mxu0 %v13072_v32  ;;  %10866 = vmatprep.subr.mxu1 %v12248_v42 }
 0x77d   :  { %10831 = vmatprep.subr.mxu0 %v12248_v42  ;;  %10867 = vmatpush3.msra.mxu1 %v13081_v33 }
 0x77e   :  { %10832 = vmatpush3.msra.mxu0 %v13081_v33  ;;  %10868 = vmatprep.subr.mxu1 %v12248_v42 }
 0x77f   :  { %10833 = vmatprep.subr.mxu0 %v12248_v42  ;;  %10869 = vmatpush3.msra.mxu1 %v13090_v34 }
 0x780   :  { %10834 = vmatpush3.msra.mxu0 %v13090_v34  ;;  %10870 = vmatprep.subr.mxu1 %v12248_v42 }
 0x781   :  { %10835 = vmatprep.subr.mxu0 %v12248_v42  ;;  %10871 = vmatpush3.msra.mxu1 %v13099_v36 }
 0x782   :  { %10836 = vmatpush3.msra.mxu0 %v13099_v36  ;;  %10872 = vmatprep.subr.mxu1 %v12248_v42 }
 0x783   :  { %10837 = vmatprep.subr.mxu0 %v12248_v42  ;;  %10873 = vmatpush3.msra.mxu1 %v13108_v37 }
 0x784   :  { %10838 = vmatpush3.msra.mxu0 %v13108_v37  ;;  %10874 = vmatprep.subr.mxu1 %v12248_v42 }
 0x785   :  { %10839 = vmatprep.subr.mxu0 %v12248_v42  ;;  %10875 = vmatpush3.msra.mxu1 %v13117_v38 }
 0x786   :  { %10840 = vmatpush3.msra.mxu0 %v13117_v38  ;;  %10876 = vmatprep.subr.mxu1 %v12248_v42 }
 0x787   :  { %10841 = vmatprep.subr.mxu0 %v12248_v42  ;;  %10877 = vmatpush3.msra.mxu1 %v13126_v13 }
 0x788   :  { %10842 = vmatpush3.msra.mxu0 %v13126_v13  ;;  %10878 = vmatprep.subr.mxu1 %v12248_v42 }
 0x789   :  { %10843 = vmatprep.subr.mxu0 %v12248_v42  ;;  %10879 = vmatpush3.msra.mxu1 %v13132_v39 }
 0x78a   :  { %10844 = vmatpush3.msra.mxu0 %v13132_v39  ;;  %10880 = vmatprep.subr.mxu1 %v12248_v42 }
 0x78b   :  { %10845 = vmatprep.subr.mxu0 %v12248_v42  ;;  %10849 = vmatprep.mubr.msk.f32.mxu0 %vm12249_vm0, %v12248_v42 }
 0x78c   :  { %10846 = vmatpush3.msra.mxu0 %v13141_v10  ;;  %10881 = vmatpush3.msra.mxu1 %v13141_v10 }
 0x78d   :  { %10847 = vmatprep.subr.mxu0 %v12248_v42  ;;  %10882 = vmatprep.subr.mxu1 %v12248_v42 }
 0x78e   :  { %10848 = vmatpush3.msra.mxu0 %v13150_v40  ;;  %10883 = vmatpush3.msra.mxu1 %v13150_v40 }
 0x78f   :  { %10884 = vmatprep.mubr.msk.f32.mxu1 %vm12249_vm0, %v12248_v42  ;;  %10887 = vmatprep.subr.bf16.mxu1 %v12248_v42 }
 0x790   :  { %9778 = vmatprep.subr.bf16.mxu0 %v11931_v56  ;;  %v13480_v56 = vld [vmem:[%s15448_s5 + $0xd8] sm:$0xff] }
 0x82e   :  { %v2504_v18 = vpop.f32.mrf.mxu1 }
 0x82f   :  { %v9729_v22 = vpop.f32.mrf.mxu0 }
 0x830   :  { %v10815_v26 = vpop.f32.mrf.mxu1 }
 0x831   :  { %v9730_v29 = vpop.f32.mrf.mxu0 }
 0x832   :  { %v9731_v30 = vadd.f32 %v9730_v29, %v9729_v22  ;;  %v2507_v32 = vpop.f32.mrf.mxu1  ;;  %v8442_v29 = vld [vmem:[%s15446_s3 + $0x4] sm:$0x1] }
 0x833   :  { %v9732_v33 = vpop.f32.mrf.mxu0 }
 0x834   :  { %v2464_v34 = vadd.f32 %v9731_v30, %v8460_v27  ;;  %v10816_v36 = vpop.f32.mrf.mxu1 }
 0x835   :  { %v9733_v37 = vpop.f32.mrf.mxu0 }
 0x836   :  { %v9734_v38 = vadd.f32 %v9733_v37, %v9732_v33  ;;  %v13335_v13 = vadd.f32 %v2504_v18, %v2464_v34  ;;  %v8443_v33 = vld [vmem:[%s15447_s4 + $0x4] sm:$0x1] }
 0x838   :  { %v2467_v39 = vadd.f32 %v9734_v38, %v8460_v27  ;;  %v2588_v40 = vmul.f32 %v13335_v13, %v13335_v13 }
 0x83a   :  { %v13337_v10 = vadd.f32 %v2507_v32, %v2467_v39 }
 0x83c   :  { %v2511_v23 = vadd.f32 %v13337_v10, %v13335_v13  ;;  %v2589_v24 = vmul.f32 %v13337_v10, %v13337_v10 }
 0x83e   :  { %v2512_v25 = vrot.slane %v2511_v23, 4  ;;  %v2590_v43 = vadd.f32 %v2589_v24, %v2588_v40 }
 0x840   :  { %v2513_v44 = vadd.f32 %v2512_v25, %v2511_v23  ;;  %v2591_v46 = vrot.slane %v2590_v43, 4 }
 0x842   :  { %v2514_v47 = vrot.slane %v2513_v44, 2  ;;  %v2592_v48 = vadd.f32 %v2591_v46, %v2590_v43 }
 0x844   :  { %v2515_v50 = vadd.f32 %v2514_v47, %v2513_v44  ;;  %v2593_v51 = vrot.slane %v2592_v48, 2 }
 0x846   :  { %v2516_v52 = vrot.slane %v2515_v50, 1  ;;  %v2594_v31 = vadd.f32 %v2593_v51, %v2592_v48 }
 0x848   :  { %v2517_v53 = vadd.f32 %v2516_v52, %v2515_v50  ;;  %v2595_v54 = vrot.slane %v2594_v31, 1 }
 0x84a   :  { %10850 = vmatmul.mubr.f32.vlgmr.msra.gmra.mxu0 %v2517_v53  ;;  %v2596_v17 = vadd.f32 %v2595_v54, %v2594_v31  ;;  %v13441_v31 = vld [vmem:[%s15448_s5 + $0xf8] sm:$0xff]  ;;  %v13446_v53 = vld [vmem:[%s15448_s5 + $0xf0] sm:$0xff]  ;;  %v13463_v54 = vld [vmem:[%s15448_s5 + $0xe8] sm:$0xff] }
 0x84b   :  { %9779 = vmatpush3.bf16.msra.mxu0 %v11933_v58  ;;  %v13498_v58 = vld [vmem:[%s15448_s5 + $0xc8] sm:$0xff] }
 0x84c   :  { %10885 = vmatmul.mubr.f32.vlgmr.msra.gmra.mxu1 %v2596_v17  ;;  %9780 = vmatprep.subr.bf16.mxu0 %v11934_v59  ;;  %v13471_v17 = vld [vmem:[%s15448_s5 + $0xe0] sm:$0xff] }
 0x84d   :  { %10903 = vmatprep.mubr.msk.bf16.mxu1 %vm12249_vm0, %v12248_v42  ;;  %10888 = vmatpush3.bf16.msra.mxu1 %v11932_v57  ;;  %v13489_v57 = vld [vmem:[%s15448_s5 + $0xd0] sm:$0xff]  ;;  %v13507_v59 = vld [vmem:[%s15448_s5 + $0xc0] sm:$0xff] }
 0x84e   :  { %10889 = vmatprep.subr.bf16.mxu1 %v12248_v42 }
 0x84f   :  { %9781 = vmatpush3.bf16.msra.mxu0 %v11936_v61  ;;  %v13525_v61 = vld [vmem:[%s15448_s5 + $0xb0] sm:$0xff] }
 0x850   :  { %9782 = vmatprep.subr.bf16.mxu0 %v11937_v62  ;;  %v13534_v62 = vld [vmem:[%s15448_s5 + $0xa8] sm:$0xff] }
 0x851   :  { %10890 = vmatpush3.bf16.msra.mxu1 %v11935_v60  ;;  %v13516_v60 = vld [vmem:[%s15448_s5 + $0xb8] sm:$0xff] }
 0x852   :  { %10891 = vmatprep.subr.bf16.mxu1 %v12248_v42 }
 0x853   :  { %9783 = vmatpush3.bf16.msra.mxu0 %v11939_v0  ;;  %v13549_v0 = vld [vmem:[%s15448_s5 + $0x98] sm:$0xff] }
 0x854   :  { %9784 = vmatprep.subr.bf16.mxu0 %v11940_v1  ;;  %v13558_v1 = vld [vmem:[%s15448_s5 + $0x90] sm:$0xff] }
 0x855   :  { %10892 = vmatpush3.bf16.msra.mxu1 %v11938_v63  ;;  %v13543_v63 = vld [vmem:[%s15448_s5 + $0xa0] sm:$0xff] }
 0x856   :  { %10893 = vmatprep.subr.bf16.mxu1 %v12248_v42 }
 0x857   :  { %9785 = vmatpush3.bf16.msra.mxu0 %v11942_v2  ;;  %v13576_v2 = vld [vmem:[%s15448_s5 + $0x80] sm:$0xff] }
 0x858   :  { %9786 = vmatprep.subr.bf16.mxu0 %v11943_v41 }
 0x859   :  { %10894 = vmatpush3.bf16.msra.mxu1 %v11941_v45  ;;  %v13567_v45 = vld [vmem:[%s15448_s5 + $0x88] sm:$0xff] }
 0x85a   :  { %10895 = vmatprep.subr.bf16.mxu1 %v12248_v42 }
 0x85b   :  { %9787 = vmatpush3.bf16.msra.mxu0 %v11945_v49 }
 0x85c   :  { %9788 = vmatprep.subr.bf16.mxu0 %v11946_v35  ;;  %v8552_v35 = vld [vmem:[%s15445_s2 + $0x5] ss:$0 sm:$0xff] }
 0x85d   :  { %10896 = vmatpush3.bf16.msra.mxu1 %v11944_v3 }
 0x85e   :  { %10897 = vmatprep.subr.bf16.mxu1 %v12248_v42 }
 0x85f   :  { %9789 = vmatpush3.bf16.msra.mxu0 %v11948_v5 }
 0x860   :  { %9790 = vmatprep.subr.bf16.mxu0 %v11949_v6 }
 0x861   :  { %10898 = vmatpush3.bf16.msra.mxu1 %v11947_v4 }
 0x862   :  { %10899 = vmatprep.subr.bf16.mxu1 %v12248_v42 }
 0x863   :  { %9791 = vmatpush3.bf16.msra.mxu0 %v11951_v8 }
 0x864   :  { %9792 = vmatprep.subr.bf16.mxu0 %v11952_v9 }
 0x865   :  { %10900 = vmatpush3.bf16.msra.mxu1 %v11950_v7 }
 0x866   :  { %10901 = vmatprep.subr.bf16.mxu1 %v12248_v42 }
 0x867   :  { %9793 = vmatpush3.bf16.msra.mxu0 %v11954_v12 }
 0x868   :  { %10907 = vmatprep.subr.mxu0 %v12248_v42 }
 0x869   :  { %10902 = vmatpush3.bf16.msra.mxu1 %v11953_v11 }
 0x86a   :  { %10942 = vmatprep.subr.mxu1 %v12248_v42 }
 0x90a   :  { %v2584_v14 = vpop.f32.mrf.mxu0 }
 0x90b   :  { %v2667_v15 = vmul.f32 0.0078125, %v2584_v14 }
 0x90c   :  { %v10851_v20 = vpop.f32.mrf.mxu0  ;;  %v2663_v28 = vpop.f32.mrf.mxu1 }
 0x90d   :  { %v2669_v21 = vmul.f32 %v2667_v15, %v2667_v15  ;;  %v2668_v55 = vmul.f32 0.0078125, %v2663_v28 }
 0x90e   :  { %v10886_v18 = vpop.f32.mrf.mxu1 }
 0x90f   :  { %v2670_v22 = vsub.f32 %v2668_v55, %v2669_v21 }
 0x911   :  { %v2671_v26 = vmax.f32 %v2670_v22, 0.0 }
 0x913   :  { %v2672_v27 = vadd.f32 1e-05, %v2671_v26 }
 0x915   :  { %12188 = vrsqrt.f32 %v2672_v27 }
 0x922   :  { %v12189_v30 = vpop.eup %12188 }
 0x923   :  { %v2674_v32 = vmul.f32 %v12189_v30, %v8442_v29 }
 0x925   :  { %v2675_v34 = vmul.f32 %v2674_v32, %v2667_v15  ;;  %v2681_v36 = vrot.slane %v2674_v32, %v12609_v19 }
 0x927   :  { %v2676_v37 = vsub.f32 %v8443_v33, %v2675_v34  ;;  %v2683_v38 = vmul.f32 %v2681_v36, %v13335_v13  ;;  %v2684_v39 = vmul.f32 %v2681_v36, %v13337_v10 }
 0x929   :  { %v2689_v40 = vrot.slane %v2676_v37, %v12609_v19 }
 0x92b   :  { %v2691_v23 = vadd.f32 %v2689_v40, %v2683_v38  ;;  %v2692_v24 = vadd.f32 %v2689_v40, %v2684_v39  ;;  %v11955_v40 = vld [vmem:[%s15444_s1 + $0x4f8] sm:$0xff]  }
 0x92d   :  { %vm2693_vm1 = vcmp.ge.f32.partialorder %v2691_v23, 0.0  ;;  %vm2694_vm2 = vcmp.ge.f32.partialorder %v2692_v24, 0.0  ;;  %v2695_v25 = vmul.f32 0.1, %v2691_v23  ;;  %v2696_v43 = vmul.f32 0.1, %v2692_v24 }
 0x92f   :  { %v2697_v44 = vsel %vm2693_vm1, %v2691_v23, %v2695_v25  ;;  %v2698_v46 = vsel %vm2694_vm2, %v2692_v24, %v2696_v43  ;;  %v11956_v23 = vld [vmem:[%s15444_s1 + $0x538] sm:$0xff]   ;;  %v11958_v25 = vld [vmem:[%s15444_s1 + $0x4f0] sm:$0xff]   ;;  %vm8033_vm1 = vcmask 1041409   ;;  %vm8035_vm2 = vcmask 523264  }
 0x930   :  { %2699 = vst [vmem:[#allocation3 + $0x1] sm:$0xff] %v2697_v44  ;;  %2700 = vst [vmem:[#allocation3 + $0x11] sm:$0xff] %v2698_v46  ;;  %v2779_v47 = vpack.c.bf16 %v2698_v46, %v2697_v44  ;;  %v11957_v24 = vld [vmem:[%s15444_s1 + $0x4b8] sm:$0xff]   ;;  %v11959_v43 = vld [vmem:[%s15444_s1 + $0x530] sm:$0xff]  }
 0x931   :  { %v11960_v44 = vld [vmem:[%s15444_s1 + $0x4b0] sm:$0xff]   ;;  %v11961_v46 = vld [vmem:[%s15444_s1 + $0x4e8] sm:$0xff]  }
 0x932   :  { %2963 = vmatprep.mubr.bf16.mxu0 %v2779_v47  ;;  %v11962_v47 = vld [vmem:[%s15444_s1 + $0x528] sm:$0xff]  }
 0x937   :  { %v2776_v48 = vld [vmem:[#allocation3 + $0x2] sm:$0xff]  ;;  %v2777_v50 = vld [vmem:[#allocation3 + $0x12] sm:$0xff] }
 0x938   :  { %v2772_v51 = vld [vmem:[#allocation3] sm:$0xff]  ;;  %v2780_v13 = vpack.c.bf16 %v2777_v50, %v2776_v48  ;;  %v2773_v52 = vld [vmem:[#allocation3 + $0x10] sm:$0xff]  ;;  %v11963_v48 = vld [vmem:[%s15444_s1 + $0x4a8] sm:$0xff]  }
 0x939   :  { %v2778_v10 = vpack.c.bf16 %v2773_v52, %v2772_v51  ;;  %v11964_v50 = vld [vmem:[%s15444_s1 + $0x4e0] sm:$0xff]   ;;  %v11967_v52 = vld [vmem:[%s15444_s1 + $0x4d8] sm:$0xff]  }
 0x93a   :  { %10904 = vmatmul.mubr.bf16.vlgmr.msra.gmra.mxu1 %v2780_v13  ;;  %v11965_v51 = vld [vmem:[%s15444_s1 + $0x520] sm:$0xff]  }
 0x93b   :  { %2964 = vmatmul.mubr.bf16.vlgmr.msra.gmra.mxu0 %v2778_v10  ;;  %10943 = vmatpush3.msra.mxu1 %v13441_v31  ;;  %v11966_v13 = vld [vmem:[%s15444_s1 + $0x4a0] sm:$0xff]   ;;  %v11968_v10 = vld [vmem:[%s15444_s1 + $0x518] sm:$0xff]  }
 0x93c   :  { %10908 = vmatpush3.msra.mxu0 %v13441_v31  ;;  %10944 = vmatprep.subr.mxu1 %v12248_v42 }
 0x93d   :  { %10909 = vmatprep.subr.mxu0 %v12248_v42  ;;  %10945 = vmatpush3.msra.mxu1 %v13446_v53 }
 0x93e   :  { %10910 = vmatpush3.msra.mxu0 %v13446_v53  ;;  %10946 = vmatprep.subr.mxu1 %v12248_v42 }
 0x93f   :  { %10911 = vmatprep.subr.mxu0 %v12248_v42  ;;  %10939 = vmatprep.mubr.msk.f32.mxu0 %vm12249_vm0, %v12248_v42 }
 0x940   :  { %10974 = vmatprep.mubr.msk.f32.mxu1 %vm12249_vm0, %v12248_v42  ;;  %10912 = vmatpush3.msra.mxu0 %v13463_v54 }
 0x941   :  { %10947 = vmatpush3.msra.mxu1 %v13463_v54  ;;  %10913 = vmatprep.subr.mxu0 %v12248_v42 }
 0x942   :  { %10948 = vmatprep.subr.mxu1 %v12248_v42  ;;  %10914 = vmatpush3.msra.mxu0 %v13471_v17 }
 0x943   :  { %10949 = vmatpush3.msra.mxu1 %v13471_v17  ;;  %10915 = vmatprep.subr.mxu0 %v12248_v42 }
 0x944   :  { %10950 = vmatprep.subr.mxu1 %v12248_v42  ;;  %10916 = vmatpush3.msra.mxu0 %v13480_v56 }
 0x945   :  { %10951 = vmatpush3.msra.mxu1 %v13480_v56  ;;  %10917 = vmatprep.subr.mxu0 %v12248_v42 }
 0x946   :  { %10952 = vmatprep.subr.mxu1 %v12248_v42  ;;  %10918 = vmatpush3.msra.mxu0 %v13489_v57 }
 0x947   :  { %10953 = vmatpush3.msra.mxu1 %v13489_v57  ;;  %10919 = vmatprep.subr.mxu0 %v12248_v42 }
 0x948   :  { %10954 = vmatprep.subr.mxu1 %v12248_v42  ;;  %10920 = vmatpush3.msra.mxu0 %v13498_v58 }
 0x949   :  { %10955 = vmatpush3.msra.mxu1 %v13498_v58  ;;  %10921 = vmatprep.subr.mxu0 %v12248_v42 }
 0x94a   :  { %10956 = vmatprep.subr.mxu1 %v12248_v42  ;;  %10922 = vmatpush3.msra.mxu0 %v13507_v59 }
 0x94b   :  { %10957 = vmatpush3.msra.mxu1 %v13507_v59  ;;  %10923 = vmatprep.subr.mxu0 %v12248_v42 }
 0x94c   :  { %10958 = vmatprep.subr.mxu1 %v12248_v42  ;;  %10924 = vmatpush3.msra.mxu0 %v13516_v60 }
 0x94d   :  { %10959 = vmatpush3.msra.mxu1 %v13516_v60  ;;  %10925 = vmatprep.subr.mxu0 %v12248_v42 }
 0x94e   :  { %10960 = vmatprep.subr.mxu1 %v12248_v42  ;;  %10926 = vmatpush3.msra.mxu0 %v13525_v61 }
 0x94f   :  { %10961 = vmatpush3.msra.mxu1 %v13525_v61  ;;  %10927 = vmatprep.subr.mxu0 %v12248_v42 }
 0x950   :  { %10962 = vmatprep.subr.mxu1 %v12248_v42  ;;  %10928 = vmatpush3.msra.mxu0 %v13534_v62 }
 0x951   :  { %10963 = vmatpush3.msra.mxu1 %v13534_v62  ;;  %10929 = vmatprep.subr.mxu0 %v12248_v42 }
 0x952   :  { %10964 = vmatprep.subr.mxu1 %v12248_v42  ;;  %10930 = vmatpush3.msra.mxu0 %v13543_v63 }
 0x953   :  { %10965 = vmatpush3.msra.mxu1 %v13543_v63  ;;  %10931 = vmatprep.subr.mxu0 %v12248_v42 }
 0x954   :  { %10966 = vmatprep.subr.mxu1 %v12248_v42  ;;  %10932 = vmatpush3.msra.mxu0 %v13549_v0 }
 0x955   :  { %10967 = vmatpush3.msra.mxu1 %v13549_v0  ;;  %10933 = vmatprep.subr.mxu0 %v12248_v42 }
 0x956   :  { %10968 = vmatprep.subr.mxu1 %v12248_v42  ;;  %10934 = vmatpush3.msra.mxu0 %v13558_v1 }
 0x957   :  { %10969 = vmatpush3.msra.mxu1 %v13558_v1  ;;  %10935 = vmatprep.subr.mxu0 %v12248_v42 }
 0x958   :  { %10970 = vmatprep.subr.mxu1 %v12248_v42  ;;  %10936 = vmatpush3.msra.mxu0 %v13567_v45 }
 0x959   :  { %10971 = vmatpush3.msra.mxu1 %v13567_v45  ;;  %10937 = vmatprep.subr.mxu0 %v12248_v42 }
 0x95a   :  { %10972 = vmatprep.subr.mxu1 %v12248_v42  ;;  %10938 = vmatpush3.msra.mxu0 %v13576_v2 }
 0x95b   :  { %10973 = vmatpush3.msra.mxu1 %v13576_v2  ;;  %9843 = vmatprep.subr.bf16.mxu0 %v11955_v40 }
 0x95c   :  { %10977 = vmatprep.subr.bf16.mxu1 %v12248_v42 }
 0x9fa   :  { %v3006_v41 = vpop.f32.mrf.mxu1 }
 0x9fb   :  { %v9794_v3 = vpop.f32.mrf.mxu0 }
 0x9fc   :  { %v10905_v49 = vpop.f32.mrf.mxu1 }
 0x9fd   :  { %v9795_v4 = vpop.f32.mrf.mxu0  ;;  %v11971_v49 = vld [vmem:[%s15444_s1 + $0x510] sm:$0xff]  }
 0x9fe   :  { %v9796_v5 = vadd.f32 %v9795_v4, %v9794_v3  ;;  %v3009_v6 = vpop.f32.mrf.mxu1  ;;  %v11970_v3 = vld [vmem:[%s15444_s1 + $0x4d0] sm:$0xff]   ;;  %v11973_v4 = vld [vmem:[%s15444_s1 + $0x4c8] sm:$0xff]  }
 0x9ff   :  { %v9797_v7 = vpop.f32.mrf.mxu0 }
 0xa00   :  { %v2966_v8 = vadd.f32 %v9796_v5, %v8552_v35  ;;  %v10906_v9 = vpop.f32.mrf.mxu1  ;;  %v11974_v5 = vld [vmem:[%s15444_s1 + $0x508] sm:$0xff]  }
 0xa01   :  { %v9798_v11 = vpop.f32.mrf.mxu0  ;;  %v11978_v9 = vld [vmem:[%s15444_s1 + $0x480] sm:$0xff]  }
 0xa02   :  { %v9799_v12 = vadd.f32 %v9798_v11, %v9797_v7  ;;  %v13588_v14 = vadd.f32 %v3006_v41, %v2966_v8  ;;  %v11969_v41 = vld [vmem:[%s15444_s1 + $0x498] sm:$0xff]   ;;  %v11976_v7 = vld [vmem:[%s15444_s1 + $0x4c0] sm:$0xff]  }
 0xa03   :  { %v11977_v8 = vld [vmem:[%s15444_s1 + $0x500] sm:$0xff]  }
 0xa04   :  { %v2969_v15 = vadd.f32 %v9799_v12, %v8552_v35  ;;  %v3090_v28 = vmul.f32 %v13588_v14, %v13588_v14  ;;  %v11972_v35 = vld [vmem:[%s15444_s1 + $0x490] sm:$0xff]  }
 0xa06   :  { %v13590_v20 = vadd.f32 %v3009_v6, %v2969_v15  ;;  %v11975_v6 = vld [vmem:[%s15444_s1 + $0x488] sm:$0xff]  }
 0xa08   :  { %v3013_v21 = vadd.f32 %v13590_v20, %v13588_v14  ;;  %v3091_v55 = vmul.f32 %v13590_v20, %v13590_v20 }
 0xa0a   :  { %v3014_v18 = vrot.slane %v3013_v21, 4  ;;  %v3092_v22 = vadd.f32 %v3091_v55, %v3090_v28 }
 0xa0c   :  { %v3015_v26 = vadd.f32 %v3014_v18, %v3013_v21  ;;  %v3093_v27 = vrot.slane %v3092_v22, 4 }
 0xa0e   :  { %v3016_v29 = vrot.slane %v3015_v26, 2  ;;  %v3094_v30 = vadd.f32 %v3093_v27, %v3092_v22 }
 0xa10   :  { %v3017_v32 = vadd.f32 %v3016_v29, %v3015_v26  ;;  %v3095_v33 = vrot.slane %v3094_v30, 2  ;;  %v8534_v29 = vld [vmem:[%s15446_s3 + $0x5] sm:$0x1] }
 0xa12   :  { %v3018_v34 = vrot.slane %v3017_v32, 1  ;;  %v3096_v36 = vadd.f32 %v3095_v33, %v3094_v30  ;;  %v8535_v33 = vld [vmem:[%s15447_s4 + $0x5] sm:$0x1] }
 0xa14   :  { %v3019_v37 = vadd.f32 %v3018_v34, %v3017_v32  ;;  %v3097_v38 = vrot.slane %v3096_v36, 1 }
 0xa16   :  { %10940 = vmatmul.mubr.f32.vlgmr.msra.gmra.mxu0 %v3019_v37  ;;  %v3098_v39 = vadd.f32 %v3097_v38, %v3096_v36 }
 0xa17   :  { %9844 = vmatpush3.bf16.msra.mxu0 %v11957_v24 }
 0xa18   :  { %10975 = vmatmul.mubr.f32.vlgmr.msra.gmra.mxu1 %v3098_v39  ;;  %9845 = vmatprep.subr.bf16.mxu0 %v11958_v25 }
 0xa19   :  { %10993 = vmatprep.mubr.msk.bf16.mxu1 %vm12249_vm0, %v12248_v42  ;;  %10978 = vmatpush3.bf16.msra.mxu1 %v11956_v23 }
 0xa1a   :  { %10979 = vmatprep.subr.bf16.mxu1 %v12248_v42 }
 0xa1b   :  { %9846 = vmatpush3.bf16.msra.mxu0 %v11960_v44 }
 0xa1c   :  { %9847 = vmatprep.subr.bf16.mxu0 %v11961_v46 }
 0xa1d   :  { %10980 = vmatpush3.bf16.msra.mxu1 %v11959_v43 }
 0xa1e   :  { %10981 = vmatprep.subr.bf16.mxu1 %v12248_v42 }
 0xa1f   :  { %9848 = vmatpush3.bf16.msra.mxu0 %v11963_v48 }
 0xa20   :  { %9849 = vmatprep.subr.bf16.mxu0 %v11964_v50 }
 0xa21   :  { %10982 = vmatpush3.bf16.msra.mxu1 %v11962_v47 }
 0xa22   :  { %10983 = vmatprep.subr.bf16.mxu1 %v12248_v42 }
 0xa23   :  { %9850 = vmatpush3.bf16.msra.mxu0 %v11966_v13 }
 0xa24   :  { %9851 = vmatprep.subr.bf16.mxu0 %v11967_v52 }
 0xa25   :  { %10984 = vmatpush3.bf16.msra.mxu1 %v11965_v51 }
 0xa26   :  { %10985 = vmatprep.subr.bf16.mxu1 %v12248_v42 }
 0xa27   :  { %9852 = vmatpush3.bf16.msra.mxu0 %v11969_v41 }
 0xa28   :  { %9853 = vmatprep.subr.bf16.mxu0 %v11970_v3 }
 0xa29   :  { %10986 = vmatpush3.bf16.msra.mxu1 %v11968_v10 }
 0xa2a   :  { %10987 = vmatprep.subr.bf16.mxu1 %v12248_v42 }
 0xa2b   :  { %9854 = vmatpush3.bf16.msra.mxu0 %v11972_v35 }
 0xa2c   :  { %9855 = vmatprep.subr.bf16.mxu0 %v11973_v4 }
 0xa2d   :  { %10988 = vmatpush3.bf16.msra.mxu1 %v11971_v49 }
 0xa2e   :  { %10989 = vmatprep.subr.bf16.mxu1 %v12248_v42 }
 0xa2f   :  { %9856 = vmatpush3.bf16.msra.mxu0 %v11975_v6 }
 0xa30   :  { %9857 = vmatprep.subr.bf16.mxu0 %v11976_v7 }
 0xa31   :  { %10990 = vmatpush3.bf16.msra.mxu1 %v11974_v5 }
 0xa32   :  { %10991 = vmatprep.subr.bf16.mxu1 %v12248_v42 }
 0xa33   :  { %9858 = vmatpush3.bf16.msra.mxu0 %v11978_v9 }
 0xa34   :  { %10997 = vmatprep.subr.mxu0 %v12248_v42 }
 0xa35   :  { %10992 = vmatpush3.bf16.msra.mxu1 %v11977_v8 }
 0xa36   :  { %11032 = vmatprep.subr.mxu1 %v12248_v42 }
 0xad6   :  { %v3086_v11 = vpop.f32.mrf.mxu0 }
 0xad7   :  { %v3169_v12 = vmul.f32 0.0078125, %v3086_v11 }
 0xad8   :  { %v10941_v15 = vpop.f32.mrf.mxu0  ;;  %v3165_v28 = vpop.f32.mrf.mxu1 }
 0xad9   :  { %v3171_v21 = vmul.f32 %v3169_v12, %v3169_v12  ;;  %v3170_v55 = vmul.f32 0.0078125, %v3165_v28  ;;  %v11979_v28 = vld [vmem:[%s15444_s1 + $0x5b8] sm:$0xff]  }
 0xada   :  { %v10976_v18 = vpop.f32.mrf.mxu1 }
 0xadb   :  { %v3172_v22 = vsub.f32 %v3170_v55, %v3171_v21  ;;  %v11980_v21 = vld [vmem:[%s15444_s1 + $0x578] sm:$0xff]   ;;  %v11982_v18 = vld [vmem:[%s15444_s1 + $0x5b0] sm:$0xff]  }
 0xadc   :  { %v11981_v55 = vld [vmem:[%s15444_s1 + $0x5f8] sm:$0xff]  }
 0xadd   :  { %v3173_v26 = vmax.f32 %v3172_v22, 0.0  ;;  %v11983_v22 = vld [vmem:[%s15444_s1 + $0x570] sm:$0xff]  }
 0xadf   :  { %v3174_v27 = vadd.f32 1e-05, %v3173_v26  ;;  %v11984_v26 = vld [vmem:[%s15444_s1 + $0x5f0] sm:$0xff]  }
 0xae1   :  { %12190 = vrsqrt.f32 %v3174_v27  ;;  %v11985_v27 = vld [vmem:[%s15444_s1 + $0x5a8] sm:$0xff]  }
 0xaee   :  { %v12191_v30 = vpop.eup %12190 }
 0xaef   :  { %v3176_v32 = vmul.f32 %v12191_v30, %v8534_v29  ;;  %v11986_v29 = vld [vmem:[%s15444_s1 + $0x568] sm:$0xff]  }
 0xaf0   :  { %v11987_v30 = vld [vmem:[%s15444_s1 + $0x5e8] sm:$0xff]  }
 0xaf1   :  { %v3177_v34 = vmul.f32 %v3176_v32, %v3169_v12  ;;  %v3183_v36 = vrot.slane %v3176_v32, %v12609_v19  ;;  %v11988_v32 = vld [vmem:[%s15444_s1 + $0x5a0] sm:$0xff]  }
 0xaf3   :  { %v3178_v37 = vsub.f32 %v8535_v33, %v3177_v34  ;;  %v3185_v38 = vmul.f32 %v3183_v36, %v13588_v14  ;;  %v3186_v39 = vmul.f32 %v3183_v36, %v13590_v20  ;;  %v11989_v33 = vld [vmem:[%s15444_s1 + $0x560] sm:$0xff]   ;;  %v11991_v36 = vld [vmem:[%s15444_s1 + $0x598] sm:$0xff]  }
 0xaf4   :  { %v11990_v34 = vld [vmem:[%s15444_s1 + $0x5e0] sm:$0xff]  }
 0xaf5   :  { %v3191_v40 = vrot.slane %v3178_v37, %v12609_v19  ;;  %v11992_v37 = vld [vmem:[%s15444_s1 + $0x558] sm:$0xff]  }
 0xaf7   :  { %v3193_v23 = vadd.f32 %v3191_v40, %v3185_v38  ;;  %v3194_v24 = vadd.f32 %v3191_v40, %v3186_v39  ;;  %v11993_v38 = vld [vmem:[%s15444_s1 + $0x5d8] sm:$0xff]   ;;  %v11994_v39 = vld [vmem:[%s15444_s1 + $0x590] sm:$0xff]  }
 0xaf8   :  { %v11995_v40 = vld [vmem:[%s15444_s1 + $0x550] sm:$0xff]  }
 0xaf9   :  { %vm3195_vm3 = vcmp.ge.f32.partialorder %v3193_v23, 0.0  ;;  %vm3196_vm4 = vcmp.ge.f32.partialorder %v3194_v24, 0.0  ;;  %v3197_v25 = vmul.f32 0.1, %v3193_v23  ;;  %v3198_v43 = vmul.f32 0.1, %v3194_v24 }
 0xafb   :  { %v3199_v44 = vsel %vm3195_vm3, %v3193_v23, %v3197_v25  ;;  %v3200_v46 = vsel %vm3196_vm4, %v3194_v24, %v3198_v43  ;;  %v11996_v23 = vld [vmem:[%s15444_s1 + $0x5d0] sm:$0xff]   ;;  %v11997_v24 = vld [vmem:[%s15444_s1 + $0x588] sm:$0xff]   ;;  %vm8108_vm3 = vcmask 9216  }
 0xafc   :  { %3201 = vst [vmem:[#allocation3 + $0x1] sm:$0xff] %v3199_v44  ;;  %3202 = vst [vmem:[#allocation3 + $0x11] sm:$0xff] %v3200_v46  ;;  %v3281_v47 = vpack.c.bf16 %v3200_v46, %v3199_v44  ;;  %v11998_v25 = vld [vmem:[%s15444_s1 + $0x548] sm:$0xff]   ;;  %v12000_v44 = vld [vmem:[%s15444_s1 + $0x580] sm:$0xff]  }
 0xafd   :  { %v11999_v43 = vld [vmem:[%s15444_s1 + $0x5c8] sm:$0xff]   ;;  %v12001_v46 = vld [vmem:[%s15444_s1 + $0x540] sm:$0xff]  }
 0xafe   :  { %3465 = vmatprep.mubr.bf16.mxu0 %v3281_v47  ;;  %v12002_v47 = vld [vmem:[%s15444_s1 + $0x5c0] sm:$0xff]  }
 0xb03   :  { %v3278_v48 = vld [vmem:[#allocation3 + $0x2] sm:$0xff]  ;;  %v3279_v50 = vld [vmem:[#allocation3 + $0x12] sm:$0xff] }
 0xb04   :  { %v3274_v51 = vld [vmem:[#allocation3] sm:$0xff]  ;;  %v3282_v14 = vpack.c.bf16 %v3279_v50, %v3278_v48  ;;  %v3275_v13 = vld [vmem:[#allocation3 + $0x10] sm:$0xff] }
 0xb05   :  { %v3280_v20 = vpack.c.bf16 %v3275_v13, %v3274_v51 }
 0xb06   :  { %10994 = vmatmul.mubr.bf16.vlgmr.msra.gmra.mxu1 %v3282_v14 }
 0xb07   :  { %3466 = vmatmul.mubr.bf16.vlgmr.msra.gmra.mxu0 %v3280_v20  ;;  %11033 = vmatpush3.msra.mxu1 %v13441_v31 }
 0xb08   :  { %10998 = vmatpush3.msra.mxu0 %v13441_v31  ;;  %11034 = vmatprep.subr.mxu1 %v12248_v42 }
 0xb09   :  { %10999 = vmatprep.subr.mxu0 %v12248_v42  ;;  %11035 = vmatpush3.msra.mxu1 %v13446_v53 }
 0xb0a   :  { %11000 = vmatpush3.msra.mxu0 %v13446_v53  ;;  %11036 = vmatprep.subr.mxu1 %v12248_v42 }
 0xb0b   :  { %11001 = vmatprep.subr.mxu0 %v12248_v42  ;;  %11037 = vmatpush3.msra.mxu1 %v13463_v54 }
 0xb0c   :  { %11002 = vmatpush3.msra.mxu0 %v13463_v54  ;;  %11038 = vmatprep.subr.mxu1 %v12248_v42 }
 0xb0d   :  { %11003 = vmatprep.subr.mxu0 %v12248_v42  ;;  %11039 = vmatpush3.msra.mxu1 %v13471_v17 }
 0xb0e   :  { %11004 = vmatpush3.msra.mxu0 %v13471_v17  ;;  %11040 = vmatprep.subr.mxu1 %v12248_v42  ;;  %v8644_v17 = vld [vmem:[%s15445_s2 + $0x6] ss:$0 sm:$0xff] }
 0xb0f   :  { %11005 = vmatprep.subr.mxu0 %v12248_v42  ;;  %11041 = vmatpush3.msra.mxu1 %v13480_v56 }
 0xb10   :  { %11006 = vmatpush3.msra.mxu0 %v13480_v56  ;;  %11042 = vmatprep.subr.mxu1 %v12248_v42 }
 0xb11   :  { %11007 = vmatprep.subr.mxu0 %v12248_v42  ;;  %11043 = vmatpush3.msra.mxu1 %v13489_v57 }
 0xb12   :  { %11008 = vmatpush3.msra.mxu0 %v13489_v57  ;;  %11044 = vmatprep.subr.mxu1 %v12248_v42 }
 0xb13   :  { %11009 = vmatprep.subr.mxu0 %v12248_v42  ;;  %11045 = vmatpush3.msra.mxu1 %v13498_v58 }
 0xb14   :  { %11010 = vmatpush3.msra.mxu0 %v13498_v58  ;;  %11046 = vmatprep.subr.mxu1 %v12248_v42 }
 0xb15   :  { %11011 = vmatprep.subr.mxu0 %v12248_v42  ;;  %11047 = vmatpush3.msra.mxu1 %v13507_v59 }
 0xb16   :  { %11012 = vmatpush3.msra.mxu0 %v13507_v59  ;;  %11048 = vmatprep.subr.mxu1 %v12248_v42 }
 0xb17   :  { %11013 = vmatprep.subr.mxu0 %v12248_v42  ;;  %11049 = vmatpush3.msra.mxu1 %v13516_v60 }
 0xb18   :  { %11014 = vmatpush3.msra.mxu0 %v13516_v60  ;;  %11050 = vmatprep.subr.mxu1 %v12248_v42 }
 0xb19   :  { %11015 = vmatprep.subr.mxu0 %v12248_v42  ;;  %11051 = vmatpush3.msra.mxu1 %v13525_v61 }
 0xb1a   :  { %11016 = vmatpush3.msra.mxu0 %v13525_v61  ;;  %11052 = vmatprep.subr.mxu1 %v12248_v42 }
 0xb1b   :  { %11017 = vmatprep.subr.mxu0 %v12248_v42  ;;  %11053 = vmatpush3.msra.mxu1 %v13534_v62 }
 0xb1c   :  { %11018 = vmatpush3.msra.mxu0 %v13534_v62  ;;  %11054 = vmatprep.subr.mxu1 %v12248_v42 }
 0xb1d   :  { %11019 = vmatprep.subr.mxu0 %v12248_v42  ;;  %11055 = vmatpush3.msra.mxu1 %v13543_v63 }
 0xb1e   :  { %11020 = vmatpush3.msra.mxu0 %v13543_v63  ;;  %11056 = vmatprep.subr.mxu1 %v12248_v42 }
 0xb1f   :  { %11021 = vmatprep.subr.mxu0 %v12248_v42  ;;  %11057 = vmatpush3.msra.mxu1 %v13549_v0 }
 0xb20   :  { %11022 = vmatpush3.msra.mxu0 %v13549_v0  ;;  %11058 = vmatprep.subr.mxu1 %v12248_v42 }
 0xb21   :  { %11023 = vmatprep.subr.mxu0 %v12248_v42  ;;  %11059 = vmatpush3.msra.mxu1 %v13558_v1 }
 0xb22   :  { %11024 = vmatpush3.msra.mxu0 %v13558_v1  ;;  %11060 = vmatprep.subr.mxu1 %v12248_v42 }
 0xb23   :  { %11025 = vmatprep.subr.mxu0 %v12248_v42  ;;  %11029 = vmatprep.mubr.msk.f32.mxu0 %vm12249_vm0, %v12248_v42 }
 0xb24   :  { %11026 = vmatpush3.msra.mxu0 %v13567_v45  ;;  %11061 = vmatpush3.msra.mxu1 %v13567_v45 }
 0xb25   :  { %11027 = vmatprep.subr.mxu0 %v12248_v42  ;;  %11062 = vmatprep.subr.mxu1 %v12248_v42 }
 0xb26   :  { %11028 = vmatpush3.msra.mxu0 %v13576_v2  ;;  %11063 = vmatpush3.msra.mxu1 %v13576_v2 }
 0xb27   :  { %11064 = vmatprep.mubr.msk.f32.mxu1 %vm12249_vm0, %v12248_v42  ;;  %11067 = vmatprep.subr.bf16.mxu1 %v12248_v42 }
 0xb28   :  { %9908 = vmatprep.subr.bf16.mxu0 %v11979_v28  ;;  %v13867_v28 = vld [vmem:[%s15448_s5 + $0x178] sm:$0xff] }
 0xbc6   :  { %v3508_v31 = vpop.f32.mrf.mxu1 }
 0xbc7   :  { %v9859_v53 = vpop.f32.mrf.mxu0 }
 0xbc8   :  { %v10995_v54 = vpop.f32.mrf.mxu1 }
 0xbc9   :  { %v9860_v56 = vpop.f32.mrf.mxu0 }
 0xbca   :  { %v9861_v57 = vadd.f32 %v9860_v56, %v9859_v53  ;;  %v3511_v58 = vpop.f32.mrf.mxu1  ;;  %v8626_v56 = vld [vmem:[%s15446_s3 + $0x6] sm:$0x1] }
 0xbcb   :  { %v9862_v59 = vpop.f32.mrf.mxu0 }
 0xbcc   :  { %v3468_v60 = vadd.f32 %v9861_v57, %v8644_v17  ;;  %v10996_v61 = vpop.f32.mrf.mxu1 }
 0xbcd   :  { %v9863_v62 = vpop.f32.mrf.mxu0 }
 0xbce   :  { %v9864_v63 = vadd.f32 %v9863_v62, %v9862_v59  ;;  %v13761_v0 = vadd.f32 %v3508_v31, %v3468_v60  ;;  %v8627_v59 = vld [vmem:[%s15447_s4 + $0x6] sm:$0x1] }
 0xbd0   :  { %v3471_v1 = vadd.f32 %v9864_v63, %v8644_v17  ;;  %v3592_v2 = vmul.f32 %v13761_v0, %v13761_v0 }
 0xbd2   :  { %v13763_v45 = vadd.f32 %v3511_v58, %v3471_v1 }
 0xbd4   :  { %v3515_v52 = vadd.f32 %v13763_v45, %v13761_v0  ;;  %v3593_v10 = vmul.f32 %v13763_v45, %v13763_v45 }
 0xbd6   :  { %v3516_v41 = vrot.slane %v3515_v52, 4  ;;  %v3594_v3 = vadd.f32 %v3593_v10, %v3592_v2 }
 0xbd8   :  { %v3517_v49 = vadd.f32 %v3516_v41, %v3515_v52  ;;  %v3595_v35 = vrot.slane %v3594_v3, 4 }
 0xbda   :  { %v3518_v4 = vrot.slane %v3517_v49, 2  ;;  %v3596_v5 = vadd.f32 %v3595_v35, %v3594_v3 }
 0xbdc   :  { %v3519_v6 = vadd.f32 %v3518_v4, %v3517_v49  ;;  %v3597_v7 = vrot.slane %v3596_v5, 2 }
 0xbde   :  { %v3520_v8 = vrot.slane %v3519_v6, 1  ;;  %v3598_v9 = vadd.f32 %v3597_v7, %v3596_v5 }
 0xbe0   :  { %v3521_v11 = vadd.f32 %v3520_v8, %v3519_v6  ;;  %v3599_v12 = vrot.slane %v3598_v9, 1 }
 0xbe2   :  { %11030 = vmatmul.mubr.f32.vlgmr.msra.gmra.mxu0 %v3521_v11  ;;  %v3600_v15 = vadd.f32 %v3599_v12, %v3598_v9 }
 0xbe3   :  { %9909 = vmatpush3.bf16.msra.mxu0 %v11980_v21 }
 0xbe4   :  { %11065 = vmatmul.mubr.f32.vlgmr.msra.gmra.mxu1 %v3600_v15  ;;  %9910 = vmatprep.subr.bf16.mxu0 %v11982_v18  ;;  %v13881_v18 = vld [vmem:[%s15448_s5 + $0x168] sm:$0xff] }
 0xbe5   :  { %11083 = vmatprep.mubr.msk.bf16.mxu1 %vm12249_vm0, %v12248_v42  ;;  %11068 = vmatpush3.bf16.msra.mxu1 %v11981_v55  ;;  %v13872_v55 = vld [vmem:[%s15448_s5 + $0x170] sm:$0xff] }
 0xbe6   :  { %11069 = vmatprep.subr.bf16.mxu1 %v12248_v42 }
 0xbe7   :  { %9911 = vmatpush3.bf16.msra.mxu0 %v11983_v22  ;;  %v13890_v22 = vld [vmem:[%s15448_s5 + $0x160] sm:$0xff] }
 0xbe8   :  { %9912 = vmatprep.subr.bf16.mxu0 %v11985_v27  ;;  %v13916_v27 = vld [vmem:[%s15448_s5 + $0x150] sm:$0xff] }
 0xbe9   :  { %11070 = vmatpush3.bf16.msra.mxu1 %v11984_v26  ;;  %v13899_v26 = vld [vmem:[%s15448_s5 + $0x158] sm:$0xff] }
 0xbea   :  { %11071 = vmatprep.subr.bf16.mxu1 %v12248_v42 }
 0xbeb   :  { %9913 = vmatpush3.bf16.msra.mxu0 %v11986_v29  ;;  %v13924_v29 = vld [vmem:[%s15448_s5 + $0x148] sm:$0xff] }
 0xbec   :  { %9914 = vmatprep.subr.bf16.mxu0 %v11988_v32  ;;  %v13942_v32 = vld [vmem:[%s15448_s5 + $0x138] sm:$0xff] }
 0xbed   :  { %11072 = vmatpush3.bf16.msra.mxu1 %v11987_v30  ;;  %v13933_v30 = vld [vmem:[%s15448_s5 + $0x140] sm:$0xff] }
 0xbee   :  { %11073 = vmatprep.subr.bf16.mxu1 %v12248_v42 }
 0xbef   :  { %9915 = vmatpush3.bf16.msra.mxu0 %v11989_v33  ;;  %v13951_v33 = vld [vmem:[%s15448_s5 + $0x130] sm:$0xff] }
 0xbf0   :  { %9916 = vmatprep.subr.bf16.mxu0 %v11991_v36  ;;  %v13966_v36 = vld [vmem:[%s15448_s5 + $0x120] sm:$0xff] }
 0xbf1   :  { %11074 = vmatpush3.bf16.msra.mxu1 %v11990_v34  ;;  %v13958_v34 = vld [vmem:[%s15448_s5 + $0x128] sm:$0xff] }
 0xbf2   :  { %11075 = vmatprep.subr.bf16.mxu1 %v12248_v42 }
 0xbf3   :  { %9917 = vmatpush3.bf16.msra.mxu0 %v11992_v37  ;;  %v13975_v37 = vld [vmem:[%s15448_s5 + $0x118] sm:$0xff] }
 0xbf4   :  { %9918 = vmatprep.subr.bf16.mxu0 %v11994_v39  ;;  %v13993_v39 = vld [vmem:[%s15448_s5 + $0x108] sm:$0xff] }
 0xbf5   :  { %11076 = vmatpush3.bf16.msra.mxu1 %v11993_v38  ;;  %v13984_v38 = vld [vmem:[%s15448_s5 + $0x110] sm:$0xff] }
 0xbf6   :  { %11077 = vmatprep.subr.bf16.mxu1 %v12248_v42 }
 0xbf7   :  { %9919 = vmatpush3.bf16.msra.mxu0 %v11995_v40  ;;  %v14002_v40 = vld [vmem:[%s15448_s5 + $0x100] sm:$0xff] }
 0xbf8   :  { %9920 = vmatprep.subr.bf16.mxu0 %v11997_v24 }
 0xbf9   :  { %11078 = vmatpush3.bf16.msra.mxu1 %v11996_v23 }
 0xbfa   :  { %11079 = vmatprep.subr.bf16.mxu1 %v12248_v42 }
 0xbfb   :  { %9921 = vmatpush3.bf16.msra.mxu0 %v11998_v25  ;;  %v8738_v25 = vld [vmem:[%s15445_s2 + $0x7] ss:$0 sm:$0xff] }
 0xbfc   :  { %9922 = vmatprep.subr.bf16.mxu0 %v12000_v44 }
 0xbfd   :  { %11080 = vmatpush3.bf16.msra.mxu1 %v11999_v43 }
 0xbfe   :  { %11081 = vmatprep.subr.bf16.mxu1 %v12248_v42 }
 0xbff   :  { %9923 = vmatpush3.bf16.msra.mxu0 %v12001_v46 }
 0xc00   :  { %11087 = vmatprep.subr.mxu0 %v12248_v42 }
 0xc01   :  { %11082 = vmatpush3.bf16.msra.mxu1 %v12002_v47 }
 0xc02   :  { %11122 = vmatprep.subr.mxu1 %v12248_v42 }
 0xca2   :  { %v3588_v48 = vpop.f32.mrf.mxu0 }
 0xca3   :  { %v3671_v50 = vmul.f32 0.0078125, %v3588_v48 }
 0xca4   :  { %v11031_v51 = vpop.f32.mrf.mxu0  ;;  %v3667_v14 = vpop.f32.mrf.mxu1 }
 0xca5   :  { %v3673_v13 = vmul.f32 %v3671_v50, %v3671_v50  ;;  %v3672_v20 = vmul.f32 0.0078125, %v3667_v14 }
 0xca6   :  { %v11066_v31 = vpop.f32.mrf.mxu1 }
 0xca7   :  { %v3674_v53 = vsub.f32 %v3672_v20, %v3673_v13 }
 0xca9   :  { %v3675_v54 = vmax.f32 %v3674_v53, 0.0 }
 0xcab   :  { %v3676_v17 = vadd.f32 1e-05, %v3675_v54 }
 0xcad   :  { %12192 = vrsqrt.f32 %v3676_v17 }
 0xcba   :  { %v12193_v57 = vpop.eup %12192 }
 0xcbb   :  { %v3678_v58 = vmul.f32 %v12193_v57, %v8626_v56 }
 0xcbd   :  { %v3679_v60 = vmul.f32 %v3678_v58, %v3671_v50  ;;  %v3685_v61 = vrot.slane %v3678_v58, %v12609_v19 }
 0xcbf   :  { %v3680_v62 = vsub.f32 %v8627_v59, %v3679_v60  ;;  %v3687_v63 = vmul.f32 %v3685_v61, %v13761_v0  ;;  %v3688_v1 = vmul.f32 %v3685_v61, %v13763_v45 }
 0xcc1   :  { %v3693_v2 = vrot.slane %v3680_v62, %v12609_v19 }
 0xcc3   :  { %v3695_v52 = vadd.f32 %v3693_v2, %v3687_v63  ;;  %v3696_v10 = vadd.f32 %v3693_v2, %v3688_v1  ;;  %v12003_v1 = vld [vmem:[%s15444_s1 + $0x678] sm:$0xff]  }
 0xcc4   :  { %v12004_v2 = vld [vmem:[%s15444_s1 + $0x6b8] sm:$0xff]  }
 0xcc5   :  { %vm3697_vm5 = vcmp.ge.f32.partialorder %v3695_v52, 0.0  ;;  %vm3698_vm6 = vcmp.ge.f32.partialorder %v3696_v10, 0.0  ;;  %v3699_v41 = vmul.f32 0.1, %v3695_v52  ;;  %v3700_v3 = vmul.f32 0.1, %v3696_v10 }
 0xcc7   :  { %v3701_v49 = vsel %vm3697_vm5, %v3695_v52, %v3699_v41  ;;  %v3702_v35 = vsel %vm3698_vm6, %v3696_v10, %v3700_v3  ;;  %v12005_v52 = vld [vmem:[%s15444_s1 + $0x638] sm:$0xff]   ;;  %v12006_v10 = vld [vmem:[%s15444_s1 + $0x670] sm:$0xff]  }
 0xcc8   :  { %3703 = vst [vmem:[#allocation3 + $0x1] sm:$0xff] %v3701_v49  ;;  %3704 = vst [vmem:[#allocation3 + $0x11] sm:$0xff] %v3702_v35  ;;  %v12007_v41 = vld [vmem:[%s15444_s1 + $0x6b0] sm:$0xff]   ;;  %v12009_v49 = vld [vmem:[%s15444_s1 + $0x668] sm:$0xff]  }
 0xcc9   :  { %v12008_v3 = vld [vmem:[%s15444_s1 + $0x630] sm:$0xff]   ;;  %v12010_v35 = vld [vmem:[%s15444_s1 + $0x6a8] sm:$0xff]  }
 0xccf   :  { %v3781_v4 = vld [vmem:[#allocation3 + $0x1] ss:$2 sm:$0xf]  ;;  %v3783_v5 = vld [vmem:[#allocation3 + $0x11] ss:$2 sm:$0xf] }
 0xcd0   :  { %v8737_v6 = vcombine.low %v3781_v4, %v3783_v5  ;;  %v3777_v7 = vld [vmem:[#allocation3] ss:$2 sm:$0x1f]  ;;  %v3779_v8 = vld [vmem:[#allocation3 + $0x10] ss:$2 sm:$0x1f] }
 0xcd1   :  { %v8736_v0 = vcombine.low %v3777_v7, %v3779_v8  ;;  %v3786_v9 = vrot.slane %v3777_v7, 1  ;;  %v3787_v45 = vrot.slane %v3779_v8, 1  ;;  %v12011_v4 = vld [vmem:[%s15444_s1 + $0x628] sm:$0xff]   ;;  %v12012_v5 = vld [vmem:[%s15444_s1 + $0x660] sm:$0xff]   ;;  %v12015_v8 = vld [vmem:[%s15444_s1 + $0x658] sm:$0xff]  }
 0xcd2   :  { %v3799_v11 = vpack.c.bf16 %v8737_v6, %v8737_v6  ;;  %v12013_v6 = vld [vmem:[%s15444_s1 + $0x6a0] sm:$0xff]  }
 0xcd3   :  { %v3798_v12 = vpack.c.bf16 %v8736_v0, %v8736_v0  ;;  %v3794_v15 = vcombine.low %v3786_v9, %v3787_v45  ;;  %v12014_v7 = vld [vmem:[%s15444_s1 + $0x620] sm:$0xff]   ;;  %v12016_v0 = vld [vmem:[%s15444_s1 + $0x698] sm:$0xff]   ;;  %v12018_v45 = vld [vmem:[%s15444_s1 + $0x650] sm:$0xff]  }
 0xcd4   :  { %3983 = vmatprep.mubr.bf16.mxu0 %v3799_v11  ;;  %v12017_v9 = vld [vmem:[%s15444_s1 + $0x618] sm:$0xff]   ;;  %v12019_v11 = vld [vmem:[%s15444_s1 + $0x690] sm:$0xff]  }
 0xcd5   :  { %3984 = vmatmul.mubr.bf16.vlgmr.msra.gmra.mxu0 %v3798_v12  ;;  %v3800_v21 = vpack.c.bf16 %v3794_v15, %v3794_v15  ;;  %v12020_v12 = vld [vmem:[%s15444_s1 + $0x610] sm:$0xff]   ;;  %v12021_v15 = vld [vmem:[%s15444_s1 + $0x648] sm:$0xff]  }
 0xcd6   :  { %11088 = vmatpush3.msra.mxu0 %v13867_v28  ;;  %11119 = vmatprep.mubr.msk.f32.mxu0 %vm12249_vm0, %v12248_v42 }
 0xcd7   :  { %11084 = vmatmul.mubr.bf16.vlgmr.msra.gmra.mxu1 %v3800_v21  ;;  %11089 = vmatprep.subr.mxu0 %v12248_v42  ;;  %v12022_v21 = vld [vmem:[%s15444_s1 + $0x688] sm:$0xff]  }
 0xcd8   :  { %11090 = vmatpush3.msra.mxu0 %v13872_v55  ;;  %11123 = vmatpush3.msra.mxu1 %v13867_v28 }
 0xcd9   :  { %11091 = vmatprep.subr.mxu0 %v12248_v42  ;;  %11124 = vmatprep.subr.mxu1 %v12248_v42 }
 0xcda   :  { %11092 = vmatpush3.msra.mxu0 %v13881_v18  ;;  %11125 = vmatpush3.msra.mxu1 %v13872_v55 }
 0xcdb   :  { %11093 = vmatprep.subr.mxu0 %v12248_v42  ;;  %11126 = vmatprep.subr.mxu1 %v12248_v42 }
 0xcdc   :  { %11094 = vmatpush3.msra.mxu0 %v13890_v22  ;;  %11127 = vmatpush3.msra.mxu1 %v13881_v18 }
 0xcdd   :  { %11095 = vmatprep.subr.mxu0 %v12248_v42  ;;  %11128 = vmatprep.subr.mxu1 %v12248_v42 }
 0xcde   :  { %11096 = vmatpush3.msra.mxu0 %v13899_v26  ;;  %11129 = vmatpush3.msra.mxu1 %v13890_v22 }
 0xcdf   :  { %11097 = vmatprep.subr.mxu0 %v12248_v42  ;;  %11130 = vmatprep.subr.mxu1 %v12248_v42 }
 0xce0   :  { %11131 = vmatpush3.msra.mxu1 %v13899_v26  ;;  %11154 = vmatprep.mubr.msk.f32.mxu1 %vm12249_vm0, %v12248_v42 }
 0xce1   :  { %11132 = vmatprep.subr.mxu1 %v12248_v42  ;;  %11098 = vmatpush3.msra.mxu0 %v13916_v27 }
 0xce2   :  { %11133 = vmatpush3.msra.mxu1 %v13916_v27  ;;  %11099 = vmatprep.subr.mxu0 %v12248_v42 }
 0xce3   :  { %11134 = vmatprep.subr.mxu1 %v12248_v42  ;;  %11100 = vmatpush3.msra.mxu0 %v13924_v29 }
 0xce4   :  { %11135 = vmatpush3.msra.mxu1 %v13924_v29  ;;  %11101 = vmatprep.subr.mxu0 %v12248_v42 }
 0xce5   :  { %11136 = vmatprep.subr.mxu1 %v12248_v42  ;;  %11102 = vmatpush3.msra.mxu0 %v13933_v30 }
 0xce6   :  { %11137 = vmatpush3.msra.mxu1 %v13933_v30  ;;  %11103 = vmatprep.subr.mxu0 %v12248_v42 }
 0xce7   :  { %11138 = vmatprep.subr.mxu1 %v12248_v42  ;;  %11104 = vmatpush3.msra.mxu0 %v13942_v32 }
 0xce8   :  { %11139 = vmatpush3.msra.mxu1 %v13942_v32  ;;  %11105 = vmatprep.subr.mxu0 %v12248_v42 }
 0xce9   :  { %11140 = vmatprep.subr.mxu1 %v12248_v42  ;;  %11106 = vmatpush3.msra.mxu0 %v13951_v33 }
 0xcea   :  { %11141 = vmatpush3.msra.mxu1 %v13951_v33  ;;  %11107 = vmatprep.subr.mxu0 %v12248_v42 }
 0xceb   :  { %11142 = vmatprep.subr.mxu1 %v12248_v42  ;;  %11108 = vmatpush3.msra.mxu0 %v13958_v34 }
 0xcec   :  { %11143 = vmatpush3.msra.mxu1 %v13958_v34  ;;  %11109 = vmatprep.subr.mxu0 %v12248_v42 }
 0xced   :  { %11144 = vmatprep.subr.mxu1 %v12248_v42  ;;  %11110 = vmatpush3.msra.mxu0 %v13966_v36 }
 0xcee   :  { %11145 = vmatpush3.msra.mxu1 %v13966_v36  ;;  %11111 = vmatprep.subr.mxu0 %v12248_v42 }
 0xcef   :  { %11146 = vmatprep.subr.mxu1 %v12248_v42  ;;  %11112 = vmatpush3.msra.mxu0 %v13975_v37 }
 0xcf0   :  { %11147 = vmatpush3.msra.mxu1 %v13975_v37  ;;  %11113 = vmatprep.subr.mxu0 %v12248_v42 }
 0xcf1   :  { %11148 = vmatprep.subr.mxu1 %v12248_v42  ;;  %11114 = vmatpush3.msra.mxu0 %v13984_v38 }
 0xcf2   :  { %11149 = vmatpush3.msra.mxu1 %v13984_v38  ;;  %11115 = vmatprep.subr.mxu0 %v12248_v42 }
 0xcf3   :  { %11150 = vmatprep.subr.mxu1 %v12248_v42  ;;  %11116 = vmatpush3.msra.mxu0 %v13993_v39 }
 0xcf4   :  { %11151 = vmatpush3.msra.mxu1 %v13993_v39  ;;  %11117 = vmatprep.subr.mxu0 %v12248_v42 }
 0xcf5   :  { %11152 = vmatprep.subr.mxu1 %v12248_v42  ;;  %11118 = vmatpush3.msra.mxu0 %v14002_v40 }
 0xcf6   :  { %11153 = vmatpush3.msra.mxu1 %v14002_v40  ;;  %9973 = vmatprep.subr.bf16.mxu0 %v12003_v1 }
 0xcf7   :  { %11157 = vmatprep.subr.bf16.mxu1 %v12248_v42 }
 0xd95   :  { %v9924_v23 = vpop.f32.mrf.mxu0 }
 0xd97   :  { %v4025_v24 = vpop.f32.mrf.mxu1  ;;  %v9925_v43 = vpop.f32.mrf.mxu0 }
 0xd98   :  { %v9926_v44 = vadd.f32 %v9925_v43, %v9924_v23  ;;  %v12023_v23 = vld [vmem:[%s15444_s1 + $0x608] sm:$0xff]   ;;  %v12026_v43 = vld [vmem:[%s15444_s1 + $0x600] sm:$0xff]  }
 0xd99   :  { %v11085_v46 = vpop.f32.mrf.mxu1  ;;  %v9927_v47 = vpop.f32.mrf.mxu0 }
 0xd9a   :  { %v3986_v48 = vadd.f32 %v9926_v44, %v8738_v25  ;;  %v12025_v25 = vld [vmem:[%s15444_s1 + $0x680] sm:$0xff]  }
 0xd9b   :  { %v4028_v50 = vpop.f32.mrf.mxu1  ;;  %v9928_v51 = vpop.f32.mrf.mxu0 }
 0xd9c   :  { %v14014_v14 = vadd.f32 %v4025_v24, %v3986_v48  ;;  %v12024_v24 = vld [vmem:[%s15444_s1 + $0x640] sm:$0xff]  }
 0xd9d   :  { %v11086_v13 = vpop.f32.mrf.mxu1 }
 0xd9e   :  { %v4031_v20 = vrot.slane %v14014_v14, 4  ;;  %v4107_v31 = vmul.f32 %v14014_v14, %v14014_v14 }
 0xda0   :  { %v4032_v53 = vadd.f32 %v4031_v20, %v14014_v14  ;;  %v4108_v54 = vrot.slane %v4107_v31, 4 }
 0xda2   :  { %v4033_v17 = vrot.slane %v4032_v53, 2  ;;  %v4109_v56 = vadd.f32 %v4108_v54, %v4107_v31  ;;  %v8718_v54 = vld [vmem:[%s15446_s3 + $0x7] sm:$0x1] }
 0xda4   :  { %v4034_v57 = vadd.f32 %v4033_v17, %v4032_v53  ;;  %v4110_v58 = vrot.slane %v4109_v56, 2 }
 0xda6   :  { %v4035_v59 = vrot.slane %v4034_v57, 1  ;;  %v4111_v60 = vadd.f32 %v4110_v58, %v4109_v56 }
 0xda8   :  { %v4036_v61 = vadd.f32 %v4035_v59, %v4034_v57  ;;  %v4112_v62 = vrot.slane %v4111_v60, 1  ;;  %v8719_v57 = vld [vmem:[%s15447_s4 + $0x7] sm:$0x1] }
 0xdaa   :  { %11120 = vmatmul.mubr.f32.vlgmr.msra.gmra.mxu0 %v4036_v61  ;;  %v4113_v63 = vadd.f32 %v4112_v62, %v4111_v60 }
 0xdab   :  { %9974 = vmatpush3.bf16.msra.mxu0 %v12005_v52 }
 0xdac   :  { %11155 = vmatmul.mubr.f32.vlgmr.msra.gmra.mxu1 %v4113_v63  ;;  %9975 = vmatprep.subr.bf16.mxu0 %v12006_v10 }
 0xdad   :  { %11173 = vmatprep.mubr.msk.bf16.mxu1 %vm12249_vm0, %v12248_v42  ;;  %11158 = vmatpush3.bf16.msra.mxu1 %v12004_v2 }
 0xdae   :  { %11159 = vmatprep.subr.bf16.mxu1 %v12248_v42 }
 0xdaf   :  { %9976 = vmatpush3.bf16.msra.mxu0 %v12008_v3 }
 0xdb0   :  { %9977 = vmatprep.subr.bf16.mxu0 %v12009_v49 }
 0xdb1   :  { %11160 = vmatpush3.bf16.msra.mxu1 %v12007_v41 }
 0xdb2   :  { %11161 = vmatprep.subr.bf16.mxu1 %v12248_v42 }
 0xdb3   :  { %9978 = vmatpush3.bf16.msra.mxu0 %v12011_v4 }
 0xdb4   :  { %9979 = vmatprep.subr.bf16.mxu0 %v12012_v5 }
 0xdb5   :  { %11162 = vmatpush3.bf16.msra.mxu1 %v12010_v35 }
 0xdb6   :  { %11163 = vmatprep.subr.bf16.mxu1 %v12248_v42 }
 0xdb7   :  { %9980 = vmatpush3.bf16.msra.mxu0 %v12014_v7  ;;  %v8832_v7 = vld [vmem:[%s15445_s2 + $0x8] ss:$0 sm:$0xff] }
 0xdb8   :  { %9981 = vmatprep.subr.bf16.mxu0 %v12015_v8 }
 0xdb9   :  { %11164 = vmatpush3.bf16.msra.mxu1 %v12013_v6 }
 0xdba   :  { %11165 = vmatprep.subr.bf16.mxu1 %v12248_v42 }
 0xdbb   :  { %9982 = vmatpush3.bf16.msra.mxu0 %v12017_v9 }
 0xdbc   :  { %9983 = vmatprep.subr.bf16.mxu0 %v12018_v45 }
 0xdbd   :  { %11166 = vmatpush3.bf16.msra.mxu1 %v12016_v0 }
 0xdbe   :  { %11167 = vmatprep.subr.bf16.mxu1 %v12248_v42 }
 0xdbf   :  { %9984 = vmatpush3.bf16.msra.mxu0 %v12020_v12 }
 0xdc0   :  { %9985 = vmatprep.subr.bf16.mxu0 %v12021_v15 }
 0xdc1   :  { %11168 = vmatpush3.bf16.msra.mxu1 %v12019_v11 }
 0xdc2   :  { %11169 = vmatprep.subr.bf16.mxu1 %v12248_v42 }
 0xdc3   :  { %9986 = vmatpush3.bf16.msra.mxu0 %v12023_v23 }
 0xdc4   :  { %9987 = vmatprep.subr.bf16.mxu0 %v12024_v24 }
 0xdc5   :  { %11170 = vmatpush3.bf16.msra.mxu1 %v12022_v21 }
 0xdc6   :  { %11171 = vmatprep.subr.bf16.mxu1 %v12248_v42 }
 0xdc7   :  { %9988 = vmatpush3.bf16.msra.mxu0 %v12026_v43 }
 0xdc8   :  { %11177 = vmatprep.subr.mxu0 %v12248_v42 }
 0xdc9   :  { %11172 = vmatpush3.bf16.msra.mxu1 %v12025_v25 }
 0xdca   :  { %11212 = vmatprep.subr.mxu1 %v12248_v42 }
 0xe6a   :  { %v4103_v44 = vpop.f32.mrf.mxu0 }
 0xe6b   :  { %v4184_v46 = vmul.f32 0.03125, %v4103_v44 }
 0xe6c   :  { %v11121_v47 = vpop.f32.mrf.mxu0  ;;  %v4180_v48 = vpop.f32.mrf.mxu1 }
 0xe6d   :  { %v4186_v50 = vmul.f32 %v4184_v46, %v4184_v46  ;;  %v4185_v51 = vmul.f32 0.03125, %v4180_v48 }
 0xe6e   :  { %v11156_v13 = vpop.f32.mrf.mxu1 }
 0xe6f   :  { %v4187_v20 = vsub.f32 %v4185_v51, %v4186_v50 }
 0xe71   :  { %v4188_v31 = vmax.f32 %v4187_v20, 0.0 }
 0xe73   :  { %v4189_v53 = vadd.f32 1e-05, %v4188_v31 }
 0xe75   :  { %12194 = vrsqrt.f32 %v4189_v53  ;;  %v12030_v53 = vld [vmem:[%s15444_s1 + $0x738] sm:$0xff]  }
 0xe82   :  { %v12195_v17 = vpop.eup %12194 }
 0xe83   :  { %v4191_v56 = vmul.f32 %v12195_v17, %v8718_v54  ;;  %v12031_v54 = vld [vmem:[%s15444_s1 + $0x778] sm:$0xff]  }
 0xe84   :  { %v12032_v17 = vld [vmem:[%s15444_s1 + $0x6f8] sm:$0xff]  }
 0xe85   :  { %v4192_v58 = vmul.f32 %v4191_v56, %v4184_v46  ;;  %v4198_v59 = vrot.slane %v4191_v56, %v12609_v19  ;;  %v12033_v56 = vld [vmem:[%s15444_s1 + $0x730] sm:$0xff]  }
 0xe87   :  { %v4193_v60 = vsub.f32 %v8719_v57, %v4192_v58  ;;  %v4200_v61 = vmul.f32 %v4198_v59, %v14014_v14  ;;  %v12034_v57 = vld [vmem:[%s15444_s1 + $0x770] sm:$0xff]   ;;  %v12036_v59 = vld [vmem:[%s15444_s1 + $0x728] sm:$0xff]  }
 0xe88   :  { %v12035_v58 = vld [vmem:[%s15444_s1 + $0x6f0] sm:$0xff]  }
 0xe89   :  { %v4205_v62 = vrot.slane %v4193_v60, %v12609_v19  ;;  %v12037_v60 = vld [vmem:[%s15444_s1 + $0x768] sm:$0xff]  }
 0xe8b   :  { %v4207_v63 = vadd.f32 %v4205_v62, %v4200_v61  ;;  %v12038_v61 = vld [vmem:[%s15444_s1 + $0x6e8] sm:$0xff]   ;;  %v12039_v62 = vld [vmem:[%s15444_s1 + $0x720] sm:$0xff]  }
 0xe8d   :  { %vm4208_vm7 = vcmp.ge.f32.partialorder %v4207_v63, 0.0  ;;  %v4209_v1 = vmul.f32 0.1, %v4207_v63 }
 0xe8f   :  { %v4210_v2 = vsel %vm4208_vm7, %v4207_v63, %v4209_v1  ;;  %v12040_v63 = vld [vmem:[%s15444_s1 + $0x760] sm:$0xff]  }
 0xe90   :  { %v4212_v52 = vcombine.high %v4210_v2, %v4210_v2  ;;  %4214 = vst [vmem:[#allocation4 + $0x1] sm:$0xf] %v4210_v2  ;;  %v12041_v1 = vld [vmem:[%s15444_s1 + $0x6e0] sm:$0xff]   ;;  %v12042_v2 = vld [vmem:[%s15444_s1 + $0x718] sm:$0xff]  }
 0xe92   :  { %4215 = vst [vmem:[#allocation4 + $0x9] sm:$0xf] %v4212_v52  ;;  %v12043_v52 = vld [vmem:[%s15444_s1 + $0x758] sm:$0xff]  }
 0xe99   :  { %v12027_v10 = vld [vmem:[#allocation4 + $0x1] ss:$8 sps:$4 sm:$0xff]  }
 0xe9a   :  { %v12028_v41 = vld [vmem:[#allocation4 + $0x2] ss:$8 sps:$4 sm:$0xff]   ;;  %v4308_v49 = vpack.c.bf16 %v12027_v10, %v12027_v10 }
 0xe9b   :  { %v12029_v3 = vld [vmem:[#allocation4] ss:$8 sps:$4 sm:$0xff]   ;;  %v4309_v35 = vpack.c.bf16 %v12028_v41, %v12028_v41 }
 0xe9c   :  { %v4307_v4 = vpack.c.bf16 %v12029_v3, %v12029_v3  ;;  %4492 = vmatprep.mubr.bf16.mxu0 %v4308_v49  ;;  %v12044_v10 = vld [vmem:[%s15444_s1 + $0x6d8] sm:$0xff]   ;;  %v12045_v41 = vld [vmem:[%s15444_s1 + $0x710] sm:$0xff]  }
 0xe9d   :  { %11174 = vmatmul.mubr.bf16.vlgmr.msra.gmra.mxu1 %v4309_v35  ;;  %v12046_v3 = vld [vmem:[%s15444_s1 + $0x750] sm:$0xff]   ;;  %v12048_v35 = vld [vmem:[%s15444_s1 + $0x708] sm:$0xff]  }
 0xe9e   :  { %4493 = vmatmul.mubr.bf16.vlgmr.msra.gmra.mxu0 %v4307_v4  ;;  %11213 = vmatpush3.msra.mxu1 %v13867_v28  ;;  %v12047_v49 = vld [vmem:[%s15444_s1 + $0x6d0] sm:$0xff]   ;;  %v12049_v4 = vld [vmem:[%s15444_s1 + $0x748] sm:$0xff]  }
 0xe9f   :  { %11178 = vmatpush3.msra.mxu0 %v13867_v28  ;;  %11214 = vmatprep.subr.mxu1 %v12248_v42 }
 0xea0   :  { %11179 = vmatprep.subr.mxu0 %v12248_v42  ;;  %11215 = vmatpush3.msra.mxu1 %v13872_v55 }
 0xea1   :  { %11180 = vmatpush3.msra.mxu0 %v13872_v55  ;;  %11216 = vmatprep.subr.mxu1 %v12248_v42 }
 0xea2   :  { %11181 = vmatprep.subr.mxu0 %v12248_v42  ;;  %11217 = vmatpush3.msra.mxu1 %v13881_v18 }
 0xea3   :  { %11182 = vmatpush3.msra.mxu0 %v13881_v18  ;;  %11218 = vmatprep.subr.mxu1 %v12248_v42 }
 0xea4   :  { %11183 = vmatprep.subr.mxu0 %v12248_v42  ;;  %11219 = vmatpush3.msra.mxu1 %v13890_v22 }
 0xea5   :  { %11184 = vmatpush3.msra.mxu0 %v13890_v22  ;;  %11220 = vmatprep.subr.mxu1 %v12248_v42 }
 0xea6   :  { %11185 = vmatprep.subr.mxu0 %v12248_v42  ;;  %11221 = vmatpush3.msra.mxu1 %v13899_v26 }
 0xea7   :  { %11186 = vmatpush3.msra.mxu0 %v13899_v26  ;;  %11222 = vmatprep.subr.mxu1 %v12248_v42 }
 0xea8   :  { %11187 = vmatprep.subr.mxu0 %v12248_v42  ;;  %11223 = vmatpush3.msra.mxu1 %v13916_v27 }
 0xea9   :  { %11188 = vmatpush3.msra.mxu0 %v13916_v27  ;;  %11224 = vmatprep.subr.mxu1 %v12248_v42 }
 0xeaa   :  { %11189 = vmatprep.subr.mxu0 %v12248_v42  ;;  %11225 = vmatpush3.msra.mxu1 %v13924_v29 }
 0xeab   :  { %11190 = vmatpush3.msra.mxu0 %v13924_v29  ;;  %11226 = vmatprep.subr.mxu1 %v12248_v42 }
 0xeac   :  { %11191 = vmatprep.subr.mxu0 %v12248_v42  ;;  %11227 = vmatpush3.msra.mxu1 %v13933_v30 }
 0xead   :  { %11192 = vmatpush3.msra.mxu0 %v13933_v30  ;;  %11228 = vmatprep.subr.mxu1 %v12248_v42 }
 0xeae   :  { %11193 = vmatprep.subr.mxu0 %v12248_v42  ;;  %11229 = vmatpush3.msra.mxu1 %v13942_v32 }
 0xeaf   :  { %11194 = vmatpush3.msra.mxu0 %v13942_v32  ;;  %11230 = vmatprep.subr.mxu1 %v12248_v42 }
 0xeb0   :  { %11195 = vmatprep.subr.mxu0 %v12248_v42  ;;  %11231 = vmatpush3.msra.mxu1 %v13951_v33 }
 0xeb1   :  { %11196 = vmatpush3.msra.mxu0 %v13951_v33  ;;  %11232 = vmatprep.subr.mxu1 %v12248_v42 }
 0xeb2   :  { %11197 = vmatprep.subr.mxu0 %v12248_v42  ;;  %11233 = vmatpush3.msra.mxu1 %v13958_v34 }
 0xeb3   :  { %11198 = vmatpush3.msra.mxu0 %v13958_v34  ;;  %11234 = vmatprep.subr.mxu1 %v12248_v42 }
 0xeb4   :  { %11199 = vmatprep.subr.mxu0 %v12248_v42  ;;  %11235 = vmatpush3.msra.mxu1 %v13966_v36 }
 0xeb5   :  { %11200 = vmatpush3.msra.mxu0 %v13966_v36  ;;  %11236 = vmatprep.subr.mxu1 %v12248_v42 }
 0xeb6   :  { %11201 = vmatprep.subr.mxu0 %v12248_v42  ;;  %11237 = vmatpush3.msra.mxu1 %v13975_v37 }
 0xeb7   :  { %11202 = vmatpush3.msra.mxu0 %v13975_v37  ;;  %11238 = vmatprep.subr.mxu1 %v12248_v42 }
 0xeb8   :  { %11203 = vmatprep.subr.mxu0 %v12248_v42  ;;  %11239 = vmatpush3.msra.mxu1 %v13984_v38 }
 0xeb9   :  { %11204 = vmatpush3.msra.mxu0 %v13984_v38  ;;  %11240 = vmatprep.subr.mxu1 %v12248_v42 }
 0xeba   :  { %11205 = vmatprep.subr.mxu0 %v12248_v42  ;;  %11209 = vmatprep.mubr.msk.f32.mxu0 %vm12249_vm0, %v12248_v42 }
 0xebb   :  { %11206 = vmatpush3.msra.mxu0 %v13993_v39  ;;  %11241 = vmatpush3.msra.mxu1 %v13993_v39 }
 0xebc   :  { %11207 = vmatprep.subr.mxu0 %v12248_v42  ;;  %11242 = vmatprep.subr.mxu1 %v12248_v42 }
 0xebd   :  { %11208 = vmatpush3.msra.mxu0 %v14002_v40  ;;  %11243 = vmatpush3.msra.mxu1 %v14002_v40 }
 0xebe   :  { %11244 = vmatprep.mubr.msk.f32.mxu1 %vm12249_vm0, %v12248_v42  ;;  %11247 = vmatprep.subr.bf16.mxu1 %v12248_v42 }
 0xebf   :  { %10038 = vmatprep.subr.bf16.mxu0 %v12030_v53 }
 0xf5d   :  { %v4534_v14 = vpop.f32.mrf.mxu1 }
 0xf5e   :  { %v9989_v5 = vpop.f32.mrf.mxu0 }
 0xf5f   :  { %v11175_v6 = vpop.f32.mrf.mxu1 }
 0xf60   :  { %v9990_v8 = vpop.f32.mrf.mxu0  ;;  %v12052_v6 = vld [vmem:[%s15444_s1 + $0x740] sm:$0xff]  }
 0xf61   :  { %v9991_v0 = vadd.f32 %v9990_v8, %v9989_v5  ;;  %v4537_v9 = vpop.f32.mrf.mxu1  ;;  %v12051_v5 = vld [vmem:[%s15444_s1 + $0x700] sm:$0xff]  }
 0xf62   :  { %v9992_v45 = vpop.f32.mrf.mxu0 }
 0xf63   :  { %v4495_v11 = vadd.f32 %v9991_v0, %v8832_v7  ;;  %v11176_v12 = vpop.f32.mrf.mxu1  ;;  %v12053_v7 = vld [vmem:[%s15444_s1 + $0x6c0] sm:$0xff]  }
 0xf64   :  { %v9993_v15 = vpop.f32.mrf.mxu0 }
 0xf65   :  { %v14182_v21 = vadd.f32 %v4534_v14, %v4495_v11  ;;  %v12050_v14 = vld [vmem:[%s15444_s1 + $0x6c8] sm:$0xff]  }
 0xf67   :  { %v4540_v23 = vrot.slane %v14182_v21, 4  ;;  %v4616_v24 = vmul.f32 %v14182_v21, %v14182_v21 }
 0xf69   :  { %v4541_v25 = vadd.f32 %v4540_v23, %v14182_v21  ;;  %v4617_v43 = vrot.slane %v4616_v24, 4 }
 0xf6b   :  { %v4542_v44 = vrot.slane %v4541_v25, 2  ;;  %v4618_v46 = vadd.f32 %v4617_v43, %v4616_v24  ;;  %v8812_v43 = vld [vmem:[%s15446_s3 + $0x8] sm:$0x1] }
 0xf6d   :  { %v4543_v47 = vadd.f32 %v4542_v44, %v4541_v25  ;;  %v4619_v48 = vrot.slane %v4618_v46, 2 }
 0xf6f   :  { %v4544_v50 = vrot.slane %v4543_v47, 1  ;;  %v4620_v51 = vadd.f32 %v4619_v48, %v4618_v46 }
 0xf71   :  { %v4545_v13 = vadd.f32 %v4544_v50, %v4543_v47  ;;  %v4621_v20 = vrot.slane %v4620_v51, 1  ;;  %v8813_v47 = vld [vmem:[%s15447_s4 + $0x8] sm:$0x1] }
 0xf73   :  { %11210 = vmatmul.mubr.f32.vlgmr.msra.gmra.mxu0 %v4545_v13  ;;  %v4622_v31 = vadd.f32 %v4621_v20, %v4620_v51 }
 0xf74   :  { %10039 = vmatpush3.bf16.msra.mxu0 %v12032_v17 }
 0xf75   :  { %11245 = vmatmul.mubr.f32.vlgmr.msra.gmra.mxu1 %v4622_v31  ;;  %10040 = vmatprep.subr.bf16.mxu0 %v12033_v56 }
 0xf76   :  { %11263 = vmatprep.mubr.msk.bf16.mxu1 %vm12249_vm0, %v12248_v42  ;;  %11248 = vmatpush3.bf16.msra.mxu1 %v12031_v54 }
 0xf77   :  { %11249 = vmatprep.subr.bf16.mxu1 %v12248_v42 }
 0xf78   :  { %10041 = vmatpush3.bf16.msra.mxu0 %v12035_v58 }
 0xf79   :  { %10042 = vmatprep.subr.bf16.mxu0 %v12036_v59 }
 0xf7a   :  { %11250 = vmatpush3.bf16.msra.mxu1 %v12034_v57 }
 0xf7b   :  { %11251 = vmatprep.subr.bf16.mxu1 %v12248_v42 }
 0xf7c   :  { %10043 = vmatpush3.bf16.msra.mxu0 %v12038_v61 }
 0xf7d   :  { %10044 = vmatprep.subr.bf16.mxu0 %v12039_v62 }
 0xf7e   :  { %11252 = vmatpush3.bf16.msra.mxu1 %v12037_v60 }
 0xf7f   :  { %11253 = vmatprep.subr.bf16.mxu1 %v12248_v42 }
 0xf80   :  { %10045 = vmatpush3.bf16.msra.mxu0 %v12041_v1 }
 0xf81   :  { %10046 = vmatprep.subr.bf16.mxu0 %v12042_v2 }
 0xf82   :  { %11254 = vmatpush3.bf16.msra.mxu1 %v12040_v63 }
 0xf83   :  { %11255 = vmatprep.subr.bf16.mxu1 %v12248_v42 }
 0xf84   :  { %10047 = vmatpush3.bf16.msra.mxu0 %v12044_v10 }
 0xf85   :  { %10048 = vmatprep.subr.bf16.mxu0 %v12045_v41 }
 0xf86   :  { %11256 = vmatpush3.bf16.msra.mxu1 %v12043_v52 }
 0xf87   :  { %11257 = vmatprep.subr.bf16.mxu1 %v12248_v42 }
 0xf88   :  { %10049 = vmatpush3.bf16.msra.mxu0 %v12047_v49  ;;  %v12057_v49 = vld [vmem:[%s15444_s1 + $0x7f8] sm:$0xff]  }
 0xf89   :  { %10050 = vmatprep.subr.bf16.mxu0 %v12048_v35  ;;  %v12058_v35 = vld [vmem:[%s15444_s1 + $0x838] sm:$0xff]  }
 0xf8a   :  { %11258 = vmatpush3.bf16.msra.mxu1 %v12046_v3 }
 0xf8b   :  { %11259 = vmatprep.subr.bf16.mxu1 %v12248_v42 }
 0xf8c   :  { %10051 = vmatpush3.bf16.msra.mxu0 %v12050_v14  ;;  %v12060_v14 = vld [vmem:[%s15444_s1 + $0x7f0] sm:$0xff]  }
 0xf8d   :  { %10052 = vmatprep.subr.bf16.mxu0 %v12051_v5  ;;  %v12061_v5 = vld [vmem:[%s15444_s1 + $0x830] sm:$0xff]  }
 0xf8e   :  { %11260 = vmatpush3.bf16.msra.mxu1 %v12049_v4  ;;  %v12059_v4 = vld [vmem:[%s15444_s1 + $0x7b8] sm:$0xff]  }
 0xf8f   :  { %11261 = vmatprep.subr.bf16.mxu1 %v12248_v42 }
 0xf90   :  { %10053 = vmatpush3.bf16.msra.mxu0 %v12053_v7  ;;  %v12063_v7 = vld [vmem:[%s15444_s1 + $0x7e8] sm:$0xff]  }
 0xf91   :  { %11267 = vmatprep.subr.mxu0 %v12248_v42 }
 0xf92   :  { %11262 = vmatpush3.bf16.msra.mxu1 %v12052_v6  ;;  %v12062_v6 = vld [vmem:[%s15444_s1 + $0x7b0] sm:$0xff]  }
 0xf93   :  { %11302 = vmatprep.subr.mxu1 %v12248_v42 }
0x1033   :  { %v4612_v8 = vpop.f32.mrf.mxu0 }
0x1034   :  { %v4693_v0 = vmul.f32 0.03125, %v4612_v8  ;;  %v12064_v8 = vld [vmem:[%s15444_s1 + $0x828] sm:$0xff]  }
0x1035   :  { %v11211_v9 = vpop.f32.mrf.mxu0  ;;  %v4689_v45 = vpop.f32.mrf.mxu1 }
0x1036   :  { %v4695_v11 = vmul.f32 %v4693_v0, %v4693_v0  ;;  %v4694_v12 = vmul.f32 0.03125, %v4689_v45  ;;  %v12066_v9 = vld [vmem:[%s15444_s1 + $0x7e0] sm:$0xff]  }
0x1037   :  { %v11246_v15 = vpop.f32.mrf.mxu1  ;;  %v12067_v45 = vld [vmem:[%s15444_s1 + $0x820] sm:$0xff]  }
0x1038   :  { %v4696_v23 = vsub.f32 %v4694_v12, %v4695_v11  ;;  %v12068_v11 = vld [vmem:[%s15444_s1 + $0x7a0] sm:$0xff]   ;;  %v12069_v12 = vld [vmem:[%s15444_s1 + $0x7d8] sm:$0xff]  }
0x1039   :  { %v12070_v15 = vld [vmem:[%s15444_s1 + $0x818] sm:$0xff]  }
0x103a   :  { %v4697_v24 = vmax.f32 %v4696_v23, 0.0  ;;  %v12071_v23 = vld [vmem:[%s15444_s1 + $0x798] sm:$0xff]  }
0x103c   :  { %v4698_v25 = vadd.f32 1e-05, %v4697_v24  ;;  %v12072_v24 = vld [vmem:[%s15444_s1 + $0x7d0] sm:$0xff]  }
0x103e   :  { %12196 = vrsqrt.f32 %v4698_v25  ;;  %v12073_v25 = vld [vmem:[%s15444_s1 + $0x810] sm:$0xff]  }
0x104b   :  { %v12197_v44 = vpop.eup %12196 }
0x104c   :  { %v4700_v46 = vmul.f32 %v12197_v44, %v8812_v43  ;;  %v12074_v43 = vld [vmem:[%s15444_s1 + $0x790] sm:$0xff]   ;;  %v12075_v44 = vld [vmem:[%s15444_s1 + $0x7c8] sm:$0xff]  }
0x104e   :  { %v4701_v48 = vmul.f32 %v4700_v46, %v4693_v0  ;;  %v4707_v50 = vrot.slane %v4700_v46, %v12609_v19  ;;  %v12065_v0 = vld [vmem:[%s15444_s1 + $0x7a8] sm:$0xff]  }
0x104f   :  { %v12076_v46 = vld [vmem:[%s15444_s1 + $0x808] sm:$0xff]  }
0x1050   :  { %v4702_v51 = vsub.f32 %v8813_v47, %v4701_v48  ;;  %v4709_v13 = vmul.f32 %v4707_v50, %v14182_v21  ;;  %v12077_v47 = vld [vmem:[%s15444_s1 + $0x788] sm:$0xff]   ;;  %v12078_v48 = vld [vmem:[%s15444_s1 + $0x7c0] sm:$0xff]  }
0x1051   :  { %v12079_v50 = vld [vmem:[%s15444_s1 + $0x800] sm:$0xff]  }
0x1052   :  { %v4714_v20 = vrot.slane %v4702_v51, %v12609_v19  ;;  %v12080_v51 = vld [vmem:[%s15444_s1 + $0x780] sm:$0xff]  }
0x1054   :  { %v4716_v31 = vadd.f32 %v4714_v20, %v4709_v13 }
0x1056   :  { %vm4717_vm8 = vcmp.ge.f32.partialorder %v4716_v31, 0.0  ;;  %v4718_v53 = vmul.f32 0.1, %v4716_v31 }
0x1058   :  { %v4719_v54 = vsel %vm4717_vm8, %v4716_v31, %v4718_v53 }
0x1059   :  { %v4721_v17 = vcombine.high %v4719_v54, %v4719_v54  ;;  %4723 = vst [vmem:[#allocation4 + $0x1] sm:$0xf] %v4719_v54 }
0x105b   :  { %4724 = vst [vmem:[#allocation4 + $0x9] sm:$0xf] %v4721_v17 }
0x1062   :  { %v12054_v56 = vld [vmem:[#allocation4 + $0x1] ss:$8 sps:$4 sm:$0xff]  }
0x1063   :  { %v12055_v57 = vld [vmem:[#allocation4 + $0x2] ss:$8 sps:$4 sm:$0xff]   ;;  %v4817_v59 = vpack.c.bf16 %v12054_v56, %v12054_v56 }
0x1064   :  { %v12056_v58 = vld [vmem:[#allocation4] ss:$8 sps:$4 sm:$0xff]   ;;  %v4818_v60 = vpack.c.bf16 %v12055_v57, %v12055_v57 }
0x1065   :  { %v4816_v61 = vpack.c.bf16 %v12056_v58, %v12056_v58  ;;  %5001 = vmatprep.mubr.bf16.mxu0 %v4817_v59 }
0x1066   :  { %11264 = vmatmul.mubr.bf16.vlgmr.msra.gmra.mxu1 %v4818_v60  ;;  %v8906_v60 = vld [vmem:[%s15446_s3 + $0x9] sm:$0x1] }
0x1067   :  { %5002 = vmatmul.mubr.bf16.vlgmr.msra.gmra.mxu0 %v4816_v61  ;;  %11303 = vmatpush3.msra.mxu1 %v13867_v28 }
0x1068   :  { %11268 = vmatpush3.msra.mxu0 %v13867_v28  ;;  %11304 = vmatprep.subr.mxu1 %v12248_v42 }
0x1069   :  { %11269 = vmatprep.subr.mxu0 %v12248_v42  ;;  %11305 = vmatpush3.msra.mxu1 %v13872_v55 }
0x106a   :  { %11270 = vmatpush3.msra.mxu0 %v13872_v55  ;;  %11306 = vmatprep.subr.mxu1 %v12248_v42 }
0x106b   :  { %11271 = vmatprep.subr.mxu0 %v12248_v42  ;;  %11307 = vmatpush3.msra.mxu1 %v13881_v18 }
0x106c   :  { %11272 = vmatpush3.msra.mxu0 %v13881_v18  ;;  %11308 = vmatprep.subr.mxu1 %v12248_v42 }
0x106d   :  { %11273 = vmatprep.subr.mxu0 %v12248_v42  ;;  %11309 = vmatpush3.msra.mxu1 %v13890_v22 }
0x106e   :  { %11274 = vmatpush3.msra.mxu0 %v13890_v22  ;;  %11310 = vmatprep.subr.mxu1 %v12248_v42  ;;  %v8926_v22 = vld [vmem:[%s15445_s2 + $0x9] ss:$0 sm:$0xff] }
0x106f   :  { %11275 = vmatprep.subr.mxu0 %v12248_v42  ;;  %11311 = vmatpush3.msra.mxu1 %v13899_v26 }
0x1070   :  { %11276 = vmatpush3.msra.mxu0 %v13899_v26  ;;  %11312 = vmatprep.subr.mxu1 %v12248_v42 }
0x1071   :  { %11277 = vmatprep.subr.mxu0 %v12248_v42  ;;  %11313 = vmatpush3.msra.mxu1 %v13916_v27 }
0x1072   :  { %11278 = vmatpush3.msra.mxu0 %v13916_v27  ;;  %11314 = vmatprep.subr.mxu1 %v12248_v42 }
0x1073   :  { %11279 = vmatprep.subr.mxu0 %v12248_v42  ;;  %11315 = vmatpush3.msra.mxu1 %v13924_v29 }
0x1074   :  { %11280 = vmatpush3.msra.mxu0 %v13924_v29  ;;  %11316 = vmatprep.subr.mxu1 %v12248_v42 }
0x1075   :  { %11281 = vmatprep.subr.mxu0 %v12248_v42  ;;  %11317 = vmatpush3.msra.mxu1 %v13933_v30 }
0x1076   :  { %11282 = vmatpush3.msra.mxu0 %v13933_v30  ;;  %11318 = vmatprep.subr.mxu1 %v12248_v42 }
0x1077   :  { %11283 = vmatprep.subr.mxu0 %v12248_v42  ;;  %11319 = vmatpush3.msra.mxu1 %v13942_v32 }
0x1078   :  { %11284 = vmatpush3.msra.mxu0 %v13942_v32  ;;  %11320 = vmatprep.subr.mxu1 %v12248_v42 }
0x1079   :  { %11285 = vmatprep.subr.mxu0 %v12248_v42  ;;  %11321 = vmatpush3.msra.mxu1 %v13951_v33 }
0x107a   :  { %11286 = vmatpush3.msra.mxu0 %v13951_v33  ;;  %11322 = vmatprep.subr.mxu1 %v12248_v42 }
0x107b   :  { %11287 = vmatprep.subr.mxu0 %v12248_v42  ;;  %11323 = vmatpush3.msra.mxu1 %v13958_v34 }
0x107c   :  { %11288 = vmatpush3.msra.mxu0 %v13958_v34  ;;  %11324 = vmatprep.subr.mxu1 %v12248_v42 }
0x107d   :  { %11289 = vmatprep.subr.mxu0 %v12248_v42  ;;  %11325 = vmatpush3.msra.mxu1 %v13966_v36 }
0x107e   :  { %11290 = vmatpush3.msra.mxu0 %v13966_v36  ;;  %11326 = vmatprep.subr.mxu1 %v12248_v42 }
0x107f   :  { %11291 = vmatprep.subr.mxu0 %v12248_v42  ;;  %11327 = vmatpush3.msra.mxu1 %v13975_v37 }
0x1080   :  { %11292 = vmatpush3.msra.mxu0 %v13975_v37  ;;  %11328 = vmatprep.subr.mxu1 %v12248_v42 }
0x1081   :  { %11293 = vmatprep.subr.mxu0 %v12248_v42  ;;  %11329 = vmatpush3.msra.mxu1 %v13984_v38 }
0x1082   :  { %11294 = vmatpush3.msra.mxu0 %v13984_v38  ;;  %11330 = vmatprep.subr.mxu1 %v12248_v42 }
0x1083   :  { %11295 = vmatprep.subr.mxu0 %v12248_v42  ;;  %11299 = vmatprep.mubr.msk.f32.mxu0 %vm12249_vm0, %v12248_v42 }
0x1084   :  { %11296 = vmatpush3.msra.mxu0 %v13993_v39  ;;  %11331 = vmatpush3.msra.mxu1 %v13993_v39 }
0x1085   :  { %11297 = vmatprep.subr.mxu0 %v12248_v42  ;;  %11332 = vmatprep.subr.mxu1 %v12248_v42 }
0x1086   :  { %11298 = vmatpush3.msra.mxu0 %v14002_v40  ;;  %11333 = vmatpush3.msra.mxu1 %v14002_v40 }
0x1087   :  { %11334 = vmatprep.mubr.msk.f32.mxu1 %vm12249_vm0, %v12248_v42  ;;  %11337 = vmatprep.subr.bf16.mxu1 %v12248_v42 }
0x1088   :  { %10103 = vmatprep.subr.bf16.mxu0 %v12057_v49  ;;  %v9009_v49 = vld [vmem:[%s15448_s5 + $0x138] sm:$0xff] }
0x1126   :  { %v5043_v28 = vpop.f32.mrf.mxu1 }
0x1127   :  { %v10054_v55 = vpop.f32.mrf.mxu0 }
0x1128   :  { %v11265_v18 = vpop.f32.mrf.mxu1 }
0x1129   :  { %v10055_v26 = vpop.f32.mrf.mxu0 }
0x112a   :  { %v10056_v27 = vadd.f32 %v10055_v26, %v10054_v55  ;;  %v5046_v29 = vpop.f32.mrf.mxu1  ;;  %v8907_v55 = vld [vmem:[%s15447_s4 + $0x9] sm:$0x1] }
0x112b   :  { %v10057_v30 = vpop.f32.mrf.mxu0 }
0x112c   :  { %v5004_v32 = vadd.f32 %v10056_v27, %v8926_v22  ;;  %v11266_v33 = vpop.f32.mrf.mxu1 }
0x112d   :  { %v10058_v34 = vpop.f32.mrf.mxu0 }
0x112e   :  { %v14350_v36 = vadd.f32 %v5043_v28, %v5004_v32 }
0x1130   :  { %v5049_v37 = vrot.slane %v14350_v36, 4  ;;  %v5125_v38 = vmul.f32 %v14350_v36, %v14350_v36 }
0x1132   :  { %v5050_v39 = vadd.f32 %v5049_v37, %v14350_v36  ;;  %v5126_v40 = vrot.slane %v5125_v38, 4 }
0x1134   :  { %v5051_v21 = vrot.slane %v5050_v39, 2  ;;  %v5127_v62 = vadd.f32 %v5126_v40, %v5125_v38 }
0x1136   :  { %v5052_v63 = vadd.f32 %v5051_v21, %v5050_v39  ;;  %v5128_v1 = vrot.slane %v5127_v62, 2 }
0x1138   :  { %v5053_v2 = vrot.slane %v5052_v63, 1  ;;  %v5129_v52 = vadd.f32 %v5128_v1, %v5127_v62  ;;  %v9015_v1 = vld [vmem:[%s15448_s5 + $0x168] sm:$0xff] }
0x113a   :  { %v5054_v10 = vadd.f32 %v5053_v2, %v5052_v63  ;;  %v5130_v41 = vrot.slane %v5129_v52, 1  ;;  %v9017_v63 = vld [vmem:[%s15448_s5 + $0x178] sm:$0xff]  ;;  %v9014_v2 = vld [vmem:[%s15448_s5 + $0x160] sm:$0xff] }
0x113c   :  { %11300 = vmatmul.mubr.f32.vlgmr.msra.gmra.mxu0 %v5054_v10  ;;  %v5131_v3 = vadd.f32 %v5130_v41, %v5129_v52  ;;  %v9013_v52 = vld [vmem:[%s15448_s5 + $0x158] sm:$0xff]  ;;  %v9012_v10 = vld [vmem:[%s15448_s5 + $0x150] sm:$0xff]  ;;  %v9011_v41 = vld [vmem:[%s15448_s5 + $0x148] sm:$0xff] }
0x113d   :  { %10104 = vmatpush3.bf16.msra.mxu0 %v12059_v4  ;;  %v9007_v4 = vld [vmem:[%s15448_s5 + $0x128] sm:$0xff] }
0x113e   :  { %11335 = vmatmul.mubr.f32.vlgmr.msra.gmra.mxu1 %v5131_v3  ;;  %10105 = vmatprep.subr.bf16.mxu0 %v12060_v14  ;;  %v9010_v3 = vld [vmem:[%s15448_s5 + $0x140] sm:$0xff] }
0x113f   :  { %11353 = vmatprep.mubr.msk.bf16.mxu1 %vm12249_vm0, %v12248_v42  ;;  %11338 = vmatpush3.bf16.msra.mxu1 %v12058_v35  ;;  %v9008_v35 = vld [vmem:[%s15448_s5 + $0x130] sm:$0xff]  ;;  %v9006_v14 = vld [vmem:[%s15448_s5 + $0x120] sm:$0xff] }
0x1140   :  { %11339 = vmatprep.subr.bf16.mxu1 %v12248_v42 }
0x1141   :  { %10106 = vmatpush3.bf16.msra.mxu0 %v12062_v6  ;;  %v9004_v6 = vld [vmem:[%s15448_s5 + $0x110] sm:$0xff] }
0x1142   :  { %10107 = vmatprep.subr.bf16.mxu0 %v12063_v7  ;;  %v9003_v7 = vld [vmem:[%s15448_s5 + $0x108] sm:$0xff] }
0x1143   :  { %11340 = vmatpush3.bf16.msra.mxu1 %v12061_v5  ;;  %v9005_v5 = vld [vmem:[%s15448_s5 + $0x118] sm:$0xff] }
0x1144   :  { %11341 = vmatprep.subr.bf16.mxu1 %v12248_v42 }
0x1145   :  { %10108 = vmatpush3.bf16.msra.mxu0 %v12065_v0 }
0x1146   :  { %10109 = vmatprep.subr.bf16.mxu0 %v12066_v9 }
0x1147   :  { %11342 = vmatpush3.bf16.msra.mxu1 %v12064_v8  ;;  %v9002_v8 = vld [vmem:[%s15448_s5 + $0x100] sm:$0xff] }
0x1148   :  { %11343 = vmatprep.subr.bf16.mxu1 %v12248_v42 }
0x1149   :  { %10110 = vmatpush3.bf16.msra.mxu0 %v12068_v11  ;;  %v9020_v11 = vld [vmem:[%s15445_s2 + $0xa] ss:$0 sm:$0xff] }
0x114a   :  { %10111 = vmatprep.subr.bf16.mxu0 %v12069_v12 }
0x114b   :  { %11344 = vmatpush3.bf16.msra.mxu1 %v12067_v45 }
0x114c   :  { %11345 = vmatprep.subr.bf16.mxu1 %v12248_v42 }
0x114d   :  { %10112 = vmatpush3.bf16.msra.mxu0 %v12071_v23 }
0x114e   :  { %10113 = vmatprep.subr.bf16.mxu0 %v12072_v24 }
0x114f   :  { %11346 = vmatpush3.bf16.msra.mxu1 %v12070_v15 }
0x1150   :  { %11347 = vmatprep.subr.bf16.mxu1 %v12248_v42 }
0x1151   :  { %10114 = vmatpush3.bf16.msra.mxu0 %v12074_v43 }
0x1152   :  { %10115 = vmatprep.subr.bf16.mxu0 %v12075_v44 }
0x1153   :  { %11348 = vmatpush3.bf16.msra.mxu1 %v12073_v25 }
0x1154   :  { %11349 = vmatprep.subr.bf16.mxu1 %v12248_v42 }
0x1155   :  { %10116 = vmatpush3.bf16.msra.mxu0 %v12077_v47 }
0x1156   :  { %10117 = vmatprep.subr.bf16.mxu0 %v12078_v48 }
0x1157   :  { %11350 = vmatpush3.bf16.msra.mxu1 %v12076_v46 }
0x1158   :  { %11351 = vmatprep.subr.bf16.mxu1 %v12248_v42 }
0x1159   :  { %10118 = vmatpush3.bf16.msra.mxu0 %v12080_v51 }
0x115a   :  { %11357 = vmatprep.subr.mxu0 %v12248_v42 }
0x115b   :  { %11352 = vmatpush3.bf16.msra.mxu1 %v12079_v50 }
0x115c   :  { %11392 = vmatprep.subr.mxu1 %v12248_v42 }
0x11fc   :  { %v5121_v13 = vpop.f32.mrf.mxu0 }
0x11fd   :  { %v5202_v20 = vmul.f32 0.03125, %v5121_v13 }
0x11fe   :  { %v11301_v31 = vpop.f32.mrf.mxu0  ;;  %v5198_v53 = vpop.f32.mrf.mxu1 }
0x11ff   :  { %v5204_v54 = vmul.f32 %v5202_v20, %v5202_v20  ;;  %v5203_v17 = vmul.f32 0.03125, %v5198_v53 }
0x1200   :  { %v11336_v56 = vpop.f32.mrf.mxu1 }
0x1201   :  { %v5205_v57 = vsub.f32 %v5203_v17, %v5204_v54 }
0x1203   :  { %v5206_v58 = vmax.f32 %v5205_v57, 0.0 }
0x1205   :  { %v5207_v59 = vadd.f32 1e-05, %v5206_v58 }
0x1207   :  { %12198 = vrsqrt.f32 %v5207_v59  ;;  %v12084_v59 = vld [vmem:[%s15444_s1 + $0x8f8] sm:$0xff]  }
0x1214   :  { %v12199_v61 = vpop.eup %12198 }
0x1215   :  { %v5209_v28 = vmul.f32 %v12199_v61, %v8906_v60  ;;  %v12085_v60 = vld [vmem:[%s15444_s1 + $0x8b8] sm:$0xff]  }
0x1216   :  { %v12086_v61 = vld [vmem:[%s15444_s1 + $0x878] sm:$0xff]  }
0x1217   :  { %v5210_v18 = vmul.f32 %v5209_v28, %v5202_v20  ;;  %v5216_v22 = vrot.slane %v5209_v28, %v12609_v19  ;;  %v12087_v28 = vld [vmem:[%s15444_s1 + $0x8f0] sm:$0xff]  }
0x1219   :  { %v5211_v26 = vsub.f32 %v8907_v55, %v5210_v18  ;;  %v5218_v27 = vmul.f32 %v5216_v22, %v14350_v36  ;;  %v9016_v36 = vld [vmem:[%s15448_s5 + $0x170] sm:$0xff]  ;;  %v12090_v22 = vld [vmem:[%s15444_s1 + $0x8e8] sm:$0xff]  }
0x121a   :  { %v12088_v55 = vld [vmem:[%s15444_s1 + $0x8b0] sm:$0xff]  }
0x121b   :  { %v5223_v29 = vrot.slane %v5211_v26, %v12609_v19  ;;  %v12089_v18 = vld [vmem:[%s15444_s1 + $0x870] sm:$0xff]   ;;  %v12091_v26 = vld [vmem:[%s15444_s1 + $0x8a8] sm:$0xff]  }
0x121d   :  { %v5225_v30 = vadd.f32 %v5223_v29, %v5218_v27  ;;  %v12092_v27 = vld [vmem:[%s15444_s1 + $0x868] sm:$0xff]   ;;  %v12093_v29 = vld [vmem:[%s15444_s1 + $0x8e0] sm:$0xff]  }
0x121f   :  { %vm5226_vm9 = vcmp.ge.f32.partialorder %v5225_v30, 0.0  ;;  %v5227_v32 = vmul.f32 0.1, %v5225_v30 }
0x1221   :  { %v5228_v33 = vsel %vm5226_vm9, %v5225_v30, %v5227_v32  ;;  %v12094_v30 = vld [vmem:[%s15444_s1 + $0x8a0] sm:$0xff]  }
0x1222   :  { %v5230_v34 = vcombine.high %v5228_v33, %v5228_v33  ;;  %5232 = vst [vmem:[#allocation4 + $0x1] sm:$0xf] %v5228_v33  ;;  %v12095_v32 = vld [vmem:[%s15444_s1 + $0x860] sm:$0xff]   ;;  %v12096_v33 = vld [vmem:[%s15444_s1 + $0x8d8] sm:$0xff]  }
0x1224   :  { %5233 = vst [vmem:[#allocation4 + $0x9] sm:$0xf] %v5230_v34  ;;  %v12097_v34 = vld [vmem:[%s15444_s1 + $0x898] sm:$0xff]  }
0x122b   :  { %v12081_v37 = vld [vmem:[#allocation4 + $0x1] ss:$8 sps:$4 sm:$0xff]  }
0x122c   :  { %v12082_v38 = vld [vmem:[#allocation4 + $0x2] ss:$8 sps:$4 sm:$0xff]   ;;  %v5326_v40 = vpack.c.bf16 %v12081_v37, %v12081_v37 }
0x122d   :  { %v12083_v39 = vld [vmem:[#allocation4] ss:$8 sps:$4 sm:$0xff]   ;;  %v5327_v21 = vpack.c.bf16 %v12082_v38, %v12082_v38 }
0x122e   :  { %v5325_v62 = vpack.c.bf16 %v12083_v39, %v12083_v39  ;;  %5510 = vmatprep.mubr.bf16.mxu0 %v5326_v40  ;;  %v12098_v37 = vld [vmem:[%s15444_s1 + $0x858] sm:$0xff]   ;;  %v12099_v38 = vld [vmem:[%s15444_s1 + $0x8d0] sm:$0xff]  }
0x122f   :  { %11354 = vmatmul.mubr.bf16.vlgmr.msra.gmra.mxu1 %v5327_v21  ;;  %v12100_v39 = vld [vmem:[%s15444_s1 + $0x890] sm:$0xff]   ;;  %v12102_v21 = vld [vmem:[%s15444_s1 + $0x8c8] sm:$0xff]  }
0x1230   :  { %5511 = vmatmul.mubr.bf16.vlgmr.msra.gmra.mxu0 %v5325_v62  ;;  %11393 = vmatpush3.msra.mxu1 %v9017_v63  ;;  %v12101_v40 = vld [vmem:[%s15444_s1 + $0x850] sm:$0xff]   ;;  %v12103_v62 = vld [vmem:[%s15444_s1 + $0x888] sm:$0xff]  }
0x1231   :  { %11358 = vmatpush3.msra.mxu0 %v9017_v63  ;;  %11394 = vmatprep.subr.mxu1 %v12248_v42  ;;  %v12104_v63 = vld [vmem:[%s15444_s1 + $0x848] sm:$0xff]  }
0x1232   :  { %11359 = vmatprep.subr.mxu0 %v12248_v42  ;;  %11395 = vmatpush3.msra.mxu1 %v9016_v36 }
0x1233   :  { %11360 = vmatpush3.msra.mxu0 %v9016_v36  ;;  %11396 = vmatprep.subr.mxu1 %v12248_v42  ;;  %v12105_v36 = vld [vmem:[%s15444_s1 + $0x8c0] sm:$0xff]  }
0x1234   :  { %11361 = vmatprep.subr.mxu0 %v12248_v42  ;;  %11397 = vmatpush3.msra.mxu1 %v9015_v1 }
0x1235   :  { %11362 = vmatpush3.msra.mxu0 %v9015_v1  ;;  %11398 = vmatprep.subr.mxu1 %v12248_v42  ;;  %v12106_v1 = vld [vmem:[%s15444_s1 + $0x880] sm:$0xff]  }
0x1236   :  { %11363 = vmatprep.subr.mxu0 %v12248_v42  ;;  %11399 = vmatpush3.msra.mxu1 %v9014_v2 }
0x1237   :  { %11364 = vmatpush3.msra.mxu0 %v9014_v2  ;;  %11400 = vmatprep.subr.mxu1 %v12248_v42  ;;  %v12107_v2 = vld [vmem:[%s15444_s1 + $0x840] sm:$0xff]  }
0x1238   :  { %11365 = vmatprep.subr.mxu0 %v12248_v42  ;;  %11401 = vmatpush3.msra.mxu1 %v9013_v52 }
0x1239   :  { %11366 = vmatpush3.msra.mxu0 %v9013_v52  ;;  %11402 = vmatprep.subr.mxu1 %v12248_v42 }
0x123a   :  { %11367 = vmatprep.subr.mxu0 %v12248_v42  ;;  %11389 = vmatprep.mubr.msk.f32.mxu0 %vm12249_vm0, %v12248_v42 }
0x123b   :  { %11424 = vmatprep.mubr.msk.f32.mxu1 %vm12249_vm0, %v12248_v42  ;;  %11368 = vmatpush3.msra.mxu0 %v9012_v10 }
0x123c   :  { %11403 = vmatpush3.msra.mxu1 %v9012_v10  ;;  %11369 = vmatprep.subr.mxu0 %v12248_v42 }
0x123d   :  { %11404 = vmatprep.subr.mxu1 %v12248_v42  ;;  %11370 = vmatpush3.msra.mxu0 %v9011_v41 }
0x123e   :  { %11405 = vmatpush3.msra.mxu1 %v9011_v41  ;;  %11371 = vmatprep.subr.mxu0 %v12248_v42 }
0x123f   :  { %11406 = vmatprep.subr.mxu1 %v12248_v42  ;;  %11372 = vmatpush3.msra.mxu0 %v9010_v3 }
0x1240   :  { %11407 = vmatpush3.msra.mxu1 %v9010_v3  ;;  %11373 = vmatprep.subr.mxu0 %v12248_v42 }
0x1241   :  { %11408 = vmatprep.subr.mxu1 %v12248_v42  ;;  %11374 = vmatpush3.msra.mxu0 %v9009_v49 }
0x1242   :  { %11409 = vmatpush3.msra.mxu1 %v9009_v49  ;;  %11375 = vmatprep.subr.mxu0 %v12248_v42 }
0x1243   :  { %11410 = vmatprep.subr.mxu1 %v12248_v42  ;;  %11376 = vmatpush3.msra.mxu0 %v9008_v35 }
0x1244   :  { %11411 = vmatpush3.msra.mxu1 %v9008_v35  ;;  %11377 = vmatprep.subr.mxu0 %v12248_v42 }
0x1245   :  { %11412 = vmatprep.subr.mxu1 %v12248_v42  ;;  %11378 = vmatpush3.msra.mxu0 %v9007_v4 }
0x1246   :  { %11413 = vmatpush3.msra.mxu1 %v9007_v4  ;;  %11379 = vmatprep.subr.mxu0 %v12248_v42 }
0x1247   :  { %11414 = vmatprep.subr.mxu1 %v12248_v42  ;;  %11380 = vmatpush3.msra.mxu0 %v9006_v14 }
0x1248   :  { %11415 = vmatpush3.msra.mxu1 %v9006_v14  ;;  %11381 = vmatprep.subr.mxu0 %v12248_v42 }
0x1249   :  { %11416 = vmatprep.subr.mxu1 %v12248_v42  ;;  %11382 = vmatpush3.msra.mxu0 %v9005_v5 }
0x124a   :  { %11417 = vmatpush3.msra.mxu1 %v9005_v5  ;;  %11383 = vmatprep.subr.mxu0 %v12248_v42 }
0x124b   :  { %11418 = vmatprep.subr.mxu1 %v12248_v42  ;;  %11384 = vmatpush3.msra.mxu0 %v9004_v6 }
0x124c   :  { %11419 = vmatpush3.msra.mxu1 %v9004_v6  ;;  %11385 = vmatprep.subr.mxu0 %v12248_v42 }
0x124d   :  { %11420 = vmatprep.subr.mxu1 %v12248_v42  ;;  %11386 = vmatpush3.msra.mxu0 %v9003_v7 }
0x124e   :  { %11421 = vmatpush3.msra.mxu1 %v9003_v7  ;;  %11387 = vmatprep.subr.mxu0 %v12248_v42  ;;  %v9000_v7 = vld [vmem:[%s15446_s3 + $0xa] sm:$0x1] }
0x124f   :  { %11422 = vmatprep.subr.mxu1 %v12248_v42  ;;  %11388 = vmatpush3.msra.mxu0 %v9002_v8 }
0x1250   :  { %11423 = vmatpush3.msra.mxu1 %v9002_v8  ;;  %10168 = vmatprep.subr.bf16.mxu0 %v12085_v60 }
0x1251   :  { %11427 = vmatprep.subr.bf16.mxu1 %v12248_v42 }
0x12ef   :  { %v5552_v0 = vpop.f32.mrf.mxu1 }
0x12f0   :  { %v10119_v9 = vpop.f32.mrf.mxu0 }
0x12f1   :  { %v11355_v45 = vpop.f32.mrf.mxu1 }
0x12f2   :  { %v10120_v12 = vpop.f32.mrf.mxu0 }
0x12f3   :  { %v10121_v15 = vadd.f32 %v10120_v12, %v10119_v9  ;;  %v5555_v23 = vpop.f32.mrf.mxu1  ;;  %v9001_v9 = vld [vmem:[%s15447_s4 + $0xa] sm:$0x1] }
0x12f4   :  { %v10122_v24 = vpop.f32.mrf.mxu0 }
0x12f5   :  { %v5513_v25 = vadd.f32 %v10121_v15, %v9020_v11  ;;  %v11356_v43 = vpop.f32.mrf.mxu1 }
0x12f6   :  { %v10123_v44 = vpop.f32.mrf.mxu0 }
0x12f7   :  { %v14534_v46 = vadd.f32 %v5552_v0, %v5513_v25 }
0x12f9   :  { %v5558_v47 = vrot.slane %v14534_v46, 4  ;;  %v5634_v48 = vmul.f32 %v14534_v46, %v14534_v46 }
0x12fb   :  { %v5559_v50 = vadd.f32 %v5558_v47, %v14534_v46  ;;  %v5635_v51 = vrot.slane %v5634_v48, 4  ;;  %v12250_v47 = vmov 1983009808  }
0x12fd   :  { %v5560_v13 = vrot.slane %v5559_v50, 2  ;;  %v5636_v20 = vadd.f32 %v5635_v51, %v5634_v48  ;;  %v5830_v48 = vunpack.c.l.s4 %v12250_v47 }
0x12ff   :  { %v5561_v31 = vadd.f32 %v5560_v13, %v5559_v50  ;;  %v5637_v53 = vrot.slane %v5636_v20, 2  ;;  %v5831_v50 = vunpack.c.0.s8 %v5830_v48 }
0x1301   :  { %v5562_v54 = vrot.slane %v5561_v31, 1  ;;  %v5638_v17 = vadd.f32 %v5637_v53, %v5636_v20 }
0x1303   :  { %v5563_v56 = vadd.f32 %v5562_v54, %v5561_v31  ;;  %v5639_v57 = vrot.slane %v5638_v17, 1  ;;  %v14633_v31 = vsub.s32 %v5831_v50, %v12603_v16 }
0x1305   :  { %11390 = vmatmul.mubr.f32.vlgmr.msra.gmra.mxu0 %v5563_v56  ;;  %v5640_v58 = vadd.f32 %v5639_v57, %v5638_v17 }
0x1306   :  { %10169 = vmatpush3.bf16.msra.mxu0 %v12086_v61 }
0x1307   :  { %11425 = vmatmul.mubr.f32.vlgmr.msra.gmra.mxu1 %v5640_v58  ;;  %10170 = vmatprep.subr.bf16.mxu0 %v12088_v55 }
0x1308   :  { %11443 = vmatprep.mubr.msk.bf16.mxu1 %vm12249_vm0, %v12248_v42  ;;  %11428 = vmatpush3.bf16.msra.mxu1 %v12084_v59 }
0x1309   :  { %11429 = vmatprep.subr.bf16.mxu1 %v12248_v42 }
0x130a   :  { %10171 = vmatpush3.bf16.msra.mxu0 %v12089_v18 }
0x130b   :  { %10172 = vmatprep.subr.bf16.mxu0 %v12091_v26 }
0x130c   :  { %11430 = vmatpush3.bf16.msra.mxu1 %v12087_v28 }
0x130d   :  { %11431 = vmatprep.subr.bf16.mxu1 %v12248_v42 }
0x130e   :  { %10173 = vmatpush3.bf16.msra.mxu0 %v12092_v27  ;;  %v14644_v27 = vld [vmem:[%s15448_s5 + $0x1f8] sm:$0xff] }
0x130f   :  { %10174 = vmatprep.subr.bf16.mxu0 %v12094_v30  ;;  %v14652_v30 = vld [vmem:[%s15448_s5 + $0x1f0] sm:$0xff] }
0x1310   :  { %11432 = vmatpush3.bf16.msra.mxu1 %v12090_v22 }
0x1311   :  { %11433 = vmatprep.subr.bf16.mxu1 %v12248_v42 }
0x1312   :  { %10175 = vmatpush3.bf16.msra.mxu0 %v12095_v32  ;;  %v14660_v32 = vld [vmem:[%s15448_s5 + $0x1e8] sm:$0xff] }
0x1313   :  { %10176 = vmatprep.subr.bf16.mxu0 %v12097_v34  ;;  %v14683_v34 = vld [vmem:[%s15448_s5 + $0x1d8] sm:$0xff] }
0x1314   :  { %11434 = vmatpush3.bf16.msra.mxu1 %v12093_v29 }
0x1315   :  { %11435 = vmatprep.subr.bf16.mxu1 %v12248_v42 }
0x1316   :  { %10177 = vmatpush3.bf16.msra.mxu0 %v12098_v37  ;;  %v14692_v37 = vld [vmem:[%s15448_s5 + $0x1d0] sm:$0xff] }
0x1317   :  { %10178 = vmatprep.subr.bf16.mxu0 %v12100_v39  ;;  %v14710_v39 = vld [vmem:[%s15448_s5 + $0x1c0] sm:$0xff] }
0x1318   :  { %11436 = vmatpush3.bf16.msra.mxu1 %v12096_v33  ;;  %v14675_v33 = vld [vmem:[%s15448_s5 + $0x1e0] sm:$0xff] }
0x1319   :  { %11437 = vmatprep.subr.bf16.mxu1 %v12248_v42 }
0x131a   :  { %10179 = vmatpush3.bf16.msra.mxu0 %v12101_v40  ;;  %v14719_v40 = vld [vmem:[%s15448_s5 + $0x1b8] sm:$0xff] }
0x131b   :  { %10180 = vmatprep.subr.bf16.mxu0 %v12103_v62  ;;  %v14737_v62 = vld [vmem:[%s15448_s5 + $0x1a8] sm:$0xff] }
0x131c   :  { %11438 = vmatpush3.bf16.msra.mxu1 %v12099_v38  ;;  %v14701_v38 = vld [vmem:[%s15448_s5 + $0x1c8] sm:$0xff] }
0x131d   :  { %11439 = vmatprep.subr.bf16.mxu1 %v12248_v42 }
0x131e   :  { %10181 = vmatpush3.bf16.msra.mxu0 %v12104_v63  ;;  %v14744_v63 = vld [vmem:[%s15448_s5 + $0x1a0] sm:$0xff] }
0x131f   :  { %10182 = vmatprep.subr.bf16.mxu0 %v12106_v1  ;;  %v14761_v1 = vld [vmem:[%s15448_s5 + $0x190] sm:$0xff] }
0x1320   :  { %11440 = vmatpush3.bf16.msra.mxu1 %v12102_v21  ;;  %v14728_v21 = vld [vmem:[%s15448_s5 + $0x1b0] sm:$0xff] }
0x1321   :  { %11441 = vmatprep.subr.bf16.mxu1 %v12248_v42 }
0x1322   :  { %10183 = vmatpush3.bf16.msra.mxu0 %v12107_v2  ;;  %v14770_v2 = vld [vmem:[%s15448_s5 + $0x188] sm:$0xff] }
0x1323   :  { %11447 = vmatprep.subr.mxu0 %v12248_v42 }
0x1324   :  { %11442 = vmatpush3.bf16.msra.mxu1 %v12105_v36  ;;  %v14752_v36 = vld [vmem:[%s15448_s5 + $0x198] sm:$0xff] }
0x1325   :  { %11482 = vmatprep.subr.mxu1 %v12248_v42 }
0x13c5   :  { %v5630_v52 = vpop.f32.mrf.mxu0 }
0x13c6   :  { %v5711_v10 = vmul.f32 0.03125, %v5630_v52  ;;  %v14779_v52 = vld [vmem:[%s15448_s5 + $0x180] sm:$0xff] }
0x13c7   :  { %v11391_v41 = vpop.f32.mrf.mxu0  ;;  %v5707_v3 = vpop.f32.mrf.mxu1 }
0x13c8   :  { %v5713_v49 = vmul.f32 %v5711_v10, %v5711_v10  ;;  %v5712_v35 = vmul.f32 0.03125, %v5707_v3 }
0x13c9   :  { %v11426_v4 = vpop.f32.mrf.mxu1 }
0x13ca   :  { %v5714_v14 = vsub.f32 %v5712_v35, %v5713_v49  ;;  %v9114_v35 = vld [vmem:[%s15445_s2 + $0xb] ss:$0 sm:$0xff] }
0x13cc   :  { %v5715_v5 = vmax.f32 %v5714_v14, 0.0 }
0x13ce   :  { %v5716_v6 = vadd.f32 1e-05, %v5715_v5 }
0x13d0   :  { %12200 = vrsqrt.f32 %v5716_v6 }
0x13dd   :  { %v12201_v8 = vpop.eup %12200 }
0x13de   :  { %v5718_v0 = vmul.f32 %v12201_v8, %v9000_v7 }
0x13e0   :  { %v5719_v45 = vmul.f32 %v5718_v0, %v5711_v10  ;;  %v5725_v11 = vrot.slane %v5718_v0, %v12609_v19 }
0x13e2   :  { %v5720_v12 = vsub.f32 %v9001_v9, %v5719_v45  ;;  %v5727_v15 = vmul.f32 %v5725_v11, %v14534_v46 }
0x13e4   :  { %v5732_v23 = vrot.slane %v5720_v12, %v12609_v19 }
0x13e6   :  { %v5734_v24 = vadd.f32 %v5732_v23, %v5727_v15 }
0x13e8   :  { %vm5735_vm10 = vcmp.ge.f32.partialorder %v5734_v24, 0.0  ;;  %v5736_v25 = vmul.f32 0.1, %v5734_v24 }
0x13ea   :  { %v5737_v43 = vsel %vm5735_vm10, %v5734_v24, %v5736_v25 }
0x13eb   :  { %v5739_v44 = vcombine.high %v5737_v43, %v5737_v43  ;;  %5741 = vst [vmem:[#allocation4 + $0x1] sm:$0xf] %v5737_v43 }
0x13ed   :  { %5742 = vst [vmem:[#allocation4 + $0x9] sm:$0xf] %v5739_v44 }
0x13f2   :  { %v5815_v51 = vld [vmem:[#allocation4] ss:$2 sm:$0x7]  ;;  %v5819_v13 = vld [vmem:[#allocation4 + $0x1] ss:$2 sm:$0x3] }
0x13f3   :  { %v5824_v20 = vrot.slane %v5815_v51, 1  ;;  %v5828_v53 = vcombine.low %v5815_v51, %v5819_v13 }
0x13f4   :  { %v5817_v46 = vld [vmem:[#allocation4 + $0x8] ss:$2 sm:$0x7]  ;;  %v5821_v54 = vld [vmem:[#allocation4 + $0x9] ss:$2 sm:$0x3] }
0x13f5   :  { %v5825_v17 = vrot.slane %v5817_v46, 1  ;;  %v5844_v56 = vcombine.low %v5817_v46, %v5821_v54  ;;  %v5842_v57 = vrot.slane %v5824_v20, %v14633_v31  ;;  %v5835_v59 = vrot.slane %v5828_v53, %v14633_v31  ;;  %v12108_v20 = vld [vmem:[%s15444_s1 + $0x9b8] sm:$0xff]   ;;  %v12109_v53 = vld [vmem:[%s15444_s1 + $0x9b0] sm:$0xff]  }
0x13f6   :  { %v12110_v46 = vld [vmem:[%s15444_s1 + $0x978] sm:$0xff]  }
0x13f7   :  { %v5858_v58 = vrot.slane %v5825_v17, %v14633_v31  ;;  %v5851_v60 = vrot.slane %v5844_v56, %v14633_v31  ;;  %v12111_v54 = vld [vmem:[%s15444_s1 + $0x938] sm:$0xff]   ;;  %v12112_v17 = vld [vmem:[%s15444_s1 + $0x9a8] sm:$0xff]   ;;  %v12113_v56 = vld [vmem:[%s15444_s1 + $0x970] sm:$0xff]  }
0x13f9   :  { %v9113_v61 = vcombine.low %v5842_v57, %v5858_v58  ;;  %v9112_v28 = vcombine.low %v5835_v59, %v5851_v60  ;;  %v12114_v57 = vld [vmem:[%s15444_s1 + $0x930] sm:$0xff]   ;;  %v12115_v58 = vld [vmem:[%s15444_s1 + $0x9a0] sm:$0xff]   ;;  %v12116_v59 = vld [vmem:[%s15444_s1 + $0x968] sm:$0xff]  }
0x13fa   :  { %v12117_v60 = vld [vmem:[%s15444_s1 + $0x928] sm:$0xff]  }
0x13fb   :  { %v5875_v55 = vrot.slane %v9113_v61, %v14633_v31  ;;  %v5868_v16 = vrot.slane %v9112_v28, %v14633_v31  ;;  %v12118_v61 = vld [vmem:[%s15444_s1 + $0x998] sm:$0xff]   ;;  %v12119_v28 = vld [vmem:[%s15444_s1 + $0x960] sm:$0xff]  }
0x13fd   :  { %v5882_v18 = vpack.c.bf16 %v5875_v55, %v5875_v55  ;;  %v5876_v22 = vcombine.high %v5868_v16, %v5868_v16  ;;  %v5880_v29 = vpack.c.bf16 %v5868_v16, %v5868_v16  ;;  %v12120_v55 = vld [vmem:[%s15444_s1 + $0x920] sm:$0xff]   ;;  %v12121_v16 = vld [vmem:[%s15444_s1 + $0x990] sm:$0xff]  }
0x13ff   :  { %11444 = vmatmul.mubr.bf16.vlgmr.msra.gmra.mxu1 %v5882_v18  ;;  %v5881_v26 = vpack.c.bf16 %v5876_v22, %v5876_v22  ;;  %v12122_v18 = vld [vmem:[%s15444_s1 + $0x958] sm:$0xff]  }
0x1400   :  { %11483 = vmatpush3.msra.mxu1 %v14644_v27  ;;  %11514 = vmatprep.mubr.msk.f32.mxu1 %vm12249_vm0, %v12248_v42  ;;  %v12123_v22 = vld [vmem:[%s15444_s1 + $0x918] sm:$0xff]  }
0x1401   :  { %6065 = vmatprep.mubr.bf16.mxu0 %v5881_v26  ;;  %11484 = vmatprep.subr.mxu1 %v12248_v42  ;;  %v12124_v26 = vld [vmem:[%s15444_s1 + $0x988] sm:$0xff]  }
0x1402   :  { %6066 = vmatmul.mubr.bf16.vlgmr.msra.gmra.mxu0 %v5880_v29  ;;  %11485 = vmatpush3.msra.mxu1 %v14652_v30  ;;  %v12125_v29 = vld [vmem:[%s15444_s1 + $0x950] sm:$0xff]  }
0x1403   :  { %11448 = vmatpush3.msra.mxu0 %v14644_v27  ;;  %11486 = vmatprep.subr.mxu1 %v12248_v42 }
0x1404   :  { %11449 = vmatprep.subr.mxu0 %v12248_v42  ;;  %11487 = vmatpush3.msra.mxu1 %v14660_v32 }
0x1405   :  { %11450 = vmatpush3.msra.mxu0 %v14652_v30  ;;  %11488 = vmatprep.subr.mxu1 %v12248_v42 }
0x1406   :  { %11451 = vmatprep.subr.mxu0 %v12248_v42  ;;  %11479 = vmatprep.mubr.msk.f32.mxu0 %vm12249_vm0, %v12248_v42 }
0x1407   :  { %11452 = vmatpush3.msra.mxu0 %v14660_v32  ;;  %11489 = vmatpush3.msra.mxu1 %v14675_v33 }
0x1408   :  { %11453 = vmatprep.subr.mxu0 %v12248_v42  ;;  %11490 = vmatprep.subr.mxu1 %v12248_v42 }
0x1409   :  { %11454 = vmatpush3.msra.mxu0 %v14675_v33  ;;  %11491 = vmatpush3.msra.mxu1 %v14683_v34 }
0x140a   :  { %11455 = vmatprep.subr.mxu0 %v12248_v42  ;;  %11492 = vmatprep.subr.mxu1 %v12248_v42 }
0x140b   :  { %11456 = vmatpush3.msra.mxu0 %v14683_v34  ;;  %11493 = vmatpush3.msra.mxu1 %v14692_v37 }
0x140c   :  { %11457 = vmatprep.subr.mxu0 %v12248_v42  ;;  %11494 = vmatprep.subr.mxu1 %v12248_v42 }
0x140d   :  { %11458 = vmatpush3.msra.mxu0 %v14692_v37  ;;  %11495 = vmatpush3.msra.mxu1 %v14701_v38 }
0x140e   :  { %11459 = vmatprep.subr.mxu0 %v12248_v42  ;;  %11496 = vmatprep.subr.mxu1 %v12248_v42 }
0x140f   :  { %11460 = vmatpush3.msra.mxu0 %v14701_v38  ;;  %11497 = vmatpush3.msra.mxu1 %v14710_v39 }
0x1410   :  { %11461 = vmatprep.subr.mxu0 %v12248_v42  ;;  %11498 = vmatprep.subr.mxu1 %v12248_v42 }
0x1411   :  { %11462 = vmatpush3.msra.mxu0 %v14710_v39  ;;  %11499 = vmatpush3.msra.mxu1 %v14719_v40 }
0x1412   :  { %11463 = vmatprep.subr.mxu0 %v12248_v42  ;;  %11500 = vmatprep.subr.mxu1 %v12248_v42 }
0x1413   :  { %11464 = vmatpush3.msra.mxu0 %v14719_v40  ;;  %11501 = vmatpush3.msra.mxu1 %v14728_v21 }
0x1414   :  { %11465 = vmatprep.subr.mxu0 %v12248_v42  ;;  %11502 = vmatprep.subr.mxu1 %v12248_v42 }
0x1415   :  { %11466 = vmatpush3.msra.mxu0 %v14728_v21  ;;  %11503 = vmatpush3.msra.mxu1 %v14737_v62 }
0x1416   :  { %11467 = vmatprep.subr.mxu0 %v12248_v42  ;;  %11504 = vmatprep.subr.mxu1 %v12248_v42 }
0x1417   :  { %11468 = vmatpush3.msra.mxu0 %v14737_v62  ;;  %11505 = vmatpush3.msra.mxu1 %v14744_v63 }
0x1418   :  { %11469 = vmatprep.subr.mxu0 %v12248_v42  ;;  %11506 = vmatprep.subr.mxu1 %v12248_v42 }
0x1419   :  { %11470 = vmatpush3.msra.mxu0 %v14744_v63  ;;  %11507 = vmatpush3.msra.mxu1 %v14752_v36 }
0x141a   :  { %11471 = vmatprep.subr.mxu0 %v12248_v42  ;;  %11508 = vmatprep.subr.mxu1 %v12248_v42 }
0x141b   :  { %11472 = vmatpush3.msra.mxu0 %v14752_v36  ;;  %11509 = vmatpush3.msra.mxu1 %v14761_v1 }
0x141c   :  { %11473 = vmatprep.subr.mxu0 %v12248_v42  ;;  %11510 = vmatprep.subr.mxu1 %v12248_v42 }
0x141d   :  { %11474 = vmatpush3.msra.mxu0 %v14761_v1  ;;  %11511 = vmatpush3.msra.mxu1 %v14770_v2 }
0x141e   :  { %11475 = vmatprep.subr.mxu0 %v12248_v42  ;;  %11512 = vmatprep.subr.mxu1 %v12248_v42 }
0x141f   :  { %11476 = vmatpush3.msra.mxu0 %v14770_v2  ;;  %11513 = vmatpush3.msra.mxu1 %v14779_v52 }
0x1420   :  { %11477 = vmatprep.subr.mxu0 %v12248_v42  ;;  %11517 = vmatprep.subr.bf16.mxu1 %v12248_v42 }
0x1421   :  { %11478 = vmatpush3.msra.mxu0 %v14779_v52 }
0x1422   :  { %10233 = vmatprep.subr.bf16.mxu0 %v12110_v46 }
0x14bf   :  { %v6107_v10 = vpop.f32.mrf.mxu1 }
0x14c1   :  { %v11445_v41 = vpop.f32.mrf.mxu1 }
0x14c2   :  { %v10184_v3 = vpop.f32.mrf.mxu0  ;;  %v12127_v41 = vld [vmem:[%s15444_s1 + $0x980] sm:$0xff]  }
0x14c3   :  { %v6110_v49 = vpop.f32.mrf.mxu1 }
0x14c4   :  { %v10185_v4 = vpop.f32.mrf.mxu0  ;;  %v12129_v49 = vld [vmem:[%s15444_s1 + $0x908] sm:$0xff]  }
0x14c5   :  { %v10186_v14 = vadd.f32 %v10185_v4, %v10184_v3  ;;  %v11446_v5 = vpop.f32.mrf.mxu1  ;;  %v12128_v3 = vld [vmem:[%s15444_s1 + $0x948] sm:$0xff]   ;;  %v12131_v4 = vld [vmem:[%s15444_s1 + $0x900] sm:$0xff]  }
0x14c6   :  { %v10187_v6 = vpop.f32.mrf.mxu0 }
0x14c7   :  { %v6068_v7 = vadd.f32 %v10186_v14, %v9114_v35  ;;  %v12130_v35 = vld [vmem:[%s15444_s1 + $0x940] sm:$0xff]  }
0x14c8   :  { %v10188_v8 = vpop.f32.mrf.mxu0 }
0x14c9   :  { %v14791_v0 = vadd.f32 %v6107_v10, %v6068_v7  ;;  %v12126_v10 = vld [vmem:[%s15444_s1 + $0x910] sm:$0xff]  }
0x14cb   :  { %v6114_v9 = vsel %vm6113_vm11, %v14791_v0, 0.0  ;;  %v6191_v45 = vmul.f32 %v14791_v0, %v14791_v0 }
0x14cc   :  { %v6115_v11 = vrot.slane %v6114_v9, 4 }
0x14cd   :  { %v6192_v12 = vsel %vm6113_vm11, %v6191_v45, 0.0 }
0x14ce   :  { %v6116_v15 = vadd.f32 %v6115_v11, %v6114_v9  ;;  %v6193_v23 = vrot.slane %v6192_v12, 4 }
0x14d0   :  { %v6117_v24 = vrot.slane %v6116_v15, 2  ;;  %v6194_v25 = vadd.f32 %v6193_v23, %v6192_v12  ;;  %v9094_v23 = vld [vmem:[%s15446_s3 + $0xb] sm:$0x1] }
0x14d2   :  { %v6118_v43 = vadd.f32 %v6117_v24, %v6116_v15  ;;  %v6195_v44 = vrot.slane %v6194_v25, 2 }
0x14d4   :  { %v6119_v47 = vrot.slane %v6118_v43, 1  ;;  %v6196_v48 = vadd.f32 %v6195_v44, %v6194_v25 }
0x14d6   :  { %v6120_v50 = vadd.f32 %v6119_v47, %v6118_v43  ;;  %v6197_v51 = vrot.slane %v6196_v48, 1  ;;  %v9095_v43 = vld [vmem:[%s15447_s4 + $0xb] sm:$0x1] }
0x14d8   :  { %11480 = vmatmul.mubr.f32.vlgmr.msra.gmra.mxu0 %v6120_v50  ;;  %v6198_v13 = vadd.f32 %v6197_v51, %v6196_v48 }
0x14d9   :  { %10234 = vmatpush3.bf16.msra.mxu0 %v12111_v54 }
0x14da   :  { %11515 = vmatmul.mubr.f32.vlgmr.msra.gmra.mxu1 %v6198_v13  ;;  %10235 = vmatprep.subr.bf16.mxu0 %v12113_v56 }
0x14db   :  { %11533 = vmatprep.mubr.msk.bf16.mxu1 %vm12249_vm0, %v12248_v42  ;;  %11518 = vmatpush3.bf16.msra.mxu1 %v12108_v20 }
0x14dc   :  { %11519 = vmatprep.subr.bf16.mxu1 %v12248_v42 }
0x14dd   :  { %10236 = vmatpush3.bf16.msra.mxu0 %v12114_v57 }
0x14de   :  { %10237 = vmatprep.subr.bf16.mxu0 %v12116_v59 }
0x14df   :  { %11520 = vmatpush3.bf16.msra.mxu1 %v12109_v53 }
0x14e0   :  { %11521 = vmatprep.subr.bf16.mxu1 %v12248_v42 }
0x14e1   :  { %10238 = vmatpush3.bf16.msra.mxu0 %v12117_v60 }
0x14e2   :  { %10239 = vmatprep.subr.bf16.mxu0 %v12119_v28 }
0x14e3   :  { %11522 = vmatpush3.bf16.msra.mxu1 %v12112_v17 }
0x14e4   :  { %11523 = vmatprep.subr.bf16.mxu1 %v12248_v42 }
0x14e5   :  { %10240 = vmatpush3.bf16.msra.mxu0 %v12120_v55 }
0x14e6   :  { %10241 = vmatprep.subr.bf16.mxu0 %v12122_v18 }
0x14e7   :  { %11524 = vmatpush3.bf16.msra.mxu1 %v12115_v58 }
0x14e8   :  { %11525 = vmatprep.subr.bf16.mxu1 %v12248_v42 }
0x14e9   :  { %10242 = vmatpush3.bf16.msra.mxu0 %v12123_v22 }
0x14ea   :  { %10243 = vmatprep.subr.bf16.mxu0 %v12125_v29 }
0x14eb   :  { %11526 = vmatpush3.bf16.msra.mxu1 %v12118_v61 }
0x14ec   :  { %11527 = vmatprep.subr.bf16.mxu1 %v12248_v42 }
0x14ed   :  { %10244 = vmatpush3.bf16.msra.mxu0 %v12126_v10 }
0x14ee   :  { %10245 = vmatprep.subr.bf16.mxu0 %v12128_v3 }
0x14ef   :  { %11528 = vmatpush3.bf16.msra.mxu1 %v12121_v16 }
0x14f0   :  { %11529 = vmatprep.subr.bf16.mxu1 %v12248_v42 }
0x14f1   :  { %10246 = vmatpush3.bf16.msra.mxu0 %v12129_v49 }
0x14f2   :  { %10247 = vmatprep.subr.bf16.mxu0 %v12130_v35 }
0x14f3   :  { %11530 = vmatpush3.bf16.msra.mxu1 %v12124_v26 }
0x14f4   :  { %11531 = vmatprep.subr.bf16.mxu1 %v12248_v42 }
0x14f5   :  { %10248 = vmatpush3.bf16.msra.mxu0 %v12131_v4 }
0x14f6   :  { %11537 = vmatprep.subr.mxu0 %v12248_v42 }
0x14f7   :  { %11532 = vmatpush3.bf16.msra.mxu1 %v12127_v41 }
0x14f8   :  { %11572 = vmatprep.subr.mxu1 %v12248_v42 }
0x1598   :  { %v6187_v14 = vpop.f32.mrf.mxu0 }
0x1599   :  { %v6269_v5 = vmul.f32 0.125, %v6187_v14 }
0x159a   :  { %v11481_v6 = vpop.f32.mrf.mxu0  ;;  %v6265_v7 = vpop.f32.mrf.mxu1 }
0x159b   :  { %v6271_v8 = vmul.f32 %v6269_v5, %v6269_v5  ;;  %v6270_v9 = vmul.f32 0.125, %v6265_v7 }
0x159c   :  { %v11516_v45 = vpop.f32.mrf.mxu1 }
0x159d   :  { %v6272_v11 = vsub.f32 %v6270_v9, %v6271_v8 }
0x159f   :  { %v6273_v12 = vmax.f32 %v6272_v11, 0.0 }
0x15a1   :  { %v6274_v15 = vadd.f32 1e-05, %v6273_v12  ;;  %v12132_v12 = vld [vmem:[%s15444_s1 + $0xa78] sm:$0xff]  }
0x15a3   :  { %12202 = vrsqrt.f32 %v6274_v15  ;;  %v12133_v15 = vld [vmem:[%s15444_s1 + $0xa70] sm:$0xff]  }
0x15b0   :  { %v12203_v24 = vpop.eup %12202 }
0x15b1   :  { %v6276_v25 = vmul.f32 %v12203_v24, %v9094_v23  ;;  %v12134_v23 = vld [vmem:[%s15444_s1 + $0xa38] sm:$0xff]  }
0x15b2   :  { %v12135_v24 = vld [vmem:[%s15444_s1 + $0x9f8] sm:$0xff]  }
0x15b3   :  { %v6277_v44 = vmul.f32 %v6276_v25, %v6269_v5  ;;  %v6283_v47 = vrot.slane %v6276_v25, %v12609_v19  ;;  %v12136_v25 = vld [vmem:[%s15444_s1 + $0xa68] sm:$0xff]  }
0x15b5   :  { %v6278_v48 = vsub.f32 %v9095_v43, %v6277_v44  ;;  %v6285_v50 = vmul.f32 %v6283_v47, %v14791_v0  ;;  %v12137_v43 = vld [vmem:[%s15444_s1 + $0xa30] sm:$0xff]   ;;  %v12139_v47 = vld [vmem:[%s15444_s1 + $0xa60] sm:$0xff]  }
0x15b6   :  { %v12138_v44 = vld [vmem:[%s15444_s1 + $0x9f0] sm:$0xff]  }
0x15b7   :  { %v6290_v51 = vrot.slane %v6278_v48, %v12609_v19  ;;  %v12140_v48 = vld [vmem:[%s15444_s1 + $0xa28] sm:$0xff]  }
0x15b9   :  { %v6292_v13 = vadd.f32 %v6290_v51, %v6285_v50  ;;  %v12141_v50 = vld [vmem:[%s15444_s1 + $0x9e8] sm:$0xff]   ;;  %v12142_v51 = vld [vmem:[%s15444_s1 + $0xa58] sm:$0xff]  }
0x15bb   :  { %vm6293_vm12 = vcmp.ge.f32.partialorder %v6292_v13, 0.0  ;;  %v6294_v20 = vmul.f32 0.1, %v6292_v13 }
0x15bd   :  { %v6295_v53 = vsel %vm6293_vm12, %v6292_v13, %v6294_v20  ;;  %v12143_v13 = vld [vmem:[%s15444_s1 + $0xa20] sm:$0xff]  }
0x15be   :  { %v6303_v46 = vrot.slane %v6295_v53, %v14633_v31  ;;  %9139 = vst.sshfl [vmem:[#allocation5 + $0x1] sm:$0x3 pattern:$0x76325410] %v6295_v53  ;;  %v12144_v20 = vld [vmem:[%s15444_s1 + $0x9e0] sm:$0xff]   ;;  %v12145_v53 = vld [vmem:[%s15444_s1 + $0xa50] sm:$0xff]  }
0x15c0   :  { %v6304_v54 = vcombine.high %v6303_v46, %v6303_v46  ;;  %v12146_v46 = vld [vmem:[%s15444_s1 + $0xa18] sm:$0xff]  }
0x15c2   :  { %6308 = vst [vmem:[#allocation5 + $0x5] sm:$0x3] %v6304_v54  ;;  %v12147_v54 = vld [vmem:[%s15444_s1 + $0x9d8] sm:$0xff]  }
0x15c5   :  { %v6380_v17 = vld [vmem:[#allocation5] sm:$0x3]  ;;  %v9207_v57 = vld.sshfl [vmem:[#allocation5 + $0x2] sm:$0x3 pattern:$0x76325410] }
0x15c6   :  { %v6382_v56 = vld [vmem:[#allocation5 + $0x1] sm:$0x3] }
0x15c7   :  { %v6392_v60 = vcombine.low %v6380_v17, %v6382_v56  ;;  %v12148_v17 = vld [vmem:[%s15444_s1 + $0xa48] sm:$0xff]   ;;  %v12149_v56 = vld [vmem:[%s15444_s1 + $0xa10] sm:$0xff]  }
0x15c9   :  { %v9208_v58 = vld.sshfl [vmem:[#allocation5 + $0x6] sm:$0x3 pattern:$0x76325410]  ;;  %v6381_v59 = vld [vmem:[#allocation5 + $0x4] sm:$0x3]  ;;  %v6399_v16 = vrot.slane %v6392_v60, %v14633_v31 }
0x15ca   :  { %v9210_v61 = vcombine.low %v9207_v57, %v9208_v58  ;;  %v6383_v28 = vld [vmem:[#allocation5 + $0x5] sm:$0x3]  ;;  %v12150_v57 = vld [vmem:[%s15444_s1 + $0x9d0] sm:$0xff]   ;;  %v12153_v60 = vld [vmem:[%s15444_s1 + $0x9c8] sm:$0xff]  }
0x15cb   :  { %v6408_v0 = vcombine.low %v6381_v59, %v6383_v28  ;;  %v12151_v58 = vld [vmem:[%s15444_s1 + $0xa40] sm:$0xff]   ;;  %v12152_v59 = vld [vmem:[%s15444_s1 + $0xa08] sm:$0xff]  }
0x15cc   :  { %v6439_v55 = vrot.slane %v9210_v61, %v14633_v31  ;;  %v12154_v61 = vld [vmem:[%s15444_s1 + $0xa00] sm:$0xff]  }
0x15cd   :  { %v6415_v18 = vrot.slane %v6408_v0, %v14633_v31  ;;  %v12155_v28 = vld [vmem:[%s15444_s1 + $0x9c0] sm:$0xff]  }
0x15ce   :  { %v6446_v22 = vpack.c.bf16 %v6439_v55, %v6439_v55 }
0x15cf   :  { %v9209_v26 = vcombine.low %v6399_v16, %v6415_v18 }
0x15d0   :  { %11534 = vmatmul.mubr.bf16.vlgmr.msra.gmra.mxu1 %v6446_v22 }
0x15d1   :  { %v6432_v29 = vrot.slane %v9209_v26, %v14633_v31  ;;  %11573 = vmatpush3.msra.mxu1 %v14644_v27  ;;  %11604 = vmatprep.mubr.msk.f32.mxu1 %vm12249_vm0, %v12248_v42 }
0x15d2   :  { %11574 = vmatprep.subr.mxu1 %v12248_v42 }
0x15d3   :  { %v6440_v10 = vcombine.high %v6432_v29, %v6432_v29  ;;  %11575 = vmatpush3.msra.mxu1 %v14652_v30  ;;  %v6444_v3 = vpack.c.bf16 %v6432_v29, %v6432_v29 }
0x15d4   :  { %11576 = vmatprep.subr.mxu1 %v12248_v42 }
0x15d5   :  { %v6445_v41 = vpack.c.bf16 %v6440_v10, %v6440_v10  ;;  %11577 = vmatpush3.msra.mxu1 %v14660_v32 }
0x15d6   :  { %11578 = vmatprep.subr.mxu1 %v12248_v42 }
0x15d7   :  { %6629 = vmatprep.mubr.bf16.mxu0 %v6445_v41  ;;  %11579 = vmatpush3.msra.mxu1 %v14675_v33 }
0x15d8   :  { %6630 = vmatmul.mubr.bf16.vlgmr.msra.gmra.mxu0 %v6444_v3  ;;  %11580 = vmatprep.subr.mxu1 %v12248_v42 }
0x15d9   :  { %11538 = vmatpush3.msra.mxu0 %v14644_v27  ;;  %11581 = vmatpush3.msra.mxu1 %v14683_v34 }
0x15da   :  { %11539 = vmatprep.subr.mxu0 %v12248_v42  ;;  %11582 = vmatprep.subr.mxu1 %v12248_v42 }
0x15db   :  { %11540 = vmatpush3.msra.mxu0 %v14652_v30  ;;  %11583 = vmatpush3.msra.mxu1 %v14692_v37 }
0x15dc   :  { %11541 = vmatprep.subr.mxu0 %v12248_v42  ;;  %11584 = vmatprep.subr.mxu1 %v12248_v42 }
0x15dd   :  { %11542 = vmatpush3.msra.mxu0 %v14660_v32  ;;  %11585 = vmatpush3.msra.mxu1 %v14701_v38 }
0x15de   :  { %11543 = vmatprep.subr.mxu0 %v12248_v42  ;;  %11586 = vmatprep.subr.mxu1 %v12248_v42 }
0x15df   :  { %11544 = vmatpush3.msra.mxu0 %v14675_v33  ;;  %11587 = vmatpush3.msra.mxu1 %v14710_v39 }
0x15e0   :  { %11545 = vmatprep.subr.mxu0 %v12248_v42  ;;  %11588 = vmatprep.subr.mxu1 %v12248_v42 }
0x15e1   :  { %11546 = vmatpush3.msra.mxu0 %v14683_v34  ;;  %11589 = vmatpush3.msra.mxu1 %v14719_v40 }
0x15e2   :  { %11547 = vmatprep.subr.mxu0 %v12248_v42  ;;  %11590 = vmatprep.subr.mxu1 %v12248_v42 }
0x15e3   :  { %11548 = vmatpush3.msra.mxu0 %v14692_v37  ;;  %11591 = vmatpush3.msra.mxu1 %v14728_v21  ;;  %v9211_v37 = vld [vmem:[%s15445_s2 + $0xc] ss:$0 sm:$0xff] }
0x15e4   :  { %11549 = vmatprep.subr.mxu0 %v12248_v42  ;;  %11592 = vmatprep.subr.mxu1 %v12248_v42 }
0x15e5   :  { %11550 = vmatpush3.msra.mxu0 %v14701_v38  ;;  %11593 = vmatpush3.msra.mxu1 %v14737_v62 }
0x15e6   :  { %11551 = vmatprep.subr.mxu0 %v12248_v42  ;;  %11594 = vmatprep.subr.mxu1 %v12248_v42 }
0x15e7   :  { %11552 = vmatpush3.msra.mxu0 %v14710_v39  ;;  %11595 = vmatpush3.msra.mxu1 %v14744_v63 }
0x15e8   :  { %11553 = vmatprep.subr.mxu0 %v12248_v42  ;;  %11596 = vmatprep.subr.mxu1 %v12248_v42 }
0x15e9   :  { %11554 = vmatpush3.msra.mxu0 %v14719_v40  ;;  %11597 = vmatpush3.msra.mxu1 %v14752_v36 }
0x15ea   :  { %11555 = vmatprep.subr.mxu0 %v12248_v42  ;;  %11598 = vmatprep.subr.mxu1 %v12248_v42 }
0x15eb   :  { %11556 = vmatpush3.msra.mxu0 %v14728_v21  ;;  %11599 = vmatpush3.msra.mxu1 %v14761_v1 }
0x15ec   :  { %11557 = vmatprep.subr.mxu0 %v12248_v42  ;;  %11600 = vmatprep.subr.mxu1 %v12248_v42 }
0x15ed   :  { %11558 = vmatpush3.msra.mxu0 %v14737_v62  ;;  %11569 = vmatprep.mubr.msk.f32.mxu0 %vm12249_vm0, %v12248_v42 }
0x15ee   :  { %11559 = vmatprep.subr.mxu0 %v12248_v42  ;;  %11601 = vmatpush3.msra.mxu1 %v14770_v2 }
0x15ef   :  { %11560 = vmatpush3.msra.mxu0 %v14744_v63  ;;  %11602 = vmatprep.subr.mxu1 %v12248_v42 }
0x15f0   :  { %11561 = vmatprep.subr.mxu0 %v12248_v42  ;;  %11603 = vmatpush3.msra.mxu1 %v14779_v52 }
0x15f1   :  { %11562 = vmatpush3.msra.mxu0 %v14752_v36  ;;  %11607 = vmatprep.subr.bf16.mxu1 %v12248_v42 }
0x15f2   :  { %11563 = vmatprep.subr.mxu0 %v12248_v42 }
0x15f3   :  { %11564 = vmatpush3.msra.mxu0 %v14761_v1 }
0x15f4   :  { %11565 = vmatprep.subr.mxu0 %v12248_v42 }
0x15f5   :  { %11566 = vmatpush3.msra.mxu0 %v14770_v2 }
0x15f6   :  { %11567 = vmatprep.subr.mxu0 %v12248_v42 }
0x15f7   :  { %11568 = vmatpush3.msra.mxu0 %v14779_v52 }
0x15f8   :  { %10298 = vmatprep.subr.bf16.mxu0 %v12134_v23 }
0x1690   :  { %v6671_v27 = vpop.f32.mrf.mxu1 }
0x1692   :  { %v11535_v30 = vpop.f32.mrf.mxu1 }
0x1694   :  { %v6674_v32 = vpop.f32.mrf.mxu1 }
0x1696   :  { %v11536_v33 = vpop.f32.mrf.mxu1 }
0x1697   :  { %v9190_v33 = vld [vmem:[%s15447_s4 + $0xc] sm:$0x1] }
0x1698   :  { %v10249_v34 = vpop.f32.mrf.mxu0 }
0x169a   :  { %v10250_v38 = vpop.f32.mrf.mxu0 }
0x169b   :  { %v10251_v39 = vadd.f32 %v10250_v38, %v10249_v34 }
0x169c   :  { %v10252_v40 = vpop.f32.mrf.mxu0 }
0x169d   :  { %v6632_v21 = vadd.f32 %v10251_v39, %v9211_v37 }
0x169e   :  { %v10253_v62 = vpop.f32.mrf.mxu0 }
0x169f   :  { %v14965_v63 = vadd.f32 %v6671_v27, %v6632_v21  ;;  %v9189_v27 = vld [vmem:[%s15446_s3 + $0xc] sm:$0x1] }
0x16a1   :  { %v6677_v36 = vsel %vm6113_vm11, %v14965_v63, 0.0  ;;  %v6754_v1 = vmul.f32 %v14965_v63, %v14965_v63 }
0x16a2   :  { %v6678_v2 = vrot.slane %v6677_v36, 4 }
0x16a3   :  { %v6755_v52 = vsel %vm6113_vm11, %v6754_v1, 0.0 }
0x16a4   :  { %v6679_v49 = vadd.f32 %v6678_v2, %v6677_v36  ;;  %v6756_v35 = vrot.slane %v6755_v52, 4 }
0x16a6   :  { %v6680_v4 = vrot.slane %v6679_v49, 2  ;;  %v6757_v14 = vadd.f32 %v6756_v35, %v6755_v52 }
0x16a8   :  { %v6681_v5 = vadd.f32 %v6680_v4, %v6679_v49  ;;  %v6758_v6 = vrot.slane %v6757_v14, 2 }
0x16aa   :  { %v6682_v7 = vrot.slane %v6681_v5, 1  ;;  %v6759_v8 = vadd.f32 %v6758_v6, %v6757_v14 }
0x16ac   :  { %v6683_v9 = vadd.f32 %v6682_v7, %v6681_v5  ;;  %v6760_v45 = vrot.slane %v6759_v8, 1 }
0x16ae   :  { %11570 = vmatmul.mubr.f32.vlgmr.msra.gmra.mxu0 %v6683_v9  ;;  %v6761_v11 = vadd.f32 %v6760_v45, %v6759_v8 }
0x16af   :  { %10299 = vmatpush3.bf16.msra.mxu0 %v12135_v24 }
0x16b0   :  { %11605 = vmatmul.mubr.f32.vlgmr.msra.gmra.mxu1 %v6761_v11  ;;  %10300 = vmatprep.subr.bf16.mxu0 %v12137_v43 }
0x16b1   :  { %11623 = vmatprep.mubr.msk.bf16.mxu1 %vm12249_vm0, %v12248_v42  ;;  %11608 = vmatpush3.bf16.msra.mxu1 %v12132_v12 }
0x16b2   :  { %11609 = vmatprep.subr.bf16.mxu1 %v12248_v42 }
0x16b3   :  { %10301 = vmatpush3.bf16.msra.mxu0 %v12138_v44  ;;  %v15085_v44 = vld [vmem:[%s15448_s5 + $0x1f0] sm:$0xff] }
0x16b4   :  { %10302 = vmatprep.subr.bf16.mxu0 %v12140_v48  ;;  %v15102_v48 = vld [vmem:[%s15448_s5 + $0x1e0] sm:$0xff] }
0x16b5   :  { %11610 = vmatpush3.bf16.msra.mxu1 %v12133_v15  ;;  %v15071_v15 = vld [vmem:[%s15448_s5 + $0x1f8] sm:$0xff] }
0x16b6   :  { %11611 = vmatprep.subr.bf16.mxu1 %v12248_v42 }
0x16b7   :  { %10303 = vmatpush3.bf16.msra.mxu0 %v12141_v50  ;;  %v15111_v50 = vld [vmem:[%s15448_s5 + $0x1d8] sm:$0xff] }
0x16b8   :  { %10304 = vmatprep.subr.bf16.mxu0 %v12143_v13  ;;  %v15129_v13 = vld [vmem:[%s15448_s5 + $0x1c8] sm:$0xff] }
0x16b9   :  { %11612 = vmatpush3.bf16.msra.mxu1 %v12136_v25 }
0x16ba   :  { %11613 = vmatprep.subr.bf16.mxu1 %v12248_v42 }
0x16bb   :  { %10305 = vmatpush3.bf16.msra.mxu0 %v12144_v20  ;;  %v15138_v20 = vld [vmem:[%s15448_s5 + $0x1c0] sm:$0xff] }
0x16bc   :  { %10306 = vmatprep.subr.bf16.mxu0 %v12146_v46  ;;  %v15156_v46 = vld [vmem:[%s15448_s5 + $0x1b0] sm:$0xff] }
0x16bd   :  { %11614 = vmatpush3.bf16.msra.mxu1 %v12139_v47  ;;  %v15093_v47 = vld [vmem:[%s15448_s5 + $0x1e8] sm:$0xff] }
0x16be   :  { %11615 = vmatprep.subr.bf16.mxu1 %v12248_v42 }
0x16bf   :  { %10307 = vmatpush3.bf16.msra.mxu0 %v12147_v54  ;;  %v15165_v54 = vld [vmem:[%s15448_s5 + $0x1a8] sm:$0xff] }
0x16c0   :  { %10308 = vmatprep.subr.bf16.mxu0 %v12149_v56  ;;  %v15180_v56 = vld [vmem:[%s15448_s5 + $0x198] sm:$0xff] }
0x16c1   :  { %11616 = vmatpush3.bf16.msra.mxu1 %v12142_v51  ;;  %v15120_v51 = vld [vmem:[%s15448_s5 + $0x1d0] sm:$0xff] }
0x16c2   :  { %11617 = vmatprep.subr.bf16.mxu1 %v12248_v42 }
0x16c3   :  { %10309 = vmatpush3.bf16.msra.mxu0 %v12150_v57  ;;  %v15189_v57 = vld [vmem:[%s15448_s5 + $0x190] sm:$0xff] }
0x16c4   :  { %10310 = vmatprep.subr.bf16.mxu0 %v12152_v59  ;;  %v15207_v59 = vld [vmem:[%s15448_s5 + $0x180] sm:$0xff] }
0x16c5   :  { %11618 = vmatpush3.bf16.msra.mxu1 %v12145_v53  ;;  %v15147_v53 = vld [vmem:[%s15448_s5 + $0x1b8] sm:$0xff] }
0x16c6   :  { %11619 = vmatprep.subr.bf16.mxu1 %v12248_v42 }
0x16c7   :  { %10311 = vmatpush3.bf16.msra.mxu0 %v12153_v60 }
0x16c8   :  { %10312 = vmatprep.subr.bf16.mxu0 %v12154_v61 }
0x16c9   :  { %11620 = vmatpush3.bf16.msra.mxu1 %v12148_v17  ;;  %v15174_v17 = vld [vmem:[%s15448_s5 + $0x1a0] sm:$0xff] }
0x16ca   :  { %11621 = vmatprep.subr.bf16.mxu1 %v12248_v42 }
0x16cb   :  { %10313 = vmatpush3.bf16.msra.mxu0 %v12155_v28 }
0x16cc   :  { %11627 = vmatprep.subr.mxu0 %v12248_v42 }
0x16cd   :  { %11622 = vmatpush3.bf16.msra.mxu1 %v12151_v58  ;;  %v15198_v58 = vld [vmem:[%s15448_s5 + $0x188] sm:$0xff] }
0x16ce   :  { %11662 = vmatprep.subr.mxu1 %v12248_v42 }
0x176e   :  { %v6750_v0 = vpop.f32.mrf.mxu0 }
0x176f   :  { %v6832_v55 = vmul.f32 0.125, %v6750_v0 }
0x1770   :  { %v11571_v16 = vpop.f32.mrf.mxu0  ;;  %v6828_v18 = vpop.f32.mrf.mxu1 }
0x1771   :  { %v6834_v22 = vmul.f32 %v6832_v55, %v6832_v55  ;;  %v6833_v26 = vmul.f32 0.125, %v6828_v18  ;;  %v9308_v16 = vld [vmem:[%s15445_s2 + $0xd] ss:$0 sm:$0xff] }
0x1772   :  { %v11606_v29 = vpop.f32.mrf.mxu1 }
0x1773   :  { %v6835_v10 = vsub.f32 %v6833_v26, %v6834_v22 }
0x1775   :  { %v6836_v41 = vmax.f32 %v6835_v10, 0.0 }
0x1777   :  { %v6837_v3 = vadd.f32 1e-05, %v6836_v41 }
0x1779   :  { %12204 = vrsqrt.f32 %v6837_v3 }
0x1786   :  { %v12205_v30 = vpop.eup %12204 }
0x1787   :  { %v6839_v32 = vmul.f32 %v12205_v30, %v9189_v27 }
0x1789   :  { %v6840_v34 = vmul.f32 %v6839_v32, %v6832_v55  ;;  %v6846_v37 = vrot.slane %v6839_v32, %v12609_v19 }
0x178b   :  { %v6841_v38 = vsub.f32 %v9190_v33, %v6840_v34  ;;  %v6848_v39 = vmul.f32 %v6846_v37, %v14965_v63 }
0x178d   :  { %v6853_v40 = vrot.slane %v6841_v38, %v12609_v19 }
0x178f   :  { %v6855_v21 = vadd.f32 %v6853_v40, %v6848_v39 }
0x1791   :  { %vm6856_vm13 = vcmp.ge.f32.partialorder %v6855_v21, 0.0  ;;  %v6857_v62 = vmul.f32 0.1, %v6855_v21 }
0x1793   :  { %v6858_v36 = vsel %vm6856_vm13, %v6855_v21, %v6857_v62 }
0x1794   :  { %v6866_v1 = vrot.slane %v6858_v36, %v14633_v31  ;;  %9236 = vst.sshfl [vmem:[#allocation5 + $0x1] sm:$0x3 pattern:$0x76325410] %v6858_v36 }
0x1796   :  { %v6867_v2 = vcombine.high %v6866_v1, %v6866_v1 }
0x1798   :  { %6871 = vst [vmem:[#allocation5 + $0x5] sm:$0x3] %v6867_v2 }
0x179b   :  { %v6943_v52 = vld [vmem:[#allocation5] sm:$0x3]  ;;  %v9304_v35 = vld.sshfl [vmem:[#allocation5 + $0x2] sm:$0x3 pattern:$0x76325410] }
0x179c   :  { %v6945_v49 = vld [vmem:[#allocation5 + $0x1] sm:$0x3] }
0x179d   :  { %v6955_v5 = vcombine.low %v6943_v52, %v6945_v49  ;;  %v12156_v52 = vld [vmem:[%s15444_s1 + $0xb38] sm:$0xff]   ;;  %v12157_v49 = vld [vmem:[%s15444_s1 + $0xb30] sm:$0xff]  }
0x179f   :  { %v9305_v4 = vld.sshfl [vmem:[#allocation5 + $0x6] sm:$0x3 pattern:$0x76325410]  ;;  %v6944_v14 = vld [vmem:[#allocation5 + $0x4] sm:$0x3]  ;;  %v6962_v9 = vrot.slane %v6955_v5, %v14633_v31 }
0x17a0   :  { %v9307_v6 = vcombine.low %v9304_v35, %v9305_v4  ;;  %v6946_v7 = vld [vmem:[#allocation5 + $0x5] sm:$0x3]  ;;  %v12158_v35 = vld [vmem:[%s15444_s1 + $0xaf8] sm:$0xff]   ;;  %v12161_v5 = vld [vmem:[%s15444_s1 + $0xaf0] sm:$0xff]  }
0x17a1   :  { %v6971_v63 = vcombine.low %v6944_v14, %v6946_v7  ;;  %v12159_v4 = vld [vmem:[%s15444_s1 + $0xab8] sm:$0xff]   ;;  %v12160_v14 = vld [vmem:[%s15444_s1 + $0xb28] sm:$0xff]   ;;  %v12163_v7 = vld [vmem:[%s15444_s1 + $0xb20] sm:$0xff]  }
0x17a2   :  { %v7002_v8 = vrot.slane %v9307_v6, %v14633_v31  ;;  %v12162_v6 = vld [vmem:[%s15444_s1 + $0xab0] sm:$0xff]  }
0x17a3   :  { %v6978_v45 = vrot.slane %v6971_v63, %v14633_v31  ;;  %v12164_v63 = vld [vmem:[%s15444_s1 + $0xae8] sm:$0xff]  }
0x17a4   :  { %v7009_v11 = vpack.c.bf16 %v7002_v8, %v7002_v8  ;;  %v12165_v8 = vld [vmem:[%s15444_s1 + $0xaa8] sm:$0xff]  }
0x17a5   :  { %v9306_v12 = vcombine.low %v6962_v9, %v6978_v45  ;;  %v12166_v9 = vld [vmem:[%s15444_s1 + $0xb18] sm:$0xff]   ;;  %v12167_v45 = vld [vmem:[%s15444_s1 + $0xae0] sm:$0xff]  }
0x17a6   :  { %11624 = vmatmul.mubr.bf16.vlgmr.msra.gmra.mxu1 %v7009_v11  ;;  %v12168_v11 = vld [vmem:[%s15444_s1 + $0xaa0] sm:$0xff]  }
0x17a7   :  { %v6995_v23 = vrot.slane %v9306_v12, %v14633_v31  ;;  %11663 = vmatpush3.msra.mxu1 %v15071_v15  ;;  %11694 = vmatprep.mubr.msk.f32.mxu1 %vm12249_vm0, %v12248_v42  ;;  %v12169_v12 = vld [vmem:[%s15444_s1 + $0xb10] sm:$0xff]  }
0x17a8   :  { %11664 = vmatprep.subr.mxu1 %v12248_v42 }
0x17a9   :  { %v7003_v24 = vcombine.high %v6995_v23, %v6995_v23  ;;  %v7007_v43 = vpack.c.bf16 %v6995_v23, %v6995_v23  ;;  %11665 = vmatpush3.msra.mxu1 %v15085_v44  ;;  %v12170_v23 = vld [vmem:[%s15444_s1 + $0xad8] sm:$0xff]  }
0x17aa   :  { %11666 = vmatprep.subr.mxu1 %v12248_v42 }
0x17ab   :  { %v7008_v25 = vpack.c.bf16 %v7003_v24, %v7003_v24  ;;  %11667 = vmatpush3.msra.mxu1 %v15093_v47  ;;  %v12171_v24 = vld [vmem:[%s15444_s1 + $0xa98] sm:$0xff]  }
0x17ac   :  { %11668 = vmatprep.subr.mxu1 %v12248_v42 }
0x17ad   :  { %7192 = vmatprep.mubr.bf16.mxu0 %v7008_v25  ;;  %11669 = vmatpush3.msra.mxu1 %v15102_v48  ;;  %v12172_v25 = vld [vmem:[%s15444_s1 + $0xb08] sm:$0xff]  }
0x17ae   :  { %7193 = vmatmul.mubr.bf16.vlgmr.msra.gmra.mxu0 %v7007_v43  ;;  %11670 = vmatprep.subr.mxu1 %v12248_v42  ;;  %v12173_v43 = vld [vmem:[%s15444_s1 + $0xad0] sm:$0xff]  }
0x17af   :  { %11628 = vmatpush3.msra.mxu0 %v15071_v15  ;;  %11659 = vmatprep.mubr.msk.f32.mxu0 %vm12249_vm0, %v12248_v42 }
0x17b0   :  { %11629 = vmatprep.subr.mxu0 %v12248_v42  ;;  %11671 = vmatpush3.msra.mxu1 %v15111_v50 }
0x17b1   :  { %11630 = vmatpush3.msra.mxu0 %v15085_v44  ;;  %11672 = vmatprep.subr.mxu1 %v12248_v42 }
0x17b2   :  { %11631 = vmatprep.subr.mxu0 %v12248_v42  ;;  %11673 = vmatpush3.msra.mxu1 %v15120_v51 }
0x17b3   :  { %11632 = vmatpush3.msra.mxu0 %v15093_v47  ;;  %11674 = vmatprep.subr.mxu1 %v12248_v42 }
0x17b4   :  { %11633 = vmatprep.subr.mxu0 %v12248_v42  ;;  %11675 = vmatpush3.msra.mxu1 %v15129_v13 }
0x17b5   :  { %11634 = vmatpush3.msra.mxu0 %v15102_v48  ;;  %11676 = vmatprep.subr.mxu1 %v12248_v42 }
0x17b6   :  { %11635 = vmatprep.subr.mxu0 %v12248_v42  ;;  %11677 = vmatpush3.msra.mxu1 %v15138_v20 }
0x17b7   :  { %11636 = vmatpush3.msra.mxu0 %v15111_v50  ;;  %11678 = vmatprep.subr.mxu1 %v12248_v42 }
0x17b8   :  { %11637 = vmatprep.subr.mxu0 %v12248_v42  ;;  %11679 = vmatpush3.msra.mxu1 %v15147_v53 }
0x17b9   :  { %11638 = vmatpush3.msra.mxu0 %v15120_v51  ;;  %11680 = vmatprep.subr.mxu1 %v12248_v42 }
0x17ba   :  { %11639 = vmatprep.subr.mxu0 %v12248_v42  ;;  %11681 = vmatpush3.msra.mxu1 %v15156_v46 }
0x17bb   :  { %11640 = vmatpush3.msra.mxu0 %v15129_v13  ;;  %11682 = vmatprep.subr.mxu1 %v12248_v42 }
0x17bc   :  { %11641 = vmatprep.subr.mxu0 %v12248_v42  ;;  %11683 = vmatpush3.msra.mxu1 %v15165_v54 }
0x17bd   :  { %11642 = vmatpush3.msra.mxu0 %v15138_v20  ;;  %11684 = vmatprep.subr.mxu1 %v12248_v42 }
0x17be   :  { %11643 = vmatprep.subr.mxu0 %v12248_v42  ;;  %11685 = vmatpush3.msra.mxu1 %v15174_v17 }
0x17bf   :  { %11644 = vmatpush3.msra.mxu0 %v15147_v53  ;;  %11686 = vmatprep.subr.mxu1 %v12248_v42 }
0x17c0   :  { %11645 = vmatprep.subr.mxu0 %v12248_v42  ;;  %11687 = vmatpush3.msra.mxu1 %v15180_v56 }
0x17c1   :  { %11646 = vmatpush3.msra.mxu0 %v15156_v46  ;;  %11688 = vmatprep.subr.mxu1 %v12248_v42 }
0x17c2   :  { %11647 = vmatprep.subr.mxu0 %v12248_v42  ;;  %11689 = vmatpush3.msra.mxu1 %v15189_v57 }
0x17c3   :  { %11648 = vmatpush3.msra.mxu0 %v15165_v54  ;;  %11690 = vmatprep.subr.mxu1 %v12248_v42 }
0x17c4   :  { %11649 = vmatprep.subr.mxu0 %v12248_v42  ;;  %11691 = vmatpush3.msra.mxu1 %v15198_v58 }
0x17c5   :  { %11650 = vmatpush3.msra.mxu0 %v15174_v17  ;;  %11692 = vmatprep.subr.mxu1 %v12248_v42 }
0x17c6   :  { %11651 = vmatprep.subr.mxu0 %v12248_v42  ;;  %11693 = vmatpush3.msra.mxu1 %v15207_v59 }
0x17c7   :  { %11652 = vmatpush3.msra.mxu0 %v15180_v56  ;;  %11697 = vmatprep.subr.bf16.mxu1 %v12248_v42 }
0x17c8   :  { %11653 = vmatprep.subr.mxu0 %v12248_v42 }
0x17c9   :  { %11654 = vmatpush3.msra.mxu0 %v15189_v57 }
0x17ca   :  { %11655 = vmatprep.subr.mxu0 %v12248_v42 }
0x17cb   :  { %11656 = vmatpush3.msra.mxu0 %v15198_v58 }
0x17cc   :  { %11657 = vmatprep.subr.mxu0 %v12248_v42 }
0x17cd   :  { %11658 = vmatpush3.msra.mxu0 %v15207_v59 }
0x17ce   :  { %10363 = vmatprep.subr.bf16.mxu0 %v12158_v35 }
0x1866   :  { %v7234_v60 = vpop.f32.mrf.mxu1 }
0x1868   :  { %v11625_v61 = vpop.f32.mrf.mxu1 }
0x1869   :  { %v12175_v61 = vld [vmem:[%s15444_s1 + $0xb00] sm:$0xff]  }
0x186a   :  { %v7237_v28 = vpop.f32.mrf.mxu1 }
0x186b   :  { %v12176_v28 = vld [vmem:[%s15444_s1 + $0xac8] sm:$0xff]  }
0x186c   :  { %v11626_v0 = vpop.f32.mrf.mxu1 }
0x186d   :  { %v12177_v0 = vld [vmem:[%s15444_s1 + $0xa88] sm:$0xff]  }
0x186e   :  { %v10314_v55 = vpop.f32.mrf.mxu0 }
0x1870   :  { %v10315_v18 = vpop.f32.mrf.mxu0 }
0x1871   :  { %v10316_v22 = vadd.f32 %v10315_v18, %v10314_v55  ;;  %v12178_v55 = vld [vmem:[%s15444_s1 + $0xac0] sm:$0xff]  }
0x1872   :  { %v10317_v26 = vpop.f32.mrf.mxu0 }
0x1873   :  { %v7195_v29 = vadd.f32 %v10316_v22, %v9308_v16  ;;  %v12179_v16 = vld [vmem:[%s15444_s1 + $0xa80] sm:$0xff]  }
0x1874   :  { %v10318_v10 = vpop.f32.mrf.mxu0 }
0x1875   :  { %v15219_v41 = vadd.f32 %v7234_v60, %v7195_v29  ;;  %v12174_v60 = vld [vmem:[%s15444_s1 + $0xa90] sm:$0xff]   ;;  %s12226_s1 = scalar_lea.vmem %s8117_s13, 32 }
0x1876   :  { %p12227_p0 = scmp.ne.s32.totalorder %s8117_s13, %s12226_s1  ;;  %p12232_p2 = scmp.lt.s32.totalorder %s12226_s1, %s12226_s1 }
0x1877   :  { %v7240_v3 = vsel %vm6113_vm11, %v15219_v41, 0.0  ;;  %v7317_v27 = vmul.f32 %v15219_v41, %v15219_v41 }
0x1878   :  { %v7241_v30 = vrot.slane %v7240_v3, 4  ;;  %p12233_p3 = por %p12232_p2, %p12231_p1 }
0x1879   :  { %v7318_v32 = vsel %vm6113_vm11, %v7317_v27, 0.0 }
0x187a   :  { %v7242_v33 = vadd.f32 %v7241_v30, %v7240_v3  ;;  %v7319_v34 = vrot.slane %v7318_v32, 4  ;;  %p12234_p4 = pnand %p12233_p3, %p12227_p0 }
0x187c   :  { %v7243_v37 = vrot.slane %v7242_v33, 2  ;;  %v7320_v38 = vadd.f32 %v7319_v34, %v7318_v32  ;;  %v9286_v34 = vld [vmem:[%s15446_s3 + $0xd] sm:$0x1] }
0x187e   :  { %v7244_v39 = vadd.f32 %v7243_v37, %v7242_v33  ;;  %v7321_v40 = vrot.slane %v7320_v38, 2 }
0x1880   :  { %v7245_v21 = vrot.slane %v7244_v39, 1  ;;  %v7322_v62 = vadd.f32 %v7321_v40, %v7320_v38 }
0x1882   :  { %v7246_v36 = vadd.f32 %v7245_v21, %v7244_v39  ;;  %v7323_v1 = vrot.slane %v7322_v62, 1  ;;  %v9287_v39 = vld [vmem:[%s15447_s4 + $0xd] sm:$0x1] }
0x1884   :  { %11660 = vmatmul.mubr.f32.vlgmr.msra.gmra.mxu0 %v7246_v36  ;;  %v7324_v2 = vadd.f32 %v7323_v1, %v7322_v62 }
0x1885   :  { %10364 = vmatpush3.bf16.msra.mxu0 %v12159_v4 }
0x1886   :  { %11695 = vmatmul.mubr.f32.vlgmr.msra.gmra.mxu1 %v7324_v2  ;;  %10365 = vmatprep.subr.bf16.mxu0 %v12161_v5 }
0x1887   :  { %11713 = vmatprep.mubr.msk.bf16.mxu1 %vm12249_vm0, %v12248_v42  ;;  %11698 = vmatpush3.bf16.msra.mxu1 %v12156_v52 }
0x1888   :  { %11699 = vmatprep.subr.bf16.mxu1 %v12248_v42 }
0x1889   :  { %10366 = vmatpush3.bf16.msra.mxu0 %v12162_v6 }
0x188a   :  { %10367 = vmatprep.subr.bf16.mxu0 %v12164_v63 }
0x188b   :  { %11700 = vmatpush3.bf16.msra.mxu1 %v12157_v49 }
0x188c   :  { %11701 = vmatprep.subr.bf16.mxu1 %v12248_v42 }
0x188d   :  { %10368 = vmatpush3.bf16.msra.mxu0 %v12165_v8 }
0x188e   :  { %10369 = vmatprep.subr.bf16.mxu0 %v12167_v45 }
0x188f   :  { %11702 = vmatpush3.bf16.msra.mxu1 %v12160_v14 }
0x1890   :  { %11703 = vmatprep.subr.bf16.mxu1 %v12248_v42 }
0x1891   :  { %10370 = vmatpush3.bf16.msra.mxu0 %v12168_v11 }
0x1892   :  { %10371 = vmatprep.subr.bf16.mxu0 %v12170_v23 }
0x1893   :  { %11704 = vmatpush3.bf16.msra.mxu1 %v12163_v7 }
0x1894   :  { %11705 = vmatprep.subr.bf16.mxu1 %v12248_v42 }
0x1895   :  { %10372 = vmatpush3.bf16.msra.mxu0 %v12171_v24 }
0x1896   :  { %10373 = vmatprep.subr.bf16.mxu0 %v12173_v43 }
0x1897   :  { %11706 = vmatpush3.bf16.msra.mxu1 %v12166_v9 }
0x1898   :  { %11707 = vmatprep.subr.bf16.mxu1 %v12248_v42 }
0x1899   :  { %10374 = vmatpush3.bf16.msra.mxu0 %v12174_v60 }
0x189a   :  { %10375 = vmatprep.subr.bf16.mxu0 %v12176_v28 }
0x189b   :  { %11708 = vmatpush3.bf16.msra.mxu1 %v12169_v12 }
0x189c   :  { %11709 = vmatprep.subr.bf16.mxu1 %v12248_v42 }
0x189d   :  { %10376 = vmatpush3.bf16.msra.mxu0 %v12177_v0 }
0x189e   :  { %10377 = vmatprep.subr.bf16.mxu0 %v12178_v55 }
0x189f   :  { %11710 = vmatpush3.bf16.msra.mxu1 %v12172_v25 }
0x18a0   :  { %11711 = vmatprep.subr.bf16.mxu1 %v12248_v42 }
0x18a1   :  { %10378 = vmatpush3.bf16.msra.mxu0 %v12179_v16 }
0x18a2   :  { %11717 = vmatprep.subr.mxu0 %v12248_v42 }
0x18a3   :  { %11712 = vmatpush3.bf16.msra.mxu1 %v12175_v61 }
0x18a4   :  { %11752 = vmatprep.subr.mxu1 %v12248_v42 }
0x1944   :  { %v7313_v18 = vpop.f32.mrf.mxu0 }
0x1945   :  { %v7395_v22 = vmul.f32 0.125, %v7313_v18 }
0x1946   :  { %v11661_v26 = vpop.f32.mrf.mxu0  ;;  %v7391_v29 = vpop.f32.mrf.mxu1 }
0x1947   :  { %v7397_v10 = vmul.f32 %v7395_v22, %v7395_v22  ;;  %v7396_v3 = vmul.f32 0.125, %v7391_v29 }
0x1948   :  { %v11696_v27 = vpop.f32.mrf.mxu1 }
0x1949   :  { %v7398_v30 = vsub.f32 %v7396_v3, %v7397_v10 }
0x194b   :  { %v7399_v32 = vmax.f32 %v7398_v30, 0.0 }
0x194d   :  { %v7400_v33 = vadd.f32 1e-05, %v7399_v32 }
0x194f   :  { %12206 = vrsqrt.f32 %v7400_v33 }
0x195c   :  { %v12207_v37 = vpop.eup %12206 }
0x195d   :  { %v7402_v38 = vmul.f32 %v12207_v37, %v9286_v34 }
0x195f   :  { %v7403_v40 = vmul.f32 %v7402_v38, %v7395_v22  ;;  %v7409_v21 = vrot.slane %v7402_v38, %v12609_v19 }
0x1961   :  { %v7404_v62 = vsub.f32 %v9287_v39, %v7403_v40  ;;  %v7411_v36 = vmul.f32 %v7409_v21, %v15219_v41 }
0x1963   :  { %v7416_v1 = vrot.slane %v7404_v62, %v12609_v19 }
0x1965   :  { %v7418_v2 = vadd.f32 %v7416_v1, %v7411_v36  ;;  %v9383_v1 = vld [vmem:[%s15446_s3 + $0xe] sm:$0x1] }
0x1967   :  { %vm7419_vm14 = vcmp.ge.f32.partialorder %v7418_v2, 0.0  ;;  %v7420_v52 = vmul.f32 0.1, %v7418_v2 }
0x1969   :  { %v7421_v49 = vsel %vm7419_vm14, %v7418_v2, %v7420_v52 }
0x196a   :  { %v7429_v35 = vrot.slane %v7421_v49, %v14633_v31  ;;  %9333 = vst.sshfl [vmem:[#allocation5 + $0x1] sm:$0x3 pattern:$0x76325410] %v7421_v49  ;;  %v9384_v49 = vld [vmem:[%s15447_s4 + $0xe] sm:$0x1] }
0x196c   :  { %v7430_v4 = vcombine.high %v7429_v35, %v7429_v35 }
0x196e   :  { %7434 = vst [vmem:[#allocation5 + $0x5] sm:$0x3] %v7430_v4 }
0x1971   :  { %v7506_v14 = vld [vmem:[#allocation5] sm:$0x3]  ;;  %v9401_v6 = vld.sshfl [vmem:[#allocation5 + $0x2] sm:$0x3 pattern:$0x76325410] }
0x1972   :  { %v7508_v5 = vld [vmem:[#allocation5 + $0x1] sm:$0x3] }
0x1973   :  { %v7518_v8 = vcombine.low %v7506_v14, %v7508_v5  ;;  %v8023_v5 = vld [vmem:[%s15449_s6 + $0x38] sm:$0xff] }
0x1975   :  { %v9402_v7 = vld.sshfl [vmem:[#allocation5 + $0x6] sm:$0x3 pattern:$0x76325410]  ;;  %v7507_v63 = vld [vmem:[#allocation5 + $0x4] sm:$0x3]  ;;  %v7525_v12 = vrot.slane %v7518_v8, %v14633_v31 }
0x1976   :  { %v9404_v9 = vcombine.low %v9401_v6, %v9402_v7  ;;  %v7509_v45 = vld [vmem:[#allocation5 + $0x5] sm:$0x3] }
0x1977   :  { %v7534_v41 = vcombine.low %v7507_v63, %v7509_v45  ;;  %v8022_v63 = vld [vmem:[%s15449_s6 + $0x30] sm:$0xff] }
0x1978   :  { %v7565_v11 = vrot.slane %v9404_v9, %v14633_v31  ;;  %v8021_v9 = vld [vmem:[%s15449_s6 + $0x28] sm:$0xff] }
0x1979   :  { %v7541_v23 = vrot.slane %v7534_v41, %v14633_v31 }
0x197a   :  { %v7572_v24 = vpack.c.bf16 %v7565_v11, %v7565_v11  ;;  %v8019_v11 = vld [vmem:[%s15449_s6 + $0x18] sm:$0xff] }
0x197b   :  { %v9403_v25 = vcombine.low %v7525_v12, %v7541_v23  ;;  %v8018_v12 = vld [vmem:[%s15449_s6 + $0x10] sm:$0xff]  ;;  %v8017_v23 = vld [vmem:[%s15449_s6 + $0x8] sm:$0xff] }
0x197c   :  { %11714 = vmatmul.mubr.bf16.vlgmr.msra.gmra.mxu1 %v7572_v24  ;;  %v8016_v24 = vld [vmem:[%s15449_s6] sm:$0xff] }
0x197d   :  { %v7558_v43 = vrot.slane %v9403_v25, %v14633_v31  ;;  %11753 = vmatpush3.msra.mxu1 %v15071_v15  ;;  %11784 = vmatprep.mubr.msk.f32.mxu1 %vm12249_vm0, %v12248_v42 }
0x197e   :  { %11754 = vmatprep.subr.mxu1 %v12248_v42 }
0x197f   :  { %v7566_v60 = vcombine.high %v7558_v43, %v7558_v43  ;;  %11755 = vmatpush3.msra.mxu1 %v15085_v44  ;;  %v7570_v28 = vpack.c.bf16 %v7558_v43, %v7558_v43 }
0x1980   :  { %11756 = vmatprep.subr.mxu1 %v12248_v42 }
0x1981   :  { %v7571_v61 = vpack.c.bf16 %v7566_v60, %v7566_v60  ;;  %11757 = vmatpush3.msra.mxu1 %v15093_v47 }
0x1982   :  { %11758 = vmatprep.subr.mxu1 %v12248_v42 }
0x1983   :  { %7755 = vmatprep.mubr.bf16.mxu0 %v7571_v61  ;;  %11759 = vmatpush3.msra.mxu1 %v15102_v48 }
0x1984   :  { %7756 = vmatmul.mubr.bf16.vlgmr.msra.gmra.mxu0 %v7570_v28  ;;  %11760 = vmatprep.subr.mxu1 %v12248_v42 }
0x1985   :  { %11718 = vmatpush3.msra.mxu0 %v15071_v15  ;;  %11761 = vmatpush3.msra.mxu1 %v15111_v50 }
0x1986   :  { %11719 = vmatprep.subr.mxu0 %v12248_v42  ;;  %11762 = vmatprep.subr.mxu1 %v12248_v42 }
0x1987   :  { %11720 = vmatpush3.msra.mxu0 %v15085_v44  ;;  %11763 = vmatpush3.msra.mxu1 %v15120_v51 }
0x1988   :  { %11721 = vmatprep.subr.mxu0 %v12248_v42  ;;  %11764 = vmatprep.subr.mxu1 %v12248_v42 }
0x1989   :  { %11722 = vmatpush3.msra.mxu0 %v15093_v47  ;;  %11765 = vmatpush3.msra.mxu1 %v15129_v13 }
0x198a   :  { %11723 = vmatprep.subr.mxu0 %v12248_v42  ;;  %11766 = vmatprep.subr.mxu1 %v12248_v42 }
0x198b   :  { %11724 = vmatpush3.msra.mxu0 %v15102_v48  ;;  %11767 = vmatpush3.msra.mxu1 %v15138_v20 }
0x198c   :  { %11725 = vmatprep.subr.mxu0 %v12248_v42  ;;  %11768 = vmatprep.subr.mxu1 %v12248_v42 }
0x198d   :  { %11726 = vmatpush3.msra.mxu0 %v15111_v50  ;;  %11769 = vmatpush3.msra.mxu1 %v15147_v53 }
0x198e   :  { %11727 = vmatprep.subr.mxu0 %v12248_v42  ;;  %11770 = vmatprep.subr.mxu1 %v12248_v42 }
0x198f   :  { %11728 = vmatpush3.msra.mxu0 %v15120_v51  ;;  %11771 = vmatpush3.msra.mxu1 %v15156_v46  ;;  %v9405_v51 = vld [vmem:[%s15445_s2 + $0xe] ss:$0 sm:$0xff] }
0x1990   :  { %11729 = vmatprep.subr.mxu0 %v12248_v42  ;;  %11772 = vmatprep.subr.mxu1 %v12248_v42 }
0x1991   :  { %11730 = vmatpush3.msra.mxu0 %v15129_v13  ;;  %11773 = vmatpush3.msra.mxu1 %v15165_v54 }
0x1992   :  { %11731 = vmatprep.subr.mxu0 %v12248_v42  ;;  %11774 = vmatprep.subr.mxu1 %v12248_v42 }
0x1993   :  { %11732 = vmatpush3.msra.mxu0 %v15138_v20  ;;  %11775 = vmatpush3.msra.mxu1 %v15174_v17 }
0x1994   :  { %11733 = vmatprep.subr.mxu0 %v12248_v42  ;;  %11776 = vmatprep.subr.mxu1 %v12248_v42 }
0x1995   :  { %11734 = vmatpush3.msra.mxu0 %v15147_v53  ;;  %11777 = vmatpush3.msra.mxu1 %v15180_v56 }
0x1996   :  { %11735 = vmatprep.subr.mxu0 %v12248_v42  ;;  %11778 = vmatprep.subr.mxu1 %v12248_v42 }
0x1997   :  { %11736 = vmatpush3.msra.mxu0 %v15156_v46  ;;  %11779 = vmatpush3.msra.mxu1 %v15189_v57 }
0x1998   :  { %11737 = vmatprep.subr.mxu0 %v12248_v42  ;;  %11780 = vmatprep.subr.mxu1 %v12248_v42 }
0x1999   :  { %11738 = vmatpush3.msra.mxu0 %v15165_v54  ;;  %11749 = vmatprep.mubr.msk.f32.mxu0 %vm12249_vm0, %v12248_v42 }
0x199a   :  { %11739 = vmatprep.subr.mxu0 %v12248_v42  ;;  %11781 = vmatpush3.msra.mxu1 %v15198_v58 }
0x199b   :  { %11740 = vmatpush3.msra.mxu0 %v15174_v17  ;;  %11782 = vmatprep.subr.mxu1 %v12248_v42 }
0x199c   :  { %11741 = vmatprep.subr.mxu0 %v12248_v42  ;;  %11783 = vmatpush3.msra.mxu1 %v15207_v59 }
0x199d   :  { %11742 = vmatpush3.msra.mxu0 %v15180_v56 }
0x199e   :  { %11743 = vmatprep.subr.mxu0 %v12248_v42 }
0x199f   :  { %11744 = vmatpush3.msra.mxu0 %v15189_v57 }
0x19a0   :  { %11745 = vmatprep.subr.mxu0 %v12248_v42 }
0x19a1   :  { %11746 = vmatpush3.msra.mxu0 %v15198_v58 }
0x19a2   :  { %11747 = vmatprep.subr.mxu0 %v12248_v42 }
0x19a3   :  { %11748 = vmatpush3.msra.mxu0 %v15207_v59 }
0x19a4   :  { %11787 = vmatprep.subr.mxu0 %v12248_v42 }
0x1a3c   :  { %v7797_v15 = vpop.f32.mrf.mxu1 }
0x1a3e   :  { %v11715_v44 = vpop.f32.mrf.mxu1 }
0x1a40   :  { %v7800_v47 = vpop.f32.mrf.mxu1 }
0x1a42   :  { %v11716_v48 = vpop.f32.mrf.mxu1 }
0x1a44   :  { %v10379_v50 = vpop.f32.mrf.mxu0 }
0x1a46   :  { %v10380_v13 = vpop.f32.mrf.mxu0 }
0x1a47   :  { %v10381_v20 = vadd.f32 %v10380_v13, %v10379_v50 }
0x1a48   :  { %v10382_v53 = vpop.f32.mrf.mxu0 }
0x1a49   :  { %v7758_v46 = vadd.f32 %v10381_v20, %v9405_v51 }
0x1a4a   :  { %v10383_v54 = vpop.f32.mrf.mxu0 }
0x1a4b   :  { %v7798_v17 = vadd.f32 %v7797_v15, %v7758_v46 }
0x1a4d   :  { %v7803_v56 = vsel %vm6113_vm11, %v7798_v17, 0.0  ;;  %v7880_v57 = vmul.f32 %v7798_v17, %v7798_v17 }
0x1a4e   :  { %v7804_v58 = vrot.slane %v7803_v56, 4 }
0x1a4f   :  { %v7881_v59 = vsel %vm6113_vm11, %v7880_v57, 0.0 }
0x1a50   :  { %v7805_v0 = vadd.f32 %v7804_v58, %v7803_v56  ;;  %v7882_v55 = vrot.slane %v7881_v59, 4 }
0x1a52   :  { %v7806_v16 = vrot.slane %v7805_v0, 2  ;;  %v7883_v18 = vadd.f32 %v7882_v55, %v7881_v59 }
0x1a54   :  { %v7807_v22 = vadd.f32 %v7806_v16, %v7805_v0  ;;  %v7884_v26 = vrot.slane %v7883_v18, 2 }
0x1a56   :  { %v7808_v29 = vrot.slane %v7807_v22, 1  ;;  %v7885_v10 = vadd.f32 %v7884_v26, %v7883_v18 }
0x1a58   :  { %v7809_v3 = vadd.f32 %v7808_v29, %v7807_v22  ;;  %v7886_v27 = vrot.slane %v7885_v10, 1 }
0x1a5a   :  { %11750 = vmatmul.mubr.f32.vlgmr.msra.gmra.mxu0 %v7809_v3  ;;  %v7887_v30 = vadd.f32 %v7886_v27, %v7885_v10 }
0x1a5b   :  { %11803 = vmatprep.mubr.msk.f32.mxu0 %vm12249_vm0, %v12248_v42  ;;  %11788 = vmatpush3.msra.mxu0 %v8023_v5 }
0x1a5c   :  { %11785 = vmatmul.mubr.f32.vlgmr.msra.gmra.mxu1 %v7887_v30  ;;  %11789 = vmatprep.subr.mxu0 %v12248_v42 }
0x1a5d   :  { %11790 = vmatpush3.msra.mxu0 %v8022_v63 }
0x1a5e   :  { %11791 = vmatprep.subr.mxu0 %v12248_v42 }
0x1a5f   :  { %11792 = vmatpush3.msra.mxu0 %v8021_v9 }
0x1a60   :  { %11793 = vmatprep.subr.mxu0 %v12248_v42 }
0x1b1a   :  { %v7876_v32 = vpop.f32.mrf.mxu0 }
0x1b1b   :  { %v7958_v33 = vmul.f32 0.125, %v7876_v32 }
0x1b1c   :  { %v11751_v34 = vpop.f32.mrf.mxu0  ;;  %v7954_v37 = vpop.f32.mrf.mxu1 }
0x1b1d   :  { %v7960_v38 = vmul.f32 %v7958_v33, %v7958_v33  ;;  %v7959_v39 = vmul.f32 0.125, %v7954_v37 }
0x1b1e   :  { %v11786_v40 = vpop.f32.mrf.mxu1 }
0x1b1f   :  { %v7961_v21 = vsub.f32 %v7959_v39, %v7960_v38 }
0x1b21   :  { %v7962_v62 = vmax.f32 %v7961_v21, 0.0 }
0x1b23   :  { %v7963_v36 = vadd.f32 1e-05, %v7962_v62 }
0x1b25   :  { %12208 = vrsqrt.f32 %v7963_v36 }
0x1b32   :  { %v12209_v2 = vpop.eup %12208 }
0x1b33   :  { %v7965_v52 = vmul.f32 %v12209_v2, %v9383_v1 }
0x1b35   :  { %v7966_v35 = vmul.f32 %v7965_v52, %v7958_v33  ;;  %v7972_v4 = vrot.slane %v7965_v52, %v12609_v19 }
0x1b37   :  { %v7967_v14 = vsub.f32 %v9384_v49, %v7966_v35  ;;  %v7974_v6 = vmul.f32 %v7972_v4, %v7798_v17 }
0x1b39   :  { %v7979_v7 = vrot.slane %v7967_v14, %v12609_v19  ;;  %v8020_v19 = vld [vmem:[%s15449_s6 + $0x20] sm:$0xff] }
0x1b3a   :  { %11794 = vmatpush3.msra.mxu0 %v8020_v19 }
0x1b3b   :  { %v7981_v8 = vadd.f32 %v7979_v7, %v7974_v6  ;;  %11795 = vmatprep.subr.mxu0 %v12248_v42 }
0x1b3c   :  { %11796 = vmatpush3.msra.mxu0 %v8019_v11 }
0x1b3d   :  { %vm7982_vm0 = vcmp.ge.f32.partialorder %v7981_v8, 0.0  ;;  %v7983_v45 = vmul.f32 0.1, %v7981_v8  ;;  %11797 = vmatprep.subr.mxu0 %v12248_v42 }
0x1b3e   :  { %11798 = vmatpush3.msra.mxu0 %v8018_v12 }
0x1b3f   :  { %v7984_v41 = vsel %vm7982_vm0, %v7981_v8, %v7983_v45  ;;  %11799 = vmatprep.subr.mxu0 %v12248_v42 }
0x1b40   :  { %7986 = vrot.lane.b32.xlu0 %v7984_v41, %s12251_s28  ;;  %11800 = vmatpush3.msra.mxu0 %v8017_v23 }
0x1b41   :  { %11801 = vmatprep.subr.mxu0 %v12248_v42 }
0x1b42   :  { %11802 = vmatpush3.msra.mxu0 %v8016_v24 }
0x1bb2   :  { %v7987_v25 = vpop.permute.xlu0 %7986 }
0x1bb3   :  { %v7989_v43 = vmax.f32 %v7984_v41, %v7987_v25 }
0x1bb5   :  { %v7997_v60 = vrot.slane %v7989_v43, %v14633_v31  ;;  %v9430_v31 = vld [vmem:[%s15450_s7] ss:$0 sm:$0xff] }
0x1bb7   :  { %v7998_v61 = vcombine.high %v7997_v60, %v7997_v60  ;;  %v8002_v28 = vsel %vm8001_vm15, %v7997_v60, -inf }
0x1bb8   :  { %v8003_v15 = vrot.slane %v8002_v28, 4 }
0x1bb9   :  { %v8009_v44 = vsel %vm8001_vm15, %v7998_v61, -inf }
0x1bba   :  { %v8004_v47 = vmax.f32 %v8002_v28, %v8003_v15  ;;  %v8010_v48 = vrot.slane %v8009_v44, 4 }
0x1bbc   :  { %v8005_v50 = vrot.slane %v8004_v47, 2  ;;  %v8011_v51 = vmax.f32 %v8009_v44, %v8010_v48 }
0x1bbe   :  { %v8006_v13 = vmax.f32 %v8004_v47, %v8005_v50  ;;  %v8012_v20 = vrot.slane %v8011_v51, 2 }
0x1bc0   :  { %v8007_v53 = vrot.slane %v8006_v13, 1  ;;  %v8013_v46 = vmax.f32 %v8011_v51, %v8012_v20 }
0x1bc2   :  { %v8014_v54 = vrot.slane %v8013_v46, 1  ;;  %v8008_v42 = vmax.f32 %v8006_v13, %v8007_v53 }
0x1bc4   :  { %v8015_v17 = vmax.f32 %v8013_v46, %v8014_v54 }
0x1bc6   :  { %v8034_v56 = vsel %vm8033_vm1, %v8015_v17, %v8008_v42 }
0x1bc7   :  { %11804 = vmatmul.mubr.msk.f32.vlgmr.msra.gmra.mxu0 %vm8035_vm2, %v8034_v56 }
0x1c87   :  { %v8104_v57 = vpop.f32.mrf.mxu0 }
0x1c88   :  { %v8105_v58 = vadd.f32 %v9430_v31, %v8104_v57 }
0x1c89   :  { %v11805_v59 = vpop.f32.mrf.mxu0 }
0x1c8a   :  { %8109 = vst.msk [vmem:[#allocation6] sm:$0x3] %vm8108_vm3, %v8105_v58 }
0x1c8b   :  { %12237 = shalt.err (!%p12234_p4)
}
0x1c8c   :  { %8119 = dma.vmem_to_hbm [thread:$0]  %s8117_s13, 32, %s15451_s8, [#allocation7]  }
0x1c8d   :  { %12246 = dma.done.wait [#allocation7], 32  }
0x1c8e   :  { %12247 = vsyncadd [#allocation7], 4294967264 }
0x1c8f   :  { %8123 = vsyncpa [#allocation7], 1 }

</bundles_post_ra>
